<compile_context>
chip_gen: v7x
topology: tpu7x:2x2x1
jax: 0.10.0
libtpu: 0.0.40
codegen_flags: <defaults>
</compile_context>

<pallas_src>
import functools

import jax
import jax.numpy as jnp
from jax import lax
from jax.experimental import pallas as pl
from jax.experimental.pallas import tpu as pltpu


# ----------------------------- fused Pallas kernel ------------------------------

def _cc_fused_kernel(gamma_ref, x_ref, xt_ref, wqk_ref, bqk_ref, wv_ref, bv_ref,
                     a_ref, crow_ref, ccol_ref, o_ref,
                     selh_qk, selw_qk, selh_v, selw_v, *, cqp, hw):
    """One batch element per grid step, everything fused:
       1x1 q/k/v convs (MXU), deformable batch-0 sampling (MXU, under pl.when),
       criss-cross energies as dense (HW,HW) matmuls + masks, joint softmax,
       output contraction as (C,HW)x(HW,HW) matmuls, gamma scale + residual."""
    b = pl.program_id(0)
    xb = x_ref[0]            # (C, HW)  lane-dense
    xtb = xt_ref[0]          # (HW, C)

    # --- fused 1x1 convs: channel-last q|k (feeds the energy matmuls) and
    #     channel-first value (feeds the output matmuls / residual path).
    proj_qk = jnp.dot(xtb, wqk_ref[...],
                      preferred_element_type=jnp.float32) + bqk_ref[...]     # (HW, 2*cqp)
    proj_v = jnp.dot(wv_ref[...], xb,
                     preferred_element_type=jnp.float32) + bv_ref[...]       # (C, HW)

    selh_qk[...] = proj_qk
    selw_qk[...] = proj_qk
    selh_v[...] = proj_v
    selw_v[...] = proj_v

    # --- deformed criss-cross samples replace q/k/v only for batch 0 (the PyTorch
    #     loops only write the batch-0 slices).  grid_sample == matmul against the
    #     dense bilinear-weight matrix A; skipped entirely for b > 0.
    @pl.when(b == 0)
    def _():
        a = a_ref[...]                                                       # (2*HW, HW)
        def_qk = jnp.dot(a, proj_qk, preferred_element_type=jnp.float32)     # (2*HW, 2*cqp)
        def_v = lax.dot_general(proj_v, a, (((1,), (1,)), ((), ())),
                                preferred_element_type=jnp.float32)          # (C, 2*HW)
        selh_qk[...] = def_qk[:hw]          # H direction, flat (h', w)
        selw_qk[...] = def_qk[hw:]          # W direction, flat (h, w')
        selh_v[...] = def_v[:, :hw]
        selw_v[...] = def_v[:, hw:]

    sh = selh_qk[...]
    sw = selw_qk[...]

    # --- full pairwise energies E[s', s] = sum_c k[c, s'] * q[c, s]  (one MXU matmul
    #     per direction; zero-padded channels contribute 0).
    dn_t = (((1,), (1,)), ((), ()))          # contract last dims of both (A @ B^T form)
    e_h = lax.dot_general(sh[:, cqp:], sh[:, :cqp], dn_t,
                          preferred_element_type=jnp.float32)                # (HW, HW)
    e_w = lax.dot_general(sw[:, cqp:], sw[:, :cqp], dn_t,
                          preferred_element_type=jnp.float32)                # (HW, HW)

    # --- criss-cross masks from (h, w) coordinate vectors (plain compares, no div/mod).
    h_row = crow_ref[0:1, :]      # (1, HW)   h(s)
    w_row = crow_ref[1:2, :]      # (1, HW)   w(s)
    h_col = ccol_ref[:, 0:1]      # (HW, 1)   h(s')
    w_col = ccol_ref[:, 1:2]      # (HW, 1)   w(s')
    mask_w = h_col == h_row                              # same row  (W direction)
    mask_h = (w_col == w_row) & (h_col != h_row)         # same column, h' != h (torch INF)

    # --- joint softmax over the criss-cross neighbours of each position.
    neg = jnp.float32(-jnp.inf)
    m = jnp.maximum(
        jnp.max(jnp.where(mask_h, e_h, neg), axis=0, keepdims=True),
        jnp.max(jnp.where(mask_w, e_w, neg), axis=0, keepdims=True))         # (1, HW)
    p_h = jnp.where(mask_h, jnp.exp(e_h - m), 0.0)
    p_w = jnp.where(mask_w, jnp.exp(e_w - m), 0.0)
    denom = (jnp.sum(p_h, axis=0, keepdims=True)
             + jnp.sum(p_w, axis=0, keepdims=True))                          # (1, HW)

    # --- output contraction: out[c, s] = sum_{s'} v[c, s'] * P[s', s]   (MXU).
    out_h = jnp.dot(selh_v[...], p_h, preferred_element_type=jnp.float32)    # (C, HW)
    out_w = jnp.dot(selw_v[...], p_w, preferred_element_type=jnp.float32)    # (C, HW)

    gamma = gamma_ref[0, 0]
    o_ref[0] = gamma * ((out_h + out_w) / denom) + xb


# ------------------------------- JAX glue -----------------------------------

def bilinear_sample_matrix(xs, ys, Hi, Wi):
    """Dense bilinear-interpolation matrix A (N, Hi*Wi): sampling img (C, Hi, Wi) at
    normalized coords (xs, ys) with PyTorch grid_sample (bilinear, zeros padding,
    align_corners=True) equals img.reshape(C, -1) @ A.T."""
    ix = (xs + 1.0) * 0.5 * (Wi - 1)
    iy = (ys + 1.0) * 0.5 * (Hi - 1)
    x0 = jnp.floor(ix)
    y0 = jnp.floor(iy)
    x1 = x0 + 1.0
    y1 = y0 + 1.0
    wx1 = ix - x0
    wx0 = 1.0 - wx1
    wy1 = iy - y0
    wy0 = 1.0 - wy1
    cols = jnp.arange(Hi * Wi)

    def corner(yy, xx, wgt):
        valid = ((xx >= 0) & (xx <= Wi - 1) & (yy >= 0) & (yy <= Hi - 1))
        xi = jnp.clip(xx, 0, Wi - 1).astype(jnp.int32)
        yi = jnp.clip(yy, 0, Hi - 1).astype(jnp.int32)
        idx = yi * Wi + xi
        onehot = (idx[:, None] == cols[None, :]).astype(jnp.float32)
        return (wgt * valid.astype(jnp.float32))[:, None] * onehot

    return (corner(y0, x0, wy0 * wx0) + corner(y0, x1, wy0 * wx1)
            + corner(y1, x0, wy1 * wx0) + corner(y1, x1, wy1 * wx1))


def cc_module_forward(x, params):
    wq, bq, wk, bk, wv, bv, offsets, gamma = params
    B, C, H, W = x.shape
    in_h = offsets.shape[2] - 2
    in_w = offsets.shape[3] - 2
    assert H == W, "forward (as written) requires square feature maps"
    assert in_h == in_w == H + 1 and in_h % 2 == 1
    Cq = wq.shape[1]
    assert Cq >= 1
    HW = H * W
    CQP = ((Cq + 7) // 8) * 8               # sublane-aligned padded q/k channel count

    # regloss (tiny parameter-only reduction, plain JAX)
    regloss = (jnp.mean((offsets[:, 0:1] - offsets[:, 1:2]) ** 2)
               + jnp.mean((offsets[:, :, :-1, :] - offsets[:, :, 1:, :]) ** 2))

    # deform = avg_pool2d(offsets, 3, stride=1); the two 1x1 avg pools are no-ops
    off = offsets[0]
    pooled = sum(off[:, i:i + in_h, j:j + in_w]
                 for i in range(3) for j in range(3)) / 9.0
    jc = (in_w - 1) // 2                    # crisscross column where x == 0
    ic = (in_h - 1) // 2                    # crisscross row where y == 0
    dx_x, dy_x = pooled[0, :, jc], pooled[1, :, jc]      # deform_x
    dx_y, dy_y = pooled[0, ic, :], pooled[1, ic, :]      # deform_y
    lin = jnp.linspace(-1.0, 1.0, in_h)

    # Deformed criss-cross sample coordinates (the PyTorch loop bodies), ordered so the
    # sampled tensors come out directly in the kernel's consumption order:
    #   rows [0, HW):     H direction, flat p = h' * W + w
    #   rows [HW, 2*HW):  W direction, flat p = h * W + w'
    xs_h = (dx_x[1:][:, None] + lin[:W][None, :]).reshape(-1)
    ys_h = jnp.broadcast_to((lin[1:] + dy_x[1:])[:, None], (H, W)).reshape(-1)
    xs_w = jnp.broadcast_to((lin[1:] + dx_y[1:])[None, :], (H, W)).reshape(-1)
    ys_w = (lin[:H][:, None] + dy_y[1:][None, :]).reshape(-1)
    # TODO(synk): A depends only on the `offsets` parameter — cache it across forward
    # calls when offsets are static (inference).
    A = bilinear_sample_matrix(jnp.concatenate([xs_h, xs_w]),
                               jnp.concatenate([ys_h, ys_w]), H, W)          # (2*HW, HW)

    # Packed conv weights: channel-last q|k (zero-padded to CQP each) and channel-first v.
    wqk_t = jnp.zeros((C, 2 * CQP), jnp.float32)
    wqk_t = wqk_t.at[:, 0:Cq].set(wq)
    wqk_t = wqk_t.at[:, CQP:CQP + Cq].set(wk)
    bqk_row = jnp.zeros((1, 2 * CQP), jnp.float32)
    bqk_row = bqk_row.at[0, 0:Cq].set(bq)
    bqk_row = bqk_row.at[0, CQP:CQP + Cq].set(bk)
    wv_t = wv.T                              # (C_out, C_in)
    bv_col = bv.reshape(C, 1)

    # Lane-dense x in both orientations (one tiny XLA transpose, 32 KB).
    x_flat = x.reshape(B, C, HW)
    xt_flat = jnp.swapaxes(x_flat, 1, 2)     # (B, HW, C)

    # (h, w) coordinates of each flat spatial index, row- and column-oriented, used
    # in-kernel to build the criss-cross masks with plain compares.
    h_of_s = jnp.repeat(jnp.arange(H, dtype=jnp.float32), W)
    w_of_s = jnp.tile(jnp.arange(W, dtype=jnp.float32), H)
    coord_row = jnp.stack([h_of_s, w_of_s], axis=0)      # (2, HW)
    coord_col = jnp.stack([h_of_s, w_of_s], axis=1)      # (HW, 2)

    gamma_arr = jnp.asarray(gamma, jnp.float32).reshape(1, 1)

    kernel = functools.partial(_cc_fused_kernel, cqp=CQP, hw=HW)
    # TODO(synk): for large H*W the dense (HW, HW) energies would need a tiled output
    # axis (or the compact 2H-1-neighbour formulation); at these criss-cross sizes the
    # single-block version fits comfortably in VMEM on v5e/v6e/v7x.
    out_flat = pl.pallas_call(
        kernel,
        out_shape=jax.ShapeDtypeStruct((B, C, HW), jnp.float32),
        grid=(B,),
        in_specs=[
            pl.BlockSpec(memory_space=pltpu.MemorySpace.SMEM),     # gamma scalar
            pl.BlockSpec((1, C, HW), lambda b: (b, 0, 0)),         # x, (C, HW)
            pl.BlockSpec((1, HW, C), lambda b: (b, 0, 0)),         # x, (HW, C)
            pl.BlockSpec((C, 2 * CQP), lambda b: (0, 0)),          # w_q|w_k (channel-last)
            pl.BlockSpec((1, 2 * CQP), lambda b: (0, 0)),          # b_q|b_k
            pl.BlockSpec((C, C), lambda b: (0, 0)),                # w_v (channel-first)
            pl.BlockSpec((C, 1), lambda b: (0, 0)),                # b_v
            pl.BlockSpec((2 * HW, HW), lambda b: (0, 0)),          # bilinear matrix A
            pl.BlockSpec((2, HW), lambda b: (0, 0)),               # coords, row layout
            pl.BlockSpec((HW, 2), lambda b: (0, 0)),               # coords, col layout
        ],
        out_specs=pl.BlockSpec((1, C, HW), lambda b: (b, 0, 0)),
        scratch_shapes=[
            pltpu.VMEM((HW, 2 * CQP), jnp.float32),    # selected q|k, H direction
            pltpu.VMEM((HW, 2 * CQP), jnp.float32),    # selected q|k, W direction
            pltpu.VMEM((C, HW), jnp.float32),          # selected v, H direction
            pltpu.VMEM((C, HW), jnp.float32),          # selected v, W direction
        ],
        compiler_params=pltpu.CompilerParams(
            dimension_semantics=("parallel",),
            vmem_limit_bytes=32 * 1024 * 1024),
    )(gamma_arr, x_flat, xt_flat, wqk_t, bqk_row, wv_t, bv_col, A,
      coord_row, coord_col)

    return out_flat.reshape(B, C, H, W), regloss


# --------------------------------- main --------------------------------------

if __name__ == "__main__":
    B, C, H, W = 2, 16, 16, 16            # x: (batch, in_dim, height, width), NCHW
    in_h, in_w = H + 1, W + 1             # module __init__ in_height / in_width
    Cq = C // 8

    key = jax.random.PRNGKey(0)
    ks = jax.random.split(key, 8)
    x = jax.random.normal(ks[0], (B, C, H, W), dtype=jnp.float32)

    # deterministic parameter init (shapes follow the module __init__)
    wq = 0.2 * jax.random.normal(ks[1], (C, Cq), dtype=jnp.float32)   # query_conv
    bq = 0.1 * jax.random.normal(ks[2], (Cq,), dtype=jnp.float32)
    wk = 0.2 * jax.random.normal(ks[3], (C, Cq), dtype=jnp.float32)   # key_conv
    bk = 0.1 * jax.random.normal(ks[4], (Cq,), dtype=jnp.float32)
    wv = 0.2 * jax.random.normal(ks[5], (C, C), dtype=jnp.float32)    # value_conv
    bv = 0.1 * jax.random.normal(ks[6], (C,), dtype=jnp.float32)
    offsets = jax.random.normal(ks[7], (1, 2, in_h + 2, in_w + 2), dtype=jnp.float32)
    # gamma is a (1,) parameter; PyTorch inits it to 0 (output == x).  Use a
    # deterministic nonzero value so the attention path is actually exercised.
    gamma = jnp.full((1,), 0.5, dtype=jnp.float32)

    params = (wq, bq, wk, bk, wv, bv, offsets, gamma)
    forward = jax.jit(cc_module_forward)
    out, regloss = forward(x, params)
    jax.block_until_ready(out)
    jax.block_until_ready(regloss)
    assert out.shape == (B, C, H, W)
    assert regloss.shape == ()
    print("KERNEL_OK")
</pallas_src>

<mosaic_0001>
module attributes {stable_mosaic.version = 11 : i64} {
  func.func @_cc_fused_kernel(%arg0: i32, %arg1: memref<1x1xf32, #tpu.memory_space<smem>>, %arg2: memref<1x16x256xf32, #tpu.memory_space<vmem>>, %arg3: memref<1x256x16xf32, #tpu.memory_space<vmem>>, %arg4: memref<16x16xf32, #tpu.memory_space<vmem>>, %arg5: memref<1x16xf32, #tpu.memory_space<vmem>>, %arg6: memref<16x16xf32, #tpu.memory_space<vmem>>, %arg7: memref<16x1xf32, #tpu.memory_space<vmem>>, %arg8: memref<512x256xf32, #tpu.memory_space<vmem>>, %arg9: memref<2x256xf32, #tpu.memory_space<vmem>>, %arg10: memref<256x2xf32, #tpu.memory_space<vmem>>, %arg11: memref<1x16x256xf32, #tpu.memory_space<vmem>>, %arg12: memref<256x16xf32, #tpu.memory_space<vmem>>, %arg13: memref<256x16xf32, #tpu.memory_space<vmem>>, %arg14: memref<16x256xf32, #tpu.memory_space<vmem>>, %arg15: memref<16x256xf32, #tpu.memory_space<vmem>>) attributes {dimension_semantics = [#tpu.dimension_semantics<parallel>], iteration_bounds = array<i64: 2>, scalar_prefetch = 0 : i64, scratch_operands = 4 : i64, tpu.core_type = #tpu.core_type<tc>, window_params = [{transform_indices = @transform_0, window_bounds = array<i64: 1, 1>}, {transform_indices = @transform_1, window_bounds = array<i64: 1, 16, 256>}, {transform_indices = @transform_2, window_bounds = array<i64: 1, 256, 16>}, {pipeline_mode = #tpu.pipeline_mode<synchronous>, transform_indices = @transform_3, window_bounds = array<i64: 16, 16>}, {pipeline_mode = #tpu.pipeline_mode<synchronous>, transform_indices = @transform_4, window_bounds = array<i64: 1, 16>}, {pipeline_mode = #tpu.pipeline_mode<synchronous>, transform_indices = @transform_5, window_bounds = array<i64: 16, 16>}, {pipeline_mode = #tpu.pipeline_mode<synchronous>, transform_indices = @transform_6, window_bounds = array<i64: 16, 1>}, {pipeline_mode = #tpu.pipeline_mode<synchronous>, transform_indices = @transform_7, window_bounds = array<i64: 512, 256>}, {pipeline_mode = #tpu.pipeline_mode<synchronous>, transform_indices = @transform_8, window_bounds = array<i64: 2, 256>}, {pipeline_mode = #tpu.pipeline_mode<synchronous>, transform_indices = @transform_9, window_bounds = array<i64: 256, 2>}, {transform_indices = @transform_10, window_bounds = array<i64: 1, 16, 256>}]} {
    %c0 = arith.constant 0 : index
    %c0_0 = arith.constant 0 : index
    %c0_1 = arith.constant 0 : index
    %0 = vector.load %arg2[%c0, %c0_0, %c0_1] : memref<1x16x256xf32, #tpu.memory_space<vmem>>, vector<1x16x256xf32>
    %1 = vector.shape_cast %0 : vector<1x16x256xf32> to vector<16x256xf32>
    %c0_2 = arith.constant 0 : index
    %c0_3 = arith.constant 0 : index
    %c0_4 = arith.constant 0 : index
    %2 = vector.load %arg3[%c0_2, %c0_3, %c0_4] : memref<1x256x16xf32, #tpu.memory_space<vmem>>, vector<1x256x16xf32>
    %3 = vector.shape_cast %2 : vector<1x256x16xf32> to vector<256x16xf32>
    %c0_5 = arith.constant 0 : index
    %c0_6 = arith.constant 0 : index
    %4 = vector.load %arg4[%c0_5, %c0_6] : memref<16x16xf32, #tpu.memory_space<vmem>>, vector<16x16xf32>
    %cst = arith.constant dense<0.000000e+00> : vector<256x16xf32>
    %5 = tpu.matmul %3, %4, %cst {dimension_numbers = #tpu.dot_dimension_numbers<[1], [0], [0], [1], [0, 0, 1, 1], [], []>} : vector<256x16xf32>, vector<16x16xf32>, vector<256x16xf32> -> vector<256x16xf32>
    %c0_7 = arith.constant 0 : index
    %c0_8 = arith.constant 0 : index
    %6 = vector.load %arg5[%c0_7, %c0_8] : memref<1x16xf32, #tpu.memory_space<vmem>>, vector<1x16xf32>
    %7 = vector.broadcast %6 : vector<1x16xf32> to vector<256x16xf32>
    %8 = arith.addf %5, %7 : vector<256x16xf32>
    %c0_9 = arith.constant 0 : index
    %c0_10 = arith.constant 0 : index
    %9 = vector.load %arg6[%c0_9, %c0_10] : memref<16x16xf32, #tpu.memory_space<vmem>>, vector<16x16xf32>
    %cst_11 = arith.constant dense<0.000000e+00> : vector<16x256xf32>
    %10 = tpu.matmul %9, %1, %cst_11 {dimension_numbers = #tpu.dot_dimension_numbers<[1], [0], [0], [1], [0, 0, 1, 1], [], []>} : vector<16x16xf32>, vector<16x256xf32>, vector<16x256xf32> -> vector<16x256xf32>
    %c0_12 = arith.constant 0 : index
    %c0_13 = arith.constant 0 : index
    %11 = vector.load %arg7[%c0_12, %c0_13] : memref<16x1xf32, #tpu.memory_space<vmem>>, vector<16x1xf32>
    %12 = vector.broadcast %11 : vector<16x1xf32> to vector<16x256xf32>
    %13 = arith.addf %10, %12 : vector<16x256xf32>
    %c0_14 = arith.constant 0 : index
    %c0_15 = arith.constant 0 : index
    %14 = vector.load %arg12[%c0_14, %c0_15] : memref<256x16xf32, #tpu.memory_space<vmem>>, vector<256x16xf32>
    tpu.vector_store %arg12[%c0_14, %c0_15], %8 {strides = array<i32>} : memref<256x16xf32, #tpu.memory_space<vmem>>, vector<256x16xf32>,
    %c0_16 = arith.constant 0 : index
    %c0_17 = arith.constant 0 : index
    %15 = vector.load %arg13[%c0_16, %c0_17] : memref<256x16xf32, #tpu.memory_space<vmem>>, vector<256x16xf32>
    tpu.vector_store %arg13[%c0_16, %c0_17], %8 {strides = array<i32>} : memref<256x16xf32, #tpu.memory_space<vmem>>, vector<256x16xf32>,
    %c0_18 = arith.constant 0 : index
    %c0_19 = arith.constant 0 : index
    %16 = vector.load %arg14[%c0_18, %c0_19] : memref<16x256xf32, #tpu.memory_space<vmem>>, vector<16x256xf32>
    tpu.vector_store %arg14[%c0_18, %c0_19], %13 {strides = array<i32>} : memref<16x256xf32, #tpu.memory_space<vmem>>, vector<16x256xf32>,
    %c0_20 = arith.constant 0 : index
    %c0_21 = arith.constant 0 : index
    %17 = vector.load %arg15[%c0_20, %c0_21] : memref<16x256xf32, #tpu.memory_space<vmem>>, vector<16x256xf32>
    tpu.vector_store %arg15[%c0_20, %c0_21], %13 {strides = array<i32>} : memref<16x256xf32, #tpu.memory_space<vmem>>, vector<16x256xf32>,
    %c0_i32 = arith.constant 0 : i32
    %18 = arith.cmpi eq, %arg0, %c0_i32 : i32
    %19 = arith.extui %18 : i1 to i32
    %c0_i32_22 = arith.constant 0 : i32
    %20 = arith.cmpi ne, %19, %c0_i32_22 : i32
    scf.if %20 {
      %c0_55 = arith.constant 0 : index
      %c0_56 = arith.constant 0 : index
      %81 = vector.load %arg8[%c0_55, %c0_56] : memref<512x256xf32, #tpu.memory_space<vmem>>, vector<512x256xf32>
      %cst_57 = arith.constant dense<0.000000e+00> : vector<512x16xf32>
      %82 = tpu.matmul %81, %8, %cst_57 {dimension_numbers = #tpu.dot_dimension_numbers<[1], [0], [0], [1], [0, 0, 1, 1], [], []>} : vector<512x256xf32>, vector<256x16xf32>, vector<512x16xf32> -> vector<512x16xf32>
      %cst_58 = arith.constant dense<0.000000e+00> : vector<16x512xf32>
      %83 = tpu.matmul %13, %81, %cst_58 {dimension_numbers = #tpu.dot_dimension_numbers<[1], [1], [0], [0], [0, 0, 1, 0], [], []>} : vector<16x256xf32>, vector<512x256xf32>, vector<16x512xf32> -> vector<16x512xf32>
      %84 = vector.extract_strided_slice %82 {offsets = [0, 0], sizes = [256, 16], strides = [1, 1]} : vector<512x16xf32> to vector<256x16xf32>
      %c0_59 = arith.constant 0 : index
      %c0_60 = arith.constant 0 : index
      %85 = vector.load %arg12[%c0_59, %c0_60] : memref<256x16xf32, #tpu.memory_space<vmem>>, vector<256x16xf32>
      tpu.vector_store %arg12[%c0_59, %c0_60], %84 {strides = array<i32>} : memref<256x16xf32, #tpu.memory_space<vmem>>, vector<256x16xf32>,
      %86 = vector.extract_strided_slice %82 {offsets = [256, 0], sizes = [256, 16], strides = [1, 1]} : vector<512x16xf32> to vector<256x16xf32>
      %c0_61 = arith.constant 0 : index
      %c0_62 = arith.constant 0 : index
      %87 = vector.load %arg13[%c0_61, %c0_62] : memref<256x16xf32, #tpu.memory_space<vmem>>, vector<256x16xf32>
      tpu.vector_store %arg13[%c0_61, %c0_62], %86 {strides = array<i32>} : memref<256x16xf32, #tpu.memory_space<vmem>>, vector<256x16xf32>,
      %88 = vector.extract_strided_slice %83 {offsets = [0, 0], sizes = [16, 256], strides = [1, 1]} : vector<16x512xf32> to vector<16x256xf32>
      %c0_63 = arith.constant 0 : index
      %c0_64 = arith.constant 0 : index
      %89 = vector.load %arg14[%c0_63, %c0_64] : memref<16x256xf32, #tpu.memory_space<vmem>>, vector<16x256xf32>
      tpu.vector_store %arg14[%c0_63, %c0_64], %88 {strides = array<i32>} : memref<16x256xf32, #tpu.memory_space<vmem>>, vector<16x256xf32>,
      %90 = vector.extract_strided_slice %83 {offsets = [0, 256], sizes = [16, 256], strides = [1, 1]} : vector<16x512xf32> to vector<16x256xf32>
      %c0_65 = arith.constant 0 : index
      %c0_66 = arith.constant 0 : index
      %91 = vector.load %arg15[%c0_65, %c0_66] : memref<16x256xf32, #tpu.memory_space<vmem>>, vector<16x256xf32>
      tpu.vector_store %arg15[%c0_65, %c0_66], %90 {strides = array<i32>} : memref<16x256xf32, #tpu.memory_space<vmem>>, vector<16x256xf32>,
    } else {
    }
    %c0_23 = arith.constant 0 : index
    %c0_24 = arith.constant 0 : index
    %21 = vector.load %arg12[%c0_23, %c0_24] : memref<256x16xf32, #tpu.memory_space<vmem>>, vector<256x16xf32>
    %c0_25 = arith.constant 0 : index
    %c0_26 = arith.constant 0 : index
    %22 = vector.load %arg13[%c0_25, %c0_26] : memref<256x16xf32, #tpu.memory_space<vmem>>, vector<256x16xf32>
    %23 = vector.extract_strided_slice %21 {offsets = [0, 8], sizes = [256, 8], strides = [1, 1]} : vector<256x16xf32> to vector<256x8xf32>
    %24 = vector.extract_strided_slice %21 {offsets = [0, 0], sizes = [256, 8], strides = [1, 1]} : vector<256x16xf32> to vector<256x8xf32>
    %cst_27 = arith.constant dense<0.000000e+00> : vector<256x256xf32>
    %25 = tpu.matmul %23, %24, %cst_27 {dimension_numbers = #tpu.dot_dimension_numbers<[1], [1], [0], [0], [0, 0, 1, 0], [], []>} : vector<256x8xf32>, vector<256x8xf32>, vector<256x256xf32> -> vector<256x256xf32>
    %26 = vector.extract_strided_slice %22 {offsets = [0, 8], sizes = [256, 8], strides = [1, 1]} : vector<256x16xf32> to vector<256x8xf32>
    %27 = vector.extract_strided_slice %22 {offsets = [0, 0], sizes = [256, 8], strides = [1, 1]} : vector<256x16xf32> to vector<256x8xf32>
    %cst_28 = arith.constant dense<0.000000e+00> : vector<256x256xf32>
    %28 = tpu.matmul %26, %27, %cst_28 {dimension_numbers = #tpu.dot_dimension_numbers<[1], [1], [0], [0], [0, 0, 1, 0], [], []>} : vector<256x8xf32>, vector<256x8xf32>, vector<256x256xf32> -> vector<256x256xf32>
    %c0_29 = arith.constant 0 : index
    %c0_30 = arith.constant 0 : index
    %29 = vector.load %arg9[%c0_29, %c0_30] : memref<2x256xf32, #tpu.memory_space<vmem>>, vector<1x256xf32>
    %c1 = arith.constant 1 : index
    %c0_31 = arith.constant 0 : index
    %30 = vector.load %arg9[%c1, %c0_31] : memref<2x256xf32, #tpu.memory_space<vmem>>, vector<1x256xf32>
    %c0_32 = arith.constant 0 : index
    %c0_33 = arith.constant 0 : index
    %31 = vector.load %arg10[%c0_32, %c0_33] : memref<256x2xf32, #tpu.memory_space<vmem>>, vector<256x1xf32>
    %c0_34 = arith.constant 0 : index
    %c1_35 = arith.constant 1 : index
    %32 = vector.load %arg10[%c0_34, %c1_35] : memref<256x2xf32, #tpu.memory_space<vmem>>, vector<256x1xf32>
    %33 = vector.broadcast %31 : vector<256x1xf32> to vector<256x256xf32>
    %34 = vector.broadcast %29 : vector<1x256xf32> to vector<256x256xf32>
    %35 = arith.cmpf oeq, %33, %34 : vector<256x256xf32>
    %36 = vector.broadcast %32 : vector<256x1xf32> to vector<256x256xf32>
    %37 = vector.broadcast %30 : vector<1x256xf32> to vector<256x256xf32>
    %38 = arith.cmpf oeq, %36, %37 : vector<256x256xf32>
    %39 = vector.broadcast %31 : vector<256x1xf32> to vector<256x256xf32>
    %40 = vector.broadcast %29 : vector<1x256xf32> to vector<256x256xf32>
    %41 = arith.cmpf one, %39, %40 : vector<256x256xf32>
    %42 = arith.andi %38, %41 : vector<256x256xi1>
    %cst_36 = arith.constant 0xFF800000 : f32
    %43 = vector.broadcast %cst_36 : f32 to vector<256x256xf32>
    %44 = arith.select %42, %25, %43 : vector<256x256xi1>, vector<256x256xf32>
    %cst_37 = arith.constant dense<0xFF800000> : vector<256xf32>
    %45 = vector.multi_reduction <maximumf>, %44, %cst_37 [0] : vector<256x256xf32> to vector<256xf32>
    %46 = vector.shape_cast %45 : vector<256xf32> to vector<1x256xf32>
    %cst_38 = arith.constant 0xFF800000 : f32
    %47 = vector.broadcast %cst_38 : f32 to vector<256x256xf32>
    %48 = arith.select %35, %28, %47 : vector<256x256xi1>, vector<256x256xf32>
    %cst_39 = arith.constant dense<0xFF800000> : vector<256xf32>
    %49 = vector.multi_reduction <maximumf>, %48, %cst_39 [0] : vector<256x256xf32> to vector<256xf32>
    %50 = vector.shape_cast %49 : vector<256xf32> to vector<1x256xf32>
    %51 = arith.maximumf %46, %50 : vector<1x256xf32>
    %52 = vector.broadcast %51 : vector<1x256xf32> to vector<256x256xf32>
    %53 = arith.subf %25, %52 : vector<256x256xf32>
    %54 = math.exp %53 : vector<256x256xf32>
    %cst_40 = arith.constant 0.000000e+00 : f32
    %55 = vector.broadcast %cst_40 : f32 to vector<256x256xf32>
    %56 = arith.select %42, %54, %55 : vector<256x256xi1>, vector<256x256xf32>
    %57 = vector.broadcast %51 : vector<1x256xf32> to vector<256x256xf32>
    %58 = arith.subf %28, %57 : vector<256x256xf32>
    %59 = math.exp %58 : vector<256x256xf32>
    %cst_41 = arith.constant 0.000000e+00 : f32
    %60 = vector.broadcast %cst_41 : f32 to vector<256x256xf32>
    %61 = arith.select %35, %59, %60 : vector<256x256xi1>, vector<256x256xf32>
    %cst_42 = arith.constant dense<0.000000e+00> : vector<256xf32>
    %62 = vector.multi_reduction <add>, %56, %cst_42 [0] : vector<256x256xf32> to vector<256xf32>
    %63 = vector.shape_cast %62 : vector<256xf32> to vector<1x256xf32>
    %cst_43 = arith.constant dense<0.000000e+00> : vector<256xf32>
    %64 = vector.multi_reduction <add>, %61, %cst_43 [0] : vector<256x256xf32> to vector<256xf32>
    %65 = vector.shape_cast %64 : vector<256xf32> to vector<1x256xf32>
    %66 = arith.addf %63, %65 : vector<1x256xf32>
    %c0_44 = arith.constant 0 : index
    %c0_45 = arith.constant 0 : index
    %67 = vector.load %arg14[%c0_44, %c0_45] : memref<16x256xf32, #tpu.memory_space<vmem>>, vector<16x256xf32>
    %cst_46 = arith.constant dense<0.000000e+00> : vector<16x256xf32>
    %68 = tpu.matmul %67, %56, %cst_46 {dimension_numbers = #tpu.dot_dimension_numbers<[1], [0], [0], [1], [0, 0, 1, 1], [], []>} : vector<16x256xf32>, vector<256x256xf32>, vector<16x256xf32> -> vector<16x256xf32>
    %c0_47 = arith.constant 0 : index
    %c0_48 = arith.constant 0 : index
    %69 = vector.load %arg15[%c0_47, %c0_48] : memref<16x256xf32, #tpu.memory_space<vmem>>, vector<16x256xf32>
    %cst_49 = arith.constant dense<0.000000e+00> : vector<16x256xf32>
    %70 = tpu.matmul %69, %61, %cst_49 {dimension_numbers = #tpu.dot_dimension_numbers<[1], [0], [0], [1], [0, 0, 1, 1], [], []>} : vector<16x256xf32>, vector<256x256xf32>, vector<16x256xf32> -> vector<16x256xf32>
    %c0_50 = arith.constant 0 : index
    %c0_51 = arith.constant 0 : index
    %71 = memref.load %arg1[%c0_50, %c0_51] : memref<1x1xf32, #tpu.memory_space<smem>>
    %72 = arith.addf %68, %70 : vector<16x256xf32>
    %73 = vector.broadcast %66 : vector<1x256xf32> to vector<16x256xf32>
    %74 = arith.divf %72, %73 : vector<16x256xf32>
    %75 = vector.broadcast %71 : f32 to vector<16x256xf32>
    %76 = arith.mulf %75, %74 : vector<16x256xf32>
    %77 = arith.addf %76, %1 : vector<16x256xf32>
    %c0_52 = arith.constant 0 : index
    %c0_53 = arith.constant 0 : index
    %c0_54 = arith.constant 0 : index
    %78 = vector.load %arg11[%c0_52, %c0_53, %c0_54] : memref<1x16x256xf32, #tpu.memory_space<vmem>>, vector<1x16x256xf32>
    %79 = vector.shape_cast %78 : vector<1x16x256xf32> to vector<16x256xf32>
    %80 = vector.shape_cast %77 : vector<16x256xf32> to vector<1x16x256xf32>
    tpu.vector_store %arg11[%c0_52, %c0_53, %c0_54], %80 {strides = array<i32>} : memref<1x16x256xf32, #tpu.memory_space<vmem>>, vector<1x16x256xf32>,
    return
  }
  func.func @transform_0(%arg0: i32) -> (i32, i32) {
    %c0_i32 = arith.constant 0 : i32
    %c0_i32_0 = arith.constant 0 : i32
    %c0_i32_1 = arith.constant 0 : i32
    return %c0_i32, %c0_i32_0 : i32, i32
  }
  func.func @transform_1(%arg0: i32) -> (i32, i32, i32) {
    %c0_i32 = arith.constant 0 : i32
    %c0_i32_0 = arith.constant 0 : i32
    %c0_i32_1 = arith.constant 0 : i32
    return %arg0, %c0_i32, %c0_i32_0 : i32, i32, i32
  }
  func.func @transform_2(%arg0: i32) -> (i32, i32, i32) {
    %c0_i32 = arith.constant 0 : i32
    %c0_i32_0 = arith.constant 0 : i32
    %c0_i32_1 = arith.constant 0 : i32
    return %arg0, %c0_i32, %c0_i32_0 : i32, i32, i32
  }
  func.func @transform_3(%arg0: i32) -> (i32, i32) {
    %c0_i32 = arith.constant 0 : i32
    %c0_i32_0 = arith.constant 0 : i32
    %c0_i32_1 = arith.constant 0 : i32
    return %c0_i32, %c0_i32_0 : i32, i32
  }
  func.func @transform_4(%arg0: i32) -> (i32, i32) {
    %c0_i32 = arith.constant 0 : i32
    %c0_i32_0 = arith.constant 0 : i32
    %c0_i32_1 = arith.constant 0 : i32
    return %c0_i32, %c0_i32_0 : i32, i32
  }
  func.func @transform_5(%arg0: i32) -> (i32, i32) {
    %c0_i32 = arith.constant 0 : i32
    %c0_i32_0 = arith.constant 0 : i32
    %c0_i32_1 = arith.constant 0 : i32
    return %c0_i32, %c0_i32_0 : i32, i32
  }
  func.func @transform_6(%arg0: i32) -> (i32, i32) {
    %c0_i32 = arith.constant 0 : i32
    %c0_i32_0 = arith.constant 0 : i32
    %c0_i32_1 = arith.constant 0 : i32
    return %c0_i32, %c0_i32_0 : i32, i32
  }
  func.func @transform_7(%arg0: i32) -> (i32, i32) {
    %c0_i32 = arith.constant 0 : i32
    %c0_i32_0 = arith.constant 0 : i32
    %c0_i32_1 = arith.constant 0 : i32
    return %c0_i32, %c0_i32_0 : i32, i32
  }
  func.func @transform_8(%arg0: i32) -> (i32, i32) {
    %c0_i32 = arith.constant 0 : i32
    %c0_i32_0 = arith.constant 0 : i32
    %c0_i32_1 = arith.constant 0 : i32
    return %c0_i32, %c0_i32_0 : i32, i32
  }
  func.func @transform_9(%arg0: i32) -> (i32, i32) {
    %c0_i32 = arith.constant 0 : i32
    %c0_i32_0 = arith.constant 0 : i32
    %c0_i32_1 = arith.constant 0 : i32
    return %c0_i32, %c0_i32_0 : i32, i32
  }
  func.func @transform_10(%arg0: i32) -> (i32, i32, i32) {
    %c0_i32 = arith.constant 0 : i32
    %c0_i32_0 = arith.constant 0 : i32
    %c0_i32_1 = arith.constant 0 : i32
    return %arg0, %c0_i32, %c0_i32_0 : i32, i32, i32
  }
}

</mosaic_0001>

<bundles_post_ra>
// kernel: cc_module_forward.1
= control target key start
LH: loop header
LB: loop body
LE: loop exit
PB: predicated region body
PF: predicated region fallthrough
CT: control target
= control target key end

     0   :  { %s5919_s15 = smov 0   ;;  %s11560_s0 = inlined_call_operand.<no memory space> [shape: f32[1,1], index: 0, kind: input, shape index: {}]   ;;  %s11561_s1 = inlined_call_operand.vmem [shape: f32[2,16,256], index: 1, kind: input, shape index: {}]   ;;  %s11562_s2 = inlined_call_operand.vmem [shape: f32[2,256,16], index: 2, kind: input, shape index: {}]   ;;  %s11563_s3 = inlined_call_operand.vmem [shape: f32[16,16], index: 3, kind: input, shape index: {}]   ;;  %s11564_s4 = inlined_call_operand.vmem [shape: f32[1,16], index: 4, kind: input, shape index: {}]   ;;  %s11565_s5 = inlined_call_operand.vmem [shape: f32[16,16], index: 5, kind: input, shape index: {}]   ;;  %s11566_s6 = inlined_call_operand.vmem [shape: f32[16,1], index: 6, kind: input, shape index: {}]   ;;  %s11567_s7 = inlined_call_operand.vmem [shape: f32[512,256], index: 7, kind: input, shape index: {}]   ;;  %s11568_s8 = inlined_call_operand.vmem [shape: f32[2,256], index: 8, kind: input, shape index: {}]   ;;  %s11569_s9 = inlined_call_operand.vmem [shape: f32[256,2], index: 9, kind: input, shape index: {}]   ;;  %s11570_s10 = inlined_call_operand.vmem [shape: f32[2,16,256], index: 10, kind: output, shape index: {}]  }
   0x1   :  { %15 = sst [smem:[#allocation6]] %s11560_s0 }
   0x2 LB: > { %s5925_s16 = sadd.s32 4294967295, %s5854_s15   ;;  %p4481_p0 = scmp.ge.s32.totalorder %s5854_s15, 1  ;;  %s5854_s15 = sphi %s5919_s15, %s21_s15  }
   0x3   : > { %p323_p1 = scmp.lt.s32.totalorder %s5854_s15, 3 }
   0x5   : > { %p324_p2 = pnand %p4481_p0, %p323_p1 }
   0x7   : > { %327 = sbr.rel (%p324_p2) target bundleno = 1730 (0x6c2), region = 60 }
   0xe   : > { %v417_v0 = vld [vmem:[%s11563_s3] sm:$0xff]  ;;  %v418_v1 = vld [vmem:[%s11563_s3 + $0x8] sm:$0xff]  ;;  %p366_p3 = scmp.lt.s32.totalorder %s5925_s16, 1  ;;  %v5856_v3 = vmov 0   ;;  %vm426_vm0 = vcmask 130048   ;;  %v5857_v41 = vmov 0.0  }
   0xf   : > { %v5064_v2 = vpack.c.bf16 %v418_v1, %v417_v0  ;;  %5555 = vset.pattern.permute.xlu0 %v5856_v3  ;;  %v750_v4 = vld [vmem:[%s11566_s6] sm:$0xff]  ;;  %v751_v5 = vld [vmem:[%s11566_s6 + $0x8] sm:$0xff]  ;;  %p4523_p4 = scmp.ne.s32.totalorder %s5925_s16, 0 }
  0x10   : > { %s367_s20 = scalar_select %p366_p3, %s5925_s16, 1  ;;  %754 = vperm.xlu0 %5555, %v750_v4   ;;  %v748_v42 = vld [vmem:[%s11565_s5] sm:$0xff]  ;;  %v749_v45 = vld [vmem:[%s11565_s5 + $0x8] sm:$0xff] }
  0x11   : > { %5536 = vmatprep.subr.bf16.mxu1 %v5064_v2  ;;  %5065 = vmatprep.subr.bf16.mxu0 %v5064_v2  ;;  %v6044_v47 = vld [vmem:[%s11564_s4] ss:$0 sm:$0xff] }
  0x12   : > { %5537 = vmatpush3.bf16.msra.mxu1 %v5064_v2  ;;  %5067 = vmatpush3.bf16.msra.mxu0 %v5064_v2  ;;  %s4784_s23 = sshll.u32 %s367_s20, 8  ;;  %s4783_s24 = sshll.u32 %s367_s20, 5 }
  0x13   : > { %s5944_s27 = scalar_lea.vmem %s11562_s2, %s4784_s23  ;;  %s370_s30 = scalar_lea.vmem %s11561_s1, %s4783_s24 }
  0x14   : > { %v403_v6 = vld [vmem:[%s5944_s27 + $0x90] sm:$0xff]  ;;  %v385_v7 = vld [vmem:[%s5944_s27] sm:$0xff]  ;;  %v404_v8 = vld [vmem:[%s5944_s27 + $0x98] sm:$0xff]  ;;  %s5958_s17 = scalar_lea.vmem %s11570_s10, %s4783_s24  ;;  %759 = vperm.xlu0 %5555, %v751_v5  }
  0x15   : > { %5043 = vmatprep.mubr.msk.f32.mxu1 %vm426_vm0, %v403_v6  ;;  %5016 = vmatprep.mubr.msk.f32.mxu0 %vm426_vm0, %v385_v7  ;;  %v386_v9 = vld [vmem:[%s5944_s27 + $0x8] sm:$0xff]  ;;  %v5965_v11 = vld [vmem:[%s370_s30 + $0x18] sm:$0xff]  ;;  %v5971_v13 = vld [vmem:[%s370_s30] sm:$0xff] }
  0x16   : > { %v5963_v10 = vld [vmem:[%s370_s30 + $0x8] sm:$0xff]  ;;  %12206 = vst [vmem:[#allocation8_spill] sm:$0xff] %v5965_v11  ;;  %5044 = vmatmul.mubr.msk.f32.vlgmr.msra.gmra.mrb[0].mxu1 %vm426_vm0, %v404_v8  ;;  %5017 = vmatmul.mubr.msk.f32.vlgmr.msra.gmra.mrb[0].mxu0 %vm426_vm0, %v386_v9  ;;  %12207 = vst [vmem:[#allocation9_spill] sm:$0xff] %v5971_v13  ;;  %v5973_v14 = vld [vmem:[%s370_s30 + $0x10] sm:$0xff] }
  0x17   : > { %12205 = vst [vmem:[#allocation7_spill] sm:$0xff] %v5963_v10  ;;  %v5068_v12 = vpack.c.bf16 %v5965_v11, %v5963_v10  ;;  %12208 = vst [vmem:[#allocation10_spill] sm:$0xff] %v5973_v14  ;;  %v405_v15 = vld [vmem:[%s5944_s27 + $0xa0] sm:$0xff]  ;;  %v5070_v16 = vpack.c.bf16 %v5973_v14, %v5971_v13  ;;  %v387_v17 = vld [vmem:[%s5944_s27 + $0x10] sm:$0xff] }
  0x18   : > { %5046 = vmatprep.mubr.msk.f32.mxu1 %vm426_vm0, %v405_v15  ;;  %v406_v18 = vld [vmem:[%s5944_s27 + $0xa8] sm:$0xff]  ;;  %v388_v19 = vld [vmem:[%s5944_s27 + $0x18] sm:$0xff]  ;;  %5019 = vmatprep.mubr.msk.f32.mxu0 %vm426_vm0, %v387_v17  ;;  %v407_v20 = vld [vmem:[%s5944_s27 + $0xb0] sm:$0xff] }
  0x19   : > { %5069 = vmatprep.subr.bf16.mxu1 %v5068_v12  ;;  %v389_v21 = vld [vmem:[%s5944_s27 + $0x20] sm:$0xff]  ;;  %v408_v22 = vld [vmem:[%s5944_s27 + $0xb8] sm:$0xff]  ;;  %v390_v23 = vld [vmem:[%s5944_s27 + $0x28] sm:$0xff] }
  0x1a   : > { %5071 = vmatpush1.bf16.msra.mxu1 %v5070_v16  ;;  %5020 = vmatmul.mubr.msk.f32.gmra.mrb[2].mxu0 %vm426_vm0, %v388_v19  ;;  %v409_v24 = vld [vmem:[%s5944_s27 + $0xc0] sm:$0xff]  ;;  %v391_v25 = vld [vmem:[%s5944_s27 + $0x30] sm:$0xff]  ;;  %v410_v26 = vld [vmem:[%s5944_s27 + $0xc8] sm:$0xff] }
  0x1b   : > { %5047 = vmatmul.mubr.msk.f32.gmra.mrb[2].mxu1 %vm426_vm0, %v406_v18  ;;  %5022 = vmatprep.mubr.msk.f32.mxu0 %vm426_vm0, %v389_v21  ;;  %v392_v27 = vld [vmem:[%s5944_s27 + $0x38] sm:$0xff]  ;;  %v411_v28 = vld [vmem:[%s5944_s27 + $0xd0] sm:$0xff]  ;;  %v393_v29 = vld [vmem:[%s5944_s27 + $0x40] sm:$0xff] }
  0x1c   : > { %5049 = vmatprep.mubr.msk.f32.mxu1 %vm426_vm0, %v407_v20  ;;  %v412_v30 = vld [vmem:[%s5944_s27 + $0xd8] sm:$0xff]  ;;  %v394_v31 = vld [vmem:[%s5944_s27 + $0x48] sm:$0xff]  ;;  %v413_v32 = vld [vmem:[%s5944_s27 + $0xe0] sm:$0xff] }
  0x1d   : > { %v395_v33 = vld [vmem:[%s5944_s27 + $0x50] sm:$0xff]  ;;  %v414_v34 = vld [vmem:[%s5944_s27 + $0xe8] sm:$0xff]  ;;  %v396_v35 = vld [vmem:[%s5944_s27 + $0x58] sm:$0xff] }
  0x1e   : > { %5023 = vmatmul.mubr.msk.f32.gmra.mrb[4].mxu0 %vm426_vm0, %v390_v23  ;;  %v415_v36 = vld [vmem:[%s5944_s27 + $0xf0] sm:$0xff]  ;;  %v397_v37 = vld [vmem:[%s5944_s27 + $0x60] sm:$0xff]  ;;  %v416_v38 = vld [vmem:[%s5944_s27 + $0xf8] sm:$0xff] }
  0x1f   : > { %5050 = vmatmul.mubr.msk.f32.gmra.mrb[4].mxu1 %vm426_vm0, %v408_v22  ;;  %5025 = vmatprep.mubr.msk.f32.mxu0 %vm426_vm0, %v391_v25  ;;  %v398_v39 = vld [vmem:[%s5944_s27 + $0x68] sm:$0xff]  ;;  %v399_v40 = vld [vmem:[%s5944_s27 + $0x70] sm:$0xff]  ;;  %v400_v43 = vld [vmem:[%s5944_s27 + $0x78] sm:$0xff] }
  0x20   : > { %5052 = vmatprep.mubr.msk.f32.mxu1 %vm426_vm0, %v409_v24  ;;  %v401_v44 = vld [vmem:[%s5944_s27 + $0x80] sm:$0xff]  ;;  %v402_v46 = vld [vmem:[%s5944_s27 + $0x88] sm:$0xff] }
  0x22   : > { %5026 = vmatmul.mubr.msk.f32.gmra.mrb[6].mxu0 %vm426_vm0, %v392_v27 }
  0x23   : > { %5053 = vmatmul.mubr.msk.f32.gmra.mrb[6].mxu1 %vm426_vm0, %v410_v26  ;;  %5028 = vmatprep.mubr.msk.f32.mxu0 %vm426_vm0, %v393_v29 }
  0x24   : > { %5055 = vmatprep.mubr.msk.f32.mxu1 %vm426_vm0, %v411_v28 }
  0x26   : > { %5029 = vmatmul.mubr.msk.f32.gmra.mrb[8].mxu0 %vm426_vm0, %v394_v31 }
  0x27   : > { %5056 = vmatmul.mubr.msk.f32.gmra.mrb[8].mxu1 %vm426_vm0, %v412_v30  ;;  %5031 = vmatprep.mubr.msk.f32.mxu0 %vm426_vm0, %v395_v33 }
  0x28   : > { %5058 = vmatprep.mubr.msk.f32.mxu1 %vm426_vm0, %v413_v32 }
  0x2a   : > { %5032 = vmatmul.mubr.msk.f32.gmra.mrb[10].mxu0 %vm426_vm0, %v396_v35 }
  0x2b   : > { %5059 = vmatmul.mubr.msk.f32.gmra.mrb[10].mxu1 %vm426_vm0, %v414_v34  ;;  %5034 = vmatprep.mubr.msk.f32.mxu0 %vm426_vm0, %v397_v37 }
  0x2c   : > { %5061 = vmatprep.mubr.msk.f32.mxu1 %vm426_vm0, %v415_v36 }
  0x2e   : > { %5035 = vmatmul.mubr.msk.f32.gmra.mrb[12].mxu0 %vm426_vm0, %v398_v39 }
  0x2f   : > { %5062 = vmatmul.mubr.msk.f32.gmra.mrb[12].mxu1 %vm426_vm0, %v416_v38  ;;  %5037 = vmatprep.mubr.msk.f32.mxu0 %vm426_vm0, %v399_v40 }
  0x30   : > { %832 = vmatprep.mubr.f32.mxu1 %v5857_v41 }
  0x32   : > { %5038 = vmatmul.mubr.msk.f32.gmra.mrb[14].mxu0 %vm426_vm0, %v400_v43 }
  0x33   : > { %4521 = vmatmul.mubr.msk.f32.vlgmr.msra.gmra.mrb[14].mxu1 %vm426_vm0, %v748_v42  ;;  %5040 = vmatprep.mubr.msk.f32.mxu0 %vm426_vm0, %v401_v44 }
  0x34   : > { %838 = vmatprep.mubr.f32.mxu1 %v5857_v41 }
  0x36   : > { %5041 = vmatmul.mubr.msk.f32.gmra.mrb[16].mxu0 %vm426_vm0, %v402_v46 }
  0x37   : > { %4522 = vmatmul.mubr.msk.f32.gmra.mrb[16].mxu1 %vm426_vm0, %v749_v45 }
  0x8f   : > { %v755_v37 = vpop.permute.xlu0 %754 }
  0xe9   : > { %v5018_v48 = vpop.f32.mrb[0].mxu0  ;;  %v5045_v49 = vpop.f32.mrb[0].mxu1 }
  0xea   : > { %v6047_v50 = vadd.f32 %v5018_v48, %v6044_v47  ;;  %v6050_v51 = vadd.f32 %v5045_v49, %v6044_v47  ;;  %v589_v52 = vpop.f32.mrb[1].mxu0  ;;  %v679_v53 = vpop.f32.mrb[1].mxu1 }
  0xeb   : > { %v6053_v54 = vadd.f32 %v6044_v47, %v589_v52  ;;  %v6056_v55 = vadd.f32 %v6044_v47, %v679_v53 }
  0xec   : > { %846 = vst.msk [vmem:[#allocation2 + $0x8] sm:$0xff] %vm426_vm0, %v6047_v50  ;;  %878 = vst.msk [vmem:[#allocation3 + $0x8] sm:$0xff] %vm426_vm0, %v6047_v50 }
  0xed   : > { %864 = vst.msk [vmem:[#allocation2 + $0x98] sm:$0xff] %vm426_vm0, %v6050_v51  ;;  %896 = vst.msk [vmem:[#allocation3 + $0x98] sm:$0xff] %vm426_vm0, %v6050_v51  ;;  %v5021_v56 = vpop.f32.mrb[2].mxu0 }
  0xee   : > { %845 = vst.msk [vmem:[#allocation2] sm:$0xff] %vm426_vm0, %v6053_v54  ;;  %877 = vst.msk [vmem:[#allocation3] sm:$0xff] %vm426_vm0, %v6053_v54  ;;  %v5048_v57 = vpop.f32.mrb[2].mxu1  ;;  %v6075_v58 = vadd.f32 %v5021_v56, %v6044_v47  ;;  %v599_v60 = vpop.f32.mrb[3].mxu0 }
  0xef   : > { %863 = vst.msk [vmem:[#allocation2 + $0x90] sm:$0xff] %vm426_vm0, %v6056_v55  ;;  %895 = vst.msk [vmem:[#allocation3 + $0x90] sm:$0xff] %vm426_vm0, %v6056_v55  ;;  %v6078_v59 = vadd.f32 %v5048_v57, %v6044_v47  ;;  %v689_v61 = vpop.f32.mrb[3].mxu1  ;;  %v6081_v62 = vadd.f32 %v6044_v47, %v599_v60 }
  0xf0   : > { %v6084_v63 = vadd.f32 %v6044_v47, %v689_v61  ;;  %848 = vst.msk [vmem:[#allocation2 + $0x18] sm:$0xff] %vm426_vm0, %v6075_v58  ;;  %880 = vst.msk [vmem:[#allocation3 + $0x18] sm:$0xff] %vm426_vm0, %v6075_v58  ;;  %v760_v61 = vpop.permute.xlu0 %759 }
  0xf1   : > { %866 = vst.msk [vmem:[#allocation2 + $0xa8] sm:$0xff] %vm426_vm0, %v6078_v59  ;;  %898 = vst.msk [vmem:[#allocation3 + $0xa8] sm:$0xff] %vm426_vm0, %v6078_v59  ;;  %v5024_v0 = vpop.f32.mrb[4].mxu0 }
  0xf2   : > { %847 = vst.msk [vmem:[#allocation2 + $0x10] sm:$0xff] %vm426_vm0, %v6081_v62  ;;  %879 = vst.msk [vmem:[#allocation3 + $0x10] sm:$0xff] %vm426_vm0, %v6081_v62  ;;  %v5051_v1 = vpop.f32.mrb[4].mxu1  ;;  %v6103_v2 = vadd.f32 %v5024_v0, %v6044_v47  ;;  %v609_v5 = vpop.f32.mrb[5].mxu0 }
  0xf3   : > { %865 = vst.msk [vmem:[#allocation2 + $0xa0] sm:$0xff] %vm426_vm0, %v6084_v63  ;;  %897 = vst.msk [vmem:[#allocation3 + $0xa0] sm:$0xff] %vm426_vm0, %v6084_v63  ;;  %v6106_v4 = vadd.f32 %v5051_v1, %v6044_v47  ;;  %v699_v6 = vpop.f32.mrb[5].mxu1  ;;  %v6109_v7 = vadd.f32 %v6044_v47, %v609_v5 }
  0xf4   : > { %v6112_v8 = vadd.f32 %v6044_v47, %v699_v6  ;;  %850 = vst.msk [vmem:[#allocation2 + $0x28] sm:$0xff] %vm426_vm0, %v6103_v2  ;;  %882 = vst.msk [vmem:[#allocation3 + $0x28] sm:$0xff] %vm426_vm0, %v6103_v2 }
  0xf5   : > { %868 = vst.msk [vmem:[#allocation2 + $0xb8] sm:$0xff] %vm426_vm0, %v6106_v4  ;;  %900 = vst.msk [vmem:[#allocation3 + $0xb8] sm:$0xff] %vm426_vm0, %v6106_v4  ;;  %v5027_v9 = vpop.f32.mrb[6].mxu0 }
  0xf6   : > { %849 = vst.msk [vmem:[#allocation2 + $0x20] sm:$0xff] %vm426_vm0, %v6109_v7  ;;  %881 = vst.msk [vmem:[#allocation3 + $0x20] sm:$0xff] %vm426_vm0, %v6109_v7  ;;  %v5054_v12 = vpop.f32.mrb[6].mxu1  ;;  %v6131_v15 = vadd.f32 %v5027_v9, %v6044_v47  ;;  %v619_v17 = vpop.f32.mrb[7].mxu0 }
  0xf7   : > { %867 = vst.msk [vmem:[#allocation2 + $0xb0] sm:$0xff] %vm426_vm0, %v6112_v8  ;;  %899 = vst.msk [vmem:[#allocation3 + $0xb0] sm:$0xff] %vm426_vm0, %v6112_v8  ;;  %v6134_v16 = vadd.f32 %v5054_v12, %v6044_v47  ;;  %v709_v18 = vpop.f32.mrb[7].mxu1  ;;  %v6137_v19 = vadd.f32 %v6044_v47, %v619_v17 }
  0xf8   : > { %v6140_v20 = vadd.f32 %v6044_v47, %v709_v18  ;;  %852 = vst.msk [vmem:[#allocation2 + $0x38] sm:$0xff] %vm426_vm0, %v6131_v15  ;;  %884 = vst.msk [vmem:[#allocation3 + $0x38] sm:$0xff] %vm426_vm0, %v6131_v15 }
  0xf9   : > { %870 = vst.msk [vmem:[#allocation2 + $0xc8] sm:$0xff] %vm426_vm0, %v6134_v16  ;;  %902 = vst.msk [vmem:[#allocation3 + $0xc8] sm:$0xff] %vm426_vm0, %v6134_v16  ;;  %v5030_v21 = vpop.f32.mrb[8].mxu0 }
  0xfa   : > { %851 = vst.msk [vmem:[#allocation2 + $0x30] sm:$0xff] %vm426_vm0, %v6137_v19  ;;  %883 = vst.msk [vmem:[#allocation3 + $0x30] sm:$0xff] %vm426_vm0, %v6137_v19  ;;  %v5057_v22 = vpop.f32.mrb[8].mxu1  ;;  %v6159_v23 = vadd.f32 %v5030_v21, %v6044_v47  ;;  %v629_v25 = vpop.f32.mrb[9].mxu0  ;;  %v922_v21 = vld [vmem:[%s11567_s7 + $0x8] sm:$0xff] (!%p4523_p4) }
  0xfb   : > { %869 = vst.msk [vmem:[#allocation2 + $0xc0] sm:$0xff] %vm426_vm0, %v6140_v20  ;;  %901 = vst.msk [vmem:[#allocation3 + $0xc0] sm:$0xff] %vm426_vm0, %v6140_v20  ;;  %v6162_v24 = vadd.f32 %v5057_v22, %v6044_v47  ;;  %v719_v26 = vpop.f32.mrb[9].mxu1  ;;  %v6165_v27 = vadd.f32 %v6044_v47, %v629_v25  ;;  %v6295_v22 = vld [vmem:[%s11567_s7 + $0x18] sm:$0xff] (!%p4523_p4)  ;;  %v6300_v25 = vld [vmem:[%s11567_s7] sm:$0xff] (!%p4523_p4)  ;;  %1113 = vmatprep.mubr.f32.mxu0 (!%p4523_p4), %v922_v21 }
  0xfc   : > { %v6168_v28 = vadd.f32 %v6044_v47, %v719_v26  ;;  %854 = vst.msk [vmem:[#allocation2 + $0x48] sm:$0xff] %vm426_vm0, %v6159_v23  ;;  %886 = vst.msk [vmem:[#allocation3 + $0x48] sm:$0xff] %vm426_vm0, %v6159_v23  ;;  %v5858_v26 = vmov (!%p4523_p4), 0.0|0.0  }
  0xfd   : > { %872 = vst.msk [vmem:[#allocation2 + $0xd8] sm:$0xff] %vm426_vm0, %v6162_v24  ;;  %904 = vst.msk [vmem:[#allocation3 + $0xd8] sm:$0xff] %vm426_vm0, %v6162_v24  ;;  %v5033_v29 = vpop.f32.mrb[10].mxu0  ;;  %5072 = vmatprep.subr.bf16.mxu0 (!%p4523_p4), %v5858_v26 }
  0xfe   : > { %853 = vst.msk [vmem:[#allocation2 + $0x40] sm:$0xff] %vm426_vm0, %v6165_v27  ;;  %885 = vst.msk [vmem:[#allocation3 + $0x40] sm:$0xff] %vm426_vm0, %v6165_v27  ;;  %v5060_v30 = vpop.f32.mrb[10].mxu1  ;;  %v6187_v31 = vadd.f32 %v5033_v29, %v6044_v47  ;;  %v639_v33 = vpop.f32.mrb[11].mxu0  ;;  %v6317_v29 = vld [vmem:[%s11567_s7 + $0x38] sm:$0xff] (!%p4523_p4) }
  0xff   : > { %871 = vst.msk [vmem:[#allocation2 + $0xd0] sm:$0xff] %vm426_vm0, %v6168_v28  ;;  %903 = vst.msk [vmem:[#allocation3 + $0xd0] sm:$0xff] %vm426_vm0, %v6168_v28  ;;  %v6190_v32 = vadd.f32 %v5060_v30, %v6044_v47  ;;  %v729_v34 = vpop.f32.mrb[11].mxu1  ;;  %v6193_v35 = vadd.f32 %v6044_v47, %v639_v33  ;;  %v5076_v30 = vpack.c.bf16 (!%p4523_p4), %v6075_v58, %v6081_v62  ;;  %v6333_v58 = vld [vmem:[%s11567_s7 + $0x20] sm:$0xff] (!%p4523_p4)  ;;  %v6338_v62 = vld [vmem:[%s11567_s7 + $0x30] sm:$0xff] (!%p4523_p4) }
 0x100   : > { %v6196_v36 = vadd.f32 %v6044_v47, %v729_v34  ;;  %856 = vst.msk [vmem:[#allocation2 + $0x58] sm:$0xff] %vm426_vm0, %v6187_v31  ;;  %888 = vst.msk [vmem:[#allocation3 + $0x58] sm:$0xff] %vm426_vm0, %v6187_v31  ;;  %v5120_v33 = vpack.c.bf16 (!%p4523_p4), %v6295_v22, %v922_v21 }
 0x101   : > { %874 = vst.msk [vmem:[#allocation2 + $0xe8] sm:$0xff] %vm426_vm0, %v6190_v32  ;;  %906 = vst.msk [vmem:[#allocation3 + $0xe8] sm:$0xff] %vm426_vm0, %v6190_v32  ;;  %v5036_v38 = vpop.f32.mrb[12].mxu0 }
 0x102   : > { %855 = vst.msk [vmem:[#allocation2 + $0x50] sm:$0xff] %vm426_vm0, %v6193_v35  ;;  %887 = vst.msk [vmem:[#allocation3 + $0x50] sm:$0xff] %vm426_vm0, %v6193_v35  ;;  %v5063_v39 = vpop.f32.mrb[12].mxu1  ;;  %v6215_v40 = vadd.f32 %v5036_v38, %v6044_v47  ;;  %v649_v42 = vpop.f32.mrb[13].mxu0  ;;  %5121 = vmatprep.subr.bf16.mxu1 (!%p4523_p4), %v5120_v33  ;;  %v5079_v38 = vpack.c.bf16 (!%p4523_p4), %v6103_v2, %v6109_v7  ;;  %v6348_v2 = vld [vmem:[%s11567_s7 + $0x58] sm:$0xff] (!%p4523_p4)  ;;  %v5082_v7 = vpack.c.bf16 (!%p4523_p4), %v6131_v15, %v6137_v19  ;;  %v6363_v15 = vld [vmem:[%s11567_s7 + $0x40] sm:$0xff] (!%p4523_p4) }
 0x103   : > { %873 = vst.msk [vmem:[#allocation2 + $0xe0] sm:$0xff] %vm426_vm0, %v6196_v36  ;;  %905 = vst.msk [vmem:[#allocation3 + $0xe0] sm:$0xff] %vm426_vm0, %v6196_v36  ;;  %v6218_v41 = vadd.f32 %v5063_v39, %v6044_v47  ;;  %v739_v43 = vpop.f32.mrb[13].mxu1  ;;  %v6221_v44 = vadd.f32 %v6044_v47, %v649_v42  ;;  %v6343_v39 = vld [vmem:[%s11567_s7 + $0x48] sm:$0xff] (!%p4523_p4)  ;;  %v5126_v42 = vpack.c.bf16 (!%p4523_p4), %v6338_v62, %v6333_v58  ;;  %v6368_v19 = vld [vmem:[%s11567_s7 + $0x50] sm:$0xff] (!%p4523_p4) }
 0x104   : > { %v6224_v45 = vadd.f32 %v6044_v47, %v739_v43  ;;  %858 = vst.msk [vmem:[#allocation2 + $0x68] sm:$0xff] %vm426_vm0, %v6215_v40  ;;  %890 = vst.msk [vmem:[#allocation3 + $0x68] sm:$0xff] %vm426_vm0, %v6215_v40  ;;  %v5128_v43 = vpack.c.bf16 (!%p4523_p4), %v6348_v2, %v6343_v39  ;;  %v5103_v33 = vpack.c.bf16 (!%p4523_p4), %v6078_v59, %v6084_v63  ;;  %v6468_v59 = vld [vmem:[%s11567_s7 + $0xd8] sm:$0xff] (!%p4523_p4) }
 0x105   : > { %876 = vst.msk [vmem:[#allocation2 + $0xf8] sm:$0xff] %vm426_vm0, %v6218_v41  ;;  %908 = vst.msk [vmem:[#allocation3 + $0xf8] sm:$0xff] %vm426_vm0, %v6218_v41  ;;  %v5039_v46 = vpop.f32.mrb[14].mxu0  ;;  %v5106_v63 = vpack.c.bf16 (!%p4523_p4), %v6106_v4, %v6112_v8  ;;  %v6483_v4 = vld [vmem:[%s11567_s7 + $0xc0] sm:$0xff] (!%p4523_p4)  ;;  %v6488_v8 = vld [vmem:[%s11567_s7 + $0xd0] sm:$0xff] (!%p4523_p4) }
 0x106   : > { %857 = vst.msk [vmem:[#allocation2 + $0x60] sm:$0xff] %vm426_vm0, %v6221_v44  ;;  %889 = vst.msk [vmem:[#allocation3 + $0x60] sm:$0xff] %vm426_vm0, %v6221_v44  ;;  %v834_v48 = vpop.f32.mrb[14].mxu1  ;;  %v6243_v49 = vadd.f32 %v5039_v46, %v6044_v47  ;;  %v659_v53 = vpop.f32.mrb[15].mxu0  ;;  %v5085_v46 = vpack.c.bf16 (!%p4523_p4), %v6159_v23, %v6165_v27  ;;  %v6378_v23 = vld [vmem:[%s11567_s7 + $0x78] sm:$0xff] (!%p4523_p4)  ;;  %v5088_v27 = vpack.c.bf16 (!%p4523_p4), %v6187_v31, %v6193_v35  ;;  %v6393_v31 = vld [vmem:[%s11567_s7 + $0x60] sm:$0xff] (!%p4523_p4) }
 0x107   : > { %875 = vst.msk [vmem:[#allocation2 + $0xf0] sm:$0xff] %vm426_vm0, %v6224_v45  ;;  %907 = vst.msk [vmem:[#allocation3 + $0xf0] sm:$0xff] %vm426_vm0, %v6224_v45  ;;  %v6245_v52 = vadd.f32 %v834_v48, %v755_v37  ;;  %v836_v56 = vpop.f32.mrb[15].mxu1  ;;  %v6248_v57 = vadd.f32 %v6044_v47, %v659_v53  ;;  %v6373_v48 = vld [vmem:[%s11567_s7 + $0x68] sm:$0xff] (!%p4523_p4)  ;;  %v5130_v53 = vpack.c.bf16 (!%p4523_p4), %v6368_v19, %v6363_v15  ;;  %v6398_v35 = vld [vmem:[%s11567_s7 + $0x70] sm:$0xff] (!%p4523_p4) }
 0x108   : > { %v6250_v60 = vadd.f32 %v836_v56, %v755_v37  ;;  %860 = vst.msk [vmem:[#allocation2 + $0x78] sm:$0xff] %vm426_vm0, %v6243_v49  ;;  %892 = vst.msk [vmem:[#allocation3 + $0x78] sm:$0xff] %vm426_vm0, %v6243_v49  ;;  %v5132_v56 = vpack.c.bf16 (!%p4523_p4), %v6378_v23, %v6373_v48 }
 0x109   : > { %909 = vst [vmem:[#allocation4] sm:$0xff] %v6245_v52  ;;  %913 = vst [vmem:[#allocation5] sm:$0xff] %v6245_v52  ;;  %v5042_v1 = vpop.f32.mrb[16].mxu0  ;;  %920 = sbr.rel (%p4523_p4) target bundleno = 797 (0x31d), region = 64 }
 0x10a   : > { %859 = vst.msk [vmem:[#allocation2 + $0x70] sm:$0xff] %vm426_vm0, %v6248_v57  ;;  %891 = vst.msk [vmem:[#allocation3 + $0x70] sm:$0xff] %vm426_vm0, %v6248_v57  ;;  %v840_v0 = vpop.f32.mrb[16].mxu1  ;;  %v6267_v6 = vadd.f32 %v5042_v1, %v6044_v47  ;;  %v669_v12 = vpop.f32.mrb[17].mxu0  ;;  %1498 = vmatprep.mubr.f32.mxu1 (!%p4523_p4), %v6250_v60  ;;  %v5134_v1 = vpack.c.bf16 (!%p4523_p4), %v6398_v35, %v6393_v31 }
 0x10b   : > { %910 = vst [vmem:[#allocation4 + $0x8] sm:$0xff] %v6250_v60  ;;  %914 = vst [vmem:[#allocation5 + $0x8] sm:$0xff] %v6250_v60  ;;  %v6264_v5 = vadd.f32 %v840_v0, %v760_v61  ;;  %v842_v9 = vpop.f32.mrb[17].mxu1  ;;  %v6272_v18 = vadd.f32 %v6044_v47, %v669_v12  ;;  %v5073_v47 = vpack.c.bf16 (!%p4523_p4), %v6047_v50, %v6053_v54  ;;  %v6307_v50 = vld [vmem:[%s11567_s7 + $0x10] sm:$0xff] (!%p4523_p4)  ;;  %v6312_v54 = vld [vmem:[%s11567_s7 + $0x28] sm:$0xff] (!%p4523_p4) }
 0x10c   : > { %v6269_v17 = vadd.f32 %v842_v9, %v760_v61  ;;  %862 = vst.msk [vmem:[#allocation2 + $0x88] sm:$0xff] %vm426_vm0, %v6267_v6  ;;  %894 = vst.msk [vmem:[#allocation3 + $0x88] sm:$0xff] %vm426_vm0, %v6267_v6  ;;  %v5122_v34 = vpack.c.bf16 (!%p4523_p4), %v6307_v50, %v6300_v25  ;;  %v5124_v37 = vpack.c.bf16 (!%p4523_p4), %v6317_v29, %v6312_v54  ;;  %v6403_v0 = vld [vmem:[%s11567_s7 + $0x88] sm:$0xff] (!%p4523_p4) }
 0x10d   : > { %911 = vst [vmem:[#allocation4 + $0x10] sm:$0xff] %v6264_v5  ;;  %915 = vst [vmem:[#allocation5 + $0x10] sm:$0xff] %v6264_v5  ;;  %5074 = vmatpush1.bf16.msra.mxu0 (!%p4523_p4), %v5073_v47  ;;  %v5091_v61 = vpack.c.bf16 (!%p4523_p4), %v6215_v40, %v6221_v44  ;;  %v6408_v40 = vld [vmem:[%s11567_s7 + $0x98] sm:$0xff] (!%p4523_p4)  ;;  %v5094_v44 = vpack.c.bf16 (!%p4523_p4), %v6243_v49, %v6248_v57  ;;  %v5097_v12 = vpack.c.bf16 (!%p4523_p4), %v6267_v6, %v6272_v18  ;;  %v6423_v49 = vld [vmem:[%s11567_s7 + $0x80] sm:$0xff] (!%p4523_p4) }
 0x10e   : > { %912 = vst [vmem:[#allocation4 + $0x18] sm:$0xff] %v6269_v17  ;;  %916 = vst [vmem:[#allocation5 + $0x18] sm:$0xff] %v6269_v17  ;;  %5075 = vmatprep.subr.bf16.mxu0 (!%p4523_p4), %v5858_v26  ;;  %5123 = vmatpush1.bf16.xpose.msra.mxu1 (!%p4523_p4), %v5122_v34  ;;  %v5136_v9 = vpack.c.bf16 (!%p4523_p4), %v6408_v40, %v6403_v0  ;;  %v6428_v57 = vld [vmem:[%s11567_s7 + $0x90] sm:$0xff] (!%p4523_p4)  ;;  %v6433_v47 = vld [vmem:[%s11567_s7 + $0xa8] sm:$0xff] (!%p4523_p4) }
 0x10f   : > { %861 = vst.msk [vmem:[#allocation2 + $0x80] sm:$0xff] %vm426_vm0, %v6272_v18  ;;  %893 = vst.msk [vmem:[#allocation3 + $0x80] sm:$0xff] %vm426_vm0, %v6272_v18  ;;  %5125 = vmatprep.subr.bf16.mxu1 (!%p4523_p4), %v5124_v37  ;;  %v6438_v6 = vld [vmem:[%s11567_s7 + $0xb8] sm:$0xff] (!%p4523_p4)  ;;  %v5100_v18 = vpack.c.bf16 (!%p4523_p4), %v6050_v51, %v6056_v55  ;;  %v5138_v21 = vpack.c.bf16 (!%p4523_p4), %v6428_v57, %v6423_v49  ;;  %v6453_v51 = vld [vmem:[%s11567_s7 + $0xa0] sm:$0xff] (!%p4523_p4) }
 0x110   : > { %v6458_v55 = vld [vmem:[%s11567_s7 + $0xb0] sm:$0xff]  ;;  %v6463_v34 = vld [vmem:[%s11567_s7 + $0xc8] sm:$0xff] }
 0x111   : > { %5077 = vmatpush1.bf16.msra.mxu0 %v5076_v30  ;;  %v5140_v30 = vpack.c.bf16 %v6438_v6, %v6433_v47  ;;  %v5142_v37 = vpack.c.bf16 %v6458_v55, %v6453_v51 }
 0x112   : > { %5078 = vmatprep.subr.bf16.mxu0 %v5858_v26 }
 0x115   : > { %5080 = vmatpush1.bf16.msra.mxu0 %v5079_v38  ;;  %v5144_v38 = vpack.c.bf16 %v6468_v59, %v6463_v34 }
 0x116   : > { %5081 = vmatprep.subr.bf16.mxu0 %v5858_v26  ;;  %5127 = vmatpush1.bf16.xpose.msra.mxu1 %v5126_v42  ;;  %v6493_v42 = vld [vmem:[%s11567_s7 + $0xe8] sm:$0xff] }
 0x117   : > { %5129 = vmatprep.subr.bf16.mxu1 %v5128_v43  ;;  %v5146_v43 = vpack.c.bf16 %v6488_v8, %v6483_v4 }
 0x119   : > { %5083 = vmatpush1.bf16.msra.mxu0 %v5082_v7  ;;  %v5109_v7 = vpack.c.bf16 %v6134_v16, %v6140_v20  ;;  %v6498_v16 = vld [vmem:[%s11567_s7 + $0xf8] sm:$0xff]  ;;  %v5112_v20 = vpack.c.bf16 %v6162_v24, %v6168_v28  ;;  %v6513_v24 = vld [vmem:[%s11567_s7 + $0xe0] sm:$0xff]  ;;  %v6518_v28 = vld [vmem:[%s11567_s7 + $0xf0] sm:$0xff] }
 0x11a   : > { %5084 = vmatprep.subr.bf16.mxu0 %v5858_v26 }
 0x11d   : > { %5086 = vmatpush1.bf16.msra.mxu0 %v5085_v46  ;;  %v5148_v46 = vpack.c.bf16 %v6498_v16, %v6493_v42 }
 0x11e   : > { %5087 = vmatprep.subr.bf16.mxu0 %v5858_v26  ;;  %5131 = vmatpush1.bf16.xpose.msra.mxu1 %v5130_v53  ;;  %v6523_v53 = vld [vmem:[%s11567_s7 + $0x108] sm:$0xff] }
 0x11f   : > { %5133 = vmatprep.subr.bf16.mxu1 %v5132_v56  ;;  %v5150_v56 = vpack.c.bf16 %v6518_v28, %v6513_v24 }
 0x121   : > { %5089 = vmatpush1.bf16.msra.mxu0 %v5088_v27  ;;  %v5115_v27 = vpack.c.bf16 %v6190_v32, %v6196_v36  ;;  %v6528_v32 = vld [vmem:[%s11567_s7 + $0x118] sm:$0xff]  ;;  %v5118_v36 = vpack.c.bf16 %v6218_v41, %v6224_v45  ;;  %v6545_v41 = vld [vmem:[%s11567_s7 + $0x110] sm:$0xff]  ;;  %v6550_v45 = vld [vmem:[%s11567_s7 + $0x128] sm:$0xff] }
 0x122   : > { %5090 = vmatprep.subr.bf16.mxu0 %v5858_v26 }
 0x125   : > { %5092 = vmatpush1.bf16.msra.mxu0 %v5091_v61  ;;  %v5152_v61 = vpack.c.bf16 %v6528_v32, %v6523_v53 }
 0x126   : > { %5093 = vmatprep.subr.bf16.mxu0 %v5858_v26  ;;  %5135 = vmatpush1.bf16.xpose.msra.mxu1 %v5134_v1 }
 0x127   : > { %5137 = vmatprep.subr.bf16.mxu1 %v5136_v9 }
 0x129   : > { %5095 = vmatpush1.bf16.msra.mxu0 %v5094_v44  ;;  %v6540_v44 = vld [vmem:[%s11567_s7 + $0x100] sm:$0xff] }
 0x12a   : > { %5096 = vmatprep.subr.bf16.mxu0 %v5858_v26  ;;  %v5154_v1 = vpack.c.bf16 %v6545_v41, %v6540_v44 }
 0x12d   : > { %5098 = vmatpush1.bf16.msra.mxu0 %v5097_v12  ;;  %v6568_v12 = vld [vmem:[%s11567_s7 + $0x120] sm:$0xff] }
 0x12e   : > { %5099 = vmatprep.subr.bf16.mxu0 %v5858_v26  ;;  %5139 = vmatpush1.bf16.xpose.msra.mxu1 %v5138_v21  ;;  %v6596_v21 = vld [vmem:[%s11567_s7 + $0x140] sm:$0xff] }
 0x12f   : > { %5141 = vmatprep.subr.bf16.mxu1 %v5140_v30 }
 0x131   : > { %5101 = vmatpush1.bf16.msra.mxu0 %v5100_v18 }
 0x132   : > { %5102 = vmatprep.subr.bf16.mxu0 %v5858_v26 }
 0x135   : > { %5104 = vmatpush1.bf16.msra.mxu0 %v5103_v33  ;;  %v6624_v33 = vld [vmem:[%s11567_s7 + $0x160] sm:$0xff] }
 0x136   : > { %5105 = vmatprep.subr.bf16.mxu0 %v5858_v26  ;;  %5143 = vmatpush1.bf16.xpose.msra.mxu1 %v5142_v37  ;;  %v6652_v37 = vld [vmem:[%s11567_s7 + $0x180] sm:$0xff] }
 0x137   : > { %5145 = vmatprep.subr.bf16.mxu1 %v5144_v38 }
 0x139   : > { %5107 = vmatpush1.bf16.msra.mxu0 %v5106_v63 }
 0x13a   : > { %5108 = vmatprep.subr.bf16.mxu0 %v5858_v26 }
 0x13d   : > { %5110 = vmatpush1.bf16.msra.mxu0 %v5109_v7  ;;  %v6680_v7 = vld [vmem:[%s11567_s7 + $0x1a0] sm:$0xff] }
 0x13e   : > { %5111 = vmatprep.subr.bf16.mxu0 %v5858_v26  ;;  %5147 = vmatpush1.bf16.xpose.msra.mxu1 %v5146_v43  ;;  %v6708_v43 = vld [vmem:[%s11567_s7 + $0x1c0] sm:$0xff] }
 0x13f   : > { %5149 = vmatprep.subr.bf16.mxu1 %v5148_v46 }
 0x141   : > { %5113 = vmatpush1.bf16.msra.mxu0 %v5112_v20 }
 0x142   : > { %5114 = vmatprep.subr.bf16.mxu0 %v5858_v26 }
 0x145   : > { %5116 = vmatpush1.bf16.msra.mxu0 %v5115_v27  ;;  %v6736_v27 = vld [vmem:[%s11567_s7 + $0x1e0] sm:$0xff] }
 0x146   : > { %5117 = vmatprep.subr.bf16.mxu0 %v5858_v26  ;;  %5151 = vmatpush1.bf16.xpose.msra.mxu1 %v5150_v56  ;;  %v6555_v26 = vld [vmem:[%s11567_s7 + $0x138] sm:$0xff]  ;;  %v6764_v56 = vld [vmem:[%s11567_s7 + $0x200] sm:$0xff] }
 0x147   : > { %5153 = vmatprep.subr.bf16.mxu1 %v5152_v61  ;;  %v5156_v9 = vpack.c.bf16 %v6555_v26, %v6550_v45 }
 0x149   : > { %5119 = vmatpush1.bf16.msra.mxu0 %v5118_v36 }
 0x14c   : > { %1114 = vmatmul.mubr.f32.vlgmr.msra.gmra.mrb[0].mxu0 %v6300_v25  ;;  %v6578_v25 = vld [vmem:[%s11567_s7 + $0x148] sm:$0xff] }
 0x14d   : > { %1118 = vmatprep.mubr.f32.mxu0 %v6295_v22  ;;  %v6573_v22 = vld [vmem:[%s11567_s7 + $0x130] sm:$0xff] }
 0x14e   : > { %5155 = vmatpush1.bf16.xpose.msra.mxu1 %v5154_v1 }
 0x14f   : > { %5157 = vmatprep.subr.bf16.mxu1 %v5156_v9 }
 0x150   : > { %1119 = vmatmul.mubr.f32.gmra.mrb[2].mxu0 %v6307_v50  ;;  %v6583_v50 = vld [vmem:[%s11567_s7 + $0x158] sm:$0xff] }
 0x151   : > { %1123 = vmatprep.mubr.f32.mxu0 %v6312_v54  ;;  %v5158_v54 = vpack.c.bf16 %v6573_v22, %v6568_v12  ;;  %v5160_v18 = vpack.c.bf16 %v6583_v50, %v6578_v25 }
 0x154   : > { %1124 = vmatmul.mubr.f32.gmra.mrb[4].mxu0 %v6333_v58  ;;  %v6606_v58 = vld [vmem:[%s11567_s7 + $0x168] sm:$0xff] }
 0x155   : > { %1128 = vmatprep.mubr.f32.mxu0 %v6317_v29  ;;  %v6601_v29 = vld [vmem:[%s11567_s7 + $0x150] sm:$0xff] }
 0x156   : > { %5159 = vmatpush1.bf16.xpose.msra.mxu1 %v5158_v54 }
 0x157   : > { %5161 = vmatprep.subr.bf16.mxu1 %v5160_v18  ;;  %v6852_v18 = vld [vmem:[%s11567_s7 + $0x260] sm:$0xff] }
 0x158   : > { %1129 = vmatmul.mubr.f32.gmra.mrb[6].mxu0 %v6338_v62  ;;  %v6611_v62 = vld [vmem:[%s11567_s7 + $0x178] sm:$0xff] }
 0x159   : > { %1133 = vmatprep.mubr.f32.mxu0 %v6343_v39  ;;  %v5162_v39 = vpack.c.bf16 %v6601_v29, %v6596_v21  ;;  %v5164_v30 = vpack.c.bf16 %v6611_v62, %v6606_v58 }
 0x15c   : > { %1134 = vmatmul.mubr.f32.gmra.mrb[8].mxu0 %v6363_v15  ;;  %v6634_v15 = vld [vmem:[%s11567_s7 + $0x188] sm:$0xff] }
 0x15d   : > { %1138 = vmatprep.mubr.f32.mxu0 %v6348_v2  ;;  %v6629_v2 = vld [vmem:[%s11567_s7 + $0x170] sm:$0xff] }
 0x15e   : > { %5163 = vmatpush1.bf16.xpose.msra.mxu1 %v5162_v39 }
 0x15f   : > { %5165 = vmatprep.subr.bf16.mxu1 %v5164_v30  ;;  %v6880_v30 = vld [vmem:[%s11567_s7 + $0x280] sm:$0xff] }
 0x160   : > { %1139 = vmatmul.mubr.f32.gmra.mrb[10].mxu0 %v6368_v19  ;;  %v6639_v19 = vld [vmem:[%s11567_s7 + $0x198] sm:$0xff] }
 0x161   : > { %1143 = vmatprep.mubr.f32.mxu0 %v6373_v48  ;;  %v5166_v48 = vpack.c.bf16 %v6629_v2, %v6624_v33  ;;  %v5168_v63 = vpack.c.bf16 %v6639_v19, %v6634_v15 }
 0x164   : > { %1144 = vmatmul.mubr.f32.gmra.mrb[12].mxu0 %v6393_v31  ;;  %v6662_v31 = vld [vmem:[%s11567_s7 + $0x1a8] sm:$0xff] }
 0x165   : > { %1148 = vmatprep.mubr.f32.mxu0 %v6378_v23  ;;  %v6657_v23 = vld [vmem:[%s11567_s7 + $0x190] sm:$0xff] }
 0x166   : > { %5167 = vmatpush1.bf16.xpose.msra.mxu1 %v5166_v48 }
 0x167   : > { %5169 = vmatprep.subr.bf16.mxu1 %v5168_v63  ;;  %v6908_v63 = vld [vmem:[%s11567_s7 + $0x2a0] sm:$0xff] }
 0x168   : > { %1149 = vmatmul.mubr.f32.gmra.mrb[14].mxu0 %v6398_v35  ;;  %v6667_v35 = vld [vmem:[%s11567_s7 + $0x1b8] sm:$0xff] }
 0x169   : > { %1153 = vmatprep.mubr.f32.mxu0 %v6403_v0  ;;  %v5170_v0 = vpack.c.bf16 %v6657_v23, %v6652_v37  ;;  %v5172_v38 = vpack.c.bf16 %v6667_v35, %v6662_v31 }
 0x16c   : > { %1154 = vmatmul.mubr.f32.gmra.mrb[16].mxu0 %v6423_v49  ;;  %v6690_v49 = vld [vmem:[%s11567_s7 + $0x1c8] sm:$0xff] }
 0x16d   : > { %1158 = vmatprep.mubr.f32.mxu0 %v6408_v40  ;;  %v6685_v40 = vld [vmem:[%s11567_s7 + $0x1b0] sm:$0xff] }
 0x16e   : > { %5171 = vmatpush1.bf16.xpose.msra.mxu1 %v5170_v0 }
 0x16f   : > { %5173 = vmatprep.subr.bf16.mxu1 %v5172_v38  ;;  %v6936_v38 = vld [vmem:[%s11567_s7 + $0x2c0] sm:$0xff] }
 0x170   : > { %1159 = vmatmul.mubr.f32.gmra.mrb[18].mxu0 %v6428_v57  ;;  %v6695_v57 = vld [vmem:[%s11567_s7 + $0x1d8] sm:$0xff] }
 0x171   : > { %1163 = vmatprep.mubr.f32.mxu0 %v6433_v47  ;;  %v5174_v47 = vpack.c.bf16 %v6685_v40, %v6680_v7  ;;  %v5176_v20 = vpack.c.bf16 %v6695_v57, %v6690_v49 }
 0x174   : > { %1164 = vmatmul.mubr.f32.gmra.mrb[20].mxu0 %v6453_v51  ;;  %v6718_v51 = vld [vmem:[%s11567_s7 + $0x1e8] sm:$0xff] }
 0x175   : > { %1168 = vmatprep.mubr.f32.mxu0 %v6438_v6  ;;  %v6713_v6 = vld [vmem:[%s11567_s7 + $0x1d0] sm:$0xff] }
 0x176   : > { %5175 = vmatpush1.bf16.xpose.msra.mxu1 %v5174_v47 }
 0x177   : > { %5177 = vmatprep.subr.bf16.mxu1 %v5176_v20  ;;  %v6964_v20 = vld [vmem:[%s11567_s7 + $0x2e0] sm:$0xff] }
 0x178   : > { %1169 = vmatmul.mubr.f32.gmra.mrb[22].mxu0 %v6458_v55  ;;  %v6723_v55 = vld [vmem:[%s11567_s7 + $0x1f8] sm:$0xff] }
 0x179   : > { %1173 = vmatprep.mubr.f32.mxu0 %v6463_v34  ;;  %v5178_v34 = vpack.c.bf16 %v6713_v6, %v6708_v43  ;;  %v5180_v46 = vpack.c.bf16 %v6723_v55, %v6718_v51 }
 0x17c   : > { %1174 = vmatmul.mubr.f32.gmra.mrb[24].mxu0 %v6483_v4  ;;  %v6746_v4 = vld [vmem:[%s11567_s7 + $0x208] sm:$0xff] }
 0x17d   : > { %1178 = vmatprep.mubr.f32.mxu0 %v6468_v59  ;;  %v6741_v59 = vld [vmem:[%s11567_s7 + $0x1f0] sm:$0xff] }
 0x17e   : > { %5179 = vmatpush1.bf16.xpose.msra.mxu1 %v5178_v34 }
 0x17f   : > { %5181 = vmatprep.subr.bf16.mxu1 %v5180_v46  ;;  %v6992_v46 = vld [vmem:[%s11567_s7 + $0x300] sm:$0xff] }
 0x180   : > { %1179 = vmatmul.mubr.f32.gmra.mrb[26].mxu0 %v6488_v8  ;;  %v6751_v8 = vld [vmem:[%s11567_s7 + $0x218] sm:$0xff] }
 0x181   : > { %1183 = vmatprep.mubr.f32.mxu0 %v6493_v42  ;;  %v5182_v42 = vpack.c.bf16 %v6741_v59, %v6736_v27  ;;  %v5184_v36 = vpack.c.bf16 %v6751_v8, %v6746_v4 }
 0x184   : > { %1184 = vmatmul.mubr.f32.gmra.mrb[28].mxu0 %v6513_v24  ;;  %v6774_v24 = vld [vmem:[%s11567_s7 + $0x228] sm:$0xff] }
 0x185   : > { %1188 = vmatprep.mubr.f32.mxu0 %v6498_v16  ;;  %v6769_v16 = vld [vmem:[%s11567_s7 + $0x210] sm:$0xff] }
 0x186   : > { %5183 = vmatpush1.bf16.xpose.msra.mxu1 %v5182_v42 }
 0x187   : > { %5185 = vmatprep.subr.bf16.mxu1 %v5184_v36  ;;  %v7020_v36 = vld [vmem:[%s11567_s7 + $0x320] sm:$0xff] }
 0x188   : > { %1189 = vmatmul.mubr.f32.gmra.mrb[30].mxu0 %v6518_v28  ;;  %v6779_v28 = vld [vmem:[%s11567_s7 + $0x238] sm:$0xff] }
 0x189   : > { %1193 = vmatprep.mubr.f32.mxu0 %v6523_v53  ;;  %v5186_v53 = vpack.c.bf16 %v6769_v16, %v6764_v56  ;;  %v5188_v61 = vpack.c.bf16 %v6779_v28, %v6774_v24 }
 0x18c   : > { %1194 = vmatmul.mubr.f32.gmra.mrb[32].mxu0 %v6540_v44  ;;  %v6793_v44 = vld [vmem:[%s11567_s7 + $0x220] sm:$0xff] }
 0x18d   : > { %1198 = vmatprep.mubr.f32.mxu0 %v6528_v32  ;;  %1499 = vmatmul.mubr.f32.vlgmr.msra.gmra.mrb[0].mxu1 %v6245_v52  ;;  %v6798_v32 = vld [vmem:[%s11567_s7 + $0x230] sm:$0xff] }
 0x18e   : > { %5187 = vmatpush1.bf16.xpose.msra.mxu1 %v5186_v53  ;;  %1504 = vmatprep.mubr.f32.mxu1 %v6269_v17  ;;  %v5190_v1 = vpack.c.bf16 %v6798_v32, %v6793_v44 }
 0x18f   : > { %5189 = vmatprep.subr.bf16.mxu1 %v5188_v61  ;;  %v7048_v61 = vld [vmem:[%s11567_s7 + $0x340] sm:$0xff] }
 0x190   : > { %1199 = vmatmul.mubr.f32.gmra.mrb[34].mxu0 %v6545_v41  ;;  %v6804_v41 = vld [vmem:[%s11567_s7 + $0x248] sm:$0xff] }
 0x191   : > { %1203 = vmatprep.mubr.f32.mxu0 %v6550_v45  ;;  %v6809_v45 = vld [vmem:[%s11567_s7 + $0x258] sm:$0xff]  ;;  %1505 = vmatmul.mubr.f32.gmra.mrb[2].mxu1 %v6264_v5 }
 0x192   : > { %1575 = vmatprep.mubr.f32.mxu1 %v6250_v60  ;;  %v5192_v9 = vpack.c.bf16 %v6809_v45, %v6804_v41  ;;  %v6834_v60 = vld [vmem:[%s11567_s7 + $0x268] sm:$0xff] }
 0x194   : > { %1204 = vmatmul.mubr.f32.gmra.mrb[36].mxu0 %v6568_v12  ;;  %v6824_v12 = vld [vmem:[%s11567_s7 + $0x240] sm:$0xff] }
 0x195   : > { %1208 = vmatprep.mubr.f32.mxu0 %v6555_v26  ;;  %v6829_v26 = vld [vmem:[%s11567_s7 + $0x250] sm:$0xff] }
 0x196   : > { %5191 = vmatpush1.bf16.xpose.msra.mxu1 %v5190_v1 }
 0x197   : > { %5193 = vmatprep.subr.bf16.mxu1 %v5192_v9  ;;  %v7076_v9 = vld [vmem:[%s11567_s7 + $0x360] sm:$0xff] }
 0x198   : > { %1209 = vmatmul.mubr.f32.gmra.mrb[38].mxu0 %v6573_v22  ;;  %v6839_v22 = vld [vmem:[%s11567_s7 + $0x278] sm:$0xff] }
 0x199   : > { %1213 = vmatprep.mubr.f32.mxu0 %v6578_v25  ;;  %v5194_v25 = vpack.c.bf16 %v6829_v26, %v6824_v12  ;;  %v5196_v54 = vpack.c.bf16 %v6839_v22, %v6834_v60 }
 0x19c   : > { %1214 = vmatmul.mubr.f32.gmra.mrb[40].mxu0 %v6596_v21  ;;  %v6862_v21 = vld [vmem:[%s11567_s7 + $0x288] sm:$0xff] }
 0x19d   : > { %1218 = vmatprep.mubr.f32.mxu0 %v6583_v50  ;;  %v6857_v50 = vld [vmem:[%s11567_s7 + $0x270] sm:$0xff] }
 0x19e   : > { %5195 = vmatpush1.bf16.xpose.msra.mxu1 %v5194_v25 }
 0x19f   : > { %5197 = vmatprep.subr.bf16.mxu1 %v5196_v54  ;;  %v7104_v54 = vld [vmem:[%s11567_s7 + $0x380] sm:$0xff] }
 0x1a0   : > { %1219 = vmatmul.mubr.f32.gmra.mrb[42].mxu0 %v6601_v29  ;;  %v6867_v29 = vld [vmem:[%s11567_s7 + $0x298] sm:$0xff] }
 0x1a1   : > { %1223 = vmatprep.mubr.f32.mxu0 %v6606_v58  ;;  %v5198_v58 = vpack.c.bf16 %v6857_v50, %v6852_v18  ;;  %v5200_v39 = vpack.c.bf16 %v6867_v29, %v6862_v21 }
 0x1a4   : > { %1224 = vmatmul.mubr.f32.gmra.mrb[44].mxu0 %v6624_v33  ;;  %v6890_v33 = vld [vmem:[%s11567_s7 + $0x2a8] sm:$0xff] }
 0x1a5   : > { %1228 = vmatprep.mubr.f32.mxu0 %v6611_v62  ;;  %v6885_v62 = vld [vmem:[%s11567_s7 + $0x290] sm:$0xff] }
 0x1a6   : > { %5199 = vmatpush1.bf16.xpose.msra.mxu1 %v5198_v58 }
 0x1a7   : > { %5201 = vmatprep.subr.bf16.mxu1 %v5200_v39  ;;  %v7132_v39 = vld [vmem:[%s11567_s7 + $0x3a0] sm:$0xff] }
 0x1a8   : > { %1229 = vmatmul.mubr.f32.gmra.mrb[46].mxu0 %v6629_v2  ;;  %v6895_v2 = vld [vmem:[%s11567_s7 + $0x2b8] sm:$0xff] }
 0x1a9   : > { %1233 = vmatprep.mubr.f32.mxu0 %v6634_v15  ;;  %v5202_v15 = vpack.c.bf16 %v6885_v62, %v6880_v30  ;;  %v5204_v48 = vpack.c.bf16 %v6895_v2, %v6890_v33 }
 0x1ac   : > { %1234 = vmatmul.mubr.f32.gmra.mrb[48].mxu0 %v6652_v37  ;;  %v6918_v37 = vld [vmem:[%s11567_s7 + $0x2c8] sm:$0xff] }
 0x1ad   : > { %1238 = vmatprep.mubr.f32.mxu0 %v6639_v19  ;;  %v6913_v19 = vld [vmem:[%s11567_s7 + $0x2b0] sm:$0xff] }
 0x1ae   : > { %5203 = vmatpush1.bf16.xpose.msra.mxu1 %v5202_v15 }
 0x1af   : > { %5205 = vmatprep.subr.bf16.mxu1 %v5204_v48  ;;  %v7160_v48 = vld [vmem:[%s11567_s7 + $0x3c0] sm:$0xff] }
 0x1b0   : > { %1239 = vmatmul.mubr.f32.gmra.mrb[50].mxu0 %v6657_v23  ;;  %v6923_v23 = vld [vmem:[%s11567_s7 + $0x2d8] sm:$0xff] }
 0x1b1   : > { %1243 = vmatprep.mubr.f32.mxu0 %v6662_v31  ;;  %v5206_v31 = vpack.c.bf16 %v6913_v19, %v6908_v63  ;;  %v5208_v0 = vpack.c.bf16 %v6923_v23, %v6918_v37 }
 0x1b4   : > { %1244 = vmatmul.mubr.f32.gmra.mrb[52].mxu0 %v6680_v7  ;;  %v6946_v7 = vld [vmem:[%s11567_s7 + $0x2e8] sm:$0xff] }
 0x1b5   : > { %1248 = vmatprep.mubr.f32.mxu0 %v6667_v35  ;;  %v6941_v35 = vld [vmem:[%s11567_s7 + $0x2d0] sm:$0xff] }
 0x1b6   : > { %5207 = vmatpush1.bf16.xpose.msra.mxu1 %v5206_v31 }
 0x1b7   : > { %5209 = vmatprep.subr.bf16.mxu1 %v5208_v0  ;;  %v7188_v0 = vld [vmem:[%s11567_s7 + $0x3e0] sm:$0xff] }
 0x1b8   : > { %1249 = vmatmul.mubr.f32.gmra.mrb[54].mxu0 %v6685_v40  ;;  %v6951_v40 = vld [vmem:[%s11567_s7 + $0x2f8] sm:$0xff] }
 0x1b9   : > { %1253 = vmatprep.mubr.f32.mxu0 %v6690_v49  ;;  %v5210_v49 = vpack.c.bf16 %v6941_v35, %v6936_v38  ;;  %v5212_v47 = vpack.c.bf16 %v6951_v40, %v6946_v7 }
 0x1bc   : > { %1254 = vmatmul.mubr.f32.gmra.mrb[56].mxu0 %v6708_v43  ;;  %v6974_v43 = vld [vmem:[%s11567_s7 + $0x308] sm:$0xff] }
 0x1bd   : > { %1258 = vmatprep.mubr.f32.mxu0 %v6695_v57  ;;  %v6969_v57 = vld [vmem:[%s11567_s7 + $0x2f0] sm:$0xff] }
 0x1be   : > { %5211 = vmatpush1.bf16.xpose.msra.mxu1 %v5210_v49 }
 0x1bf   : > { %5213 = vmatprep.subr.bf16.mxu1 %v5212_v47 }
 0x1c0   : > { %1259 = vmatmul.mubr.f32.gmra.mrb[58].mxu0 %v6713_v6  ;;  %v6979_v6 = vld [vmem:[%s11567_s7 + $0x318] sm:$0xff] }
 0x1c1   : > { %1263 = vmatprep.mubr.f32.mxu0 %v6718_v51  ;;  %v5214_v51 = vpack.c.bf16 %v6969_v57, %v6964_v20  ;;  %v5216_v34 = vpack.c.bf16 %v6979_v6, %v6974_v43 }
 0x1c4   : > { %1264 = vmatmul.mubr.f32.gmra.mrb[60].mxu0 %v6736_v27  ;;  %v7002_v27 = vld [vmem:[%s11567_s7 + $0x328] sm:$0xff] }
 0x1c5   : > { %1268 = vmatprep.mubr.f32.mxu0 %v6723_v55  ;;  %v6997_v55 = vld [vmem:[%s11567_s7 + $0x310] sm:$0xff] }
 0x1c6   : > { %5215 = vmatpush1.bf16.xpose.msra.mxu1 %v5214_v51 }
 0x1c7   : > { %5217 = vmatprep.subr.bf16.mxu1 %v5216_v34 }
 0x1c8   : > { %1269 = vmatmul.mubr.f32.gmra.mrb[62].mxu0 %v6741_v59  ;;  %v7007_v59 = vld [vmem:[%s11567_s7 + $0x338] sm:$0xff] }
 0x1c9   : > { %1273 = vmatprep.mubr.f32.mxu0 %v6746_v4  ;;  %v5218_v4 = vpack.c.bf16 %v6997_v55, %v6992_v46  ;;  %v5220_v42 = vpack.c.bf16 %v7007_v59, %v7002_v27 }
 0x1cc   : > { %1274 = vmatmul.mubr.f32.gmra.mrb[64].mxu0 %v6764_v56  ;;  %v7030_v56 = vld [vmem:[%s11567_s7 + $0x348] sm:$0xff] }
 0x1cd   : > { %1278 = vmatprep.mubr.f32.mxu0 %v6751_v8  ;;  %v7025_v8 = vld [vmem:[%s11567_s7 + $0x330] sm:$0xff] }
 0x1ce   : > { %5219 = vmatpush1.bf16.xpose.msra.mxu1 %v5218_v4 }
 0x1cf   : > { %5221 = vmatprep.subr.bf16.mxu1 %v5220_v42 }
 0x1d0   : > { %1279 = vmatmul.mubr.f32.gmra.mrb[66].mxu0 %v6769_v16  ;;  %v7035_v16 = vld [vmem:[%s11567_s7 + $0x358] sm:$0xff] }
 0x1d1   : > { %1283 = vmatprep.mubr.f32.mxu0 %v6774_v24  ;;  %v5222_v24 = vpack.c.bf16 %v7025_v8, %v7020_v36  ;;  %v5224_v53 = vpack.c.bf16 %v7035_v16, %v7030_v56 }
 0x1d4   : > { %1284 = vmatmul.mubr.f32.gmra.mrb[68].mxu0 %v6793_v44  ;;  %v7058_v44 = vld [vmem:[%s11567_s7 + $0x368] sm:$0xff] }
 0x1d5   : > { %1288 = vmatprep.mubr.f32.mxu0 %v6779_v28  ;;  %v7053_v28 = vld [vmem:[%s11567_s7 + $0x350] sm:$0xff] }
 0x1d6   : > { %5223 = vmatpush1.bf16.xpose.msra.mxu1 %v5222_v24 }
 0x1d7   : > { %5225 = vmatprep.subr.bf16.mxu1 %v5224_v53 }
 0x1d8   : > { %1289 = vmatmul.mubr.f32.gmra.mrb[70].mxu0 %v6798_v32  ;;  %v7063_v32 = vld [vmem:[%s11567_s7 + $0x378] sm:$0xff] }
 0x1d9   : > { %1293 = vmatprep.mubr.f32.mxu0 %v6804_v41  ;;  %v5226_v41 = vpack.c.bf16 %v7053_v28, %v7048_v61  ;;  %v5228_v1 = vpack.c.bf16 %v7063_v32, %v7058_v44 }
 0x1dc   : > { %1294 = vmatmul.mubr.f32.gmra.mrb[72].mxu0 %v6824_v12  ;;  %v7086_v12 = vld [vmem:[%s11567_s7 + $0x388] sm:$0xff] }
 0x1dd   : > { %1298 = vmatprep.mubr.f32.mxu0 %v6809_v45  ;;  %v7081_v45 = vld [vmem:[%s11567_s7 + $0x370] sm:$0xff] }
 0x1de   : > { %5227 = vmatpush1.bf16.xpose.msra.mxu1 %v5226_v41 }
 0x1df   : > { %5229 = vmatprep.subr.bf16.mxu1 %v5228_v1 }
 0x1e0   : > { %1299 = vmatmul.mubr.f32.gmra.mrb[74].mxu0 %v6829_v26  ;;  %v7091_v26 = vld [vmem:[%s11567_s7 + $0x398] sm:$0xff] }
 0x1e1   : > { %1303 = vmatprep.mubr.f32.mxu0 %v6834_v60  ;;  %v5230_v60 = vpack.c.bf16 %v7081_v45, %v7076_v9  ;;  %v5232_v25 = vpack.c.bf16 %v7091_v26, %v7086_v12 }
 0x1e4   : > { %1304 = vmatmul.mubr.f32.gmra.mrb[76].mxu0 %v6852_v18  ;;  %v7114_v18 = vld [vmem:[%s11567_s7 + $0x3a8] sm:$0xff] }
 0x1e5   : > { %1308 = vmatprep.mubr.f32.mxu0 %v6839_v22  ;;  %v7109_v22 = vld [vmem:[%s11567_s7 + $0x390] sm:$0xff] }
 0x1e6   : > { %5231 = vmatpush1.bf16.xpose.msra.mxu1 %v5230_v60 }
 0x1e7   : > { %5233 = vmatprep.subr.bf16.mxu1 %v5232_v25 }
 0x1e8   : > { %1309 = vmatmul.mubr.f32.gmra.mrb[78].mxu0 %v6857_v50  ;;  %v7119_v50 = vld [vmem:[%s11567_s7 + $0x3b8] sm:$0xff] }
 0x1e9   : > { %1313 = vmatprep.mubr.f32.mxu0 %v6862_v21  ;;  %v5234_v21 = vpack.c.bf16 %v7109_v22, %v7104_v54  ;;  %v5236_v58 = vpack.c.bf16 %v7119_v50, %v7114_v18 }
 0x1ec   : > { %1314 = vmatmul.mubr.f32.gmra.mrb[80].mxu0 %v6880_v30  ;;  %v7142_v30 = vld [vmem:[%s11567_s7 + $0x3c8] sm:$0xff] }
 0x1ed   : > { %1318 = vmatprep.mubr.f32.mxu0 %v6867_v29  ;;  %v7137_v29 = vld [vmem:[%s11567_s7 + $0x3b0] sm:$0xff] }
 0x1ee   : > { %5235 = vmatpush1.bf16.xpose.msra.mxu1 %v5234_v21 }
 0x1ef   : > { %5237 = vmatprep.subr.bf16.mxu1 %v5236_v58 }
 0x1f0   : > { %1319 = vmatmul.mubr.f32.gmra.mrb[82].mxu0 %v6885_v62  ;;  %v7147_v62 = vld [vmem:[%s11567_s7 + $0x3d8] sm:$0xff] }
 0x1f1   : > { %1323 = vmatprep.mubr.f32.mxu0 %v6890_v33  ;;  %v5238_v33 = vpack.c.bf16 %v7137_v29, %v7132_v39  ;;  %v5240_v15 = vpack.c.bf16 %v7147_v62, %v7142_v30 }
 0x1f4   : > { %1324 = vmatmul.mubr.f32.gmra.mrb[84].mxu0 %v6908_v63  ;;  %v7170_v63 = vld [vmem:[%s11567_s7 + $0x3e8] sm:$0xff] }
 0x1f5   : > { %1328 = vmatprep.mubr.f32.mxu0 %v6895_v2  ;;  %v7165_v2 = vld [vmem:[%s11567_s7 + $0x3d0] sm:$0xff] }
 0x1f6   : > { %5239 = vmatpush1.bf16.xpose.msra.mxu1 %v5238_v33 }
 0x1f7   : > { %5241 = vmatprep.subr.bf16.mxu1 %v5240_v15 }
 0x1f8   : > { %1329 = vmatmul.mubr.f32.gmra.mrb[86].mxu0 %v6913_v19  ;;  %v7175_v19 = vld [vmem:[%s11567_s7 + $0x3f8] sm:$0xff] }
 0x1f9   : > { %1333 = vmatprep.mubr.f32.mxu0 %v6918_v37  ;;  %v5242_v37 = vpack.c.bf16 %v7165_v2, %v7160_v48  ;;  %v5244_v31 = vpack.c.bf16 %v7175_v19, %v7170_v63 }
 0x1fc   : > { %1334 = vmatmul.mubr.f32.gmra.mrb[88].mxu0 %v6936_v38 }
 0x1fd   : > { %1338 = vmatprep.mubr.f32.mxu0 %v6923_v23  ;;  %v7193_v23 = vld [vmem:[%s11567_s7 + $0x3f0] sm:$0xff] }
 0x1fe   : > { %5243 = vmatpush1.bf16.xpose.msra.mxu1 %v5242_v37  ;;  %v5246_v38 = vpack.c.bf16 %v7193_v23, %v7188_v0 }
 0x1ff   : > { %5245 = vmatprep.subr.bf16.mxu1 %v5244_v31 }
 0x200   : > { %1339 = vmatmul.mubr.f32.gmra.mrb[90].mxu0 %v6941_v35 }
 0x201   : > { %1343 = vmatprep.mubr.f32.mxu0 %v6946_v7 }
 0x204   : > { %1344 = vmatmul.mubr.f32.gmra.mrb[92].mxu0 %v6964_v20 }
 0x205   : > { %1348 = vmatprep.mubr.f32.mxu0 %v6951_v40 }
 0x206   : > { %5247 = vmatpush1.bf16.xpose.msra.mxu1 %v5246_v38 }
 0x208   : > { %1349 = vmatmul.mubr.f32.gmra.mrb[94].mxu0 %v6969_v57 }
 0x209   : > { %1353 = vmatprep.mubr.f32.mxu0 %v6974_v43 }
 0x20c   : > { %1354 = vmatmul.mubr.f32.gmra.mrb[96].mxu0 %v6992_v46 }
 0x20d   : > { %1358 = vmatprep.mubr.f32.mxu0 %v6979_v6  ;;  %1576 = vmatmul.mubr.f32.vlgmr.msra.gmra.mrb[4].mxu1 %v6245_v52 }
 0x20e   : > { %1581 = vmatprep.mubr.f32.mxu1 %v6269_v17 }
 0x210   : > { %1359 = vmatmul.mubr.f32.gmra.mrb[98].mxu0 %v6997_v55 }
 0x211   : > { %1363 = vmatprep.mubr.f32.mxu0 %v7002_v27  ;;  %1582 = vmatmul.mubr.f32.gmra.mrb[6].mxu1 %v6264_v5 }
 0x214   : > { %1364 = vmatmul.mubr.f32.gmra.mrb[100].mxu0 %v7020_v36 }
 0x215   : > { %1368 = vmatprep.mubr.f32.mxu0 %v7007_v59 }
 0x218   : > { %1369 = vmatmul.mubr.f32.gmra.mrb[102].mxu0 %v7025_v8 }
 0x219   : > { %1373 = vmatprep.mubr.f32.mxu0 %v7030_v56 }
 0x21c   : > { %1374 = vmatmul.mubr.f32.gmra.mrb[104].mxu0 %v7048_v61 }
 0x21d   : > { %1378 = vmatprep.mubr.f32.mxu0 %v7035_v16 }
 0x21f   : > { %v1115_v35 = vpop.f32.mrb[0].mxu0 }
 0x220   : > { %1588 = vst.msk [vmem:[#allocation2] sm:$0xff] %vm426_vm0, %v1115_v35  ;;  %v1117_v52 = vpop.f32.mrb[1].mxu0  ;;  %1379 = vmatmul.mubr.f32.gmra.mrb[106].mxu0 %v7053_v28 }
 0x221   : > { %1383 = vmatprep.mubr.f32.mxu0 %v7058_v44 }
 0x223   : > { %v1120_v17 = vpop.f32.mrb[2].mxu0 }
 0x224   : > { %1589 = vst.msk [vmem:[#allocation2 + $0x8] sm:$0xff] %vm426_vm0, %v1120_v17  ;;  %v1122_v5 = vpop.f32.mrb[3].mxu0  ;;  %1384 = vmatmul.mubr.f32.gmra.mrb[108].mxu0 %v7076_v9 }
 0x225   : > { %1388 = vmatprep.mubr.f32.mxu0 %v7063_v32 }
 0x227   : > { %v1125_v7 = vpop.f32.mrb[4].mxu0 }
 0x228   : > { %1590 = vst.msk [vmem:[#allocation2 + $0x10] sm:$0xff] %vm426_vm0, %v1125_v7  ;;  %v1127_v40 = vpop.f32.mrb[5].mxu0  ;;  %1389 = vmatmul.mubr.f32.gmra.mrb[110].mxu0 %v7081_v45 }
 0x229   : > { %1393 = vmatprep.mubr.f32.mxu0 %v7086_v12 }
 0x22b   : > { %v1130_v49 = vpop.f32.mrb[6].mxu0 }
 0x22c   : > { %1591 = vst.msk [vmem:[#allocation2 + $0x18] sm:$0xff] %vm426_vm0, %v1130_v49  ;;  %v1132_v47 = vpop.f32.mrb[7].mxu0  ;;  %1394 = vmatmul.mubr.f32.gmra.mrb[112].mxu0 %v7104_v54 }
 0x22d   : > { %1398 = vmatprep.mubr.f32.mxu0 %v7091_v26 }
 0x22f   : > { %v1135_v20 = vpop.f32.mrb[8].mxu0 }
 0x230   : > { %1592 = vst.msk [vmem:[#allocation2 + $0x20] sm:$0xff] %vm426_vm0, %v1135_v20  ;;  %v1137_v57 = vpop.f32.mrb[9].mxu0  ;;  %1399 = vmatmul.mubr.f32.gmra.mrb[114].mxu0 %v7109_v22 }
 0x231   : > { %1403 = vmatprep.mubr.f32.mxu0 %v7114_v18 }
 0x233   : > { %v1140_v43 = vpop.f32.mrb[10].mxu0 }
 0x234   : > { %1593 = vst.msk [vmem:[#allocation2 + $0x28] sm:$0xff] %vm426_vm0, %v1140_v43  ;;  %v1142_v6 = vpop.f32.mrb[11].mxu0  ;;  %1404 = vmatmul.mubr.f32.gmra.mrb[116].mxu0 %v7132_v39 }
 0x235   : > { %1408 = vmatprep.mubr.f32.mxu0 %v7119_v50 }
 0x237   : > { %v1145_v51 = vpop.f32.mrb[12].mxu0 }
 0x238   : > { %1594 = vst.msk [vmem:[#allocation2 + $0x30] sm:$0xff] %vm426_vm0, %v1145_v51  ;;  %v1147_v34 = vpop.f32.mrb[13].mxu0  ;;  %1409 = vmatmul.mubr.f32.gmra.mrb[118].mxu0 %v7137_v29 }
 0x239   : > { %1413 = vmatprep.mubr.f32.mxu0 %v7142_v30 }
 0x23b   : > { %v1150_v46 = vpop.f32.mrb[14].mxu0 }
 0x23c   : > { %1595 = vst.msk [vmem:[#allocation2 + $0x38] sm:$0xff] %vm426_vm0, %v1150_v46  ;;  %v1152_v55 = vpop.f32.mrb[15].mxu0  ;;  %1414 = vmatmul.mubr.f32.gmra.mrb[120].mxu0 %v7160_v48 }
 0x23d   : > { %1418 = vmatprep.mubr.f32.mxu0 %v7147_v62 }
 0x23f   : > { %v1155_v27 = vpop.f32.mrb[16].mxu0 }
 0x240   : > { %1596 = vst.msk [vmem:[#allocation2 + $0x40] sm:$0xff] %vm426_vm0, %v1155_v27  ;;  %v1157_v59 = vpop.f32.mrb[17].mxu0  ;;  %1419 = vmatmul.mubr.f32.gmra.mrb[122].mxu0 %v7165_v2 }
 0x241   : > { %1423 = vmatprep.mubr.f32.mxu0 %v7170_v63 }
 0x243   : > { %v1160_v4 = vpop.f32.mrb[18].mxu0 }
 0x244   : > { %1597 = vst.msk [vmem:[#allocation2 + $0x48] sm:$0xff] %vm426_vm0, %v1160_v4  ;;  %v1162_v42 = vpop.f32.mrb[19].mxu0  ;;  %1424 = vmatmul.mubr.f32.gmra.mrb[124].mxu0 %v7188_v0 }
 0x245   : > { %1428 = vmatprep.mubr.f32.mxu0 %v7175_v19 }
 0x247   : > { %v1165_v36 = vpop.f32.mrb[20].mxu0 }
 0x248   : > { %1598 = vst.msk [vmem:[#allocation2 + $0x50] sm:$0xff] %vm426_vm0, %v1165_v36  ;;  %v1167_v8 = vpop.f32.mrb[21].mxu0  ;;  %1429 = vmatmul.mubr.f32.gmra.mrb[126].mxu0 %v7193_v23 }
 0x24b   : > { %v1170_v56 = vpop.f32.mrb[22].mxu0 }
 0x24c   : > { %1599 = vst.msk [vmem:[#allocation2 + $0x58] sm:$0xff] %vm426_vm0, %v1170_v56  ;;  %v1172_v16 = vpop.f32.mrb[23].mxu0 }
 0x24f   : > { %v1175_v24 = vpop.f32.mrb[24].mxu0 }
 0x250   : > { %1600 = vst.msk [vmem:[#allocation2 + $0x60] sm:$0xff] %vm426_vm0, %v1175_v24  ;;  %v1177_v53 = vpop.f32.mrb[25].mxu0 }
 0x253   : > { %v1180_v61 = vpop.f32.mrb[26].mxu0 }
 0x254   : > { %1601 = vst.msk [vmem:[#allocation2 + $0x68] sm:$0xff] %vm426_vm0, %v1180_v61  ;;  %v1182_v28 = vpop.f32.mrb[27].mxu0 }
 0x257   : > { %v1185_v44 = vpop.f32.mrb[28].mxu0 }
 0x258   : > { %1602 = vst.msk [vmem:[#allocation2 + $0x70] sm:$0xff] %vm426_vm0, %v1185_v44  ;;  %v1187_v32 = vpop.f32.mrb[29].mxu0 }
 0x25b   : > { %v1190_v41 = vpop.f32.mrb[30].mxu0 }
 0x25c   : > { %1603 = vst.msk [vmem:[#allocation2 + $0x78] sm:$0xff] %vm426_vm0, %v1190_v41  ;;  %v1192_v1 = vpop.f32.mrb[31].mxu0 }
 0x25f   : > { %v1195_v9 = vpop.f32.mrb[32].mxu0 }
 0x260   : > { %1604 = vst.msk [vmem:[#allocation2 + $0x80] sm:$0xff] %vm426_vm0, %v1195_v9  ;;  %v1197_v45 = vpop.f32.mrb[33].mxu0  ;;  %v1500_v26 = vpop.f32.mrb[0].mxu1 }
 0x261   : > { %1652 = vst [vmem:[#allocation4] sm:$0xff] %v1500_v26  ;;  %v1502_v25 = vpop.f32.mrb[1].mxu1 }
 0x262   : > { %1653 = vst [vmem:[#allocation4 + $0x8] sm:$0xff] %v1502_v25 }
 0x263   : > { %v1200_v12 = vpop.f32.mrb[34].mxu0 }
 0x264   : > { %1605 = vst.msk [vmem:[#allocation2 + $0x88] sm:$0xff] %vm426_vm0, %v1200_v12  ;;  %v1202_v60 = vpop.f32.mrb[35].mxu0  ;;  %v1506_v52 = vpop.f32.mrb[2].mxu1 }
 0x265   : > { %1654 = vst [vmem:[#allocation4 + $0x10] sm:$0xff] %v1506_v52  ;;  %v1508_v17 = vpop.f32.mrb[3].mxu1 }
 0x266   : > { %1655 = vst [vmem:[#allocation4 + $0x18] sm:$0xff] %v1508_v17 }
 0x267   : > { %v1205_v54 = vpop.f32.mrb[36].mxu0 }
 0x268   : > { %1606 = vst.msk [vmem:[#allocation2 + $0x90] sm:$0xff] %vm426_vm0, %v1205_v54  ;;  %v1207_v22 = vpop.f32.mrb[37].mxu0 }
 0x26b   : > { %v1210_v18 = vpop.f32.mrb[38].mxu0 }
 0x26c   : > { %1607 = vst.msk [vmem:[#allocation2 + $0x98] sm:$0xff] %vm426_vm0, %v1210_v18  ;;  %v1212_v50 = vpop.f32.mrb[39].mxu0 }
 0x26f   : > { %v1215_v21 = vpop.f32.mrb[40].mxu0 }
 0x270   : > { %1608 = vst.msk [vmem:[#allocation2 + $0xa0] sm:$0xff] %vm426_vm0, %v1215_v21  ;;  %v1217_v58 = vpop.f32.mrb[41].mxu0 }
 0x273   : > { %v1220_v39 = vpop.f32.mrb[42].mxu0 }
 0x274   : > { %1609 = vst.msk [vmem:[#allocation2 + $0xa8] sm:$0xff] %vm426_vm0, %v1220_v39  ;;  %v1222_v29 = vpop.f32.mrb[43].mxu0 }
 0x277   : > { %v1225_v30 = vpop.f32.mrb[44].mxu0 }
 0x278   : > { %1610 = vst.msk [vmem:[#allocation2 + $0xb0] sm:$0xff] %vm426_vm0, %v1225_v30  ;;  %v1227_v62 = vpop.f32.mrb[45].mxu0 }
 0x27b   : > { %v1230_v33 = vpop.f32.mrb[46].mxu0 }
 0x27c   : > { %1611 = vst.msk [vmem:[#allocation2 + $0xb8] sm:$0xff] %vm426_vm0, %v1230_v33  ;;  %v1232_v15 = vpop.f32.mrb[47].mxu0 }
 0x27f   : > { %v1235_v48 = vpop.f32.mrb[48].mxu0 }
 0x280   : > { %1612 = vst.msk [vmem:[#allocation2 + $0xc0] sm:$0xff] %vm426_vm0, %v1235_v48  ;;  %v1237_v2 = vpop.f32.mrb[49].mxu0 }
 0x283   : > { %v1240_v63 = vpop.f32.mrb[50].mxu0 }
 0x284   : > { %1613 = vst.msk [vmem:[#allocation2 + $0xc8] sm:$0xff] %vm426_vm0, %v1240_v63  ;;  %v1242_v19 = vpop.f32.mrb[51].mxu0 }
 0x287   : > { %v1245_v37 = vpop.f32.mrb[52].mxu0 }
 0x288   : > { %1614 = vst.msk [vmem:[#allocation2 + $0xd0] sm:$0xff] %vm426_vm0, %v1245_v37  ;;  %v1247_v31 = vpop.f32.mrb[53].mxu0 }
 0x28b   : > { %v1250_v0 = vpop.f32.mrb[54].mxu0 }
 0x28c   : > { %1615 = vst.msk [vmem:[#allocation2 + $0xd8] sm:$0xff] %vm426_vm0, %v1250_v0  ;;  %v1252_v23 = vpop.f32.mrb[55].mxu0 }
 0x28f   : > { %v1255_v38 = vpop.f32.mrb[56].mxu0 }
 0x290   : > { %1616 = vst.msk [vmem:[#allocation2 + $0xe0] sm:$0xff] %vm426_vm0, %v1255_v38  ;;  %v1257_v35 = vpop.f32.mrb[57].mxu0 }
 0x293   : > { %v1260_v5 = vpop.f32.mrb[58].mxu0 }
 0x294   : > { %1617 = vst.msk [vmem:[#allocation2 + $0xe8] sm:$0xff] %vm426_vm0, %v1260_v5  ;;  %v1262_v7 = vpop.f32.mrb[59].mxu0 }
 0x297   : > { %v1265_v40 = vpop.f32.mrb[60].mxu0 }
 0x298   : > { %1618 = vst.msk [vmem:[#allocation2 + $0xf0] sm:$0xff] %vm426_vm0, %v1265_v40  ;;  %v1267_v49 = vpop.f32.mrb[61].mxu0 }
 0x29b   : > { %v1270_v47 = vpop.f32.mrb[62].mxu0 }
 0x29c   : > { %1619 = vst.msk [vmem:[#allocation2 + $0xf8] sm:$0xff] %vm426_vm0, %v1270_v47  ;;  %v1272_v20 = vpop.f32.mrb[63].mxu0 }
 0x29f   : > { %v1275_v57 = vpop.f32.mrb[64].mxu0 }
 0x2a0   : > { %1620 = vst.msk [vmem:[#allocation3] sm:$0xff] %vm426_vm0, %v1275_v57  ;;  %v1277_v43 = vpop.f32.mrb[65].mxu0 }
 0x2a3   : > { %v1280_v6 = vpop.f32.mrb[66].mxu0 }
 0x2a4   : > { %1621 = vst.msk [vmem:[#allocation3 + $0x8] sm:$0xff] %vm426_vm0, %v1280_v6  ;;  %v1282_v51 = vpop.f32.mrb[67].mxu0 }
 0x2a7   : > { %v1285_v34 = vpop.f32.mrb[68].mxu0 }
 0x2a8   : > { %1622 = vst.msk [vmem:[#allocation3 + $0x10] sm:$0xff] %vm426_vm0, %v1285_v34  ;;  %v1287_v46 = vpop.f32.mrb[69].mxu0 }
 0x2ab   : > { %v1290_v55 = vpop.f32.mrb[70].mxu0 }
 0x2ac   : > { %1623 = vst.msk [vmem:[#allocation3 + $0x18] sm:$0xff] %vm426_vm0, %v1290_v55  ;;  %v1292_v27 = vpop.f32.mrb[71].mxu0 }
 0x2af   : > { %v1295_v59 = vpop.f32.mrb[72].mxu0 }
 0x2b0   : > { %1624 = vst.msk [vmem:[#allocation3 + $0x20] sm:$0xff] %vm426_vm0, %v1295_v59  ;;  %v1297_v4 = vpop.f32.mrb[73].mxu0 }
 0x2b3   : > { %v1300_v42 = vpop.f32.mrb[74].mxu0 }
 0x2b4   : > { %1625 = vst.msk [vmem:[#allocation3 + $0x28] sm:$0xff] %vm426_vm0, %v1300_v42  ;;  %v1302_v36 = vpop.f32.mrb[75].mxu0 }
 0x2b7   : > { %v1305_v8 = vpop.f32.mrb[76].mxu0 }
 0x2b8   : > { %1626 = vst.msk [vmem:[#allocation3 + $0x30] sm:$0xff] %vm426_vm0, %v1305_v8  ;;  %v1307_v56 = vpop.f32.mrb[77].mxu0 }
 0x2bb   : > { %v1310_v16 = vpop.f32.mrb[78].mxu0 }
 0x2bc   : > { %1627 = vst.msk [vmem:[#allocation3 + $0x38] sm:$0xff] %vm426_vm0, %v1310_v16  ;;  %v1312_v24 = vpop.f32.mrb[79].mxu0 }
 0x2bf   : > { %v1315_v53 = vpop.f32.mrb[80].mxu0 }
 0x2c0   : > { %1628 = vst.msk [vmem:[#allocation3 + $0x40] sm:$0xff] %vm426_vm0, %v1315_v53  ;;  %v1317_v61 = vpop.f32.mrb[81].mxu0 }
 0x2c3   : > { %v1320_v28 = vpop.f32.mrb[82].mxu0 }
 0x2c4   : > { %1629 = vst.msk [vmem:[#allocation3 + $0x48] sm:$0xff] %vm426_vm0, %v1320_v28  ;;  %v1322_v44 = vpop.f32.mrb[83].mxu0 }
 0x2c7   : > { %v1325_v32 = vpop.f32.mrb[84].mxu0 }
 0x2c8   : > { %1630 = vst.msk [vmem:[#allocation3 + $0x50] sm:$0xff] %vm426_vm0, %v1325_v32  ;;  %v1327_v41 = vpop.f32.mrb[85].mxu0 }
 0x2cb   : > { %v1330_v1 = vpop.f32.mrb[86].mxu0 }
 0x2cc   : > { %1631 = vst.msk [vmem:[#allocation3 + $0x58] sm:$0xff] %vm426_vm0, %v1330_v1  ;;  %v1332_v9 = vpop.f32.mrb[87].mxu0 }
 0x2cf   : > { %v1335_v45 = vpop.f32.mrb[88].mxu0 }
 0x2d0   : > { %1632 = vst.msk [vmem:[#allocation3 + $0x60] sm:$0xff] %vm426_vm0, %v1335_v45  ;;  %v1337_v12 = vpop.f32.mrb[89].mxu0 }
 0x2d3   : > { %v1340_v26 = vpop.f32.mrb[90].mxu0 }
 0x2d4   : > { %1633 = vst.msk [vmem:[#allocation3 + $0x68] sm:$0xff] %vm426_vm0, %v1340_v26  ;;  %v1342_v60 = vpop.f32.mrb[91].mxu0 }
 0x2d7   : > { %v1345_v25 = vpop.f32.mrb[92].mxu0 }
 0x2d8   : > { %1634 = vst.msk [vmem:[#allocation3 + $0x70] sm:$0xff] %vm426_vm0, %v1345_v25  ;;  %v1347_v54 = vpop.f32.mrb[93].mxu0 }
 0x2db   : > { %v1350_v22 = vpop.f32.mrb[94].mxu0 }
 0x2dc   : > { %1635 = vst.msk [vmem:[#allocation3 + $0x78] sm:$0xff] %vm426_vm0, %v1350_v22  ;;  %v1352_v18 = vpop.f32.mrb[95].mxu0 }
 0x2df   : > { %v1355_v50 = vpop.f32.mrb[96].mxu0 }
 0x2e0   : > { %1636 = vst.msk [vmem:[#allocation3 + $0x80] sm:$0xff] %vm426_vm0, %v1355_v50  ;;  %v1357_v21 = vpop.f32.mrb[97].mxu0  ;;  %v1577_v39 = vpop.f32.mrb[4].mxu1 }
 0x2e1   : > { %1656 = vst [vmem:[#allocation5] sm:$0xff] %v1577_v39  ;;  %v1579_v30 = vpop.f32.mrb[5].mxu1 }
 0x2e2   : > { %1657 = vst [vmem:[#allocation5 + $0x8] sm:$0xff] %v1579_v30 }
 0x2e3   : > { %v1360_v58 = vpop.f32.mrb[98].mxu0 }
 0x2e4   : > { %1637 = vst.msk [vmem:[#allocation3 + $0x88] sm:$0xff] %vm426_vm0, %v1360_v58  ;;  %v1362_v29 = vpop.f32.mrb[99].mxu0  ;;  %v1583_v33 = vpop.f32.mrb[6].mxu1 }
 0x2e5   : > { %1658 = vst [vmem:[#allocation5 + $0x10] sm:$0xff] %v1583_v33  ;;  %v1585_v48 = vpop.f32.mrb[7].mxu1 }
 0x2e6   : > { %1659 = vst [vmem:[#allocation5 + $0x18] sm:$0xff] %v1585_v48 }
 0x2e7   : > { %v1365_v62 = vpop.f32.mrb[100].mxu0 }
 0x2e8   : > { %1638 = vst.msk [vmem:[#allocation3 + $0x90] sm:$0xff] %vm426_vm0, %v1365_v62  ;;  %v1367_v15 = vpop.f32.mrb[101].mxu0 }
 0x2eb   : > { %v1370_v2 = vpop.f32.mrb[102].mxu0 }
 0x2ec   : > { %1639 = vst.msk [vmem:[#allocation3 + $0x98] sm:$0xff] %vm426_vm0, %v1370_v2  ;;  %v1372_v63 = vpop.f32.mrb[103].mxu0 }
 0x2ef   : > { %v1375_v19 = vpop.f32.mrb[104].mxu0 }
 0x2f0   : > { %1640 = vst.msk [vmem:[#allocation3 + $0xa0] sm:$0xff] %vm426_vm0, %v1375_v19  ;;  %v1377_v37 = vpop.f32.mrb[105].mxu0 }
 0x2f3   : > { %v1380_v31 = vpop.f32.mrb[106].mxu0 }
 0x2f4   : > { %1641 = vst.msk [vmem:[#allocation3 + $0xa8] sm:$0xff] %vm426_vm0, %v1380_v31  ;;  %v1382_v0 = vpop.f32.mrb[107].mxu0 }
 0x2f7   : > { %v1385_v23 = vpop.f32.mrb[108].mxu0 }
 0x2f8   : > { %1642 = vst.msk [vmem:[#allocation3 + $0xb0] sm:$0xff] %vm426_vm0, %v1385_v23  ;;  %v1387_v38 = vpop.f32.mrb[109].mxu0 }
 0x2fb   : > { %v1390_v35 = vpop.f32.mrb[110].mxu0 }
 0x2fc   : > { %1643 = vst.msk [vmem:[#allocation3 + $0xb8] sm:$0xff] %vm426_vm0, %v1390_v35  ;;  %v1392_v52 = vpop.f32.mrb[111].mxu0 }
 0x2ff   : > { %v1395_v17 = vpop.f32.mrb[112].mxu0 }
 0x300   : > { %1644 = vst.msk [vmem:[#allocation3 + $0xc0] sm:$0xff] %vm426_vm0, %v1395_v17  ;;  %v1397_v5 = vpop.f32.mrb[113].mxu0 }
 0x303   : > { %v1400_v7 = vpop.f32.mrb[114].mxu0 }
 0x304   : > { %1645 = vst.msk [vmem:[#allocation3 + $0xc8] sm:$0xff] %vm426_vm0, %v1400_v7  ;;  %v1402_v40 = vpop.f32.mrb[115].mxu0 }
 0x307   : > { %v1405_v49 = vpop.f32.mrb[116].mxu0 }
 0x308   : > { %1646 = vst.msk [vmem:[#allocation3 + $0xd0] sm:$0xff] %vm426_vm0, %v1405_v49  ;;  %v1407_v47 = vpop.f32.mrb[117].mxu0 }
 0x30b   : > { %v1410_v20 = vpop.f32.mrb[118].mxu0 }
 0x30c   : > { %1647 = vst.msk [vmem:[#allocation3 + $0xd8] sm:$0xff] %vm426_vm0, %v1410_v20  ;;  %v1412_v57 = vpop.f32.mrb[119].mxu0 }
 0x30f   : > { %v1415_v43 = vpop.f32.mrb[120].mxu0 }
 0x310   : > { %1648 = vst.msk [vmem:[#allocation3 + $0xe0] sm:$0xff] %vm426_vm0, %v1415_v43  ;;  %v1417_v6 = vpop.f32.mrb[121].mxu0 }
 0x313   : > { %v1420_v51 = vpop.f32.mrb[122].mxu0 }
 0x314   : > { %1649 = vst.msk [vmem:[#allocation3 + $0xe8] sm:$0xff] %vm426_vm0, %v1420_v51  ;;  %v1422_v34 = vpop.f32.mrb[123].mxu0 }
 0x317   : > { %v1425_v46 = vpop.f32.mrb[124].mxu0 }
 0x318   : > { %1650 = vst.msk [vmem:[#allocation3 + $0xf0] sm:$0xff] %vm426_vm0, %v1425_v46  ;;  %v1427_v55 = vpop.f32.mrb[125].mxu0 }
 0x31b   : > { %v1430_v27 = vpop.f32.mrb[126].mxu0 }
 0x31c   : > { %1651 = vst.msk [vmem:[#allocation3 + $0xf8] sm:$0xff] %vm426_vm0, %v1430_v27  ;;  %v1432_v59 = vpop.f32.mrb[127].mxu0 }
 0x31d PF: > { %v1661_v4 = vld [vmem:[#allocation2 + $0x8] sm:$0xff]  ;;  %v1660_v42 = vld [vmem:[#allocation2] sm:$0xff]  ;;  %5557 = vset.pattern.permute.xlu1 %v5856_v3  ;;  %5556 = vset.pattern.permute.xlu0 %v5856_v3  ;;  %s5859_s11 = smov 120   ;;  %v1694_v56 = vld [vmem:[#allocation3 + $0x10] sm:$0xff]  ;;  %vm1820_vm1 = vcmask 64512   ;;  %s4313_s25 = sld [smem:[#allocation6]] }
 0x31e   : > { %1758 = vrot.lane.b32.xlu1 %v1661_v4, %s5859_s11  ;;  %1756 = vrot.lane.b32.xlu0 %v1660_v42, %s5859_s11  ;;  %v1693_v36 = vld [vmem:[#allocation3 + $0x8] sm:$0xff]  ;;  %v1692_v8 = vld [vmem:[#allocation3] sm:$0xff]  ;;  %v1662_v16 = vld [vmem:[#allocation2 + $0x10] sm:$0xff]  ;;  %v5251_v44 = vpack.c.bf16 %v1661_v4, %v1660_v42 }
 0x31f   : > { %v1695_v53 = vld [vmem:[#allocation3 + $0x18] sm:$0xff]  ;;  %vm7313_vm2 = vmpackc.low %vm1820_vm1, %vm1820_vm1  ;;  %v5299_v45 = vpack.c.bf16 %v1693_v36, %v1692_v8  ;;  %v7327_v26 = vld [vmem:[#allocation2 + $0x90] sm:$0xff] }
 0x320   : > { %v7309_v61 = vld [vmem:[#allocation2 + $0x88] sm:$0xff]  ;;  %v1663_v32 = vld [vmem:[#allocation2 + $0x18] sm:$0xff]  ;;  %v7335_v54 = vld [vmem:[#allocation3 + $0x90] sm:$0xff]  ;;  %v5305_v48 = vpack.c.bf16 %v1695_v53, %v1694_v56 }
 0x321   : > { %v7321_v9 = vld [vmem:[#allocation3 + $0x88] sm:$0xff]  ;;  %v7329_v60 = vld [vmem:[#allocation2 + $0x98] sm:$0xff]  ;;  %v1696_v18 = vld [vmem:[#allocation3 + $0x20] sm:$0xff]  ;;  %v5257_v62 = vpack.c.bf16 %v1663_v32, %v1662_v16 }
 0x322   : > { %2240 = vrot.lane.b32.xlu1 %v1693_v36, %s5859_s11  ;;  %2238 = vrot.lane.b32.xlu0 %v1692_v8, %s5859_s11  ;;  %v5254_v25 = vpack.c.bf16 %v7329_v60, %v7327_v26  ;;  %v7337_v22 = vld [vmem:[#allocation3 + $0x98] sm:$0xff]  ;;  %v1664_v50 = vld [vmem:[#allocation2 + $0x20] sm:$0xff]  ;;  %v7353_v39 = vld [vmem:[#allocation2 + $0xa8] sm:$0xff] }
 0x323   : > { %v7305_v24 = vld [vmem:[#allocation2 + $0x80] sm:$0xff]  ;;  %v5302_v21 = vpack.c.bf16 %v7337_v22, %v7335_v54  ;;  %v7359_v30 = vld [vmem:[#allocation3 + $0xa8] sm:$0xff]  ;;  %v1698_v19 = vld [vmem:[#allocation3 + $0x30] sm:$0xff] }
 0x324   : > { %v5248_v41 = vpack.c.bf16 %v7309_v61, %v7305_v24  ;;  %v7319_v1 = vld [vmem:[#allocation3 + $0x80] sm:$0xff]  ;;  %v1697_v33 = vld [vmem:[#allocation3 + $0x28] sm:$0xff]  ;;  %v1666_v37 = vld [vmem:[#allocation2 + $0x30] sm:$0xff] }
 0x325   : > { %v5296_v12 = vpack.c.bf16 %v7321_v9, %v7319_v1  ;;  %v7351_v58 = vld [vmem:[#allocation2 + $0xa0] sm:$0xff]  ;;  %v1665_v15 = vld [vmem:[#allocation2 + $0x28] sm:$0xff]  ;;  %v7375_v31 = vld [vmem:[#allocation2 + $0xb0] sm:$0xff]  ;;  %v5311_v5 = vpack.c.bf16 %v1697_v33, %v1696_v18 }
 0x326   : > { %2242 = vrot.lane.b32.xlu1 %v1694_v56, %s5859_s11  ;;  %1760 = vrot.lane.b32.xlu0 %v1662_v16, %s5859_s11  ;;  %v7357_v29 = vld [vmem:[#allocation3 + $0xa0] sm:$0xff]  ;;  %v5260_v2 = vpack.c.bf16 %v7353_v39, %v7351_v58  ;;  %v7377_v0 = vld [vmem:[#allocation2 + $0xb8] sm:$0xff]  ;;  %v7381_v23 = vld [vmem:[#allocation3 + $0xb0] sm:$0xff]  ;;  %v5263_v35 = vpack.c.bf16 %v1665_v15, %v1664_v50 }
 0x327   : > { %5250 = vmatprep.subr.msk.bf16.mxu0 %vm7313_vm2, %v5248_v41  ;;  %5298 = vmatprep.subr.msk.bf16.mxu1 %vm7313_vm2, %v5296_v12  ;;  %v5308_v63 = vpack.c.bf16 %v7359_v30, %v7357_v29  ;;  %v7383_v38 = vld [vmem:[#allocation3 + $0xb8] sm:$0xff]  ;;  %v5266_v7 = vpack.c.bf16 %v7377_v0, %v7375_v31  ;;  %v1700_v49 = vld [vmem:[#allocation3 + $0x40] sm:$0xff]  ;;  %v7401_v57 = vld [vmem:[#allocation2 + $0xc8] sm:$0xff] }
 0x328   : > { %5253 = vmatpush3.bf16.xpose.msk.msra.mxu0 %vm7313_vm2, %v5251_v44  ;;  %5301 = vmatpush3.bf16.xpose.msk.msra.mxu1 %vm7313_vm2, %v5299_v45  ;;  %v1699_v52 = vld [vmem:[#allocation3 + $0x38] sm:$0xff]  ;;  %v5314_v40 = vpack.c.bf16 %v7383_v38, %v7381_v23  ;;  %v1668_v47 = vld [vmem:[#allocation2 + $0x40] sm:$0xff]  ;;  %v7407_v6 = vld [vmem:[#allocation3 + $0xc8] sm:$0xff] }
 0x329   : > { %5256 = vmatprep.subr.msk.bf16.mxu0 %vm7313_vm2, %v5254_v25  ;;  %5304 = vmatprep.subr.msk.bf16.mxu1 %vm7313_vm2, %v5302_v21  ;;  %v1667_v17 = vld [vmem:[#allocation2 + $0x38] sm:$0xff]  ;;  %v7399_v20 = vld [vmem:[#allocation2 + $0xc0] sm:$0xff]  ;;  %v1701_v34 = vld [vmem:[#allocation3 + $0x48] sm:$0xff]  ;;  %v5317_v55 = vpack.c.bf16 %v1699_v52, %v1698_v19 }
 0x32a   : > { %2244 = vrot.lane.b32.xlu1 %v1695_v53, %s5859_s11  ;;  %1762 = vrot.lane.b32.xlu0 %v1663_v32, %s5859_s11  ;;  %v7405_v43 = vld [vmem:[#allocation3 + $0xc0] sm:$0xff]  ;;  %v5269_v51 = vpack.c.bf16 %v1667_v17, %v1666_v37  ;;  %v1669_v46 = vld [vmem:[#allocation2 + $0x48] sm:$0xff]  ;;  %v5272_v27 = vpack.c.bf16 %v7401_v57, %v7399_v20  ;;  %v1702_v4 = vld [vmem:[#allocation3 + $0x50] sm:$0xff]  ;;  %v5323_v41 = vpack.c.bf16 %v1701_v34, %v1700_v49 }
 0x32b   : > { %v5320_v59 = vpack.c.bf16 %v7407_v6, %v7405_v43  ;;  %v1670_v42 = vld [vmem:[#allocation2 + $0x50] sm:$0xff]  ;;  %v7425_v8 = vld [vmem:[#allocation2 + $0xd8] sm:$0xff]  ;;  %v5275_v53 = vpack.c.bf16 %v1669_v46, %v1668_v47  ;;  %v1704_v25 = vld [vmem:[#allocation3 + $0x60] sm:$0xff] }
 0x32c   : > { %v7423_v36 = vld [vmem:[#allocation2 + $0xd0] sm:$0xff]  ;;  %v7431_v16 = vld [vmem:[#allocation3 + $0xd8] sm:$0xff]  ;;  %v7449_v21 = vld [vmem:[#allocation2 + $0xe8] sm:$0xff] }
 0x32d   : > { %v7429_v56 = vld [vmem:[#allocation3 + $0xd0] sm:$0xff]  ;;  %v1703_v44 = vld [vmem:[#allocation3 + $0x58] sm:$0xff]  ;;  %v5278_v45 = vpack.c.bf16 %v7425_v8, %v7423_v36 }
 0x32e   : > { %2246 = vrot.lane.b32.xlu1 %v1696_v18, %s5859_s11  ;;  %1764 = vrot.lane.b32.xlu0 %v1664_v50, %s5859_s11  ;;  %v1671_v32 = vld [vmem:[#allocation2 + $0x58] sm:$0xff]  ;;  %v5326_v12 = vpack.c.bf16 %v7431_v16, %v7429_v56  ;;  %v1672_v18 = vld [vmem:[#allocation2 + $0x60] sm:$0xff] }
 0x32f   : > { %v7447_v50 = vld [vmem:[#allocation2 + $0xe0] sm:$0xff] }
 0x330   : > { %5259 = vmatpush3.bf16.xpose.msk.msra.mxu0 %vm7313_vm2, %v5257_v62  ;;  %5307 = vmatpush3.bf16.xpose.msk.msra.mxu1 %vm7313_vm2, %v5305_v48  ;;  %v1720_v62 = vld [vmem:[#allocation3 + $0xe0] sm:$0xff]  ;;  %v1705_v48 = vld [vmem:[#allocation3 + $0x68] sm:$0xff] }
 0x331   : > { %5262 = vmatprep.subr.msk.bf16.mxu0 %vm7313_vm2, %v5260_v2  ;;  %5310 = vmatprep.subr.msk.bf16.mxu1 %vm7313_vm2, %v5308_v63  ;;  %v1673_v2 = vld [vmem:[#allocation2 + $0x68] sm:$0xff]  ;;  %v5329_v63 = vpack.c.bf16 %v1703_v44, %v1702_v4 }
 0x332   : > { %2248 = vrot.lane.b32.xlu1 %v1697_v33, %s5859_s11  ;;  %1766 = vrot.lane.b32.xlu0 %v1665_v15, %s5859_s11  ;;  %v7453_v33 = vld [vmem:[#allocation3 + $0xe8] sm:$0xff]  ;;  %v5281_v15 = vpack.c.bf16 %v1671_v32, %v1670_v42 }
 0x336   : > { %2250 = vrot.lane.b32.xlu1 %v1698_v19, %s5859_s11  ;;  %1768 = vrot.lane.b32.xlu0 %v1666_v37, %s5859_s11  ;;  %v5284_v19 = vpack.c.bf16 %v7449_v21, %v7447_v50  ;;  %v5332_v37 = vpack.c.bf16 %v7453_v33, %v1720_v62 }
 0x338   : > { %5265 = vmatpush3.bf16.xpose.msk.msra.mxu0 %vm7313_vm2, %v5263_v35  ;;  %5313 = vmatpush3.bf16.xpose.msk.msra.mxu1 %vm7313_vm2, %v5311_v5  ;;  %v1706_v35 = vld [vmem:[#allocation3 + $0x70] sm:$0xff]  ;;  %v7468_v5 = vld [vmem:[#allocation2 + $0xf8] sm:$0xff] }
 0x339   : > { %5268 = vmatprep.subr.msk.bf16.mxu0 %vm7313_vm2, %v5266_v7  ;;  %5316 = vmatprep.subr.msk.bf16.mxu1 %vm7313_vm2, %v5314_v40  ;;  %v1722_v7 = vld [vmem:[#allocation3 + $0xf0] sm:$0xff]  ;;  %v1723_v40 = vld [vmem:[#allocation3 + $0xf8] sm:$0xff] }
 0x33a   : > { %2252 = vrot.lane.b32.xlu1 %v1699_v52, %s5859_s11  ;;  %1770 = vrot.lane.b32.xlu0 %v1667_v17, %s5859_s11  ;;  %v1674_v52 = vld [vmem:[#allocation2 + $0x70] sm:$0xff] }
 0x33b   : > { %v1690_v17 = vld [vmem:[#allocation2 + $0xf0] sm:$0xff] }
 0x33e   : > { %2254 = vrot.lane.b32.xlu1 %v1700_v49, %s5859_s11  ;;  %1772 = vrot.lane.b32.xlu0 %v1668_v47, %s5859_s11  ;;  %v5287_v49 = vpack.c.bf16 %v1673_v2, %v1672_v18  ;;  %v1707_v47 = vld [vmem:[#allocation3 + $0x78] sm:$0xff] }
 0x340   : > { %5271 = vmatpush3.bf16.xpose.msk.msra.mxu0 %vm7313_vm2, %v5269_v51  ;;  %5319 = vmatpush3.bf16.xpose.msk.msra.mxu1 %vm7313_vm2, %v5317_v55  ;;  %v1675_v51 = vld [vmem:[#allocation2 + $0x78] sm:$0xff]  ;;  %v5338_v55 = vpack.c.bf16 %v1723_v40, %v1722_v7 }
 0x341   : > { %5274 = vmatprep.subr.msk.bf16.mxu0 %vm7313_vm2, %v5272_v27  ;;  %5322 = vmatprep.subr.msk.bf16.mxu1 %vm7313_vm2, %v5320_v59  ;;  %v5293_v27 = vpack.c.bf16 %v1675_v51, %v1674_v52  ;;  %v5341_v59 = vpack.c.bf16 %v1707_v47, %v1706_v35 }
 0x342   : > { %2256 = vrot.lane.b32.xlu1 %v1701_v34, %s5859_s11  ;;  %1774 = vrot.lane.b32.xlu0 %v1669_v46, %s5859_s11  ;;  %v5335_v34 = vpack.c.bf16 %v1705_v48, %v1704_v25  ;;  %v5290_v46 = vpack.c.bf16 %v7468_v5, %v1690_v17 }
 0x346   : > { %2258 = vrot.lane.b32.xlu1 %v1702_v4, %s5859_s11  ;;  %1776 = vrot.lane.b32.xlu0 %v1670_v42, %s5859_s11  ;;  %v7601_v4 = vld [vmem:[%s11569_s9 + $0x60] sm:$0xff] }
 0x348   : > { %5277 = vmatpush3.bf16.xpose.msk.msra.mxu0 %vm7313_vm2, %v5275_v53  ;;  %5325 = vmatpush3.bf16.xpose.msk.msra.mxu1 %vm7313_vm2, %v5323_v41  ;;  %v2695_v53 = vld [vmem:[%s11569_s9 + $0x28] sm:$0xff] }
 0x349   : > { %5280 = vmatprep.subr.msk.bf16.mxu0 %vm7313_vm2, %v5278_v45  ;;  %5328 = vmatprep.subr.msk.bf16.mxu1 %vm7313_vm2, %v5326_v12  ;;  %v7635_v45 = vld [vmem:[%s11569_s9 + $0xc0] sm:$0xff] }
 0x34a   : > { %2260 = vrot.lane.b32.xlu1 %v1703_v44, %s5859_s11  ;;  %1778 = vrot.lane.b32.xlu0 %v1671_v32, %s5859_s11  ;;  %v7624_v44 = vld [vmem:[%s11569_s9 + $0xa0] sm:$0xff] }
 0x34e   : > { %2262 = vrot.lane.b32.xlu1 %v1704_v25, %s5859_s11  ;;  %1780 = vrot.lane.b32.xlu0 %v1672_v18, %s5859_s11  ;;  %v7646_v18 = vld [vmem:[%s11569_s9 + $0xe0] sm:$0xff] }
 0x350   : > { %5283 = vmatpush3.bf16.xpose.msk.msra.mxu0 %vm7313_vm2, %v5281_v15  ;;  %5331 = vmatpush3.bf16.xpose.msk.msra.mxu1 %vm7313_vm2, %v5329_v63  ;;  %v2697_v15 = vld [vmem:[%s11569_s9 + $0x38] sm:$0xff] }
 0x351   : > { %5286 = vmatprep.subr.msk.bf16.mxu0 %vm7313_vm2, %v5284_v19  ;;  %5334 = vmatprep.subr.msk.bf16.mxu1 %vm7313_vm2, %v5332_v37 }
 0x352   : > { %2264 = vrot.lane.b32.xlu1 %v1705_v48, %s5859_s11  ;;  %1782 = vrot.lane.b32.xlu0 %v1673_v2, %s5859_s11 }
 0x356   : > { %2266 = vrot.lane.b32.xlu1 %v1706_v35, %s5859_s11  ;;  %1784 = vrot.lane.b32.xlu0 %v1674_v52, %s5859_s11  ;;  %v2699_v35 = vld [vmem:[%s11569_s9 + $0x48] sm:$0xff] }
 0x358   : > { %5289 = vmatpush3.bf16.xpose.msk.msra.mxu0 %vm7313_vm2, %v5287_v49  ;;  %5337 = vmatpush3.bf16.xpose.msk.msra.mxu1 %vm7313_vm2, %v5335_v34  ;;  %v2700_v49 = vld [vmem:[%s11569_s9 + $0x50] sm:$0xff]  ;;  %v2701_v34 = vld [vmem:[%s11569_s9 + $0x58] sm:$0xff] }
 0x359   : > { %5292 = vmatprep.subr.msk.bf16.mxu0 %vm7313_vm2, %v5290_v46  ;;  %5340 = vmatprep.subr.msk.bf16.mxu1 %vm7313_vm2, %v5338_v55  ;;  %v2703_v55 = vld [vmem:[%s11569_s9 + $0x68] sm:$0xff] }
 0x35a   : > { %2268 = vrot.lane.b32.xlu1 %v1707_v47, %s5859_s11  ;;  %1786 = vrot.lane.b32.xlu0 %v1675_v51, %s5859_s11 }
 0x35e   : > { %2270 = vrot.lane.b32.xlu1 %v7319_v1, %s5859_s11  ;;  %1788 = vrot.lane.b32.xlu0 %v7305_v24, %s5859_s11 }
 0x360   : > { %5295 = vmatpush3.bf16.xpose.msk.msra.mxu0 %vm7313_vm2, %v5293_v27  ;;  %5343 = vmatpush3.bf16.xpose.msk.msra.mxu1 %vm7313_vm2, %v5341_v59 }
 0x362   : > { %2272 = vrot.lane.b32.xlu1 %v7321_v9, %s5859_s11  ;;  %1790 = vrot.lane.b32.xlu0 %v7309_v61, %s5859_s11 }
 0x366   : > { %2274 = vrot.lane.b32.xlu1 %v7335_v54, %s5859_s11  ;;  %1792 = vrot.lane.b32.xlu0 %v7327_v26, %s5859_s11  ;;  %v2690_v54 = vld [vmem:[%s11569_s9] sm:$0xff] }
 0x36a   : > { %2276 = vrot.lane.b32.xlu1 %v7337_v22, %s5859_s11  ;;  %1794 = vrot.lane.b32.xlu0 %v7329_v60, %s5859_s11  ;;  %v7560_v60 = vld [vmem:[%s11569_s9 + $0x8] sm:$0xff] }
 0x36e   : > { %2278 = vrot.lane.b32.xlu1 %v7357_v29, %s5859_s11  ;;  %1796 = vrot.lane.b32.xlu0 %v7351_v58, %s5859_s11  ;;  %v2693_v29 = vld [vmem:[%s11569_s9 + $0x18] sm:$0xff] }
 0x372   : > { %2280 = vrot.lane.b32.xlu1 %v7359_v30, %s5859_s11  ;;  %1798 = vrot.lane.b32.xlu0 %v7353_v39, %s5859_s11  ;;  %v2692_v39 = vld [vmem:[%s11569_s9 + $0x10] sm:$0xff] }
 0x376   : > { %2282 = vrot.lane.b32.xlu1 %v7381_v23, %s5859_s11  ;;  %1800 = vrot.lane.b32.xlu0 %v7375_v31, %s5859_s11 }
 0x37a   : > { %2284 = vrot.lane.b32.xlu1 %v7383_v38, %s5859_s11  ;;  %1802 = vrot.lane.b32.xlu0 %v7377_v0, %s5859_s11  ;;  %v2694_v0 = vld [vmem:[%s11569_s9 + $0x20] sm:$0xff] }
 0x37e   : > { %2286 = vrot.lane.b32.xlu1 %v7405_v43, %s5859_s11  ;;  %1804 = vrot.lane.b32.xlu0 %v7399_v20, %s5859_s11  ;;  %v5860_v20 = vmov 1  }
 0x382   : > { %2288 = vrot.lane.b32.xlu1 %v7407_v6, %s5859_s11  ;;  %1806 = vrot.lane.b32.xlu0 %v7401_v57, %s5859_s11  ;;  %v7591_v57 = vld [vmem:[%s11569_s9 + $0x40] sm:$0xff] }
 0x386   : > { %2290 = vrot.lane.b32.xlu1 %v7429_v56, %s5859_s11  ;;  %1808 = vrot.lane.b32.xlu0 %v7423_v36, %s5859_s11 }
 0x38a   : > { %2292 = vrot.lane.b32.xlu1 %v7431_v16, %s5859_s11  ;;  %1810 = vrot.lane.b32.xlu0 %v7425_v8, %s5859_s11  ;;  %v7611_v8 = vld [vmem:[%s11569_s9 + $0x80] sm:$0xff] }
 0x38e   : > { %2294 = vrot.lane.b32.xlu1 %v1720_v62, %s5859_s11  ;;  %1812 = vrot.lane.b32.xlu0 %v7447_v50, %s5859_s11 }
 0x390   : > { %v1757_v24 = vpop.permute.xlu0 %1756  ;;  %v1759_v61 = vpop.permute.xlu1 %1758 }
 0x391   : > { %4852 = vmatprep.mubr.msk.f32.mxu0 %vm1820_vm1, %v1757_v24 }
 0x392   : > { %2296 = vrot.lane.b32.xlu1 %v7453_v33, %s5859_s11  ;;  %1814 = vrot.lane.b32.xlu0 %v7449_v21, %s5859_s11  ;;  %v2696_v21 = vld [vmem:[%s11569_s9 + $0x30] sm:$0xff] }
 0x393   : > { %4853 = vmatmul.mubr.msk.f32.vlgmr.msra.gmra.mrb[0].mxu0 %vm1820_vm1, %v1757_v24 }
 0x394   : > { %v2239_v28 = vpop.permute.xlu0 %2238  ;;  %4854 = vmatprep.mubr.msk.f32.mxu0 %vm1820_vm1, %v1759_v61  ;;  %v2241_v1 = vpop.permute.xlu1 %2240 }
 0x395   : > { %4948 = vmatprep.mubr.msk.f32.mxu1 %vm1820_vm1, %v2239_v28 }
 0x396   : > { %2298 = vrot.lane.b32.xlu1 %v1722_v7, %s5859_s11  ;;  %1816 = vrot.lane.b32.xlu0 %v1690_v17, %s5859_s11 }
 0x397   : > { %4855 = vmatmul.mubr.msk.f32.gmra.mrb[2].mxu0 %vm1820_vm1, %v1759_v61  ;;  %4949 = vmatmul.mubr.msk.f32.vlgmr.msra.gmra.mrb[0].mxu1 %vm1820_vm1, %v2239_v28  ;;  %v2704_v28 = vld [vmem:[%s11569_s9 + $0x70] sm:$0xff] }
 0x398   : > { %v1761_v9 = vpop.permute.xlu0 %1760  ;;  %4950 = vmatprep.mubr.msk.f32.mxu1 %vm1820_vm1, %v2241_v1  ;;  %v2243_v26 = vpop.permute.xlu1 %2242 }
 0x399   : > { %4856 = vmatprep.mubr.msk.f32.mxu0 %vm1820_vm1, %v1761_v9 }
 0x39a   : > { %2300 = vrot.lane.b32.xlu1 %v1723_v40, %s5859_s11  ;;  %1818 = vrot.lane.b32.xlu0 %v7468_v5, %s5859_s11 }
 0x39b   : > { %4857 = vmatmul.mubr.msk.f32.gmra.mrb[4].mxu0 %vm1820_vm1, %v1761_v9  ;;  %4951 = vmatmul.mubr.msk.f32.gmra.mrb[2].mxu1 %vm1820_vm1, %v2241_v1 }
 0x39c   : > { %v1763_v22 = vpop.permute.xlu0 %1762  ;;  %4952 = vmatprep.mubr.msk.f32.mxu1 %vm1820_vm1, %v2243_v26  ;;  %v2245_v58 = vpop.permute.xlu1 %2244 }
 0x39d   : > { %4858 = vmatprep.mubr.msk.f32.mxu0 %vm1820_vm1, %v1763_v22 }
 0x39e   : > { %2729 = vperm.xlu1 %5557, %v7560_v60   ;;  %2724 = vperm.xlu0 %5556, %v2690_v54  }
 0x39f   : > { %4859 = vmatmul.mubr.msk.f32.gmra.mrb[6].mxu0 %vm1820_vm1, %v1763_v22  ;;  %4953 = vmatmul.mubr.msk.f32.gmra.mrb[4].mxu1 %vm1820_vm1, %v2243_v26  ;;  %v2707_v26 = vld [vmem:[%s11569_s9 + $0x88] sm:$0xff]  ;;  %v7734_v22 = vld [vmem:[%s11569_s9 + $0x90] sm:$0xff] }
 0x3a0   : > { %v1765_v30 = vpop.permute.xlu0 %1764  ;;  %4954 = vmatprep.mubr.msk.f32.mxu1 %vm1820_vm1, %v2245_v58  ;;  %v2247_v31 = vpop.permute.xlu1 %2246 }
 0x3a1   : > { %4860 = vmatprep.mubr.msk.f32.mxu0 %vm1820_vm1, %v1765_v30 }
 0x3a2   : > { %2734 = vperm.xlu1 %5557, %v2692_v39   ;;  %2739 = vperm.xlu0 %5556, %v2693_v29  }
 0x3a3   : > { %4861 = vmatmul.mubr.msk.f32.gmra.mrb[8].mxu0 %vm1820_vm1, %v1765_v30  ;;  %4955 = vmatmul.mubr.msk.f32.gmra.mrb[6].mxu1 %vm1820_vm1, %v2245_v58 }
 0x3a4   : > { %v1767_v23 = vpop.permute.xlu0 %1766  ;;  %4956 = vmatprep.mubr.msk.f32.mxu1 %vm1820_vm1, %v2247_v31  ;;  %v2249_v38 = vpop.permute.xlu1 %2248 }
 0x3a5   : > { %4862 = vmatprep.mubr.msk.f32.mxu0 %vm1820_vm1, %v1767_v23 }
 0x3a6   : > { %5558 = vset.pattern.permute.xlu1 %v5860_v20  ;;  %2744 = vperm.xlu0 %5556, %v2694_v0  }
 0x3a7   : > { %4863 = vmatmul.mubr.msk.f32.gmra.mrb[10].mxu0 %vm1820_vm1, %v1767_v23  ;;  %4957 = vmatmul.mubr.msk.f32.gmra.mrb[8].mxu1 %vm1820_vm1, %v2247_v31  ;;  %v2705_v31 = vld [vmem:[%s11569_s9 + $0x78] sm:$0xff]  ;;  %v7758_v23 = vld [vmem:[%s11569_s9 + $0xb0] sm:$0xff] }
 0x3a8   : > { %2958 = vperm.xlu1 %5558, %v2690_v54   ;;  %v1769_v43 = vpop.permute.xlu0 %1768  ;;  %4958 = vmatprep.mubr.msk.f32.mxu1 %vm1820_vm1, %v2249_v38  ;;  %v2251_v6 = vpop.permute.xlu1 %2250 }
 0x3a9   : > { %4864 = vmatprep.mubr.msk.f32.mxu0 %vm1820_vm1, %v1769_v43 }
 0x3aa   : > { %2764 = vperm.xlu0 %5556, %v7591_v57  }
 0x3ab   : > { %4865 = vmatmul.mubr.msk.f32.gmra.mrb[12].mxu0 %vm1820_vm1, %v1769_v43  ;;  %4959 = vmatmul.mubr.msk.f32.gmra.mrb[10].mxu1 %vm1820_vm1, %v2249_v38  ;;  %v7770_v43 = vld [vmem:[%s11569_s9 + $0xc8] sm:$0xff] }
 0x3ac   : > { %2966 = vperm.xlu1 %5558, %v2692_v39   ;;  %v1771_v42 = vpop.permute.xlu0 %1770  ;;  %4960 = vmatprep.mubr.msk.f32.mxu1 %vm1820_vm1, %v2251_v6  ;;  %v2253_v36 = vpop.permute.xlu1 %2252 }
 0x3ad   : > { %4866 = vmatprep.mubr.msk.f32.mxu0 %vm1820_vm1, %v1771_v42 }
 0x3ae   : > { %2784 = vperm.xlu0 %5556, %v7601_v4  }
 0x3af   : > { %4867 = vmatmul.mubr.msk.f32.gmra.mrb[14].mxu0 %vm1820_vm1, %v1771_v42  ;;  %4961 = vmatmul.mubr.msk.f32.gmra.mrb[12].mxu1 %vm1820_vm1, %v2251_v6  ;;  %v7780_v42 = vld [vmem:[%s11569_s9 + $0xd0] sm:$0xff] }
 0x3b0   : > { %2970 = vperm.xlu1 %5558, %v2693_v29   ;;  %v1773_v56 = vpop.permute.xlu0 %1772  ;;  %4962 = vmatprep.mubr.msk.f32.mxu1 %vm1820_vm1, %v2253_v36  ;;  %v2255_v16 = vpop.permute.xlu1 %2254  ;;  %v7746_v29 = vld [vmem:[%s11569_s9 + $0xa8] sm:$0xff] }
 0x3b1   : > { %4868 = vmatprep.mubr.msk.f32.mxu0 %vm1820_vm1, %v1773_v56 }
 0x3b2   : > { %2804 = vperm.xlu0 %5556, %v7611_v8  }
 0x3b3   : > { %4869 = vmatmul.mubr.msk.f32.gmra.mrb[16].mxu0 %vm1820_vm1, %v1773_v56  ;;  %4963 = vmatmul.mubr.msk.f32.gmra.mrb[14].mxu1 %vm1820_vm1, %v2253_v36 }
 0x3b4   : > { %5559 = vset.pattern.permute.xlu1 %v5856_v3  ;;  %v1775_v32 = vpop.permute.xlu0 %1774  ;;  %4964 = vmatprep.mubr.msk.f32.mxu1 %vm1820_vm1, %v2255_v16  ;;  %v2257_v41 = vpop.permute.xlu1 %2256 }
 0x3b5   : > { %2749 = vperm.xlu1 %5559, %v2695_v53   ;;  %4870 = vmatprep.mubr.msk.f32.mxu0 %vm1820_vm1, %v1775_v32 }
 0x3b6   : > { %2824 = vperm.xlu0 %5556, %v7624_v44  }
 0x3b7   : > { %4871 = vmatmul.mubr.msk.f32.gmra.mrb[18].mxu0 %vm1820_vm1, %v1775_v32  ;;  %4965 = vmatmul.mubr.msk.f32.gmra.mrb[16].mxu1 %vm1820_vm1, %v2255_v16  ;;  %v7792_v32 = vld [vmem:[%s11569_s9 + $0xe8] sm:$0xff] }
 0x3b8   : > { %v1777_v12 = vpop.permute.xlu0 %1776  ;;  %4966 = vmatprep.mubr.msk.f32.mxu1 %vm1820_vm1, %v2257_v41  ;;  %v2259_v25 = vpop.permute.xlu1 %2258 }
 0x3b9   : > { %5560 = vset.pattern.permute.xlu1 %v5860_v20  ;;  %4872 = vmatprep.mubr.msk.f32.mxu0 %vm1820_vm1, %v1777_v12 }
 0x3ba   : > { %2974 = vperm.xlu1 %5560, %v2694_v0   ;;  %2844 = vperm.xlu0 %5556, %v7635_v45  }
 0x3bb   : > { %4873 = vmatmul.mubr.msk.f32.gmra.mrb[20].mxu0 %vm1820_vm1, %v1777_v12  ;;  %4967 = vmatmul.mubr.msk.f32.gmra.mrb[18].mxu1 %vm1820_vm1, %v2257_v41 }
 0x3bc   : > { %v1779_v50 = vpop.permute.xlu0 %1778  ;;  %4968 = vmatprep.mubr.msk.f32.mxu1 %vm1820_vm1, %v2259_v25  ;;  %v2261_v62 = vpop.permute.xlu1 %2260 }
 0x3bd   : > { %4874 = vmatprep.mubr.msk.f32.mxu0 %vm1820_vm1, %v1779_v50 }
 0x3be   : > { %5561 = vset.pattern.permute.xlu1 %v5856_v3  ;;  %2864 = vperm.xlu0 %5556, %v7646_v18  }
 0x3bf   : > { %2754 = vperm.xlu1 %5561, %v2696_v21   ;;  %4875 = vmatmul.mubr.msk.f32.gmra.mrb[22].mxu0 %vm1820_vm1, %v1779_v50  ;;  %v2709_v50 = vld [vmem:[%s11569_s9 + $0x98] sm:$0xff] }
 0x3c0   : > { %4969 = vmatmul.mubr.msk.f32.gmra.mrb[20].mxu1 %vm1820_vm1, %v2259_v25  ;;  %v1781_v33 = vpop.permute.xlu0 %1780  ;;  %v2263_v48 = vpop.permute.xlu1 %2262  ;;  %v7806_v25 = vld [vmem:[%s11569_s9 + $0xf0] sm:$0xff] }
 0x3c1   : > { %4876 = vmatprep.mubr.msk.f32.mxu0 %vm1820_vm1, %v1781_v33  ;;  %4970 = vmatprep.mubr.msk.f32.mxu1 %vm1820_vm1, %v2261_v62 }
 0x3c2   : > { %5583 = vset.pattern.permute.xlu0 %v5860_v20 }
 0x3c3   : > { %2759 = vperm.xlu1 %5561, %v2697_v15   ;;  %4877 = vmatmul.mubr.msk.f32.gmra.mrb[24].mxu0 %vm1820_vm1, %v1781_v33 }
 0x3c4   : > { %4971 = vmatmul.mubr.msk.f32.gmra.mrb[22].mxu1 %vm1820_vm1, %v2261_v62  ;;  %2962 = vperm.xlu0 %5583, %v7560_v60   ;;  %v1783_v2 = vpop.permute.xlu0 %1782  ;;  %v2265_v63 = vpop.permute.xlu1 %2264 }
 0x3c5   : > { %4878 = vmatprep.mubr.msk.f32.mxu0 %vm1820_vm1, %v1783_v2  ;;  %4972 = vmatprep.mubr.msk.f32.mxu1 %vm1820_vm1, %v2263_v48 }
 0x3c7   : > { %5562 = vset.pattern.permute.xlu1 %v5860_v20  ;;  %4879 = vmatmul.mubr.msk.f32.gmra.mrb[26].mxu0 %vm1820_vm1, %v1783_v2 }
 0x3c8   : > { %4973 = vmatmul.mubr.msk.f32.gmra.mrb[24].mxu1 %vm1820_vm1, %v2263_v48  ;;  %2986 = vperm.xlu1 %5562, %v2697_v15   ;;  %v1785_v19 = vpop.permute.xlu0 %1784  ;;  %v2267_v37 = vpop.permute.xlu1 %2266  ;;  %v2883_v15 = vlaneseq }
 0x3c9   : > { %2978 = vperm.xlu0 %5583, %v2695_v53   ;;  %4880 = vmatprep.mubr.msk.f32.mxu0 %vm1820_vm1, %v1785_v19 }
 0x3ca   : > { %4974 = vmatprep.mubr.msk.f32.mxu1 %vm1820_vm1, %v2265_v63  ;;  %v2884_v48 = vshrl.u32 %v2883_v15, 7 }
 0x3cb   : > { %4881 = vmatmul.mubr.msk.f32.gmra.mrb[28].mxu0 %vm1820_vm1, %v1785_v19 }
 0x3cc   : > { %4975 = vmatmul.mubr.msk.f32.gmra.mrb[26].mxu1 %vm1820_vm1, %v2265_v63  ;;  %5563 = vset.pattern.permute.xlu1 %v5856_v3  ;;  %v1787_v52 = vpop.permute.xlu0 %1786  ;;  %v2269_v17 = vpop.permute.xlu1 %2268  ;;  %v2713_v63 = vld [vmem:[%s11569_s9 + $0xb8] sm:$0xff]  ;;  %v2885_v19 = vsub.s32 0, %v2884_v48 }
 0x3cd   : > { %2769 = vperm.xlu1 %5563, %v2699_v35   ;;  %2982 = vperm.xlu0 %5583, %v2696_v21  }
 0x3ce   : > { %4882 = vmatprep.mubr.msk.f32.mxu0 %vm1820_vm1, %v1787_v52  ;;  %4976 = vmatprep.mubr.msk.f32.mxu1 %vm1820_vm1, %v2267_v37 }
 0x3cf   : > { %4883 = vmatmul.mubr.msk.f32.gmra.mrb[30].mxu0 %vm1820_vm1, %v1787_v52  ;;  %v2889_v52 = vsub.s32 1, %v2884_v48 }
 0x3d0   : > { %4977 = vmatmul.mubr.msk.f32.gmra.mrb[28].mxu1 %vm1820_vm1, %v2267_v37  ;;  %v1789_v5 = vpop.permute.xlu0 %1788  ;;  %v2271_v7 = vpop.permute.xlu1 %2270 }
 0x3d1   : > { %5564 = vset.pattern.permute.xlu1 %v5860_v20  ;;  %4884 = vmatprep.mubr.msk.f32.mxu0 %vm1820_vm1, %v1789_v5 }
 0x3d2   : > { %2990 = vperm.xlu1 %5564, %v7591_v57   ;;  %4978 = vmatprep.mubr.msk.f32.mxu1 %vm1820_vm1, %v2269_v17 }
 0x3d3   : > { %4885 = vmatmul.mubr.msk.f32.gmra.mrb[32].mxu0 %vm1820_vm1, %v1789_v5  ;;  %2994 = vperm.xlu0 %5583, %v2699_v35   ;;  %v2687_v35 = vld [vmem:[%s11568_s8] ss:$2 sm:$0x3] }
 0x3d4   : > { %4979 = vmatmul.mubr.msk.f32.gmra.mrb[30].mxu1 %vm1820_vm1, %v2269_v17  ;;  %v1791_v40 = vpop.permute.xlu0 %1790  ;;  %v2273_v47 = vpop.permute.xlu1 %2272  ;;  %v7846_v17 = vrot.slane %v2687_v35, %v2885_v19 }
 0x3d5   : > { %4886 = vmatprep.mubr.msk.f32.mxu0 %vm1820_vm1, %v1791_v40  ;;  %4980 = vmatprep.mubr.msk.f32.mxu1 %vm1820_vm1, %v2271_v7 }
 0x3d6   : > { %5565 = vset.pattern.permute.xlu1 %v5856_v3  ;;  %12213 = vst [vmem:[#allocation13_spill] sm:$0xff] %v7846_v17 }
 0x3d7   : > { %2774 = vperm.xlu1 %5565, %v2700_v49   ;;  %4887 = vmatmul.mubr.msk.f32.gmra.mrb[34].mxu0 %vm1820_vm1, %v1791_v40 }
 0x3d8   : > { %4981 = vmatmul.mubr.msk.f32.gmra.mrb[32].mxu1 %vm1820_vm1, %v2271_v7  ;;  %v1793_v51 = vpop.permute.xlu0 %1792  ;;  %v2275_v46 = vpop.permute.xlu1 %2274  ;;  %2998 = vperm.xlu0 %5583, %v2700_v49   ;;  %v7850_v7 = vrot.slane %v2687_v35, %v2889_v52 }
 0x3d9   : > { %4888 = vmatprep.mubr.msk.f32.mxu0 %vm1820_vm1, %v1793_v51  ;;  %4982 = vmatprep.mubr.msk.f32.mxu1 %vm1820_vm1, %v2273_v47 }
 0x3da   : > { %12215 = vst [vmem:[#allocation15_spill] sm:$0xff] %v7850_v7 }
 0x3db   : > { %2779 = vperm.xlu1 %5565, %v2701_v34   ;;  %4889 = vmatmul.mubr.msk.f32.gmra.mrb[36].mxu0 %vm1820_vm1, %v1793_v51  ;;  %v12216_v51 = vmov 0 }
 0x3dc   : > { %4983 = vmatmul.mubr.msk.f32.gmra.mrb[34].mxu1 %vm1820_vm1, %v2273_v47  ;;  %v1795_v27 = vpop.permute.xlu0 %1794  ;;  %v2277_v59 = vpop.permute.xlu1 %2276  ;;  %3010 = vperm.xlu0 %5583, %v2703_v55  }
 0x3dd   : > { %4890 = vmatprep.mubr.msk.f32.mxu0 %vm1820_vm1, %v1795_v27  ;;  %4984 = vmatprep.mubr.msk.f32.mxu1 %vm1820_vm1, %v2275_v46 }
 0x3df   : > { %5566 = vset.pattern.permute.xlu1 %v5860_v20  ;;  %4891 = vmatmul.mubr.msk.f32.gmra.mrb[38].mxu0 %vm1820_vm1, %v1795_v27  ;;  %v12223_v27 = vmov 0 }
 0x3e0   : > { %4985 = vmatmul.mubr.msk.f32.gmra.mrb[36].mxu1 %vm1820_vm1, %v2275_v46  ;;  %3002 = vperm.xlu1 %5566, %v2701_v34   ;;  %v1797_v24 = vpop.permute.xlu0 %1796  ;;  %v2279_v61 = vpop.permute.xlu1 %2278  ;;  %v12219_v34 = vmov 0 }
 0x3e1   : > { %4892 = vmatprep.mubr.msk.f32.mxu0 %vm1820_vm1, %v1797_v24  ;;  %4986 = vmatprep.mubr.msk.f32.mxu1 %vm1820_vm1, %v2277_v59 }
 0x3e2   : > { %3014 = vperm.xlu0 %5583, %v2704_v28  }
 0x3e3   : > { %4893 = vmatmul.mubr.msk.f32.gmra.mrb[40].mxu0 %vm1820_vm1, %v1797_v24 }
 0x3e4   : > { %4987 = vmatmul.mubr.msk.f32.gmra.mrb[38].mxu1 %vm1820_vm1, %v2277_v59  ;;  %5567 = vset.pattern.permute.xlu1 %v5856_v3  ;;  %v1799_v1 = vpop.permute.xlu0 %1798  ;;  %v2281_v9 = vpop.permute.xlu1 %2280  ;;  %v12226_v59 = vmov 0 }
 0x3e5   : > { %2789 = vperm.xlu1 %5567, %v2703_v55   ;;  %4894 = vmatprep.mubr.msk.f32.mxu0 %vm1820_vm1, %v1799_v1 }
 0x3e6   : > { %4988 = vmatprep.mubr.msk.f32.mxu1 %vm1820_vm1, %v2279_v61  ;;  %3026 = vperm.xlu0 %5583, %v2707_v26  }
 0x3e7   : > { %4895 = vmatmul.mubr.msk.f32.gmra.mrb[42].mxu0 %vm1820_vm1, %v1799_v1  ;;  %v2717_v1 = vld [vmem:[%s11569_s9 + $0xd8] sm:$0xff] }
 0x3e8   : > { %4989 = vmatmul.mubr.msk.f32.gmra.mrb[40].mxu1 %vm1820_vm1, %v2279_v61  ;;  %v1801_v60 = vpop.permute.xlu0 %1800  ;;  %v2283_v54 = vpop.permute.xlu1 %2282  ;;  %v12229_v61 = vmov 0 }
 0x3e9   : > { %5568 = vset.pattern.permute.xlu1 %v5860_v20  ;;  %4896 = vmatprep.mubr.msk.f32.mxu0 %vm1820_vm1, %v1801_v60 }
 0x3ea   : > { %3006 = vperm.xlu1 %5568, %v7601_v4   ;;  %4990 = vmatprep.mubr.msk.f32.mxu1 %vm1820_vm1, %v2281_v9 }
 0x3eb   : > { %4897 = vmatmul.mubr.msk.f32.gmra.mrb[44].mxu0 %vm1820_vm1, %v1801_v60  ;;  %3030 = vperm.xlu0 %5583, %v7734_v22  }
 0x3ec   : > { %4991 = vmatmul.mubr.msk.f32.gmra.mrb[42].mxu1 %vm1820_vm1, %v2281_v9  ;;  %v1803_v58 = vpop.permute.xlu0 %1802  ;;  %v2285_v39 = vpop.permute.xlu1 %2284 }
 0x3ed   : > { %4898 = vmatprep.mubr.msk.f32.mxu0 %vm1820_vm1, %v1803_v58  ;;  %4992 = vmatprep.mubr.msk.f32.mxu1 %vm1820_vm1, %v2283_v54 }
 0x3ee   : > { %5569 = vset.pattern.permute.xlu1 %v5856_v3 }
 0x3ef   : > { %2794 = vperm.xlu1 %5569, %v2704_v28   ;;  %4899 = vmatmul.mubr.msk.f32.gmra.mrb[46].mxu0 %vm1820_vm1, %v1803_v58  ;;  %v12237_v58 = vmov 0 }
 0x3f0   : > { %4993 = vmatmul.mubr.msk.f32.gmra.mrb[44].mxu1 %vm1820_vm1, %v2283_v54  ;;  %v1805_v30 = vpop.permute.xlu0 %1804  ;;  %v2287_v0 = vpop.permute.xlu1 %2286  ;;  %3042 = vperm.xlu0 %5583, %v7746_v29  }
 0x3f1   : > { %4900 = vmatprep.mubr.msk.f32.mxu0 %vm1820_vm1, %v1805_v30  ;;  %4994 = vmatprep.mubr.msk.f32.mxu1 %vm1820_vm1, %v2285_v39 }
 0x3f3   : > { %2799 = vperm.xlu1 %5569, %v2705_v31   ;;  %4901 = vmatmul.mubr.msk.f32.gmra.mrb[48].mxu0 %vm1820_vm1, %v1805_v30  ;;  %v12242_v30 = vmov 0 }
 0x3f4   : > { %4995 = vmatmul.mubr.msk.f32.gmra.mrb[46].mxu1 %vm1820_vm1, %v2285_v39  ;;  %v1807_v38 = vpop.permute.xlu0 %1806  ;;  %v2289_v57 = vpop.permute.xlu1 %2288  ;;  %3046 = vperm.xlu0 %5583, %v7758_v23  }
 0x3f5   : > { %4902 = vmatprep.mubr.msk.f32.mxu0 %vm1820_vm1, %v1807_v38  ;;  %4996 = vmatprep.mubr.msk.f32.mxu1 %vm1820_vm1, %v2287_v0 }
 0x3f7   : > { %5570 = vset.pattern.permute.xlu1 %v5860_v20  ;;  %4903 = vmatmul.mubr.msk.f32.gmra.mrb[50].mxu0 %vm1820_vm1, %v1807_v38 }
 0x3f8   : > { %4997 = vmatmul.mubr.msk.f32.gmra.mrb[48].mxu1 %vm1820_vm1, %v2287_v0  ;;  %3018 = vperm.xlu1 %5570, %v2705_v31   ;;  %v1809_v6 = vpop.permute.xlu0 %1808  ;;  %v2291_v4 = vpop.permute.xlu1 %2290 }
 0x3f9   : > { %4904 = vmatprep.mubr.msk.f32.mxu0 %vm1820_vm1, %v1809_v6  ;;  %4998 = vmatprep.mubr.msk.f32.mxu1 %vm1820_vm1, %v2289_v57 }
 0x3fa   : > { %3058 = vperm.xlu0 %5583, %v7770_v43  }
 0x3fb   : > { %4905 = vmatmul.mubr.msk.f32.gmra.mrb[52].mxu0 %vm1820_vm1, %v1809_v6  ;;  %v12250_v6 = vmov 0 }
 0x3fc   : > { %4999 = vmatmul.mubr.msk.f32.gmra.mrb[50].mxu1 %vm1820_vm1, %v2289_v57  ;;  %5571 = vset.pattern.permute.xlu1 %v5856_v3  ;;  %v1811_v36 = vpop.permute.xlu0 %1810  ;;  %v2293_v56 = vpop.permute.xlu1 %2292 }
 0x3fd   : > { %2809 = vperm.xlu1 %5571, %v2707_v26   ;;  %4906 = vmatprep.mubr.msk.f32.mxu0 %vm1820_vm1, %v1811_v36 }
 0x3fe   : > { %5000 = vmatprep.mubr.msk.f32.mxu1 %vm1820_vm1, %v2291_v4  ;;  %3062 = vperm.xlu0 %5583, %v7780_v42  }
 0x3ff   : > { %4907 = vmatmul.mubr.msk.f32.gmra.mrb[54].mxu0 %vm1820_vm1, %v1811_v36 }
 0x400   : > { %5001 = vmatmul.mubr.msk.f32.gmra.mrb[52].mxu1 %vm1820_vm1, %v2291_v4  ;;  %v1813_v16 = vpop.permute.xlu0 %1812  ;;  %v2295_v53 = vpop.permute.xlu1 %2294 }
 0x401   : > { %5572 = vset.pattern.permute.xlu1 %v5860_v20  ;;  %4908 = vmatprep.mubr.msk.f32.mxu0 %vm1820_vm1, %v1813_v16 }
 0x402   : > { %3022 = vperm.xlu1 %5572, %v7611_v8   ;;  %5002 = vmatprep.mubr.msk.f32.mxu1 %vm1820_vm1, %v2293_v56 }
 0x403   : > { %4909 = vmatmul.mubr.msk.f32.gmra.mrb[56].mxu0 %vm1820_vm1, %v1813_v16  ;;  %3074 = vperm.xlu0 %5583, %v7792_v32  }
 0x404   : > { %5003 = vmatmul.mubr.msk.f32.gmra.mrb[54].mxu1 %vm1820_vm1, %v2293_v56  ;;  %v1815_v41 = vpop.permute.xlu0 %1814  ;;  %v2297_v12 = vpop.permute.xlu1 %2296 }
 0x405   : > { %4910 = vmatprep.mubr.msk.f32.mxu0 %vm1820_vm1, %v1815_v41  ;;  %5004 = vmatprep.mubr.msk.f32.mxu1 %vm1820_vm1, %v2295_v53 }
 0x406   : > { %5573 = vset.pattern.permute.xlu1 %v5856_v3 }
 0x407   : > { %2814 = vperm.xlu1 %5573, %v7734_v22   ;;  %4911 = vmatmul.mubr.msk.f32.gmra.mrb[58].mxu0 %vm1820_vm1, %v1815_v41 }
 0x408   : > { %5005 = vmatmul.mubr.msk.f32.gmra.mrb[56].mxu1 %vm1820_vm1, %v2295_v53  ;;  %v1817_v8 = vpop.permute.xlu0 %1816  ;;  %v2299_v21 = vpop.permute.xlu1 %2298  ;;  %3078 = vperm.xlu0 %5583, %v7806_v25  }
 0x409   : > { %4912 = vmatprep.mubr.msk.f32.mxu0 %vm1820_vm1, %v1817_v8  ;;  %5006 = vmatprep.mubr.msk.f32.mxu1 %vm1820_vm1, %v2297_v12 }
 0x40b   : > { %2819 = vperm.xlu1 %5573, %v2709_v50   ;;  %4913 = vmatmul.mubr.msk.f32.gmra.mrb[60].mxu0 %vm1820_vm1, %v1817_v8 }
 0x40c   : > { %5007 = vmatmul.mubr.msk.f32.gmra.mrb[58].mxu1 %vm1820_vm1, %v2297_v12  ;;  %v1819_v62 = vpop.permute.xlu0 %1818  ;;  %v2301_v33 = vpop.permute.xlu1 %2300 }
 0x40d   : > { %4914 = vmatprep.mubr.msk.f32.mxu0 %vm1820_vm1, %v1819_v62  ;;  %5008 = vmatprep.mubr.msk.f32.mxu1 %vm1820_vm1, %v2299_v21 }
 0x40f   : > { %5574 = vset.pattern.permute.xlu1 %v5860_v20  ;;  %4915 = vmatmul.mubr.msk.f32.gmra.mrb[62].mxu0 %vm1820_vm1, %v1819_v62 }
 0x410   : > { %5009 = vmatmul.mubr.msk.f32.gmra.mrb[60].mxu1 %vm1820_vm1, %v2299_v21  ;;  %3034 = vperm.xlu1 %5574, %v2709_v50  }
 0x411   : > { %5010 = vmatprep.mubr.msk.f32.mxu1 %vm1820_vm1, %v2301_v33 }
 0x414   : > { %5011 = vmatmul.mubr.msk.f32.gmra.mrb[62].mxu1 %vm1820_vm1, %v2301_v33  ;;  %5575 = vset.pattern.permute.xlu1 %v5856_v3 }
 0x415   : > { %2829 = vperm.xlu1 %5575, %v7746_v29  }
 0x419   : > { %5576 = vset.pattern.permute.xlu1 %v5860_v20 }
 0x41a   : > { %3038 = vperm.xlu1 %5576, %v7624_v44   ;;  %v4652_v44 = vld [vmem:[%s11568_s8 + $0x1] ss:$2 sm:$0x3] }
 0x41b   : > { %v7852_v40 = vrot.slane %v4652_v44, %v2885_v19  ;;  %v7854_v49 = vrot.slane %v4652_v44, %v2889_v52  ;;  %v12266_v52 = vmov 0 }
 0x41d   : > { %v7831_v2 = vpop.permute.xlu1 %2729  ;;  %v7848_v5 = vpop.permute.xlu0 %2724 }
 0x41e   : > { %12211 = vst [vmem:[#allocation11_spill] sm:$0xff] %v7831_v2  ;;  %5577 = vset.pattern.permute.xlu1 %v5856_v3  ;;  %12214 = vst [vmem:[#allocation14_spill] sm:$0xff] %v7848_v5  ;;  %vm3160_vm3 = vcmp.ne.f32.partialorder %v7848_v5, %v7846_v17  ;;  %vm3161_vm4 = vcmp.ne.f32.partialorder %v7848_v5, %v7850_v7 }
 0x41f   : > { %2834 = vperm.xlu1 %5577, %v7758_v23  }
 0x421   : > { %v7838_v37 = vpop.permute.xlu1 %2734  ;;  %v7878_v55 = vpop.permute.xlu0 %2739 }
 0x422   : > { %12212 = vst [vmem:[#allocation12_spill] sm:$0xff] %v7838_v37  ;;  %vm3164_vm9 = vcmp.ne.f32.partialorder %v7838_v37, %v7846_v17  ;;  %vm3165_vm10 = vcmp.ne.f32.partialorder %v7838_v37, %v7850_v7  ;;  %12222 = vst [vmem:[#allocation18_spill] sm:$0xff] %v7878_v55  ;;  %vm3166_vm15 = vcmp.ne.f32.partialorder %v7878_v55, %v7846_v17 }
 0x423   : > { %2839 = vperm.xlu1 %5577, %v2713_v63  }
 0x425   : > { %v7912_v60 = vpop.permute.xlu0 %2744 }
 0x426   : > { %12234 = vst [vmem:[#allocation24_spill] sm:$0xff] %v7912_v60 }
 0x427   : > { %5578 = vset.pattern.permute.xlu1 %v5860_v20  ;;  %v2959_v47 = vpop.permute.xlu1 %2958 }
 0x428   : > { %vm3096_vm5 = vcmp.eq.f32.partialorder %v2959_v47, %v7852_v40  ;;  %vm3097_vm6 = vcmp.eq.f32.partialorder %v2959_v47, %v7854_v49  ;;  %3050 = vperm.xlu1 %5578, %v2713_v63  }
 0x429   : > { %vm7863_vm7 = vmand %vm3096_vm5, %vm3160_vm3  ;;  %v7918_v54 = vpop.permute.xlu0 %2764 }
 0x42a   : > { %v12217_v51 = vsel %vm7863_vm7, 4294967295, %v12216_v51  ;;  %vm7867_vm8 = vmand %vm3097_vm6, %vm3161_vm4  ;;  %12236 = vst [vmem:[#allocation26_spill] sm:$0xff] %v7918_v54 }
 0x42b   : > { %12218 = vst [vmem:[#allocation16_spill] sm:$0xff] %v12217_v51  ;;  %v12220_v34 = vsel %vm7867_vm8, 4294967295, %v12219_v34  ;;  %v2967_v46 = vpop.permute.xlu1 %2966 }
 0x42c   : > { %12221 = vst [vmem:[#allocation17_spill] sm:$0xff] %v12220_v34  ;;  %vm3100_vm11 = vcmp.eq.f32.partialorder %v2967_v46, %v7852_v40  ;;  %vm3101_vm12 = vcmp.eq.f32.partialorder %v2967_v46, %v7854_v49  ;;  %5579 = vset.pattern.permute.xlu1 %v5856_v3  ;;  %v12270_v46 = vmov 0 }
 0x42d   : > { %vm7880_vm13 = vmand %vm3100_vm11, %vm3164_vm9  ;;  %2849 = vperm.xlu1 %5579, %v7770_v43   ;;  %v7933_v39 = vpop.permute.xlu0 %2784 }
 0x42e   : > { %v12224_v27 = vsel %vm7880_vm13, 4294967295, %v12223_v27  ;;  %vm7885_vm14 = vmand %vm3101_vm12, %vm3165_vm10  ;;  %12240 = vst [vmem:[#allocation28_spill] sm:$0xff] %v7933_v39 }
 0x42f   : > { %12225 = vst [vmem:[#allocation19_spill] sm:$0xff] %v12224_v27  ;;  %v12227_v59 = vsel %vm7885_vm14, 4294967295, %v12226_v59  ;;  %v7891_v24 = vpop.permute.xlu1 %2970 }
 0x430   : > { %12228 = vst [vmem:[#allocation20_spill] sm:$0xff] %v12227_v59  ;;  %vm3102_vm0 = vcmp.eq.f32.partialorder %v7891_v24, %v7852_v40 }
 0x431   : > { %vm7895_vm1 = vmand %vm3102_vm0, %vm3166_vm15  ;;  %5580 = vset.pattern.permute.xlu1 %v5860_v20  ;;  %v7946_v31 = vpop.permute.xlu0 %2804 }
 0x432   : > { %v12230_v61 = vsel %vm7895_vm1, 4294967295, %v12229_v61  ;;  %3054 = vperm.xlu1 %5580, %v7635_v45   ;;  %12245 = vst [vmem:[#allocation31_spill] sm:$0xff] %v7946_v31 }
 0x433   : > { %12231 = vst [vmem:[#allocation21_spill] sm:$0xff] %v12230_v61 }
 0x434   : > { %v7901_v28 = vpop.permute.xlu1 %2749 }
 0x435   : > { %12232 = vst [vmem:[#allocation22_spill] sm:$0xff] %v7901_v28  ;;  %v7952_v38 = vpop.permute.xlu0 %2824 }
 0x436   : > { %5581 = vset.pattern.permute.xlu1 %v5856_v3  ;;  %12247 = vst [vmem:[#allocation33_spill] sm:$0xff] %v7952_v38 }
 0x437   : > { %2854 = vperm.xlu1 %5581, %v7780_v42  }
 0x439   : > { %v7908_v9 = vpop.permute.xlu1 %2974 }
 0x43b   : > { %2859 = vperm.xlu1 %5581, %v2717_v1  }
 0x43e   : > { %v7910_v26 = vpop.permute.xlu1 %2754 }
 0x43f   : > { %12233 = vst [vmem:[#allocation23_spill] sm:$0xff] %v7910_v26  ;;  %5582 = vset.pattern.permute.xlu1 %v5860_v20 }
 0x440   : > { %3066 = vperm.xlu1 %5582, %v2717_v1  }
 0x442   : > { %v7915_v45 = vpop.permute.xlu1 %2759 }
 0x443   : > { %12235 = vst [vmem:[#allocation25_spill] sm:$0xff] %v7915_v45  ;;  %vm3174_vm2 = vcmp.ne.f32.partialorder %v7915_v45, %v7846_v17  ;;  %vm3175_vm5 = vcmp.ne.f32.partialorder %v7915_v45, %v7850_v7 }
 0x444   : > { %5584 = vset.pattern.permute.xlu1 %v5856_v3 }
 0x445   : > { %2869 = vperm.xlu1 %5584, %v7792_v32  }
 0x447   : > { %v2987_v22 = vpop.permute.xlu1 %2986 }
 0x448   : > { %vm3110_vm3 = vcmp.eq.f32.partialorder %v2987_v22, %v7852_v40  ;;  %vm3111_vm6 = vcmp.eq.f32.partialorder %v2987_v22, %v7854_v49 }
 0x449   : > { %5585 = vset.pattern.permute.xlu1 %v5860_v20  ;;  %vm7925_vm4 = vmand %vm3110_vm3, %vm3174_vm2 }
 0x44a   : > { %v12238_v58 = vsel %vm7925_vm4, 4294967295, %v12237_v58  ;;  %3070 = vperm.xlu1 %5585, %v7646_v18   ;;  %vm7937_vm9 = vmand %vm3111_vm6, %vm3175_vm5  ;;  %v2721_v18 = vld [vmem:[%s11569_s9 + $0xf8] sm:$0xff]  ;;  %vm3163_vm5 = vcmp.ne.f32.partialorder %v7831_v2, %v7850_v7  ;;  %vm3104_vm6 = vcmp.eq.f32.partialorder %v7908_v9, %v7852_v40 }
 0x44b   : > { %12239 = vst [vmem:[#allocation27_spill] sm:$0xff] %v12238_v58  ;;  %v12243_v30 = vsel %vm7937_vm9, 4294967295, %v12242_v30 }
 0x44c   : > { %v7935_v29 = vpop.permute.xlu1 %2769  ;;  %12244 = vst [vmem:[#allocation30_spill] sm:$0xff] %v12243_v30 }
 0x44d   : > { %12241 = vst [vmem:[#allocation29_spill] sm:$0xff] %v7935_v29 }
 0x44e   : > { %5586 = vset.pattern.permute.xlu1 %v5856_v3  ;;  %v7957_v3 = vpop.permute.xlu0 %2844 }
 0x44f   : > { %2874 = vperm.xlu1 %5586, %v7806_v25   ;;  %12249 = vst [vmem:[#allocation35_spill] sm:$0xff] %v7957_v3 }
 0x451   : > { %v7948_v0 = vpop.permute.xlu1 %2990 }
 0x452   : > { %v7973_v4 = vpop.permute.xlu0 %2864 }
 0x453   : > { %2879 = vperm.xlu1 %5586, %v2721_v18   ;;  %12256 = vst [vmem:[#allocation38_spill] sm:$0xff] %v7973_v4 }
 0x456   : > { %v7950_v23 = vpop.permute.xlu1 %2774  ;;  %v2963_v16 = vpop.permute.xlu0 %2962 }
 0x457   : > { %12246 = vst [vmem:[#allocation32_spill] sm:$0xff] %v7950_v23  ;;  %5587 = vset.pattern.permute.xlu1 %v5860_v20  ;;  %v12253_v20 = vmov 0  ;;  %vm3098_vm3 = vcmp.eq.f32.partialorder %v2963_v16, %v7852_v40 }
 0x458   : > { %3082 = vperm.xlu1 %5587, %v2721_v18  }
 0x45a   : > { %v7955_v57 = vpop.permute.xlu1 %2779  ;;  %v2979_v44 = vpop.permute.xlu0 %2978 }
 0x45b   : > { %12248 = vst [vmem:[#allocation34_spill] sm:$0xff] %v7955_v57  ;;  %vm3182_vm10 = vcmp.ne.f32.partialorder %v7955_v57, %v7846_v17  ;;  %vm3183_vm11 = vcmp.ne.f32.partialorder %v7955_v57, %v7850_v7 }
 0x45f   : > { %v3003_v43 = vpop.permute.xlu1 %3002 }
 0x460   : > { %vm3118_vm12 = vcmp.eq.f32.partialorder %v3003_v43, %v7852_v40  ;;  %vm3119_vm15 = vcmp.eq.f32.partialorder %v3003_v43, %v7854_v49 }
 0x461   : > { %vm7965_vm0 = vmand %vm3118_vm12, %vm3182_vm10  ;;  %vm12265_vm10 = vcmp.ne.f32.partialorder %v7831_v2, %v7846_v17  ;;  %vm12281_vm12 = vcmp.eq.f32.partialorder %v7838_v37, %v7846_v17 }
 0x462   : > { %v12251_v6 = vsel %vm7965_vm0, 4294967295, %v12250_v6  ;;  %vm7969_vm2 = vmand %vm3119_vm15, %vm3183_vm11  ;;  %vm12275_vm11 = vcmp.ne.f32.partialorder %v7878_v55, %v7850_v7 }
 0x463   : > { %12252 = vst [vmem:[#allocation36_spill] sm:$0xff] %v12251_v6  ;;  %v12254_v20 = vsel %vm7969_vm2, 4294967295, %v12253_v20  ;;  %vm8046_vm15 = vmand %vm3098_vm3, %vm12265_vm10  ;;  %vm12273_vm10 = vcmp.eq.f32.partialorder %v7848_v5, %v7846_v17 }
 0x464   : > { %12255 = vst [vmem:[#allocation37_spill] sm:$0xff] %v12254_v20  ;;  %v7975_v42 = vpop.permute.xlu1 %2789  ;;  %v12267_v52 = vsel %vm8046_vm15, 4294967295, %v12266_v52 }
 0x465   : > { %12257 = vst [vmem:[#allocation39_spill] sm:$0xff] %v7975_v42  ;;  %12268 = vst [vmem:[#allocation47_spill] sm:$0xff] %v12267_v52 }
 0x466   : > { %v7977_v36 = vpop.f32.mrb[0].mxu0 }
 0x467   : > { %v7979_v56 = vpop.f32.mrb[1].mxu0  ;;  %v3288_v21 = vsel %vm7863_vm7, %v7977_v36, -inf }
 0x468   : > { %12258 = vst [vmem:[#allocation40_spill] sm:$0xff] %v7979_v56  ;;  %v3289_v48 = vsel %vm7867_vm8, %v7979_v56, -inf }
 0x469   : > { %v7981_v53 = vpop.permute.xlu1 %3006 }
 0x46a   : > { %v7983_v32 = vpop.f32.mrb[2].mxu0  ;;  %v7985_v41 = vpop.f32.mrb[0].mxu1 }
 0x46b   : > { %v7987_v12 = vpop.f32.mrb[3].mxu0  ;;  %v7989_v25 = vpop.f32.mrb[1].mxu1  ;;  %v3290_v1 = vsel %vm8046_vm15, %v7983_v32, -inf  ;;  %v3426_v22 = vsel %vm12273_vm10, %v7985_v41, -inf  ;;  %vm12280_vm10 = vcmp.eq.f32.partialorder %v7848_v5, %v7850_v7 }
 0x46c   : > { %12259 = vst [vmem:[#allocation41_spill] sm:$0xff] %v7987_v12  ;;  %12260 = vst [vmem:[#allocation42_spill] sm:$0xff] %v7989_v25 }
 0x46e   : > { %v8006_v8 = vpop.f32.mrb[4].mxu0  ;;  %v8008_v50 = vpop.f32.mrb[2].mxu1 }
 0x46f   : > { %12261 = vst [vmem:[#allocation43_spill] sm:$0xff] %v8006_v8  ;;  %v3292_v62 = vsel %vm7880_vm13, %v8006_v8, -inf  ;;  %v8021_v33 = vpop.f32.mrb[5].mxu0  ;;  %v8023_v15 = vpop.f32.mrb[3].mxu1 }
 0x470   : > { %12262 = vst [vmem:[#allocation44_spill] sm:$0xff] %v8021_v33  ;;  %12263 = vst [vmem:[#allocation45_spill] sm:$0xff] %v8023_v15  ;;  %v3352_v63 = vmax.f32 %v3288_v21, %v3292_v62  ;;  %v3293_v19 = vsel %vm7885_vm14, %v8021_v33, -inf  ;;  %v8035_v35 = vpop.permute.xlu1 %2794  ;;  %vm12269_vm14 = vcmp.eq.f32.partialorder %v2963_v16, %v7854_v49  ;;  %v12277_v16 = vmov 0 }
 0x471   : > { %12264 = vst [vmem:[#allocation46_spill] sm:$0xff] %v8035_v35  ;;  %v3389_v47 = vmax.f32 %v3289_v48, %v3293_v19  ;;  %vm8061_vm3 = vmand %vm12269_vm14, %vm3163_vm5  ;;  %vm12276_vm14 = vcmp.eq.f32.partialorder %v7891_v24, %v7854_v49  ;;  %v3427_v62 = vsel %vm12280_vm10, %v7989_v25, -inf  ;;  %vm12286_vm10 = vcmp.ne.f32.partialorder %v7912_v60, %v7846_v17 }
 0x472   : > { %v12271_v46 = vsel %vm8061_vm3, 4294967295, %v12270_v46  ;;  %v8072_v18 = vpop.f32.mrb[4].mxu1  ;;  %v8074_v43 = vpop.f32.mrb[6].mxu0  ;;  %vm8082_vm5 = vmand %vm12276_vm14, %vm12275_vm11  ;;  %v3291_v21 = vsel %vm8061_vm3, %v7987_v12, -inf  ;;  %vm12284_vm11 = vcmp.eq.f32.partialorder %v7838_v37, %v7850_v7  ;;  %vm12290_vm14 = vcmp.eq.f32.partialorder %v7831_v2, %v7846_v17 }
 0x473   : > { %12272 = vst [vmem:[#allocation48_spill] sm:$0xff] %v12271_v46  ;;  %12274 = vst [vmem:[#allocation49_spill] sm:$0xff] %v8074_v43  ;;  %v12278_v16 = vsel %vm8082_vm5, 4294967295, %v12277_v16  ;;  %v3430_v48 = vsel %vm12281_vm12, %v8072_v18, -inf  ;;  %v3294_v24 = vsel %vm7895_vm1, %v8074_v43, -inf  ;;  %v8100_v19 = vpop.f32.mrb[7].mxu0  ;;  %vm12291_vm12 = vcmp.eq.f32.partialorder %v7831_v2, %v7850_v7 }
 0x474   : > { %12279 = vst [vmem:[#allocation50_spill] sm:$0xff] %v12278_v16  ;;  %12282 = vst [vmem:[#allocation51_spill] sm:$0xff] %v8100_v19  ;;  %v8102_v11 = vpop.f32.mrb[5].mxu1  ;;  %v3490_v14 = vmax.f32 %v3426_v22, %v3430_v48  ;;  %v3353_v10 = vmax.f32 %v3290_v1, %v3294_v24  ;;  %v3295_v13 = vsel %vm8082_vm5, %v8100_v19, -inf  ;;  %v8111_v27 = vpop.permute.xlu1 %2799  ;;  %v12287_v1 = vmov 0 }
 0x475   : > { %12283 = vst [vmem:[#allocation52_spill] sm:$0xff] %v8102_v11  ;;  %v3431_v59 = vsel %vm12284_vm11, %v8102_v11, -inf  ;;  %12285 = vst [vmem:[#allocation53_spill] sm:$0xff] %v8111_v27  ;;  %v3390_v61 = vmax.f32 %v3291_v21, %v3295_v13  ;;  %v3428_v13 = vsel %vm12290_vm14, %v8008_v50, -inf  ;;  %vm12302_vm11 = vcmp.eq.f32.partialorder %v2979_v44, %v7852_v40 }
 0x476   : > { %v3527_v46 = vmax.f32 %v3427_v62, %v3431_v59  ;;  %vm8122_vm5 = vmand %vm3104_vm6, %vm12286_vm10  ;;  %v3429_v59 = vsel %vm12291_vm12, %v8023_v15, -inf  ;;  %v8137_v22 = vpop.f32.mrb[8].mxu0  ;;  %v8139_v21 = vpop.f32.mrb[6].mxu1  ;;  %vm12293_vm6 = vcmp.ne.f32.partialorder %v7912_v60, %v7850_v7  ;;  %vm12294_vm10 = vcmp.eq.f32.partialorder %v7908_v9, %v7854_v49 }
 0x477   : > { %v12288_v1 = vsel %vm8122_vm5, 4294967295, %v12287_v1  ;;  %12292 = vst [vmem:[#allocation55_spill] sm:$0xff] %v8137_v22  ;;  %vm8147_vm1 = vmand %vm12294_vm10, %vm12293_vm6  ;;  %v12295_v62 = vmov 0  ;;  %v3296_v48 = vsel %vm8122_vm5, %v8137_v22, -inf  ;;  %vm12298_vm12 = vcmp.eq.f32.partialorder %v7878_v55, %v7846_v17  ;;  %v8158_v16 = vpop.f32.mrb[9].mxu0  ;;  %v8160_v52 = vpop.f32.mrb[7].mxu1 }
 0x478   : > { %12289 = vst [vmem:[#allocation54_spill] sm:$0xff] %v12288_v1  ;;  %v12296_v62 = vsel %vm8147_vm1, 4294967295, %v12295_v62  ;;  %v3432_v24 = vsel %vm12298_vm12, %v8139_v21, -inf  ;;  %12299 = vst [vmem:[#allocation57_spill] sm:$0xff] %v8158_v16  ;;  %vm12301_vm10 = vcmp.ne.f32.partialorder %v7901_v28, %v7846_v17  ;;  %v12303_v9 = vmov 0  ;;  %v2983_v1 = vpop.permute.xlu0 %2982  ;;  %v3019_v33 = vpop.permute.xlu1 %3018 }
 0x479   : > { %12297 = vst [vmem:[#allocation56_spill] sm:$0xff] %v12296_v62  ;;  %12300 = vst [vmem:[#allocation58_spill] sm:$0xff] %v8160_v52  ;;  %v3354_v34 = vmax.f32 %v3352_v63, %v3296_v48  ;;  %v3491_v51 = vmax.f32 %v3428_v13, %v3432_v24  ;;  %v3297_v37 = vsel %vm8147_vm1, %v8158_v16, -inf  ;;  %vm12306_vm12 = vcmp.eq.f32.partialorder %v7878_v55, %v7850_v7 }
 0x47a   : > { %vm8171_vm5 = vmand %vm12302_vm11, %vm12301_vm10  ;;  %v3433_v19 = vsel %vm12306_vm12, %v8160_v52, -inf  ;;  %vm12307_vm6 = vcmp.ne.f32.partialorder %v7901_v28, %v7850_v7  ;;  %vm12308_vm11 = vcmp.eq.f32.partialorder %v2979_v44, %v7854_v49  ;;  %v12309_v2 = vmov 0  ;;  %v8197_v48 = vpop.f32.mrb[10].mxu0  ;;  %v8199_v24 = vpop.f32.mrb[8].mxu1 }
 0x47b   : > { %v12304_v9 = vsel %vm8171_vm5, 4294967295, %v12303_v9  ;;  %vm8187_vm10 = vmand %vm12308_vm11, %vm12307_vm6  ;;  %v3391_v63 = vmax.f32 %v3389_v47, %v3297_v37  ;;  %v3528_v13 = vmax.f32 %v3429_v59, %v3433_v19  ;;  %vm3126_vm14 = vcmp.eq.f32.partialorder %v3019_v33, %v7852_v40  ;;  %12312 = vst [vmem:[#allocation61_spill] sm:$0xff] %v8197_v48  ;;  %v8221_v47 = vpop.f32.mrb[11].mxu0  ;;  %v8223_v19 = vpop.f32.mrb[9].mxu1 }
 0x47c   : > { %12305 = vst [vmem:[#allocation59_spill] sm:$0xff] %v12304_v9  ;;  %v12310_v2 = vsel %vm8187_vm10, 4294967295, %v12309_v2  ;;  %vm3127_vm1 = vcmp.eq.f32.partialorder %v3019_v33, %v7854_v49  ;;  %vm11631_vm6 = vcmp.eq.f32.partialorder %v7912_v60, %v7846_v17  ;;  %vm11632_vm11 = vcmp.eq.f32.partialorder %v7912_v60, %v7850_v7  ;;  %12317 = vst [vmem:[#allocation63_spill] sm:$0xff] %v8221_v47  ;;  %v8241_v12 = vpop.permute.xlu1 %2809 }
 0x47d   : > { %12311 = vst [vmem:[#allocation60_spill] sm:$0xff] %v12310_v2  ;;  %vm12313_vm3 = vcmp.ne.f32.partialorder %v8111_v27, %v7846_v17  ;;  %v12314_v37 = vmov 0  ;;  %vm3108_vm13 = vcmp.eq.f32.partialorder %v2983_v1, %v7852_v40  ;;  %vm3109_vm12 = vcmp.eq.f32.partialorder %v2983_v1, %v7854_v49  ;;  %12318 = vst [vmem:[#allocation64_spill] sm:$0xff] %v8223_v19 }
 0x47e   : > { %vm8208_vm15 = vmand %vm3126_vm14, %vm12313_vm3  ;;  %v3298_v33 = vsel %vm8171_vm5, %v8197_v48, -inf  ;;  %v3434_v44 = vsel %vm11631_vm6, %v8199_v24, -inf  ;;  %vm12319_vm3 = vcmp.ne.f32.partialorder %v8111_v27, %v7850_v7  ;;  %v12320_v59 = vmov 0  ;;  %12323 = vst [vmem:[#allocation66_spill] sm:$0xff] %v8241_v12 }
 0x47f   : > { %v12315_v37 = vsel %vm8208_vm15, 4294967295, %v12314_v37  ;;  %vm8228_vm14 = vmand %vm3127_vm1, %vm12319_vm3  ;;  %v3355_v62 = vmax.f32 %v3353_v10, %v3298_v33  ;;  %v8232_v55 = vmax.f32 %v3490_v14, %v3434_v44  ;;  %v3299_v9 = vsel %vm8187_vm10, %v8221_v47, -inf  ;;  %v8252_v14 = vpop.f32.mrb[12].mxu0  ;;  %v8254_v33 = vpop.f32.mrb[10].mxu1 }
 0x480   : > { %12316 = vst [vmem:[#allocation62_spill] sm:$0xff] %v12315_v37  ;;  %v12321_v59 = vsel %vm8228_vm14, 4294967295, %v12320_v59  ;;  %v3435_v16 = vsel %vm11632_vm11, %v8223_v19, -inf  ;;  %v3392_v5 = vmax.f32 %v3390_v61, %v3299_v9  ;;  %vm12324_vm1 = vcmp.ne.f32.partialorder %v7910_v26, %v7846_v17  ;;  %12328 = vst [vmem:[#allocation68_spill] sm:$0xff] %v8252_v14  ;;  %v8274_v9 = vpop.f32.mrb[13].mxu0  ;;  %v8276_v44 = vpop.f32.mrb[11].mxu1 }
 0x481   : > { %12322 = vst [vmem:[#allocation65_spill] sm:$0xff] %v12321_v59  ;;  %v8243_v56 = vmax.f32 %v3527_v46, %v3435_v16  ;;  %vm8248_vm3 = vmand %vm3108_vm13, %vm12324_vm1  ;;  %v12325_v10 = vmov 0  ;;  %vm11647_vm6 = vcmp.eq.f32.partialorder %v7901_v28, %v7846_v17  ;;  %vm12329_vm11 = vcmp.ne.f32.partialorder %v7910_v26, %v7850_v7  ;;  %v8291_v52 = vpop.permute.xlu1 %3022 }
 0x482   : > { %v12326_v10 = vsel %vm8248_vm3, 4294967295, %v12325_v10  ;;  %vm8263_vm10 = vmand %vm3109_vm12, %vm12329_vm11  ;;  %v12330_v61 = vmov 0  ;;  %v3300_v46 = vsel %vm8248_vm3, %v8252_v14, -inf  ;;  %v3436_v16 = vsel %vm11647_vm6, %v8254_v33, -inf  ;;  %12333 = vst [vmem:[#allocation70_spill] sm:$0xff] %v8274_v9 }
 0x483   : > { %12327 = vst [vmem:[#allocation67_spill] sm:$0xff] %v12326_v10  ;;  %v12331_v61 = vsel %vm8263_vm10, 4294967295, %v12330_v61  ;;  %12334 = vst [vmem:[#allocation71_spill] sm:$0xff] %v8276_v44  ;;  %vm11648_vm13 = vcmp.eq.f32.partialorder %v7901_v28, %v7850_v7  ;;  %v3356_v1 = vmax.f32 %v3354_v34, %v3300_v46  ;;  %v8280_v2 = vmax.f32 %v3491_v51, %v3436_v16  ;;  %v8297_v51 = vpop.f32.mrb[14].mxu0  ;;  %v8299_v34 = vpop.f32.mrb[12].mxu1 }
 0x484   : > { %12332 = vst [vmem:[#allocation69_spill] sm:$0xff] %v12331_v61  ;;  %v3301_v10 = vsel %vm8263_vm10, %v8274_v9, -inf  ;;  %v3437_v60 = vsel %vm11648_vm13, %v8276_v44, -inf  ;;  %vm3176_vm12 = vcmp.ne.f32.partialorder %v7918_v54, %v7846_v17  ;;  %12335 = vst [vmem:[#allocation72_spill] sm:$0xff] %v8297_v51  ;;  %vm11661_vm1 = vcmp.eq.f32.partialorder %v7910_v26, %v7846_v17  ;;  %v2995_v46 = vpop.permute.xlu0 %2994 }
 0x485   : > { %v3393_v47 = vmax.f32 %v3391_v63, %v3301_v10  ;;  %v8289_v19 = vmax.f32 %v3528_v13, %v3437_v60  ;;  %vm11664_vm6 = vcmp.eq.f32.partialorder %v7910_v26, %v7850_v7  ;;  %vm3112_vm13 = vcmp.eq.f32.partialorder %v7948_v0, %v7852_v40  ;;  %v8316_v13 = vpop.f32.mrb[15].mxu0  ;;  %v8318_v10 = vpop.f32.mrb[13].mxu1 }
 0x486   : > { %v3302_v60 = vsel %vm7925_vm4, %v8297_v51, -inf  ;;  %v3438_v63 = vsel %vm11661_vm1, %v8299_v34, -inf  ;;  %12336 = vst [vmem:[#allocation73_spill] sm:$0xff] %v8316_v13  ;;  %12337 = vst [vmem:[#allocation74_spill] sm:$0xff] %v8318_v10  ;;  %v3303_v28 = vsel %vm7937_vm9, %v8316_v13, -inf  ;;  %v3439_v58 = vsel %vm11664_vm6, %v8318_v10, -inf  ;;  %v8379_v13 = vpop.permute.xlu1 %2814 }
 0x487   : > { %v3357_v16 = vmax.f32 %v3355_v62, %v3302_v60  ;;  %v3494_v61 = vmax.f32 %v8232_v55, %v3438_v63  ;;  %v3394_v9 = vmax.f32 %v3392_v5, %v3303_v28  ;;  %v3531_v44 = vmax.f32 %v8243_v56, %v3439_v58  ;;  %vm8332_vm1 = vmand %vm3112_vm13, %vm3176_vm12  ;;  %v8340_v55 = vpop.f32.mrb[16].mxu0  ;;  %v8342_v62 = vpop.f32.mrb[14].mxu1  ;;  %12349 = vst [vmem:[#allocation80_spill] sm:$0xff] %v8379_v13 }
 0x488   : > { %v12338_v11 = vmov 0  ;;  %12341 = vst [vmem:[#allocation76_spill] sm:$0xff] %v8340_v55  ;;  %vm11681_vm6 = vcmp.eq.f32.partialorder %v7915_v45, %v7846_v17  ;;  %vm11682_vm9 = vcmp.eq.f32.partialorder %v7915_v45, %v7850_v7  ;;  %vm12342_vm13 = vcmp.ne.f32.partialorder %v7918_v54, %v7850_v7  ;;  %v8367_v56 = vpop.f32.mrb[17].mxu0  ;;  %v2999_v60 = vpop.permute.xlu0 %2998 }
 0x489   : > { %v12339_v11 = vsel %vm8332_vm1, 4294967295, %v12338_v11  ;;  %vm12343_vm12 = vcmp.eq.f32.partialorder %v7948_v0, %v7854_v49  ;;  %v12344_v5 = vmov 0  ;;  %vm3114_vm11 = vcmp.eq.f32.partialorder %v2995_v46, %v7852_v40  ;;  %12347 = vst [vmem:[#allocation78_spill] sm:$0xff] %v8367_v56  ;;  %v8369_v0 = vpop.f32.mrb[15].mxu1 }
 0x48a   : > { %12340 = vst [vmem:[#allocation75_spill] sm:$0xff] %v12339_v11  ;;  %vm8354_vm10 = vmand %vm12343_vm12, %vm12342_vm13  ;;  %v3304_v28 = vsel %vm8332_vm1, %v8340_v55, -inf  ;;  %v3440_v58 = vsel %vm11681_vm6, %v8342_v62, -inf  ;;  %v3441_v11 = vsel %vm11682_vm9, %v8369_v0, -inf  ;;  %vm12350_vm13 = vcmp.ne.f32.partialorder %v7935_v29, %v7846_v17 }
 0x48b   : > { %v12345_v5 = vsel %vm8354_vm10, 4294967295, %v12344_v5  ;;  %12348 = vst [vmem:[#allocation79_spill] sm:$0xff] %v8369_v0  ;;  %v3358_v63 = vmax.f32 %v3356_v1, %v3304_v28  ;;  %v3495_v30 = vmax.f32 %v8280_v2, %v3440_v58  ;;  %v3305_v26 = vsel %vm8354_vm10, %v8367_v56, -inf  ;;  %vm8385_vm12 = vmand %vm3114_vm11, %vm12350_vm13  ;;  %v8393_v2 = vpop.f32.mrb[18].mxu0  ;;  %v8395_v28 = vpop.f32.mrb[16].mxu1 }
 0x48c   : > { %12346 = vst [vmem:[#allocation77_spill] sm:$0xff] %v12345_v5  ;;  %v3395_v10 = vmax.f32 %v3393_v47, %v3305_v26  ;;  %v3532_v15 = vmax.f32 %v8289_v19, %v3441_v11  ;;  %v12351_v1 = vmov 0  ;;  %12354 = vst [vmem:[#allocation82_spill] sm:$0xff] %v8393_v2  ;;  %vm11699_vm9 = vcmp.eq.f32.partialorder %v7918_v54, %v7846_v17  ;;  %v8419_v19 = vpop.f32.mrb[19].mxu0  ;;  %v8432_v56 = vpop.permute.xlu1 %2819 }
 0x48d   : > { %v12352_v1 = vsel %vm8385_vm12, 4294967295, %v12351_v1  ;;  %vm11700_vm10 = vcmp.eq.f32.partialorder %v7918_v54, %v7850_v7  ;;  %vm12355_vm11 = vcmp.ne.f32.partialorder %v7935_v29, %v7850_v7  ;;  %vm12356_vm13 = vcmp.eq.f32.partialorder %v2995_v46, %v7854_v49  ;;  %12360 = vst [vmem:[#allocation84_spill] sm:$0xff] %v8419_v19  ;;  %v8421_v46 = vpop.f32.mrb[17].mxu1  ;;  %12362 = vst [vmem:[#allocation86_spill] sm:$0xff] %v8432_v56 }
 0x48e   : > { %12353 = vst [vmem:[#allocation81_spill] sm:$0xff] %v12352_v1  ;;  %vm8406_vm1 = vmand %vm12356_vm13, %vm12355_vm11  ;;  %v12357_v11 = vmov 0  ;;  %vm3116_vm4 = vcmp.eq.f32.partialorder %v2999_v60, %v7852_v40  ;;  %vm3117_vm6 = vcmp.eq.f32.partialorder %v2999_v60, %v7854_v49  ;;  %v3306_v26 = vsel %vm8385_vm12, %v8393_v2, -inf }
 0x48f   : > { %v12358_v11 = vsel %vm8406_vm1, 4294967295, %v12357_v11  ;;  %v3442_v47 = vsel %vm11699_vm9, %v8395_v28, -inf  ;;  %12361 = vst [vmem:[#allocation85_spill] sm:$0xff] %v8421_v46  ;;  %v3359_v58 = vmax.f32 %v3357_v16, %v3306_v26  ;;  %v3307_v45 = vsel %vm8406_vm1, %v8419_v19, -inf  ;;  %v8443_v16 = vpop.f32.mrb[20].mxu0  ;;  %v8445_v26 = vpop.f32.mrb[18].mxu1 }
 0x490   : > { %12359 = vst [vmem:[#allocation83_spill] sm:$0xff] %v12358_v11  ;;  %v8423_v5 = vmax.f32 %v3494_v61, %v3442_v47  ;;  %v3443_v1 = vsel %vm11700_vm10, %v8421_v46, -inf  ;;  %v3396_v0 = vmax.f32 %v3394_v9, %v3307_v45  ;;  %vm12363_vm11 = vcmp.ne.f32.partialorder %v7950_v23, %v7846_v17  ;;  %12367 = vst [vmem:[#allocation88_spill] sm:$0xff] %v8443_v16  ;;  %v8467_v47 = vpop.f32.mrb[19].mxu1  ;;  %v8480_v19 = vpop.permute.xlu1 %3034 }
 0x491   : > { %v8434_v25 = vmax.f32 %v3531_v44, %v3443_v1  ;;  %vm8439_vm13 = vmand %vm3116_vm4, %vm12363_vm11  ;;  %v12364_v61 = vmov 0  ;;  %vm11715_vm9 = vcmp.eq.f32.partialorder %v7935_v29, %v7846_v17  ;;  %vm12368_vm10 = vcmp.ne.f32.partialorder %v7950_v23, %v7850_v7  ;;  %v8465_v1 = vpop.f32.mrb[21].mxu0  ;;  %12373 = vst [vmem:[#allocation91_spill] sm:$0xff] %v8467_v47 }
 0x492   : > { %v12365_v61 = vsel %vm8439_vm13, 4294967295, %v12364_v61  ;;  %vm8454_vm1 = vmand %vm3117_vm6, %vm12368_vm10  ;;  %v12369_v45 = vmov 0  ;;  %v3308_v9 = vsel %vm8439_vm13, %v8443_v16, -inf  ;;  %v3444_v44 = vsel %vm11715_vm9, %v8445_v26, -inf  ;;  %12372 = vst [vmem:[#allocation90_spill] sm:$0xff] %v8465_v1 }
 0x493   : > { %12366 = vst [vmem:[#allocation87_spill] sm:$0xff] %v12365_v61  ;;  %v12370_v45 = vsel %vm8454_vm1, 4294967295, %v12369_v45  ;;  %vm11716_vm4 = vcmp.eq.f32.partialorder %v7935_v29, %v7850_v7  ;;  %v3360_v60 = vmax.f32 %v3358_v63, %v3308_v9  ;;  %v8471_v11 = vmax.f32 %v3495_v30, %v3444_v44  ;;  %v3011_v30 = vpop.permute.xlu0 %3010  ;;  %v8488_v63 = vpop.f32.mrb[22].mxu0 }
 0x494   : > { %12371 = vst [vmem:[#allocation89_spill] sm:$0xff] %v12370_v45  ;;  %v3309_v61 = vsel %vm8454_vm1, %v8465_v1, -inf  ;;  %v3445_v54 = vsel %vm11716_vm4, %v8467_v47, -inf  ;;  %vm3184_vm10 = vcmp.ne.f32.partialorder %v7933_v39, %v7846_v17  ;;  %12374 = vst [vmem:[#allocation92_spill] sm:$0xff] %v8488_v63  ;;  %vm3120_vm11 = vcmp.eq.f32.partialorder %v7981_v53, %v7852_v40  ;;  %v8495_v44 = vpop.f32.mrb[20].mxu1  ;;  %v8514_v45 = vpop.permute.xlu1 %2829 }
 0x495   : > { %v3397_v46 = vmax.f32 %v3395_v10, %v3309_v61  ;;  %v8482_v16 = vmax.f32 %v3532_v15, %v3445_v54  ;;  %v3310_v9 = vsel %vm7965_vm0, %v8488_v63, -inf  ;;  %vm11725_vm9 = vcmp.eq.f32.partialorder %v7950_v23, %v7846_v17  ;;  %v8499_v54 = vpop.f32.mrb[23].mxu0  ;;  %v8512_v6 = vpop.f32.mrb[21].mxu1  ;;  %12377 = vst [vmem:[#allocation95_spill] sm:$0xff] %v8514_v45 }
 0x496   : > { %12375 = vst [vmem:[#allocation93_spill] sm:$0xff] %v8499_v54  ;;  %vm11732_vm4 = vcmp.eq.f32.partialorder %v7950_v23, %v7850_v7  ;;  %vm3121_vm6 = vcmp.eq.f32.partialorder %v7981_v53, %v7854_v49  ;;  %v3361_v15 = vmax.f32 %v3359_v58, %v3310_v9  ;;  %v3446_v10 = vsel %vm11725_vm9, %v8495_v44, -inf  ;;  %12376 = vst [vmem:[#allocation94_spill] sm:$0xff] %v8512_v6 }
 0x497   : > { %v3311_v61 = vsel %vm7969_vm2, %v8499_v54, -inf  ;;  %v3498_v29 = vmax.f32 %v8423_v5, %v3446_v10  ;;  %v3447_v58 = vsel %vm11732_vm4, %v8512_v6, -inf  ;;  %vm8527_vm9 = vmand %vm3120_vm11, %vm3184_vm10  ;;  %v12378_v9 = vmov 0  ;;  %v8532_v54 = vpop.f32.mrb[24].mxu0  ;;  %v3015_v10 = vpop.permute.xlu0 %3014 }
 0x498   : > { %v3398_v1 = vmax.f32 %v3396_v0, %v3311_v61  ;;  %v12379_v9 = vsel %vm8527_vm9, 4294967295, %v12378_v9  ;;  %v3535_v20 = vmax.f32 %v8434_v25, %v3447_v58  ;;  %12381 = vst [vmem:[#allocation97_spill] sm:$0xff] %v8532_v54  ;;  %vm11753_vm2 = vcmp.eq.f32.partialorder %v7955_v57, %v7846_v17  ;;  %v8552_v25 = vpop.f32.mrb[22].mxu1  ;;  %v8554_v0 = vpop.f32.mrb[25].mxu0 }
 0x499   : > { %12380 = vst [vmem:[#allocation96_spill] sm:$0xff] %v12379_v9  ;;  %vm11754_vm4 = vcmp.eq.f32.partialorder %v7955_v57, %v7850_v7  ;;  %vm12382_vm0 = vcmp.ne.f32.partialorder %v7933_v39, %v7850_v7  ;;  %v12383_v5 = vmov 0  ;;  %vm3186_vm10 = vcmp.ne.f32.partialorder %v7975_v42, %v7846_v17  ;;  %12386 = vst [vmem:[#allocation99_spill] sm:$0xff] %v8554_v0  ;;  %v8565_v9 = vpop.f32.mrb[23].mxu1 }
 0x49a   : > { %vm8541_vm1 = vmand %vm3121_vm6, %vm12382_vm0  ;;  %vm3122_vm11 = vcmp.eq.f32.partialorder %v3011_v30, %v7852_v40  ;;  %v3312_v53 = vsel %vm8527_vm9, %v8532_v54, -inf  ;;  %vm3187_vm0 = vcmp.ne.f32.partialorder %v7975_v42, %v7850_v7  ;;  %v3448_v58 = vsel %vm11753_vm2, %v8552_v25, -inf  ;;  %12387 = vst [vmem:[#allocation100_spill] sm:$0xff] %v8565_v9 }
 0x49b   : > { %v12384_v5 = vsel %vm8541_vm1, 4294967295, %v12383_v5  ;;  %v3362_v61 = vmax.f32 %v3360_v60, %v3312_v53  ;;  %v3313_v23 = vsel %vm8541_vm1, %v8554_v0, -inf  ;;  %v3499_v6 = vmax.f32 %v8471_v11, %v3448_v58  ;;  %vm8575_vm6 = vmand %vm3122_vm11, %vm3186_vm10  ;;  %v8582_v0 = vpop.f32.mrb[26].mxu0 }
 0x49c   : > { %12385 = vst [vmem:[#allocation98_spill] sm:$0xff] %v12384_v5  ;;  %v3399_v47 = vmax.f32 %v3397_v46, %v3313_v23  ;;  %v3449_v54 = vsel %vm11754_vm4, %v8565_v9, -inf  ;;  %v12388_v60 = vmov 0  ;;  %v8580_v5 = vpop.permute.xlu1 %3038  ;;  %12391 = vst [vmem:[#allocation102_spill] sm:$0xff] %v8582_v0  ;;  %vm11771_vm2 = vcmp.eq.f32.partialorder %v7933_v39, %v7846_v17  ;;  %v8604_v46 = vpop.f32.mrb[24].mxu1 }
 0x49d   : > { %v12389_v60 = vsel %vm8575_vm6, 4294967295, %v12388_v60  ;;  %v3536_v53 = vmax.f32 %v8482_v16, %v3449_v54  ;;  %vm11786_vm13 = vcmp.eq.f32.partialorder %v7933_v39, %v7850_v7  ;;  %vm12392_vm10 = vcmp.eq.f32.partialorder %v3011_v30, %v7854_v49  ;;  %v8606_v16 = vpop.f32.mrb[27].mxu0  ;;  %v8617_v57 = vpop.f32.mrb[25].mxu1 }
 0x49e   : > { %12390 = vst [vmem:[#allocation101_spill] sm:$0xff] %v12389_v60  ;;  %vm8593_vm11 = vmand %vm12392_vm10, %vm3187_vm0  ;;  %v12393_v23 = vmov 0  ;;  %vm3188_vm4 = vcmp.ne.f32.partialorder %v8035_v35, %v7846_v17  ;;  %vm3124_vm1 = vcmp.eq.f32.partialorder %v3015_v10, %v7852_v40  ;;  %vm3125_vm9 = vcmp.eq.f32.partialorder %v3015_v10, %v7854_v49  ;;  %v8631_v63 = vpop.f32.mrb[28].mxu0 }
 0x49f   : > { %v12394_v23 = vsel %vm8593_vm11, 4294967295, %v12393_v23  ;;  %v3314_v11 = vsel %vm8575_vm6, %v8582_v0, -inf  ;;  %12396 = vst [vmem:[#allocation104_spill] sm:$0xff] %v8606_v16  ;;  %vm3189_vm0 = vcmp.ne.f32.partialorder %v8035_v35, %v7850_v7  ;;  %v3450_v54 = vsel %vm11771_vm2, %v8604_v46, -inf  ;;  %12397 = vst [vmem:[#allocation105_spill] sm:$0xff] %v8617_v57 }
 0x4a0   : > { %12395 = vst [vmem:[#allocation103_spill] sm:$0xff] %v12394_v23  ;;  %v3363_v30 = vmax.f32 %v3361_v15, %v3314_v11  ;;  %v3315_v58 = vsel %vm8593_vm11, %v8606_v16, -inf  ;;  %v8619_v60 = vmax.f32 %v3498_v29, %v3450_v54  ;;  %v3451_v0 = vsel %vm11786_vm13, %v8617_v57, -inf  ;;  %vm8625_vm10 = vmand %vm3124_vm1, %vm3188_vm4  ;;  %v8633_v23 = vpop.permute.xlu1 %2834  ;;  %v8644_v54 = vpop.f32.mrb[26].mxu1 }
 0x4a1   : > { %v3400_v9 = vmax.f32 %v3398_v1, %v3315_v58  ;;  %v12398_v15 = vmov 0  ;;  %v8629_v11 = vmax.f32 %v3535_v20, %v3451_v0  ;;  %12401 = vst [vmem:[#allocation107_spill] sm:$0xff] %v8631_v63  ;;  %12402 = vst [vmem:[#allocation108_spill] sm:$0xff] %v8633_v23  ;;  %v12403_v29 = vmov 0  ;;  %v8648_v20 = vpop.f32.mrb[29].mxu0  ;;  %v8657_v39 = vpop.f32.mrb[27].mxu1 }
 0x4a2   : > { %v12399_v15 = vsel %vm8625_vm10, 4294967295, %v12398_v15  ;;  %vm8637_vm2 = vmand %vm3125_vm9, %vm3189_vm0  ;;  %v3316_v1 = vsel %vm8625_vm10, %v8631_v63, -inf  ;;  %vm11784_vm1 = vcmp.eq.f32.partialorder %v7975_v42, %v7846_v17  ;;  %12406 = vst [vmem:[#allocation110_spill] sm:$0xff] %v8648_v20  ;;  %vm11785_vm9 = vcmp.eq.f32.partialorder %v7975_v42, %v7850_v7 }
 0x4a3   : > { %12400 = vst [vmem:[#allocation106_spill] sm:$0xff] %v12399_v15  ;;  %v12404_v29 = vsel %vm8637_vm2, 4294967295, %v12403_v29  ;;  %v3364_v0 = vmax.f32 %v3362_v61, %v3316_v1  ;;  %v3452_v10 = vsel %vm11784_vm1, %v8644_v54, -inf  ;;  %v3317_v58 = vsel %vm8637_vm2, %v8648_v20, -inf  ;;  %12407 = vst [vmem:[#allocation111_spill] sm:$0xff] %v8657_v39  ;;  %v3027_v15 = vpop.permute.xlu0 %3026 }
 0x4a4   : > { %12405 = vst [vmem:[#allocation109_spill] sm:$0xff] %v12404_v29  ;;  %v8661_v16 = vmax.f32 %v3499_v6, %v3452_v10  ;;  %v3401_v57 = vmax.f32 %v3399_v47, %v3317_v58  ;;  %v3453_v61 = vsel %vm11785_vm9, %v8657_v39, -inf  ;;  %vm3192_vm4 = vcmp.ne.f32.partialorder %v7946_v31, %v7846_v17  ;;  %v8673_v29 = vpop.f32.mrb[30].mxu0  ;;  %v8675_v20 = vpop.permute.xlu1 %2839 }
 0x4a5   : > { %v8671_v1 = vmax.f32 %v3536_v53, %v3453_v61  ;;  %12408 = vst [vmem:[#allocation112_spill] sm:$0xff] %v8673_v29  ;;  %12409 = vst [vmem:[#allocation113_spill] sm:$0xff] %v8675_v20  ;;  %vm3128_vm1 = vcmp.eq.f32.partialorder %v8291_v52, %v7852_v40  ;;  %v3318_v6 = vsel %vm8208_vm15, %v8673_v29, -inf  ;;  %v8682_v47 = vpop.f32.mrb[28].mxu1  ;;  %vm11795_vm9 = vcmp.eq.f32.partialorder %v8035_v35, %v7846_v17  ;;  %v8686_v10 = vpop.f32.mrb[31].mxu0 }
 0x4a6   : > { %12410 = vst [vmem:[#allocation114_spill] sm:$0xff] %v8686_v10  ;;  %vm11800_vm13 = vcmp.eq.f32.partialorder %v8035_v35, %v7850_v7  ;;  %vm3129_vm0 = vcmp.eq.f32.partialorder %v8291_v52, %v7854_v49  ;;  %v3365_v53 = vmax.f32 %v3363_v30, %v3318_v6  ;;  %v3454_v58 = vsel %vm11795_vm9, %v8682_v47, -inf  ;;  %v8699_v37 = vpop.f32.mrb[29].mxu1  ;;  %vm8709_vm15 = vmand %vm3128_vm1, %vm3192_vm4 }
 0x4a7   : > { %v3319_v61 = vsel %vm8228_vm14, %v8686_v10, -inf  ;;  %12411 = vst [vmem:[#allocation115_spill] sm:$0xff] %v8699_v37  ;;  %v3502_v42 = vmax.f32 %v8619_v60, %v3454_v58  ;;  %v3455_v52 = vsel %vm11800_vm13, %v8699_v37, -inf  ;;  %v12412_v30 = vmov 0  ;;  %v3031_v6 = vpop.permute.xlu0 %3030  ;;  %v8730_v59 = vpop.f32.mrb[30].mxu1 }
 0x4a8   : > { %v3402_v39 = vmax.f32 %v3400_v9, %v3319_v61  ;;  %v12413_v30 = vsel %vm8709_vm15, 4294967295, %v12412_v30  ;;  %vm3130_vm9 = vcmp.eq.f32.partialorder %v3027_v15, %v7852_v40  ;;  %v3539_v60 = vmax.f32 %v8629_v11, %v3455_v52  ;;  %v8716_v9 = vpop.f32.mrb[32].mxu0  ;;  %v8747_v10 = vpop.f32.mrb[31].mxu1 }
 0x4a9   : > { %12414 = vst [vmem:[#allocation116_spill] sm:$0xff] %v12413_v30  ;;  %12415 = vst [vmem:[#allocation117_spill] sm:$0xff] %v8716_v9  ;;  %vm12416_vm2 = vcmp.ne.f32.partialorder %v7946_v31, %v7850_v7  ;;  %v12417_v58 = vmov 0  ;;  %vm3194_vm1 = vcmp.ne.f32.partialorder %v8241_v12, %v7846_v17  ;;  %v3320_v61 = vsel %vm8709_vm15, %v8716_v9, -inf  ;;  %v8734_v11 = vpop.f32.mrb[33].mxu0  ;;  %v8749_v37 = vpop.permute.xlu1 %3050 }
 0x4aa   : > { %vm8721_vm13 = vmand %vm3129_vm0, %vm12416_vm2  ;;  %vm11815_vm4 = vcmp.eq.f32.partialorder %v8111_v27, %v7846_v17  ;;  %12420 = vst [vmem:[#allocation119_spill] sm:$0xff] %v8734_v11  ;;  %vm11822_vm2 = vcmp.eq.f32.partialorder %v8111_v27, %v7850_v7  ;;  %vm3195_vm0 = vcmp.ne.f32.partialorder %v8241_v12, %v7850_v7  ;;  %v3366_v52 = vmax.f32 %v3364_v0, %v3320_v61 }
 0x4ab   : > { %v12418_v58 = vsel %vm8721_vm13, 4294967295, %v12417_v58  ;;  %v3456_v30 = vsel %vm11815_vm4, %v8730_v59, -inf  ;;  %v3321_v35 = vsel %vm8721_vm13, %v8734_v11, -inf  ;;  %12421 = vst [vmem:[#allocation120_spill] sm:$0xff] %v8747_v10  ;;  %v3457_v0 = vsel %vm11822_vm2, %v8747_v10, -inf  ;;  %vm8761_vm4 = vmand %vm3130_vm9, %vm3194_vm1  ;;  %v8766_v11 = vpop.f32.mrb[34].mxu0 }
 0x4ac   : > { %12419 = vst [vmem:[#allocation118_spill] sm:$0xff] %v12418_v58  ;;  %v3503_v9 = vmax.f32 %v8661_v16, %v3456_v30  ;;  %v3403_v29 = vmax.f32 %v3401_v57, %v3321_v35  ;;  %v12422_v61 = vmov 0  ;;  %v3540_v58 = vmax.f32 %v8671_v1, %v3457_v0  ;;  %12425 = vst [vmem:[#allocation122_spill] sm:$0xff] %v8766_v11  ;;  %v8785_v16 = vpop.f32.mrb[32].mxu1  ;;  %v8787_v1 = vpop.f32.mrb[35].mxu0 }
 0x4ad   : > { %v12423_v61 = vsel %vm8761_vm4, 4294967295, %v12422_v61  ;;  %vm11839_vm14 = vcmp.eq.f32.partialorder %v7946_v31, %v7846_v17  ;;  %vm11840_vm13 = vcmp.eq.f32.partialorder %v7946_v31, %v7850_v7  ;;  %vm12426_vm2 = vcmp.eq.f32.partialorder %v3027_v15, %v7854_v49  ;;  %12430 = vst [vmem:[#allocation124_spill] sm:$0xff] %v8787_v1  ;;  %v8798_v27 = vpop.f32.mrb[33].mxu1 }
 0x4ae   : > { %12424 = vst [vmem:[#allocation121_spill] sm:$0xff] %v12423_v61  ;;  %vm8774_vm15 = vmand %vm12426_vm2, %vm3195_vm0  ;;  %v12427_v57 = vmov 0  ;;  %vm3196_vm9 = vcmp.ne.f32.partialorder %v8379_v13, %v7846_v17  ;;  %vm3132_vm1 = vcmp.eq.f32.partialorder %v3031_v6, %v7852_v40  ;;  %v3322_v35 = vsel %vm8761_vm4, %v8766_v11, -inf  ;;  %v8800_v61 = vpop.permute.xlu1 %2849 }
 0x4af   : > { %v12428_v57 = vsel %vm8774_vm15, 4294967295, %v12427_v57  ;;  %v3367_v15 = vmax.f32 %v3365_v53, %v3322_v35  ;;  %v3458_v30 = vsel %vm11839_vm14, %v8785_v16, -inf  ;;  %v3323_v0 = vsel %vm8774_vm15, %v8787_v1, -inf  ;;  %12431 = vst [vmem:[#allocation125_spill] sm:$0xff] %v8798_v27  ;;  %12432 = vst [vmem:[#allocation126_spill] sm:$0xff] %v8800_v61  ;;  %v8817_v1 = vpop.f32.mrb[36].mxu0 }
 0x4b0   : > { %12429 = vst [vmem:[#allocation123_spill] sm:$0xff] %v12428_v57  ;;  %v8802_v10 = vmax.f32 %v3502_v42, %v3458_v30  ;;  %v3404_v11 = vmax.f32 %v3402_v39, %v3323_v0  ;;  %v3459_v53 = vsel %vm11840_vm13, %v8798_v27, -inf  ;;  %vm8811_vm0 = vmand %vm3132_vm1, %vm3196_vm9  ;;  %v12433_v35 = vmov 0  ;;  %v8843_v30 = vpop.f32.mrb[37].mxu0 }
 0x4b1   : > { %v12434_v35 = vsel %vm8811_vm0, 4294967295, %v12433_v35  ;;  %v8815_v57 = vmax.f32 %v3539_v60, %v3459_v53  ;;  %12436 = vst [vmem:[#allocation128_spill] sm:$0xff] %v8817_v1  ;;  %vm11855_vm14 = vcmp.eq.f32.partialorder %v8241_v12, %v7846_v17  ;;  %vm11856_vm10 = vcmp.eq.f32.partialorder %v8241_v12, %v7850_v7  ;;  %v8841_v60 = vpop.f32.mrb[34].mxu1  ;;  %12442 = vst [vmem:[#allocation130_spill] sm:$0xff] %v8843_v30 }
 0x4b2   : > { %12435 = vst [vmem:[#allocation127_spill] sm:$0xff] %v12434_v35  ;;  %vm3198_vm13 = vcmp.ne.f32.partialorder %v8432_v56, %v7846_v17  ;;  %vm3134_vm9 = vcmp.eq.f32.partialorder %v8480_v19, %v7852_v40  ;;  %vm12437_vm1 = vcmp.ne.f32.partialorder %v8379_v13, %v7850_v7  ;;  %vm12438_vm15 = vcmp.eq.f32.partialorder %v3031_v6, %v7854_v49  ;;  %v8854_v31 = vpop.f32.mrb[35].mxu1 }
 0x4b3   : > { %vm8834_vm4 = vmand %vm12438_vm15, %vm12437_vm1  ;;  %v12439_v39 = vmov 0  ;;  %v3324_v42 = vsel %vm8811_vm0, %v8817_v1, -inf  ;;  %vm3135_vm2 = vcmp.eq.f32.partialorder %v8480_v19, %v7854_v49  ;;  %v3460_v6 = vsel %vm11855_vm14, %v8841_v60, -inf  ;;  %12443 = vst [vmem:[#allocation131_spill] sm:$0xff] %v8854_v31 }
 0x4b4   : > { %v12440_v39 = vsel %vm8834_vm4, 4294967295, %v12439_v39  ;;  %v3368_v0 = vmax.f32 %v3366_v52, %v3324_v42  ;;  %v3325_v53 = vsel %vm8834_vm4, %v8843_v30, -inf  ;;  %v8856_v35 = vmax.f32 %v3503_v9, %v3460_v6  ;;  %v8862_v52 = vpop.permute.xlu1 %3054  ;;  %vm8867_vm15 = vmand %vm3134_vm9, %vm3198_vm13  ;;  %v8873_v9 = vpop.f32.mrb[38].mxu0 }
 0x4b5   : > { %12441 = vst [vmem:[#allocation129_spill] sm:$0xff] %v12440_v39  ;;  %v3405_v27 = vmax.f32 %v3403_v29, %v3325_v53  ;;  %v3461_v19 = vsel %vm11856_vm10, %v8854_v31, -inf  ;;  %v12444_v42 = vmov 0  ;;  %v3043_v39 = vpop.permute.xlu0 %3042  ;;  %12447 = vst [vmem:[#allocation133_spill] sm:$0xff] %v8873_v9  ;;  %vm12448_vm1 = vcmp.ne.f32.partialorder %v8432_v56, %v7850_v7  ;;  %v8887_v53 = vpop.f32.mrb[36].mxu1 }
 0x4b6   : > { %v12445_v42 = vsel %vm8867_vm15, 4294967295, %v12444_v42  ;;  %v8871_v30 = vmax.f32 %v3540_v58, %v3461_v19  ;;  %vm8878_vm14 = vmand %vm3135_vm2, %vm12448_vm1  ;;  %v12449_v29 = vmov 0  ;;  %vm3136_vm10 = vcmp.eq.f32.partialorder %v8580_v5, %v7852_v40  ;;  %v8891_v58 = vpop.f32.mrb[39].mxu0  ;;  %v8904_v31 = vpop.f32.mrb[37].mxu1 }
 0x4b7   : > { %12446 = vst [vmem:[#allocation132_spill] sm:$0xff] %v12445_v42  ;;  %v12450_v29 = vsel %vm8878_vm14, 4294967295, %v12449_v29  ;;  %v3326_v6 = vsel %vm8867_vm15, %v8873_v9, -inf  ;;  %vm11867_vm13 = vcmp.eq.f32.partialorder %v8379_v13, %v7846_v17  ;;  %12452 = vst [vmem:[#allocation135_spill] sm:$0xff] %v8891_v58  ;;  %vm11872_vm2 = vcmp.eq.f32.partialorder %v8379_v13, %v7850_v7  ;;  %v8941_v13 = vpop.f32.mrb[38].mxu1 }
 0x4b8   : > { %12451 = vst [vmem:[#allocation134_spill] sm:$0xff] %v12450_v29  ;;  %v3369_v19 = vmax.f32 %v3367_v15, %v3326_v6  ;;  %v3462_v42 = vsel %vm11867_vm13, %v8887_v53, -inf  ;;  %v3327_v12 = vsel %vm8878_vm14, %v8891_v58, -inf  ;;  %12453 = vst [vmem:[#allocation136_spill] sm:$0xff] %v8904_v31  ;;  %vm3200_vm1 = vcmp.ne.f32.partialorder %v7952_v38, %v7846_v17  ;;  %v8958_v58 = vpop.f32.mrb[39].mxu1 }
 0x4b9   : > { %v3506_v9 = vmax.f32 %v8802_v10, %v3462_v42  ;;  %v3406_v1 = vmax.f32 %v3404_v11, %v3327_v12  ;;  %v3463_v15 = vsel %vm11872_vm2, %v8904_v31, -inf  ;;  %vm3201_vm13 = vcmp.ne.f32.partialorder %v7952_v38, %v7850_v7  ;;  %vm8918_vm9 = vmand %vm3136_vm10, %vm3200_vm1  ;;  %v8925_v10 = vpop.permute.xlu1 %2854  ;;  %v8927_v11 = vpop.f32.mrb[40].mxu0  ;;  %12464 = vst [vmem:[#allocation142_spill] sm:$0xff] %v8958_v58 }
 0x4ba   : > { %v12454_v6 = vmov 0  ;;  %vm3138_vm14 = vcmp.eq.f32.partialorder %v3043_v39, %v7852_v40  ;;  %v3543_v12 = vmax.f32 %v8815_v57, %v3463_v15  ;;  %12457 = vst [vmem:[#allocation138_spill] sm:$0xff] %v8925_v10  ;;  %12458 = vst [vmem:[#allocation139_spill] sm:$0xff] %v8927_v11  ;;  %vm12459_vm2 = vcmp.eq.f32.partialorder %v8580_v5, %v7854_v49  ;;  %v8945_v57 = vpop.f32.mrb[41].mxu0  ;;  %v3047_v31 = vpop.permute.xlu0 %3046 }
 0x4bb   : > { %v12455_v6 = vsel %vm8918_vm9, 4294967295, %v12454_v6  ;;  %vm8932_vm4 = vmand %vm12459_vm2, %vm3201_vm13  ;;  %v12460_v42 = vmov 0  ;;  %vm3202_vm10 = vcmp.ne.f32.partialorder %v8514_v45, %v7846_v17  ;;  %v3328_v29 = vsel %vm8918_vm9, %v8927_v11, -inf  ;;  %12463 = vst [vmem:[#allocation141_spill] sm:$0xff] %v8945_v57 }
 0x4bc   : > { %12456 = vst [vmem:[#allocation137_spill] sm:$0xff] %v12455_v6  ;;  %v12461_v42 = vsel %vm8932_vm4, 4294967295, %v12460_v42  ;;  %vm11889_vm1 = vcmp.eq.f32.partialorder %v8432_v56, %v7846_v17  ;;  %vm11894_vm13 = vcmp.eq.f32.partialorder %v8432_v56, %v7850_v7  ;;  %vm3203_vm2 = vcmp.ne.f32.partialorder %v8514_v45, %v7850_v7 }
 0x4bd   : > { %12462 = vst [vmem:[#allocation140_spill] sm:$0xff] %v12461_v42  ;;  %v3370_v5 = vmax.f32 %v3368_v0, %v3328_v29  ;;  %v3464_v15 = vsel %vm11889_vm1, %v8941_v13, -inf  ;;  %v3329_v6 = vsel %vm8932_vm4, %v8945_v57, -inf  ;;  %v3465_v0 = vsel %vm11894_vm13, %v8958_v58, -inf  ;;  %vm8970_vm1 = vmand %vm3138_vm14, %vm3202_vm10  ;;  %v8975_v57 = vpop.f32.mrb[42].mxu0 }
 0x4be   : > { %v3507_v11 = vmax.f32 %v8856_v35, %v3464_v15  ;;  %v3407_v63 = vmax.f32 %v3405_v27, %v3329_v6  ;;  %v12465_v29 = vmov 0  ;;  %v3544_v42 = vmax.f32 %v8871_v30, %v3465_v0  ;;  %12468 = vst [vmem:[#allocation144_spill] sm:$0xff] %v8975_v57  ;;  %v8979_v27 = vpop.permute.xlu1 %2859  ;;  %v8991_v30 = vpop.f32.mrb[40].mxu1 }
 0x4bf   : > { %v12466_v29 = vsel %vm8970_vm1, 4294967295, %v12465_v29  ;;  %12469 = vst [vmem:[#allocation145_spill] sm:$0xff] %v8979_v27  ;;  %vm12470_vm13 = vcmp.eq.f32.partialorder %v3043_v39, %v7854_v49  ;;  %v12471_v35 = vmov 0  ;;  %vm3140_vm14 = vcmp.eq.f32.partialorder %v3047_v31, %v7852_v40  ;;  %v8993_v15 = vpop.f32.mrb[43].mxu0  ;;  %v9007_v56 = vpop.f32.mrb[41].mxu1 }
 0x4c0   : > { %12467 = vst [vmem:[#allocation143_spill] sm:$0xff] %v12466_v29  ;;  %vm8983_vm4 = vmand %vm12470_vm13, %vm3203_vm2  ;;  %v3330_v6 = vsel %vm8970_vm1, %v8975_v57, -inf  ;;  %vm11913_vm10 = vcmp.eq.f32.partialorder %v7952_v38, %v7850_v7  ;;  %vm3204_vm15 = vcmp.ne.f32.partialorder %v8633_v23, %v7846_v17  ;;  %vm12475_vm2 = vcmp.eq.f32.partialorder %v7952_v38, %v7846_v17 }
 0x4c1   : > { %v12472_v35 = vsel %vm8983_vm4, 4294967295, %v12471_v35  ;;  %12474 = vst [vmem:[#allocation147_spill] sm:$0xff] %v8993_v15  ;;  %v3371_v39 = vmax.f32 %v3369_v19, %v3330_v6  ;;  %v3466_v0 = vsel %vm12475_vm2, %v8991_v30, -inf  ;;  %v3331_v29 = vsel %vm8983_vm4, %v8993_v15, -inf  ;;  %12476 = vst [vmem:[#allocation148_spill] sm:$0xff] %v9007_v56  ;;  %v9019_v6 = vpop.f32.mrb[44].mxu0 }
 0x4c2   : > { %12473 = vst [vmem:[#allocation146_spill] sm:$0xff] %v12472_v35  ;;  %v9009_v58 = vmax.f32 %v3506_v9, %v3466_v0  ;;  %v3408_v57 = vmax.f32 %v3406_v1, %v3331_v29  ;;  %v3467_v2 = vsel %vm11913_vm10, %v9007_v56, -inf  ;;  %vm3205_vm13 = vcmp.ne.f32.partialorder %v8633_v23, %v7850_v7  ;;  %12477 = vst [vmem:[#allocation149_spill] sm:$0xff] %v9019_v6  ;;  %v9036_v1 = vpop.f32.mrb[42].mxu1  ;;  %v9038_v9 = vpop.permute.xlu1 %3066 }
 0x4c3   : > { %v9017_v19 = vmax.f32 %v3543_v12, %v3467_v2  ;;  %vm9023_vm2 = vmand %vm3140_vm14, %vm3204_vm15  ;;  %v12478_v35 = vmov 0  ;;  %vm11920_vm4 = vcmp.eq.f32.partialorder %v8514_v45, %v7846_v17  ;;  %vm3207_vm14 = vcmp.ne.f32.partialorder %v8675_v20, %v7850_v7  ;;  %v9050_v0 = vpop.f32.mrb[45].mxu0  ;;  %v9061_v38 = vpop.f32.mrb[43].mxu1 }
 0x4c4   : > { %v12479_v35 = vsel %vm9023_vm2, 4294967295, %v12478_v35  ;;  %v3332_v2 = vsel %vm9023_vm2, %v9019_v6, -inf  ;;  %vm3143_vm1 = vcmp.eq.f32.partialorder %v8749_v37, %v7854_v49  ;;  %v3468_v29 = vsel %vm11920_vm4, %v9036_v1, -inf  ;;  %12481 = vst [vmem:[#allocation151_spill] sm:$0xff] %v9050_v0  ;;  %12486 = vst [vmem:[#allocation153_spill] sm:$0xff] %v9061_v38  ;;  %v3059_v56 = vpop.permute.xlu0 %3058 }
 0x4c5   : > { %12480 = vst [vmem:[#allocation150_spill] sm:$0xff] %v12479_v35  ;;  %v3372_v12 = vmax.f32 %v3370_v5, %v3332_v2  ;;  %vm12482_vm10 = vcmp.eq.f32.partialorder %v3047_v31, %v7854_v49  ;;  %v12483_v35 = vmov 0  ;;  %v9063_v15 = vmax.f32 %v3507_v11, %v3468_v29 }
 0x4c6   : > { %vm9057_vm15 = vmand %vm12482_vm10, %vm3205_vm13  ;;  %vm12487_vm4 = vcmp.eq.f32.partialorder %v8514_v45, %v7850_v7  ;;  %vm12488_vm2 = vcmp.ne.f32.partialorder %v8675_v20, %v7846_v17  ;;  %vm12489_vm10 = vcmp.eq.f32.partialorder %v8749_v37, %v7852_v40  ;;  %v12490_v31 = vmov 0  ;;  %v9095_v45 = vpop.f32.mrb[44].mxu1 }
 0x4c7   : > { %v12484_v35 = vsel %vm9057_vm15, 4294967295, %v12483_v35  ;;  %v3333_v5 = vsel %vm9057_vm15, %v9050_v0, -inf  ;;  %v3469_v2 = vsel %vm12487_vm4, %v9061_v38, -inf  ;;  %vm9078_vm13 = vmand %vm12489_vm10, %vm12488_vm2  ;;  %v12494_v0 = vmov 0  ;;  %v9114_v38 = vpop.permute.xlu1 %2869 }
 0x4c8   : > { %12485 = vst [vmem:[#allocation152_spill] sm:$0xff] %v12484_v35  ;;  %v12491_v31 = vsel %vm9078_vm13, 4294967295, %v12490_v31  ;;  %v3409_v11 = vmax.f32 %v3407_v63, %v3333_v5  ;;  %v9082_v29 = vmax.f32 %v3544_v42, %v3469_v2  ;;  %v9084_v35 = vpop.f32.mrb[46].mxu0  ;;  %vm9086_vm15 = vmand %vm3143_vm1, %vm3207_vm14  ;;  %vm11939_vm2 = vcmp.eq.f32.partialorder %v8633_v23, %v7846_v17 }
 0x4c9   : > { %12492 = vst [vmem:[#allocation154_spill] sm:$0xff] %v12491_v31  ;;  %12493 = vst [vmem:[#allocation155_spill] sm:$0xff] %v9084_v35  ;;  %v12495_v0 = vsel %vm9086_vm15, 4294967295, %v12494_v0  ;;  %v3334_v37 = vsel %vm9078_vm13, %v9084_v35, -inf  ;;  %v9099_v63 = vpop.f32.mrb[47].mxu0  ;;  %vm11946_vm1 = vcmp.eq.f32.partialorder %v8633_v23, %v7850_v7  ;;  %v3470_v5 = vsel %vm11939_vm2, %v9095_v45, -inf }
 0x4ca   : > { %12496 = vst [vmem:[#allocation156_spill] sm:$0xff] %v12495_v0  ;;  %12497 = vst [vmem:[#allocation157_spill] sm:$0xff] %v9099_v63  ;;  %v3373_v42 = vmax.f32 %v3371_v39, %v3334_v37  ;;  %v3335_v2 = vsel %vm9086_vm15, %v9099_v63, -inf  ;;  %v9112_v31 = vpop.f32.mrb[45].mxu1  ;;  %vm3208_vm10 = vcmp.ne.f32.partialorder %v7957_v3, %v7846_v17  ;;  %v3510_v35 = vmax.f32 %v9009_v58, %v3470_v5 }
 0x4cb   : > { %12498 = vst [vmem:[#allocation158_spill] sm:$0xff] %v9112_v31  ;;  %12499 = vst [vmem:[#allocation159_spill] sm:$0xff] %v9114_v38  ;;  %v3410_v39 = vmax.f32 %v3408_v57, %v3335_v2  ;;  %v3471_v37 = vsel %vm11946_vm1, %v9112_v31, -inf  ;;  %vm3209_vm4 = vcmp.ne.f32.partialorder %v7957_v3, %v7850_v7  ;;  %vm12500_vm15 = vcmp.eq.f32.partialorder %v8862_v52, %v7852_v40  ;;  %v9135_v57 = vpop.f32.mrb[48].mxu0  ;;  %v9147_v23 = vpop.f32.mrb[46].mxu1 }
 0x4cc   : > { %vm9130_vm13 = vmand %vm12500_vm15, %vm3208_vm10  ;;  %v12501_v0 = vmov 0  ;;  %v3547_v58 = vmax.f32 %v9017_v19, %v3471_v37  ;;  %12504 = vst [vmem:[#allocation161_spill] sm:$0xff] %v9135_v57  ;;  %vm12505_vm1 = vcmp.eq.f32.partialorder %v8862_v52, %v7854_v49  ;;  %v12506_v5 = vmov 0  ;;  %v9151_v63 = vpop.f32.mrb[49].mxu0  ;;  %v9174_v6 = vpop.permute.xlu1 %3070 }
 0x4cd   : > { %v12502_v0 = vsel %vm9130_vm13, 4294967295, %v12501_v0  ;;  %vm9140_vm2 = vmand %vm12505_vm1, %vm3209_vm4  ;;  %v3336_v2 = vsel %vm9130_vm13, %v9135_v57, -inf  ;;  %vm11961_vm15 = vcmp.eq.f32.partialorder %v8675_v20, %v7846_v17  ;;  %12509 = vst [vmem:[#allocation163_spill] sm:$0xff] %v9151_v63  ;;  %vm11964_vm10 = vcmp.eq.f32.partialorder %v8675_v20, %v7850_v7  ;;  %v9176_v55 = vpop.f32.mrb[50].mxu0 }
 0x4ce   : > { %12503 = vst [vmem:[#allocation160_spill] sm:$0xff] %v12502_v0  ;;  %v12507_v5 = vsel %vm9140_vm2, 4294967295, %v12506_v5  ;;  %vm3210_vm4 = vcmp.ne.f32.partialorder %v8800_v61, %v7846_v17  ;;  %v3374_v52 = vmax.f32 %v3372_v12, %v3336_v2  ;;  %v3472_v19 = vsel %vm11961_vm15, %v9147_v23, -inf  ;;  %v9164_v0 = vpop.f32.mrb[47].mxu1  ;;  %12511 = vst [vmem:[#allocation165_spill] sm:$0xff] %v9176_v55 }
 0x4cf   : > { %12508 = vst [vmem:[#allocation162_spill] sm:$0xff] %v12507_v5  ;;  %v3337_v37 = vsel %vm9140_vm2, %v9151_v63, -inf  ;;  %12510 = vst [vmem:[#allocation164_spill] sm:$0xff] %v9164_v0  ;;  %vm3211_vm1 = vcmp.ne.f32.partialorder %v8800_v61, %v7850_v7  ;;  %v3511_v31 = vmax.f32 %v9063_v15, %v3472_v19  ;;  %v3473_v12 = vsel %vm11964_vm10, %v9164_v0, -inf }
 0x4d0   : > { %v3411_v57 = vmax.f32 %v3409_v11, %v3337_v37  ;;  %v3548_v2 = vmax.f32 %v9082_v29, %v3473_v12  ;;  %vm12512_vm15 = vcmp.eq.f32.partialorder %v3059_v56, %v7852_v40  ;;  %v12513_v5 = vmov 0  ;;  %v9187_v11 = vpop.f32.mrb[48].mxu1  ;;  %v9191_v29 = vpop.f32.mrb[51].mxu0 }
 0x4d1   : > { %vm9180_vm14 = vmand %vm12512_vm15, %vm3210_vm4  ;;  %vm11977_vm10 = vcmp.eq.f32.partialorder %v7957_v3, %v7846_v17  ;;  %12516 = vst [vmem:[#allocation167_spill] sm:$0xff] %v9191_v29  ;;  %vm12517_vm2 = vcmp.eq.f32.partialorder %v3059_v56, %v7854_v49  ;;  %v12518_v19 = vmov 0  ;;  %vm11988_vm15 = vcmp.eq.f32.partialorder %v7957_v3, %v7850_v7  ;;  %v3063_v37 = vpop.permute.xlu0 %3062  ;;  %v9210_v20 = vpop.f32.mrb[49].mxu1 }
 0x4d2   : > { %v12514_v5 = vsel %vm9180_vm14, 4294967295, %v12513_v5  ;;  %v3338_v15 = vsel %vm9180_vm14, %v9176_v55, -inf  ;;  %vm9195_vm13 = vmand %vm12517_vm2, %vm3211_vm1  ;;  %vm3212_vm4 = vcmp.ne.f32.partialorder %v8925_v10, %v7846_v17  ;;  %12521 = vst [vmem:[#allocation169_spill] sm:$0xff] %v9210_v20  ;;  %vm3148_vm1 = vcmp.eq.f32.partialorder %v3063_v37, %v7852_v40 }
 0x4d3   : > { %12515 = vst [vmem:[#allocation166_spill] sm:$0xff] %v12514_v5  ;;  %v12519_v19 = vsel %vm9195_vm13, 4294967295, %v12518_v19  ;;  %v3375_v12 = vmax.f32 %v3373_v42, %v3338_v15  ;;  %v3474_v5 = vsel %vm11977_vm10, %v9187_v11, -inf  ;;  %v3339_v56 = vsel %vm9195_vm13, %v9191_v29, -inf  ;;  %vm9226_vm13 = vmand %vm3148_vm1, %vm3212_vm4 }
 0x4d4   : > { %12520 = vst [vmem:[#allocation168_spill] sm:$0xff] %v12519_v19  ;;  %v9215_v63 = vmax.f32 %v3510_v35, %v3474_v5  ;;  %v3412_v0 = vmax.f32 %v3410_v39, %v3339_v56  ;;  %v3475_v42 = vsel %vm11988_vm15, %v9210_v20, -inf  ;;  %vm3149_vm10 = vcmp.eq.f32.partialorder %v3063_v37, %v7854_v49  ;;  %v9224_v19 = vpop.f32.mrb[52].mxu0  ;;  %v9243_v39 = vpop.f32.mrb[50].mxu1 }
 0x4d5   : > { %v9222_v15 = vmax.f32 %v3547_v58, %v3475_v42  ;;  %12522 = vst [vmem:[#allocation170_spill] sm:$0xff] %v9224_v19  ;;  %v12523_v29 = vmov 0  ;;  %vm12001_vm2 = vcmp.eq.f32.partialorder %v8800_v61, %v7846_v17  ;;  %vm12002_vm14 = vcmp.eq.f32.partialorder %v8800_v61, %v7850_v7  ;;  %v9245_v58 = vpop.f32.mrb[53].mxu0  ;;  %v9256_v37 = vpop.permute.xlu1 %2874 }
 0x4d6   : > { %v12524_v29 = vsel %vm9226_vm13, 4294967295, %v12523_v29  ;;  %vm3214_vm9 = vcmp.ne.f32.partialorder %v8979_v27, %v7846_v17  ;;  %vm3150_vm0 = vcmp.eq.f32.partialorder %v9038_v9, %v7852_v40  ;;  %v3340_v35 = vsel %vm9226_vm13, %v9224_v19, -inf  ;;  %12526 = vst [vmem:[#allocation172_spill] sm:$0xff] %v9245_v58  ;;  %12531 = vst [vmem:[#allocation174_spill] sm:$0xff] %v9256_v37  ;;  %v9265_v3 = vpop.f32.mrb[51].mxu1 }
 0x4d7   : > { %12525 = vst [vmem:[#allocation171_spill] sm:$0xff] %v12524_v29  ;;  %vm12527_vm4 = vcmp.ne.f32.partialorder %v8925_v10, %v7850_v7  ;;  %v12528_v5 = vmov 0  ;;  %vm3151_vm15 = vcmp.eq.f32.partialorder %v9038_v9, %v7854_v49  ;;  %v3376_v56 = vmax.f32 %v3374_v52, %v3340_v35  ;;  %12532 = vst [vmem:[#allocation175_spill] sm:$0xff] %v9265_v3 }
 0x4d8   : > { %vm9250_vm1 = vmand %vm3149_vm10, %vm12527_vm4  ;;  %v3476_v42 = vsel %vm12001_vm2, %v9243_v39, -inf  ;;  %v3477_v9 = vsel %vm12002_vm14, %v9265_v3, -inf  ;;  %v12533_v52 = vmov 0  ;;  %vm12537_vm4 = vcmp.ne.f32.partialorder %v8979_v27, %v7850_v7 }
 0x4d9   : > { %v12529_v5 = vsel %vm9250_vm1, 4294967295, %v12528_v5  ;;  %v3341_v29 = vsel %vm9250_vm1, %v9245_v58, -inf  ;;  %v9267_v20 = vmax.f32 %v3511_v31, %v3476_v42  ;;  %vm9276_vm10 = vmand %vm3150_vm0, %vm3214_vm9  ;;  %v9280_v35 = vmax.f32 %v3548_v2, %v3477_v9  ;;  %v9298_v2 = vpop.f32.mrb[52].mxu1  ;;  %v3075_v42 = vpop.permute.xlu0 %3074 }
 0x4da   : > { %12530 = vst [vmem:[#allocation173_spill] sm:$0xff] %v12529_v5  ;;  %v3413_v19 = vmax.f32 %v3411_v57, %v3341_v29  ;;  %v12534_v52 = vsel %vm9276_vm10, 4294967295, %v12533_v52  ;;  %v9282_v5 = vpop.f32.mrb[54].mxu0  ;;  %vm9287_vm2 = vmand %vm3151_vm15, %vm12537_vm4  ;;  %v12538_v31 = vmov 0  ;;  %vm3152_vm14 = vcmp.eq.f32.partialorder %v9174_v6, %v7852_v40 }
 0x4db   : > { %12535 = vst [vmem:[#allocation176_spill] sm:$0xff] %v12534_v52  ;;  %12536 = vst [vmem:[#allocation177_spill] sm:$0xff] %v9282_v5  ;;  %v12539_v31 = vsel %vm9287_vm2, 4294967295, %v12538_v31  ;;  %vm3216_vm0 = vcmp.ne.f32.partialorder %v7973_v4, %v7846_v17  ;;  %v3342_v57 = vsel %vm9276_vm10, %v9282_v5, -inf  ;;  %vm12011_vm9 = vcmp.eq.f32.partialorder %v8925_v10, %v7846_v17  ;;  %v9302_v29 = vpop.f32.mrb[55].mxu0  ;;  %v9311_v52 = vpop.f32.mrb[53].mxu1 }
 0x4dc   : > { %12540 = vst [vmem:[#allocation178_spill] sm:$0xff] %v12539_v31  ;;  %12541 = vst [vmem:[#allocation179_spill] sm:$0xff] %v9302_v29  ;;  %v3377_v9 = vmax.f32 %v3375_v12, %v3342_v57  ;;  %v3478_v61 = vsel %vm12011_vm9, %v9298_v2, -inf  ;;  %v3343_v58 = vsel %vm9287_vm2, %v9302_v29, -inf  ;;  %vm12018_vm15 = vcmp.eq.f32.partialorder %v8925_v10, %v7850_v7  ;;  %v9332_v29 = vpop.permute.xlu1 %2879 }
 0x4dd   : > { %12542 = vst [vmem:[#allocation180_spill] sm:$0xff] %v9311_v52  ;;  %vm3153_vm4 = vcmp.eq.f32.partialorder %v9174_v6, %v7854_v49  ;;  %v3514_v3 = vmax.f32 %v9215_v63, %v3478_v61  ;;  %v3414_v12 = vmax.f32 %v3412_v0, %v3343_v58  ;;  %v3479_v57 = vsel %vm12018_vm15, %v9311_v52, -inf  ;;  %vm9328_vm9 = vmand %vm3152_vm14, %vm3216_vm0  ;;  %v9335_v0 = vpop.f32.mrb[56].mxu0  ;;  %v9342_v58 = vpop.f32.mrb[54].mxu1 }
 0x4de   : > { %v12543_v31 = vmov 0  ;;  %12546 = vst [vmem:[#allocation182_spill] sm:$0xff] %v9332_v29  ;;  %v3551_v61 = vmax.f32 %v9222_v15, %v3479_v57  ;;  %12547 = vst [vmem:[#allocation183_spill] sm:$0xff] %v9335_v0  ;;  %vm3217_vm2 = vcmp.ne.f32.partialorder %v7973_v4, %v7850_v7  ;;  %v3344_v63 = vsel %vm9328_vm9, %v9335_v0, -inf  ;;  %v9358_v10 = vpop.f32.mrb[55].mxu1  ;;  %v3079_v0 = vpop.permute.xlu0 %3078 }
 0x4df   : > { %v12544_v31 = vsel %vm9328_vm9, 4294967295, %v12543_v31  ;;  %vm12035_vm14 = vcmp.eq.f32.partialorder %v8979_v27, %v7846_v17  ;;  %vm9348_vm15 = vmand %vm3153_vm4, %vm3217_vm2  ;;  %v12548_v6 = vmov 0  ;;  %v3378_v15 = vmax.f32 %v3376_v56, %v3344_v63  ;;  %12552 = vst [vmem:[#allocation186_spill] sm:$0xff] %v9358_v10 }
 0x4e0   : > { %12545 = vst [vmem:[#allocation181_spill] sm:$0xff] %v12544_v31  ;;  %v12549_v6 = vsel %vm9348_vm15, 4294967295, %v12548_v6  ;;  %v3480_v57 = vsel %vm12035_vm14, %v9342_v58, -inf  ;;  %v9356_v31 = vpop.f32.mrb[57].mxu0  ;;  %vm12038_vm9 = vcmp.eq.f32.partialorder %v8979_v27, %v7850_v7  ;;  %vm3154_vm2 = vcmp.eq.f32.partialorder %v3075_v42, %v7852_v40 }
 0x4e1   : > { %12550 = vst [vmem:[#allocation184_spill] sm:$0xff] %v12549_v6  ;;  %12551 = vst [vmem:[#allocation185_spill] sm:$0xff] %v9356_v31  ;;  %v3515_v52 = vmax.f32 %v9267_v20, %v3480_v57  ;;  %v3345_v56 = vsel %vm9348_vm15, %v9356_v31, -inf  ;;  %v3481_v63 = vsel %vm12038_vm9, %v9358_v10, -inf  ;;  %vm3155_vm4 = vcmp.eq.f32.partialorder %v3075_v42, %v7854_v49  ;;  %v9375_v51 = vpop.f32.mrb[58].mxu0  ;;  %v9389_v57 = vpop.f32.mrb[56].mxu1 }
 0x4e2   : > { %v3415_v5 = vmax.f32 %v3413_v19, %v3345_v56  ;;  %v3552_v55 = vmax.f32 %v9280_v35, %v3481_v63  ;;  %12553 = vst [vmem:[#allocation187_spill] sm:$0xff] %v9375_v51  ;;  %vm12554_vm14 = vcmp.ne.f32.partialorder %v9114_v38, %v7846_v17  ;;  %v12555_v20 = vmov 0  ;;  %v9393_v19 = vpop.f32.mrb[59].mxu0  ;;  %v3083_v56 = vpop.permute.xlu1 %3082 }
 0x4e3   : > { %vm9380_vm0 = vmand %vm3154_vm2, %vm12554_vm14  ;;  %vm12049_vm9 = vcmp.eq.f32.partialorder %v7973_v4, %v7846_v17  ;;  %12558 = vst [vmem:[#allocation189_spill] sm:$0xff] %v9393_v19  ;;  %vm12559_vm14 = vcmp.ne.f32.partialorder %v9114_v38, %v7850_v7  ;;  %v12560_v35 = vmov 0  ;;  %vm12060_vm15 = vcmp.eq.f32.partialorder %v7973_v4, %v7850_v7  ;;  %v9411_v27 = vpop.f32.mrb[57].mxu1 }
 0x4e4   : > { %v12556_v20 = vsel %vm9380_vm0, 4294967295, %v12555_v20  ;;  %v3346_v42 = vsel %vm9380_vm0, %v9375_v51, -inf  ;;  %vm9398_vm2 = vmand %vm3155_vm4, %vm12559_vm14  ;;  %12563 = vst [vmem:[#allocation191_spill] sm:$0xff] %v9411_v27  ;;  %vm3156_vm14 = vcmp.eq.f32.partialorder %v3079_v0, %v7852_v40  ;;  %vm12564_vm0 = vcmp.ne.f32.partialorder %v9256_v37, %v7846_v17 }
 0x4e5   : > { %12557 = vst [vmem:[#allocation188_spill] sm:$0xff] %v12556_v20  ;;  %v12561_v35 = vsel %vm9398_vm2, 4294967295, %v12560_v35  ;;  %v3379_v63 = vmax.f32 %v3377_v9, %v3346_v42  ;;  %v3482_v20 = vsel %vm12049_vm9, %v9389_v57, -inf  ;;  %v3347_v6 = vsel %vm9398_vm2, %v9393_v19, -inf  ;;  %vm9424_vm2 = vmand %vm3156_vm14, %vm12564_vm0  ;;  %v9428_v19 = vpop.f32.mrb[60].mxu0 }
 0x4e6   : > { %12562 = vst [vmem:[#allocation190_spill] sm:$0xff] %v12561_v35  ;;  %v3516_v31 = vmax.f32 %v3514_v3, %v3482_v20  ;;  %v3416_v10 = vmax.f32 %v3414_v12, %v3347_v6  ;;  %v3483_v9 = vsel %vm12060_vm15, %v9411_v27, -inf  ;;  %vm3157_vm9 = vcmp.eq.f32.partialorder %v3079_v0, %v7854_v49  ;;  %12568 = vst [vmem:[#allocation193_spill] sm:$0xff] %v9428_v19  ;;  %v9442_v12 = vpop.f32.mrb[58].mxu1 }
 0x4e7   : > { %v12565_v42 = vmov 0  ;;  %v3553_v35 = vmax.f32 %v3551_v61, %v3483_v9  ;;  %vm12069_vm4 = vcmp.eq.f32.partialorder %v9114_v38, %v7846_v17  ;;  %vm3158_vm0 = vcmp.eq.f32.partialorder %v3083_v56, %v7852_v40  ;;  %v9444_v61 = vpop.f32.mrb[61].mxu0  ;;  %v9461_v9 = vpop.f32.mrb[59].mxu1 }
 0x4e8   : > { %v12566_v42 = vsel %vm9424_vm2, 4294967295, %v12565_v42  ;;  %v3348_v3 = vsel %vm9424_vm2, %v9428_v19, -inf  ;;  %12569 = vst [vmem:[#allocation194_spill] sm:$0xff] %v9444_v61  ;;  %vm12570_vm14 = vcmp.ne.f32.partialorder %v9256_v37, %v7850_v7  ;;  %v12571_v0 = vmov 0  ;;  %12574 = vst [vmem:[#allocation196_spill] sm:$0xff] %v9461_v9 }
 0x4e9   : > { %12567 = vst [vmem:[#allocation192_spill] sm:$0xff] %v12566_v42  ;;  %vm9449_vm10 = vmand %vm3157_vm9, %vm12570_vm14  ;;  %vm3159_vm15 = vcmp.eq.f32.partialorder %v3083_v56, %v7854_v49  ;;  %v3380_v6 = vmax.f32 %v3378_v15, %v3348_v3  ;;  %v3484_v40 = vsel %vm12069_vm4, %v9442_v12, -inf  ;;  %vm12575_vm9 = vcmp.eq.f32.partialorder %v9114_v38, %v7850_v7  ;;  %v9474_v56 = vpop.f32.mrb[62].mxu0  ;;  %v9486_v3 = vpop.f32.mrb[60].mxu1 }
 0x4ea   : > { %v12572_v0 = vsel %vm9449_vm10, 4294967295, %v12571_v0  ;;  %v3349_v20 = vsel %vm9449_vm10, %v9444_v61, -inf  ;;  %v3517_v42 = vmax.f32 %v3515_v52, %v3484_v40  ;;  %v3485_v27 = vsel %vm12575_vm9, %v9461_v9, -inf  ;;  %12580 = vst [vmem:[#allocation198_spill] sm:$0xff] %v9474_v56  ;;  %v9490_v40 = vpop.f32.mrb[63].mxu0 }
 0x4eb   : > { %12573 = vst [vmem:[#allocation195_spill] sm:$0xff] %v12572_v0  ;;  %v3417_v4 = vmax.f32 %v3415_v5, %v3349_v20  ;;  %vm12576_vm14 = vcmp.ne.f32.partialorder %v9332_v29, %v7846_v17  ;;  %v12577_v49 = vmov 0  ;;  %v3554_v15 = vmax.f32 %v3552_v55, %v3485_v27  ;;  %12585 = vst [vmem:[#allocation200_spill] sm:$0xff] %v9490_v40  ;;  %v9499_v0 = vpop.f32.mrb[61].mxu1 }
 0x4ec   : > { %vm9470_vm1 = vmand %vm3158_vm0, %vm12576_vm14  ;;  %vm12581_vm4 = vcmp.ne.f32.partialorder %v9332_v29, %v7850_v7  ;;  %v12582_v5 = vmov 0  ;;  %vm12149_vm0 = vcmp.eq.f32.partialorder %v9256_v37, %v7846_v17  ;;  %12586 = vst [vmem:[#allocation201_spill] sm:$0xff] %v9499_v0  ;;  %vm12151_vm9 = vcmp.eq.f32.partialorder %v9332_v29, %v7850_v7 }
 0x4ed   : > { %v12578_v49 = vsel %vm9470_vm1, 4294967295, %v12577_v49  ;;  %vm9479_vm10 = vmand %vm3159_vm15, %vm12581_vm4  ;;  %v3350_v52 = vsel %vm9470_vm1, %v9474_v56, -inf  ;;  %v3486_v27 = vsel %vm12149_vm0, %v9486_v3, -inf  ;;  %vm12176_vm15 = vcmp.eq.f32.partialorder %v9256_v37, %v7850_v7  ;;  %v9507_v56 = vpop.f32.mrb[62].mxu1 }
 0x4ee   : > { %12579 = vst [vmem:[#allocation197_spill] sm:$0xff] %v12578_v49  ;;  %v12583_v5 = vsel %vm9479_vm10, 4294967295, %v12582_v5  ;;  %v3381_v55 = vmax.f32 %v3379_v63, %v3350_v52  ;;  %v3351_v20 = vsel %vm9479_vm10, %v9490_v40, -inf  ;;  %v3518_v49 = vmax.f32 %v3516_v31, %v3486_v27 }
 0x4ef   : > { %12584 = vst [vmem:[#allocation199_spill] sm:$0xff] %v12583_v5  ;;  %v3418_v38 = vmax.f32 %v3416_v10, %v3351_v20  ;;  %v3487_v63 = vsel %vm12176_vm15, %v9499_v0, -inf  ;;  %vm12124_vm4 = vcmp.eq.f32.partialorder %v9332_v29, %v7846_v17  ;;  %v9515_v10 = vpop.f32.mrb[63].mxu1 }
 0x4f0   : > { %v3382_v52 = vmax.f32 %v3380_v6, %v3381_v55  ;;  %v3555_v61 = vmax.f32 %v3553_v35, %v3487_v63  ;;  %v3488_v31 = vsel %vm12124_vm4, %v9507_v56, -inf }
 0x4f1   : > { %v3419_v9 = vmax.f32 %v3417_v4, %v3418_v38  ;;  %v3519_v6 = vmax.f32 %v3517_v42, %v3488_v31  ;;  %v3489_v38 = vsel %vm12151_vm9, %v9515_v10, -inf }
 0x4f2   : > { %v3383_v5 = vrot.slane %v3382_v52, 4  ;;  %v3556_v35 = vmax.f32 %v3554_v15, %v3489_v38  ;;  %v12653_v38 = vld [vmem:[#allocation131_spill] sm:$0xff] }
 0x4f3   : > { %v3420_v27 = vrot.slane %v3419_v9, 4  ;;  %v3520_v20 = vmax.f32 %v3518_v49, %v3519_v6 }
 0x4f4   : > { %v3384_v4 = vmax.f32 %v3382_v52, %v3383_v5  ;;  %v3557_v37 = vmax.f32 %v3555_v61, %v3556_v35 }
 0x4f5   : > { %v3421_v55 = vmax.f32 %v3419_v9, %v3420_v27  ;;  %v3521_v40 = vrot.slane %v3520_v20, 4 }
 0x4f6   : > { %v3385_v63 = vrot.slane %v3384_v4, 2  ;;  %v3558_v0 = vrot.slane %v3557_v37, 4 }
 0x4f7   : > { %v3422_v17 = vrot.slane %v3421_v55, 2  ;;  %v3522_v51 = vmax.f32 %v3520_v20, %v3521_v40 }
 0x4f8   : > { %v3386_v19 = vmax.f32 %v3384_v4, %v3385_v63  ;;  %v3559_v48 = vmax.f32 %v3557_v37, %v3558_v0  ;;  %v12642_v0 = vld [vmem:[#allocation100_spill] sm:$0xff] }
 0x4f9   : > { %v3423_v14 = vmax.f32 %v3421_v55, %v3422_v17  ;;  %v3523_v22 = vrot.slane %v3522_v51, 2 }
 0x4fa   : > { %v3560_v42 = vrot.slane %v3559_v48, 2  ;;  %v3387_v31 = vrot.slane %v3386_v19, 1 }
 0x4fb   : > { %v3524_v43 = vmax.f32 %v3522_v51, %v3523_v22  ;;  %v3424_v8 = vrot.slane %v3423_v14, 1 }
 0x4fc   : > { %v3561_v29 = vmax.f32 %v3559_v48, %v3560_v42  ;;  %v3388_v15 = vmax.f32 %v3386_v19, %v3387_v31  ;;  %v12587_v42 = vld [vmem:[#allocation43_spill] sm:$0xff]  ;;  %v12588_v31 = vld [vmem:[#allocation49_spill] sm:$0xff] }
 0x4fd   : > { %v3525_v7 = vrot.slane %v3524_v43, 1  ;;  %v3425_v49 = vmax.f32 %v3423_v14, %v3424_v8  ;;  %v12669_v19 = vld [vmem:[#allocation191_spill] sm:$0xff] }
 0x4fe   : > { %v3562_v5 = vrot.slane %v3561_v29, 1 }
 0x4ff   : > { %v3526_v9 = vmax.f32 %v3524_v43, %v3525_v7 }
 0x500   : > { %v3563_v52 = vmax.f32 %v3561_v29, %v3562_v5  ;;  %v12589_v5 = vld [vmem:[#allocation55_spill] sm:$0xff] }
 0x501   : > { %v9523_v61 = vmax.f32 %v3388_v15, %v3526_v9  ;;  %v12590_v15 = vld [vmem:[#allocation61_spill] sm:$0xff]  ;;  %v12591_v9 = vld [vmem:[#allocation68_spill] sm:$0xff] }
 0x502   : > { %v9525_v27 = vmax.f32 %v3425_v49, %v3563_v52  ;;  %v12592_v49 = vld [vmem:[#allocation72_spill] sm:$0xff] }
 0x503   : > { %v3822_v17 = vsub.f32 %v7985_v41, %v9523_v61  ;;  %v3824_v37 = vsub.f32 %v8008_v50, %v9523_v61  ;;  %v3826_v22 = vsub.f32 %v8072_v18, %v9523_v61  ;;  %v3828_v48 = vsub.f32 %v8139_v21, %v9523_v61  ;;  %v12627_v21 = vld [vmem:[#allocation58_spill] sm:$0xff]  ;;  %v12665_v41 = vld [vmem:[#allocation175_spill] sm:$0xff] }
 0x504   : > { %v3830_v7 = vsub.f32 %v8199_v24, %v9523_v61  ;;  %v3832_v8 = vsub.f32 %v8254_v33, %v9523_v61  ;;  %v3834_v43 = vsub.f32 %v8299_v34, %v9523_v61  ;;  %v12617_v40 = vsub.f32 %v8395_v28, %v9523_v61 }
 0x505   : > { %v3886_v18 = vmul.f32 1.442695, %v3822_v17  ;;  %v3890_v34 = vmul.f32 1.442695, %v3824_v37  ;;  %v3894_v6 = vmul.f32 1.442695, %v3826_v22  ;;  %v12623_v28 = vsub.f32 %v8552_v25, %v9523_v61 }
 0x506   : > { %v3898_v4 = vmul.f32 1.442695, %v3828_v48  ;;  %v3902_v50 = vmul.f32 1.442695, %v3830_v7  ;;  %v3906_v51 = vmul.f32 1.442695, %v3832_v8  ;;  %v12614_v7 = vsub.f32 %v8342_v62, %v9523_v61 }
 0x507   : > { %5588 = vpow2.f32 %v3886_v18  ;;  %v3910_v48 = vmul.f32 1.442695, %v3834_v43  ;;  %v12618_v43 = vsub.f32 %v8445_v26, %v9523_v61  ;;  %v12620_v62 = vsub.f32 %v8495_v44, %v9523_v61  ;;  %v12633_v8 = vld [vmem:[#allocation74_spill] sm:$0xff]  ;;  %v12657_v37 = vld [vmem:[#allocation148_spill] sm:$0xff] }
 0x508   : > { %5590 = vpow2.f32 %v3890_v34  ;;  %v3914_v18 = vmul.f32 1.442695, %v12614_v7  ;;  %v12621_v34 = vld [vmem:[#allocation42_spill] sm:$0xff]  ;;  %v3930_v26 = vmul.f32 1.442695, %v12623_v28  ;;  %v12626_v44 = vsub.f32 %v8644_v54, %v9523_v61 }
 0x509   : > { %5592 = vpow2.f32 %v3894_v6  ;;  %v3918_v6 = vmul.f32 1.442695, %v12617_v40  ;;  %v3922_v24 = vmul.f32 1.442695, %v12618_v43  ;;  %v3926_v7 = vmul.f32 1.442695, %v12620_v62 }
 0x50a   : > { %5594 = vpow2.f32 %v3898_v4  ;;  %v12624_v40 = vsub.f32 %v8604_v46, %v9523_v61  ;;  %v3938_v62 = vmul.f32 1.442695, %v12626_v44  ;;  %v12629_v25 = vsub.f32 %v8682_v47, %v9523_v61  ;;  %v12640_v4 = vld [vmem:[#allocation91_spill] sm:$0xff]  ;;  %v12661_v17 = vld [vmem:[#allocation158_spill] sm:$0xff] }
 0x50b   : > { %5596 = vpow2.f32 %v3902_v50  ;;  %v12622_v50 = vld [vmem:[#allocation45_spill] sm:$0xff]  ;;  %v12630_v28 = vsub.f32 %v8730_v59, %v9523_v61  ;;  %v12632_v54 = vsub.f32 %v8785_v16, %v9523_v61  ;;  %v12636_v59 = vsub.f32 %v8841_v60, %v9523_v61  ;;  %v12649_v60 = vld [vmem:[#allocation120_spill] sm:$0xff] }
 0x50c   : > { %5598 = vpow2.f32 %v3906_v51  ;;  %v3934_v43 = vmul.f32 1.442695, %v12624_v40  ;;  %v12625_v51 = vld [vmem:[#allocation52_spill] sm:$0xff]  ;;  %v3942_v46 = vmul.f32 1.442695, %v12629_v25  ;;  %v12638_v16 = vld [vmem:[#allocation85_spill] sm:$0xff]  ;;  %v12675_v20 = vsub.f32 %v12622_v50, %v9525_v27 }
 0x50d   : > { %5600 = vpow2.f32 %v3910_v48  ;;  %v12628_v48 = vld [vmem:[#allocation64_spill] sm:$0xff]  ;;  %v3946_v40 = vmul.f32 1.442695, %v12630_v28  ;;  %v3950_v44 = vmul.f32 1.442695, %v12632_v54  ;;  %v12645_v54 = vld [vmem:[#allocation105_spill] sm:$0xff]  ;;  %v12677_v63 = vsub.f32 %v12625_v51, %v9525_v27 }
 0x50e   : > { %5602 = vpow2.f32 %v3914_v18  ;;  %v12631_v18 = vld [vmem:[#allocation71_spill] sm:$0xff]  ;;  %v3954_v25 = vmul.f32 1.442695, %v12636_v59  ;;  %v12678_v55 = vsub.f32 %v12627_v21, %v9525_v27  ;;  %v12681_v50 = vsub.f32 %v9095_v45, %v9523_v61 }
 0x50f   : > { %5604 = vpow2.f32 %v3918_v6  ;;  %v12634_v6 = vld [vmem:[#allocation79_spill] sm:$0xff]  ;;  %v3896_v35 = vmul.f32 1.442695, %v12677_v63  ;;  %v12685_v21 = vsub.f32 %v12631_v18, %v9525_v27  ;;  %v12687_v45 = vsub.f32 %v12633_v8, %v9525_v27 }
 0x510   : > { %5606 = vpow2.f32 %v3922_v24  ;;  %v12637_v24 = vsub.f32 %v8887_v53, %v9523_v61  ;;  %v12644_v53 = vsub.f32 %v8941_v13, %v9523_v61  ;;  %v12693_v8 = vsub.f32 %v12640_v4, %v9525_v27 }
 0x511   : > { %v9701_v47 = vpop.eup %5588  ;;  %5608 = vpow2.f32 %v3926_v7  ;;  %v12648_v7 = vld [vmem:[#allocation115_spill] sm:$0xff]  ;;  %v12699_v4 = vsub.f32 %v12642_v0, %v9525_v27  ;;  %v12705_v0 = vsub.f32 %v9342_v58, %v9523_v61  ;;  %v12710_v58 = vld [vmem:[#allocation14_spill] sm:$0xff] }
 0x512   : > { %12635 = vst [vmem:[#allocation43_spill] sm:$0xff] %v9701_v47  ;;  %v3958_v28 = vmul.f32 1.442695, %v12637_v24  ;;  %v9711_v22 = vpop.eup %5590  ;;  %5610 = vpow2.f32 %v3930_v26  ;;  %v12641_v47 = vld [vmem:[#allocation94_spill] sm:$0xff]  ;;  %v3962_v24 = vmul.f32 1.442695, %v12644_v53  ;;  %v12652_v53 = vsub.f32 %v8991_v30, %v9523_v61 }
 0x513   : > { %12639 = vst [vmem:[#allocation49_spill] sm:$0xff] %v9711_v22  ;;  %v9719_v59 = vpop.eup %5592  ;;  %5612 = vpow2.f32 %v3934_v43  ;;  %v12646_v26 = vld [vmem:[#allocation111_spill] sm:$0xff]  ;;  %v12650_v43 = vld [vmem:[#allocation125_spill] sm:$0xff] }
 0x514   : > { %12643 = vst [vmem:[#allocation55_spill] sm:$0xff] %v9719_v59  ;;  %v9728_v29 = vpop.eup %5594  ;;  %5614 = vpow2.f32 %v3938_v62  ;;  %v3966_v22 = vmul.f32 1.442695, %v12652_v53  ;;  %v12654_v62 = vld [vmem:[#allocation136_spill] sm:$0xff]  ;;  %v12656_v59 = vld [vmem:[#allocation142_spill] sm:$0xff]  ;;  %v12660_v53 = vsub.f32 %v9036_v1, %v9523_v61 }
 0x515   : > { %12647 = vst [vmem:[#allocation61_spill] sm:$0xff] %v9728_v29  ;;  %v9736_v13 = vpop.eup %5596  ;;  %5616 = vpow2.f32 %v3942_v46  ;;  %v12658_v46 = vld [vmem:[#allocation153_spill] sm:$0xff] }
 0x516   : > { %12651 = vst [vmem:[#allocation68_spill] sm:$0xff] %v9736_v13  ;;  %v9745_v33 = vpop.eup %5598  ;;  %5618 = vpow2.f32 %v3946_v40  ;;  %v3970_v29 = vmul.f32 1.442695, %v12660_v53  ;;  %v12662_v40 = vld [vmem:[#allocation164_spill] sm:$0xff]  ;;  %v12664_v13 = vld [vmem:[#allocation169_spill] sm:$0xff]  ;;  %v12668_v53 = vld [vmem:[#allocation186_spill] sm:$0xff] }
 0x517   : > { %12655 = vst [vmem:[#allocation72_spill] sm:$0xff] %v9745_v33  ;;  %v9753_v30 = vpop.eup %5600  ;;  %5620 = vpow2.f32 %v3950_v44  ;;  %v12666_v44 = vld [vmem:[#allocation180_spill] sm:$0xff] }
 0x518   : > { %12659 = vst [vmem:[#allocation42_spill] sm:$0xff] %v9753_v30  ;;  %v9762_v14 = vpop.eup %5602  ;;  %5622 = vpow2.f32 %v3954_v25  ;;  %v12671_v25 = vld [vmem:[#allocation196_spill] sm:$0xff]  ;;  %v12672_v30 = vld [vmem:[#allocation201_spill] sm:$0xff] }
 0x519   : > { %12663 = vst [vmem:[#allocation45_spill] sm:$0xff] %v9762_v14  ;;  %v9770_v1 = vpop.eup %5604  ;;  %5624 = vpow2.f32 %v3958_v28  ;;  %v12674_v28 = vsub.f32 %v12621_v34, %v9525_v27 }
 0x51a   : > { %12667 = vst [vmem:[#allocation52_spill] sm:$0xff] %v9770_v1  ;;  %v9776_v14 = vpop.eup %5606  ;;  %5626 = vpow2.f32 %v3962_v24  ;;  %v3892_v24 = vmul.f32 1.442695, %v12675_v20  ;;  %v3974_v20 = vmul.f32 1.442695, %v12681_v50 }
 0x51b   : > { %12670 = vst [vmem:[#allocation58_spill] sm:$0xff] %v9776_v14  ;;  %v9784_v1 = vpop.eup %5608  ;;  %5628 = vpow2.f32 %v3966_v22  ;;  %v3888_v33 = vmul.f32 1.442695, %v12674_v28  ;;  %v12679_v22 = vld [vmem:[#allocation40_spill] sm:$0xff] }
 0x51c   : > { %12673 = vst [vmem:[#allocation64_spill] sm:$0xff] %v9784_v1  ;;  %v9792_v14 = vpop.eup %5610  ;;  %5630 = vpow2.f32 %v3970_v29  ;;  %v3900_v1 = vmul.f32 1.442695, %v12678_v55  ;;  %v12683_v29 = vsub.f32 %v12628_v48, %v9525_v27  ;;  %v3908_v55 = vmul.f32 1.442695, %v12685_v21 }
 0x51d   : > { %12676 = vst [vmem:[#allocation71_spill] sm:$0xff] %v9792_v14  ;;  %v9802_v34 = vpop.eup %5612  ;;  %5632 = vpow2.f32 %v3888_v33  ;;  %v3912_v33 = vmul.f32 1.442695, %v12687_v45  ;;  %v12689_v48 = vsub.f32 %v12634_v6, %v9525_v27  ;;  %v12695_v6 = vsub.f32 %v12641_v47, %v9525_v27 }
 0x51e   : > { %12680 = vst [vmem:[#allocation74_spill] sm:$0xff] %v9802_v34  ;;  %v9807_v28 = vpop.eup %5614  ;;  %5634 = vpow2.f32 %v3892_v24  ;;  %v3904_v63 = vmul.f32 1.442695, %v12683_v29  ;;  %v12701_v47 = vsub.f32 %v9243_v39, %v9523_v61  ;;  %v12706_v39 = vsub.f32 %v9389_v57, %v9523_v61  ;;  %v12713_v57 = vld [vmem:[#allocation41_spill] sm:$0xff] }
 0x51f   : > { %12682 = vst [vmem:[#allocation79_spill] sm:$0xff] %v9807_v28  ;;  %v9812_v51 = vpop.eup %5616  ;;  %5636 = vpow2.f32 %v3896_v35  ;;  %v3916_v24 = vmul.f32 1.442695, %v12689_v48  ;;  %v12691_v35 = vsub.f32 %v12638_v16, %v9525_v27  ;;  %v12697_v16 = vsub.f32 %v9147_v23, %v9523_v61  ;;  %v12724_v28 = vld [vmem:[#allocation12_spill] sm:$0xff] }
 0x520   : > { %12684 = vst [vmem:[#allocation85_spill] sm:$0xff] %v9812_v51  ;;  %v9817_v52 = vpop.eup %5618  ;;  %5638 = vpow2.f32 %v3900_v1  ;;  %v3924_v1 = vmul.f32 1.442695, %v12693_v8  ;;  %v12702_v23 = vsub.f32 %v9298_v2, %v9523_v61  ;;  %v12707_v2 = vsub.f32 %v12646_v26, %v9525_v27 }
 0x521   : > { %12686 = vst [vmem:[#allocation91_spill] sm:$0xff] %v9817_v52  ;;  %v9822_v50 = vpop.eup %5620  ;;  %5640 = vpow2.f32 %v3974_v20  ;;  %v3920_v18 = vmul.f32 1.442695, %v12691_v35  ;;  %v3928_v20 = vmul.f32 1.442695, %v12695_v6  ;;  %v12715_v26 = vsub.f32 %v12649_v60, %v9525_v27 }
 0x522   : > { %12688 = vst [vmem:[#allocation94_spill] sm:$0xff] %v9822_v50  ;;  %v9827_v29 = vpop.eup %5622  ;;  %5642 = vpow2.f32 %v3904_v63  ;;  %v9847_v63 = vmul.f32 1.442695, %v12697_v16  ;;  %v9862_v6 = vmul.f32 1.442695, %v12701_v47  ;;  %v4229_v50 = vld [vmem:[#allocation4 + $0x8] sm:$0xff]  ;;  %v12723_v51 = vsub.f32 %v12653_v38, %v9525_v27 }
 0x523   : > { %12690 = vst [vmem:[#allocation100_spill] sm:$0xff] %v9827_v29  ;;  %v9832_v21 = vpop.eup %5624  ;;  %5644 = vpow2.f32 %v3908_v55  ;;  %v12698_v55 = vsub.f32 %v9187_v11, %v9523_v61  ;;  %v9867_v16 = vmul.f32 1.442695, %v12702_v23  ;;  %v12703_v11 = vsub.f32 %v12645_v54, %v9525_v27  ;;  %v12721_v29 = vld [vmem:[#allocation51_spill] sm:$0xff]  ;;  %4378 = vmatprep.mubr.f32.mxu0 %v4229_v50  ;;  %v12732_v50 = vld [vmem:[#allocation18_spill] sm:$0xff] }
 0x524   : > { %12692 = vst [vmem:[#allocation105_spill] sm:$0xff] %v9832_v21  ;;  %v9837_v45 = vpop.eup %5626  ;;  %5646 = vpow2.f32 %v3912_v33  ;;  %v3932_v33 = vmul.f32 1.442695, %v12699_v4  ;;  %v9877_v4 = vmul.f32 1.442695, %v12705_v0  ;;  %v12709_v54 = vsub.f32 %v12648_v7, %v9525_v27  ;;  %v12711_v0 = vld [vmem:[#allocation15_spill] sm:$0xff] }
 0x525   : > { %12694 = vst [vmem:[#allocation111_spill] sm:$0xff] %v9837_v45  ;;  %v9842_v48 = vpop.eup %5628  ;;  %v9852_v35 = vmul.f32 1.442695, %v12698_v55  ;;  %5648 = vpow2.f32 %v3916_v24  ;;  %v3936_v24 = vmul.f32 1.442695, %v12703_v11  ;;  %vm12712_vm14 = vcmp.eq.f32.partialorder %v12710_v58, %v12711_v0  ;;  %v12729_v38 = vld [vmem:[#allocation63_spill] sm:$0xff] }
 0x526   : > { %12696 = vst [vmem:[#allocation115_spill] sm:$0xff] %v9842_v48  ;;  %v9857_v8 = vpop.eup %5630  ;;  %5650 = vpow2.f32 %v3920_v18  ;;  %v9882_v47 = vmul.f32 1.442695, %v12706_v39  ;;  %v3940_v18 = vmul.f32 1.442695, %v12707_v2  ;;  %v12720_v39 = vsub.f32 %v12650_v43, %v9525_v27  ;;  %v12726_v43 = vld [vmem:[#allocation57_spill] sm:$0xff] }
 0x527   : > { %12700 = vst [vmem:[#allocation120_spill] sm:$0xff] %v9857_v8  ;;  %v9872_v55 = vpop.eup %5632  ;;  %5652 = vpow2.f32 %v3924_v1  ;;  %v3944_v11 = vmul.f32 1.442695, %v12709_v54  ;;  %v3948_v2 = vmul.f32 1.442695, %v12715_v26  ;;  %v12718_v54 = vld [vmem:[#allocation44_spill] sm:$0xff]  ;;  %v12731_v34 = vsub.f32 %v12656_v59, %v9525_v27 }
 0x528   : > { %12704 = vst [vmem:[#allocation125_spill] sm:$0xff] %v9872_v55  ;;  %v9887_v23 = vpop.eup %5634  ;;  %5654 = vpow2.f32 %v3928_v20  ;;  %v4015_v8 = vsel %vm12712_vm14, %v9872_v55, 0.0  ;;  %v12716_v20 = vld [vmem:[#allocation11_spill] sm:$0xff]  ;;  %v3952_v21 = vmul.f32 1.442695, %v12720_v39  ;;  %v4233_v26 = vld [vmem:[#allocation5 + $0x8] sm:$0xff]  ;;  %vm12733_vm14 = vcmp.eq.f32.partialorder %v12732_v50, %v12711_v0 }
 0x529   : > { %12708 = vst [vmem:[#allocation131_spill] sm:$0xff] %v9887_v23  ;;  %v9898_v1 = vpop.eup %5636  ;;  %5656 = vpow2.f32 %v3932_v33  ;;  %vm12717_vm4 = vcmp.eq.f32.partialorder %v12716_v20, %v12711_v0  ;;  %v3956_v48 = vmul.f32 1.442695, %v12723_v51  ;;  %4300 = vmatprep.mubr.f32.mxu1 %v4233_v26  ;;  %v12734_v26 = vld [vmem:[#allocation70_spill] sm:$0xff]  ;;  %v12737_v51 = vld [vmem:[#allocation73_spill] sm:$0xff]  ;;  %v12739_v14 = vsub.f32 %v12658_v46, %v9525_v27  ;;  %v12745_v59 = vld [vmem:[#allocation84_spill] sm:$0xff] }
 0x52a   : > { %12714 = vst [vmem:[#allocation136_spill] sm:$0xff] %v9898_v1  ;;  %v4017_v7 = vsel %vm12717_vm4, %v9887_v23, 0.0  ;;  %v9909_v45 = vpop.eup %5638  ;;  %5658 = vpow2.f32 %v3936_v24  ;;  %vm12725_vm4 = vcmp.eq.f32.partialorder %v12724_v28, %v12711_v0  ;;  %v12742_v28 = vld [vmem:[#allocation78_spill] sm:$0xff]  ;;  %v12753_v46 = vld [vmem:[#allocation93_spill] sm:$0xff]  ;;  %v12774_v58 = vld [vmem:[#allocation119_spill] sm:$0xff] }
 0x52b   : > { %12719 = vst [vmem:[#allocation142_spill] sm:$0xff] %v9909_v45  ;;  %v4189_v33 = vadd.f32 %v4017_v7, %v4015_v8  ;;  %v9916_v52 = vpop.eup %5640  ;;  %5660 = vpow2.f32 %v3940_v18  ;;  %v4019_v24 = vsel %vm12725_vm4, %v9898_v1, 0.0  ;;  %v12728_v18 = vsub.f32 %v12654_v62, %v9525_v27  ;;  %v12740_v62 = vld [vmem:[#allocation24_spill] sm:$0xff]  ;;  %v12758_v1 = vld [vmem:[#allocation99_spill] sm:$0xff]  ;;  %v12766_v20 = vld [vmem:[#allocation110_spill] sm:$0xff] }
 0x52c   : > { %12722 = vst [vmem:[#allocation148_spill] sm:$0xff] %v9916_v52  ;;  %v9927_v39 = vpop.eup %5642  ;;  %5662 = vpow2.f32 %v3944_v11  ;;  %v3964_v8 = vmul.f32 1.442695, %v12731_v34  ;;  %v4021_v11 = vsel %vm12733_vm14, %v9909_v45, 0.0  ;;  %v3972_v50 = vmul.f32 1.442695, %v12739_v14 }
 0x52d   : > { %12727 = vst [vmem:[#allocation153_spill] sm:$0xff] %v9927_v39  ;;  %v3960_v7 = vmul.f32 1.442695, %v12728_v18  ;;  %v4190_v60 = vadd.f32 %v4189_v33, %v4019_v24  ;;  %v9934_v52 = vpop.eup %5644  ;;  %5664 = vpow2.f32 %v3948_v2  ;;  %v12736_v33 = vsub.f32 %v12657_v37, %v9525_v27  ;;  %v12748_v37 = vld [vmem:[#allocation22_spill] sm:$0xff] }
 0x52e   : > { %12730 = vst [vmem:[#allocation158_spill] sm:$0xff] %v9934_v52  ;;  %v9945_v18 = vpop.eup %5646  ;;  %5666 = vpow2.f32 %v3952_v21  ;;  %vm12741_vm4 = vcmp.eq.f32.partialorder %v12740_v62, %v12711_v0  ;;  %v12747_v62 = vsub.f32 %v12662_v40, %v9525_v27  ;;  %vm12749_vm14 = vcmp.eq.f32.partialorder %v12748_v37, %v12711_v0  ;;  %v12750_v45 = vld [vmem:[#allocation90_spill] sm:$0xff]  ;;  %v12761_v40 = vld [vmem:[#allocation104_spill] sm:$0xff] }
 0x52f   : > { %12735 = vst [vmem:[#allocation164_spill] sm:$0xff] %v9945_v18  ;;  %v3968_v24 = vmul.f32 1.442695, %v12736_v33  ;;  %v4191_v2 = vadd.f32 %v4190_v60, %v4021_v11  ;;  %v9952_v34 = vpop.eup %5648  ;;  %5668 = vpow2.f32 %v3956_v48  ;;  %v4023_v21 = vsel %vm12741_vm4, %v9927_v39, 0.0  ;;  %v12782_v23 = vld [vmem:[#allocation130_spill] sm:$0xff] }
 0x530   : > { %12738 = vst [vmem:[#allocation169_spill] sm:$0xff] %v9952_v34  ;;  %v9963_v33 = vpop.eup %5650  ;;  %5670 = vpow2.f32 %v3960_v7  ;;  %v12744_v60 = vsub.f32 %v12661_v17, %v9525_v27  ;;  %v3980_v39 = vmul.f32 1.442695, %v12747_v62  ;;  %v4025_v7 = vsel %vm12749_vm14, %v9934_v52, 0.0  ;;  %v12756_v17 = vld [vmem:[#allocation23_spill] sm:$0xff] }
 0x531   : > { %12743 = vst [vmem:[#allocation175_spill] sm:$0xff] %v9963_v33  ;;  %v4192_v48 = vadd.f32 %v4191_v2, %v4023_v21  ;;  %v9970_v14 = vpop.eup %5652  ;;  %5672 = vpow2.f32 %v3964_v8  ;;  %v12752_v2 = vsub.f32 %v12664_v13, %v9525_v27  ;;  %v12755_v37 = vsub.f32 %v12665_v41, %v9525_v27  ;;  %v12764_v13 = vld [vmem:[#allocation25_spill] sm:$0xff]  ;;  %v12769_v41 = vld [vmem:[#allocation114_spill] sm:$0xff] }
 0x532   : > { %v3976_v11 = vmul.f32 1.442695, %v12744_v60  ;;  %12746 = vst [vmem:[#allocation180_spill] sm:$0xff] %v9970_v14  ;;  %v9981_v60 = vpop.eup %5654  ;;  %5674 = vpow2.f32 %v3968_v24  ;;  %vm12757_vm4 = vcmp.eq.f32.partialorder %v12756_v17, %v12711_v0  ;;  %v12763_v17 = vsub.f32 %v12668_v53, %v9525_v27  ;;  %v12777_v53 = vld [vmem:[#allocation124_spill] sm:$0xff] }
 0x533   : > { %12751 = vst [vmem:[#allocation186_spill] sm:$0xff] %v9981_v60  ;;  %v3984_v21 = vmul.f32 1.442695, %v12752_v2  ;;  %v4193_v8 = vadd.f32 %v4192_v48, %v4025_v7  ;;  %v9988_v62 = vpop.eup %5656  ;;  %5676 = vpow2.f32 %v3972_v50  ;;  %v3988_v52 = vmul.f32 1.442695, %v12755_v37 }
 0x534   : > { %12754 = vst [vmem:[#allocation191_spill] sm:$0xff] %v9988_v62  ;;  %v4027_v24 = vsel %vm12757_vm4, %v9945_v18, 0.0  ;;  %v9999_v2 = vpop.eup %5658  ;;  %5678 = vpow2.f32 %v3976_v11  ;;  %v12760_v48 = vsub.f32 %v12666_v44, %v9525_v27  ;;  %v3996_v18 = vmul.f32 1.442695, %v12763_v17  ;;  %v12772_v44 = vld [vmem:[#allocation26_spill] sm:$0xff] }
 0x535   : > { %12759 = vst [vmem:[#allocation196_spill] sm:$0xff] %v9999_v2  ;;  %v4194_v50 = vadd.f32 %v4193_v8, %v4027_v24  ;;  %v10006_v37 = vpop.eup %5660  ;;  %5680 = vpow2.f32 %v3980_v39  ;;  %vm12765_vm14 = vcmp.eq.f32.partialorder %v12764_v13, %v12711_v0  ;;  %v12768_v8 = vsub.f32 %v12669_v19, %v9525_v27  ;;  %v12780_v19 = vld [vmem:[#allocation29_spill] sm:$0xff] }
 0x536   : > { %v3992_v7 = vmul.f32 1.442695, %v12760_v48  ;;  %12762 = vst [vmem:[#allocation201_spill] sm:$0xff] %v10006_v37  ;;  %v4029_v11 = vsel %vm12765_vm14, %v9952_v34, 0.0  ;;  %v10017_v48 = vpop.eup %5662  ;;  %5682 = vpow2.f32 %v3984_v21  ;;  %v12771_v13 = vsub.f32 %v12671_v25, %v9525_v27 }
 0x537   : > { %12767 = vst [vmem:[#allocation40_spill] sm:$0xff] %v10017_v48  ;;  %v4000_v24 = vmul.f32 1.442695, %v12768_v8  ;;  %v4195_v39 = vadd.f32 %v4194_v50, %v4029_v11  ;;  %v10024_v17 = vpop.eup %5664  ;;  %5684 = vpow2.f32 %v3988_v52  ;;  %vm12773_vm4 = vcmp.eq.f32.partialorder %v12772_v44, %v12711_v0 }
 0x538   : > { %12770 = vst [vmem:[#allocation15_spill] sm:$0xff] %v10024_v17  ;;  %v4004_v34 = vmul.f32 1.442695, %v12771_v13  ;;  %v4031_v21 = vsel %vm12773_vm4, %v9963_v33, 0.0  ;;  %v10035_v8 = vpop.eup %5666  ;;  %5686 = vpow2.f32 %v3992_v7  ;;  %v12776_v50 = vsub.f32 %v12672_v30, %v9525_v27  ;;  %v12790_v30 = vld [vmem:[#allocation32_spill] sm:$0xff] }
 0x539   : > { %12775 = vst [vmem:[#allocation41_spill] sm:$0xff] %v10035_v8  ;;  %v4196_v52 = vadd.f32 %v4195_v39, %v4031_v21  ;;  %v10042_v13 = vpop.eup %5668  ;;  %5688 = vpow2.f32 %v3996_v18  ;;  %v12779_v44 = vsub.f32 %v9515_v10, %v9525_v27  ;;  %vm12781_vm14 = vcmp.eq.f32.partialorder %v12780_v19, %v12711_v0  ;;  %v12786_v10 = vld [vmem:[#allocation135_spill] sm:$0xff] }
 0x53a   : > { %v4008_v11 = vmul.f32 1.442695, %v12776_v50  ;;  %12778 = vst [vmem:[#allocation44_spill] sm:$0xff] %v10042_v13  ;;  %v4033_v7 = vsel %vm12781_vm14, %v9970_v14, 0.0  ;;  %v10053_v50 = vpop.eup %5670  ;;  %v12784_v39 = vsub.f32 %v9442_v12, %v9523_v61  ;;  %5690 = vpow2.f32 %v4000_v24 }
 0x53b   : > { %v4012_v33 = vmul.f32 1.442695, %v12779_v44  ;;  %12783 = vst [vmem:[#allocation51_spill] sm:$0xff] %v10053_v50  ;;  %v4197_v18 = vadd.f32 %v4196_v52, %v4033_v7  ;;  %v10062_v25 = vpop.eup %5672  ;;  %v12788_v19 = vsub.f32 %v9486_v3, %v9523_v61  ;;  %5692 = vpow2.f32 %v4004_v34 }
 0x53c   : > { %v10058_v21 = vmul.f32 1.442695, %v12784_v39  ;;  %12787 = vst [vmem:[#allocation63_spill] sm:$0xff] %v10062_v25  ;;  %vm12791_vm4 = vcmp.eq.f32.partialorder %v12790_v30, %v12711_v0  ;;  %v12792_v39 = vld [vmem:[#allocation141_spill] sm:$0xff]  ;;  %v10075_v52 = vpop.eup %5674  ;;  %v12794_v7 = vsub.f32 %v9507_v56, %v9523_v61  ;;  %5694 = vpow2.f32 %v4008_v11  ;;  %v12800_v30 = vld [vmem:[#allocation151_spill] sm:$0xff] }
 0x53d   : > { %v10067_v14 = vmul.f32 1.442695, %v12788_v19  ;;  %v4035_v12 = vsel %vm12791_vm4, %v9981_v60, 0.0  ;;  %12793 = vst [vmem:[#allocation73_spill] sm:$0xff] %v10075_v52  ;;  %v12796_v19 = vld [vmem:[#allocation147_spill] sm:$0xff]  ;;  %5696 = vpow2.f32 %v4012_v33  ;;  %v12806_v60 = vld [vmem:[#allocation28_spill] sm:$0xff] }
 0x53e   : > { %12785 = vst [vmem:[#allocation57_spill] sm:$0xff] %v10058_v21  ;;  %v10080_v44 = vmul.f32 1.442695, %v12794_v7  ;;  %v4198_v3 = vadd.f32 %v4197_v18, %v4035_v12  ;;  %v12798_v21 = vld [vmem:[#allocation34_spill] sm:$0xff]  ;;  %5698 = vpow2.f32 %v9847_v63  ;;  %vm12807_vm4 = vcmp.eq.f32.partialorder %v12806_v60, %v12711_v0  ;;  %v12809_v63 = vld [vmem:[#allocation179_spill] sm:$0xff]  ;;  %v12821_v33 = vld [vmem:[#allocation53_spill] sm:$0xff] }
 0x53f   : > { %12789 = vst [vmem:[#allocation70_spill] sm:$0xff] %v10067_v14  ;;  %v10084_v14 = vpop.eup %5676  ;;  %vm12799_vm14 = vcmp.eq.f32.partialorder %v12798_v21, %v12711_v0  ;;  %5700 = vpow2.f32 %v9852_v35  ;;  %v4039_v7 = vsel %vm12807_vm4, %v9999_v2, 0.0  ;;  %v12808_v21 = vld [vmem:[#allocation172_spill] sm:$0xff]  ;;  %v12819_v18 = vld [vmem:[#allocation46_spill] sm:$0xff]  ;;  %vm12822_vm0 = vcmp.eq.f32.partialorder %v12821_v33, %v12711_v0  ;;  %v12824_v2 = vld [vmem:[#allocation31_spill] sm:$0xff] }
 0x540   : > { %12795 = vst [vmem:[#allocation78_spill] sm:$0xff] %v10080_v44  ;;  %12797 = vst [vmem:[#allocation84_spill] sm:$0xff] %v10084_v14  ;;  %v4037_v24 = vsel %vm12799_vm14, %v9988_v62, 0.0  ;;  %v10094_v44 = vpop.eup %5678  ;;  %5702 = vpow2.f32 %v9862_v6  ;;  %v12814_v62 = vld [vmem:[#allocation39_spill] sm:$0xff]  ;;  %vm12820_vm4 = vcmp.eq.f32.partialorder %v12819_v18, %v12711_v0  ;;  %v12828_v18 = vld [vmem:[#allocation80_spill] sm:$0xff] }
 0x541   : > { %12802 = vst [vmem:[#allocation90_spill] sm:$0xff] %v10094_v44  ;;  %v4199_v11 = vadd.f32 %v4198_v3, %v4037_v24  ;;  %v10101_v55 = vpop.eup %5680  ;;  %5704 = vpow2.f32 %v9867_v16  ;;  %vm12815_vm14 = vcmp.eq.f32.partialorder %v12814_v62, %v12711_v0  ;;  %v4043_v16 = vsel %vm12820_vm4, %v10017_v48, 0.0  ;;  %v12830_v33 = vld [vmem:[#allocation86_spill] sm:$0xff] }
 0x542   : > { %12805 = vst [vmem:[#allocation93_spill] sm:$0xff] %v10101_v55  ;;  %v10112_v3 = vpop.eup %5682  ;;  %v4041_v24 = vsel %vm12815_vm14, %v10006_v37, 0.0  ;;  %5706 = vpow2.f32 %v9877_v4  ;;  %v4045_v62 = vsel %vm12822_vm0, %v10024_v17, 0.0  ;;  %vm12825_vm14 = vcmp.eq.f32.partialorder %v12824_v2, %v12711_v0  ;;  %v12826_v4 = vld [vmem:[#allocation66_spill] sm:$0xff]  ;;  %v12833_v2 = vld [vmem:[#allocation33_spill] sm:$0xff] }
 0x543   : > { %12810 = vst [vmem:[#allocation99_spill] sm:$0xff] %v10112_v3  ;;  %v4200_v34 = vadd.f32 %v4199_v11, %v4039_v7  ;;  %v10119_v56 = vpop.eup %5684  ;;  %v4047_v7 = vsel %vm12825_vm14, %v10035_v8, 0.0  ;;  %vm12827_vm9 = vcmp.eq.f32.partialorder %v12826_v4, %v12711_v0  ;;  %vm12829_vm4 = vcmp.eq.f32.partialorder %v12828_v18, %v12711_v0  ;;  %v12835_v4 = vld [vmem:[#allocation95_spill] sm:$0xff]  ;;  %v12837_v18 = vld [vmem:[#allocation108_spill] sm:$0xff]  ;;  %v12840_v17 = vld [vmem:[#allocation113_spill] sm:$0xff] }
 0x544   : > { %12813 = vst [vmem:[#allocation104_spill] sm:$0xff] %v10119_v56  ;;  %v10130_v11 = vpop.eup %5686  ;;  %v4049_v6 = vsel %vm12827_vm9, %v10042_v13, 0.0  ;;  %v4051_v48 = vsel %vm12829_vm4, %v10053_v50, 0.0  ;;  %vm12831_vm0 = vcmp.eq.f32.partialorder %v12830_v33, %v12711_v0  ;;  %vm12834_vm14 = vcmp.eq.f32.partialorder %v12833_v2, %v12711_v0 }
 0x545   : > { %12818 = vst [vmem:[#allocation110_spill] sm:$0xff] %v10130_v11  ;;  %v4201_v37 = vadd.f32 %v4200_v34, %v4041_v24  ;;  %v10141_v35 = vpop.eup %5688  ;;  %v4053_v34 = vsel %vm12831_vm0, %v10062_v25, 0.0  ;;  %v4055_v8 = vsel %vm12834_vm14, %v10075_v52, 0.0  ;;  %vm12836_vm9 = vcmp.eq.f32.partialorder %v12835_v4, %v12711_v0  ;;  %v12842_v52 = vld [vmem:[#allocation35_spill] sm:$0xff] }
 0x546   : > { %12823 = vst [vmem:[#allocation114_spill] sm:$0xff] %v10141_v35  ;;  %v10159_v24 = vpop.eup %5690  ;;  %v10169_v13 = vsel %vm12836_vm9, %v10084_v14, 0.0  ;;  %vm12838_vm4 = vcmp.eq.f32.partialorder %v12837_v18, %v12711_v0  ;;  %vm12841_vm0 = vcmp.eq.f32.partialorder %v12840_v17, %v12711_v0  ;;  %vm12843_vm14 = vcmp.eq.f32.partialorder %v12842_v52, %v12711_v0  ;;  %v12844_v14 = vld [vmem:[#allocation126_spill] sm:$0xff] }
 0x547   : > { %12832 = vst [vmem:[#allocation119_spill] sm:$0xff] %v10159_v24  ;;  %v10175_v50 = vsel %vm12838_vm4, %v10094_v44, 0.0  ;;  %v4202_v33 = vadd.f32 %v4201_v37, %v4043_v16  ;;  %v10177_v25 = vpop.eup %5692  ;;  %v10183_v2 = vsel %vm12841_vm0, %v10101_v55, 0.0  ;;  %v10189_v4 = vsel %vm12843_vm14, %v10112_v3, 0.0  ;;  %v12846_v37 = vld [vmem:[#allocation138_spill] sm:$0xff] }
 0x548   : > { %12839 = vst [vmem:[#allocation124_spill] sm:$0xff] %v10177_v25  ;;  %vm12845_vm9 = vcmp.eq.f32.partialorder %v12844_v14, %v12711_v0  ;;  %vm12847_vm4 = vcmp.eq.f32.partialorder %v12846_v37, %v12711_v0  ;;  %v10203_v17 = vpop.eup %5694  ;;  %v12849_v52 = vsub.f32 %v7977_v36, %v9523_v61  ;;  %v12850_v44 = vsub.f32 %v7983_v32, %v9523_v61  ;;  %v12853_v37 = vld [vmem:[#allocation145_spill] sm:$0xff] }
 0x549   : > { %v10195_v18 = vsel %vm12845_vm9, %v10119_v56, 0.0  ;;  %v10201_v16 = vsel %vm12847_vm4, %v10130_v11, 0.0  ;;  %12848 = vst [vmem:[#allocation130_spill] sm:$0xff] %v10203_v17  ;;  %v4203_v55 = vadd.f32 %v4202_v33, %v4045_v62  ;;  %v12851_v14 = vsub.f32 %v12587_v42, %v9523_v61  ;;  %v10214_v12 = vpop.eup %5696  ;;  %v12856_v62 = vld [vmem:[#allocation38_spill] sm:$0xff] }
 0x54a   : > { %v3630_v3 = vmul.f32 1.442695, %v12849_v52  ;;  %v3634_v60 = vmul.f32 1.442695, %v12850_v44  ;;  %12852 = vst [vmem:[#allocation135_spill] sm:$0xff] %v10214_v12  ;;  %vm12854_vm0 = vcmp.eq.f32.partialorder %v12853_v37, %v12711_v0  ;;  %vm12857_vm14 = vcmp.eq.f32.partialorder %v12856_v62, %v12711_v0  ;;  %v10234_v52 = vpop.eup %5698 }
 0x54b   : > { %v3638_v56 = vmul.f32 1.442695, %v12851_v14  ;;  %v10220_v11 = vsel %vm12854_vm0, %v10141_v35, 0.0  ;;  %v10226_v36 = vsel %vm12857_vm14, %v10159_v24, 0.0  ;;  %v12859_v32 = vsub.f32 %v12588_v31, %v9523_v61  ;;  %12861 = vst [vmem:[#allocation151_spill] sm:$0xff] %v10234_v52 }
 0x54c   : > { %12855 = vst [vmem:[#allocation141_spill] sm:$0xff] %v10220_v11  ;;  %12858 = vst [vmem:[#allocation147_spill] sm:$0xff] %v10226_v36  ;;  %v12860_v42 = vsub.f32 %v12589_v5, %v9523_v61  ;;  %v4204_v33 = vadd.f32 %v4203_v55, %v4047_v7  ;;  %v12862_v37 = vsub.f32 %v12590_v15, %v9523_v61  ;;  %v10251_v5 = vpop.eup %5700  ;;  %v12871_v7 = vld [vmem:[#allocation76_spill] sm:$0xff]  ;;  %5708 = vpow2.f32 %v9882_v47 }
 0x54d   : > { %v3642_v44 = vmul.f32 1.442695, %v12859_v32  ;;  %v12863_v62 = vsub.f32 %v12591_v9, %v9523_v61  ;;  %v12864_v31 = vsub.f32 %v12592_v49, %v9523_v61  ;;  %12865 = vst [vmem:[#allocation172_spill] sm:$0xff] %v10251_v5  ;;  %v10263_v9 = vsel %vm12176_vm15, %v10203_v17, 0.0  ;;  %v10275_v52 = vpop.eup %5702  ;;  %v12879_v17 = vld [vmem:[#allocation88_spill] sm:$0xff] }
 0x54e   : > { %v3646_v14 = vmul.f32 1.442695, %v12860_v42  ;;  %v10239_v35 = vmul.f32 1.442695, %v12862_v37  ;;  %v12866_v42 = vld [vmem:[#allocation159_spill] sm:$0xff]  ;;  %12870 = vst [vmem:[#allocation202_spill] sm:$0xff] %v10263_v9  ;;  %v12872_v37 = vsub.f32 %v12871_v7, %v9523_v61  ;;  %v4205_v15 = vadd.f32 %v4204_v33, %v4049_v6 }
 0x54f   : > { %v10244_v24 = vmul.f32 1.442695, %v12863_v62  ;;  %v10249_v32 = vmul.f32 1.442695, %v12864_v31  ;;  %vm12867_vm9 = vcmp.eq.f32.partialorder %v12866_v42, %v12711_v0  ;;  %v12873_v62 = vld [vmem:[#allocation82_spill] sm:$0xff]  ;;  %12875 = vst [vmem:[#allocation76_spill] sm:$0xff] %v10275_v52  ;;  %v12880_v9 = vsub.f32 %v12879_v17, %v9523_v61 }
 0x550   : > { %v10257_v55 = vsel %vm12867_vm9, %v10177_v25, 0.0  ;;  %v10268_v49 = vmul.f32 1.442695, %v12872_v37  ;;  %v12874_v31 = vsub.f32 %v12873_v62, %v9523_v61  ;;  %v12876_v42 = vld [vmem:[#allocation182_spill] sm:$0xff]  ;;  %v12881_v37 = vld [vmem:[#allocation92_spill] sm:$0xff]  ;;  %v12884_v52 = vld [vmem:[#allocation97_spill] sm:$0xff]  ;;  %5710 = vpow2.f32 %v3630_v3 }
 0x551   : > { %12868 = vst [vmem:[#allocation179_spill] sm:$0xff] %v10257_v55  ;;  %vm12877_vm4 = vcmp.eq.f32.partialorder %v12876_v42, %v12711_v0  ;;  %v10286_v7 = vmul.f32 1.442695, %v12880_v9  ;;  %v12882_v55 = vsub.f32 %v12881_v37, %v9523_v61  ;;  %v12885_v42 = vsub.f32 %v12884_v52, %v9523_v61  ;;  %v12887_v6 = vld [vmem:[#allocation102_spill] sm:$0xff]  ;;  %v12890_v9 = vld [vmem:[#allocation107_spill] sm:$0xff]  ;;  %v12893_v36 = vld [vmem:[#allocation112_spill] sm:$0xff] }
 0x552   : > { %v10273_v5 = vmul.f32 1.442695, %v12874_v31  ;;  %v10281_v25 = vsel %vm12877_vm4, %v10214_v12, 0.0  ;;  %v10293_v31 = vpop.eup %5704  ;;  %v12888_v33 = vsub.f32 %v12887_v6, %v9523_v61  ;;  %v12894_v47 = vsub.f32 %v12893_v36, %v9523_v61  ;;  %v12895_v52 = vld [vmem:[#allocation117_spill] sm:$0xff]  ;;  %v12898_v6 = vld [vmem:[#allocation122_spill] sm:$0xff] }
 0x553   : > { %12878 = vst [vmem:[#allocation82_spill] sm:$0xff] %v10281_v25  ;;  %v10291_v62 = vmul.f32 1.442695, %v12882_v55  ;;  %12883 = vst [vmem:[#allocation88_spill] sm:$0xff] %v10293_v31  ;;  %v10299_v12 = vmul.f32 1.442695, %v12885_v42  ;;  %v12891_v25 = vsub.f32 %v12890_v9, %v9523_v61  ;;  %v10311_v55 = vpop.eup %5706  ;;  %v4206_v31 = vadd.f32 %v4205_v15, %v4051_v48 }
 0x554   : > { %v10304_v17 = vmul.f32 1.442695, %v12888_v33  ;;  %12892 = vst [vmem:[#allocation102_spill] sm:$0xff] %v10311_v55  ;;  %v10316_v11 = vmul.f32 1.442695, %v12894_v47  ;;  %v12896_v42 = vsub.f32 %v12895_v52, %v9523_v61  ;;  %v12899_v33 = vsub.f32 %v12898_v6, %v9523_v61  ;;  %v12903_v48 = vld [vmem:[#allocation133_spill] sm:$0xff] }
 0x555   : > { %12886 = vst [vmem:[#allocation92_spill] sm:$0xff] %v10299_v12  ;;  %v10309_v37 = vmul.f32 1.442695, %v12891_v25  ;;  %v12901_v25 = vld [vmem:[#allocation128_spill] sm:$0xff]  ;;  %v12904_v36 = vsub.f32 %v12903_v48, %v9523_v61  ;;  %v12906_v47 = vld [vmem:[#allocation139_spill] sm:$0xff]  ;;  %5712 = vpow2.f32 %v3634_v60  ;;  %v12911_v48 = vld [vmem:[#allocation149_spill] sm:$0xff]  ;;  %v12917_v60 = vsub.f32 %v12721_v29, %v9525_v27 }
 0x556   : > { %12889 = vst [vmem:[#allocation97_spill] sm:$0xff] %v10304_v17  ;;  %v10321_v12 = vmul.f32 1.442695, %v12896_v42  ;;  %v10326_v17 = vmul.f32 1.442695, %v12899_v33  ;;  %v12902_v9 = vsub.f32 %v12901_v25, %v9523_v61  ;;  %v12907_v52 = vsub.f32 %v12906_v47, %v9523_v61  ;;  %v12908_v6 = vld [vmem:[#allocation144_spill] sm:$0xff] }
 0x557   : > { %v10336_v15 = vmul.f32 1.442695, %v12904_v36  ;;  %v12909_v33 = vsub.f32 %v12908_v6, %v9523_v61  ;;  %v12910_v25 = vsub.f32 %v12679_v22, %v9525_v27  ;;  %v12912_v36 = vsub.f32 %v12911_v48, %v9523_v61  ;;  %v12915_v6 = vld [vmem:[#allocation155_spill] sm:$0xff]  ;;  %v12918_v48 = vld [vmem:[#allocation161_spill] sm:$0xff] }
 0x558   : > { %12897 = vst [vmem:[#allocation107_spill] sm:$0xff] %v10321_v12  ;;  %12900 = vst [vmem:[#allocation112_spill] sm:$0xff] %v10326_v17  ;;  %v10331_v55 = vmul.f32 1.442695, %v12902_v9  ;;  %v10341_v42 = vmul.f32 1.442695, %v12907_v52  ;;  %v4207_v12 = vadd.f32 %v4206_v31, %v4053_v34  ;;  %v12913_v47 = vsub.f32 %v12713_v57, %v9525_v27 }
 0x559   : > { %12905 = vst [vmem:[#allocation117_spill] sm:$0xff] %v10336_v15  ;;  %v10346_v17 = vmul.f32 1.442695, %v12909_v33  ;;  %v3632_v9 = vmul.f32 1.442695, %v12910_v25  ;;  %5714 = vpow2.f32 %v3638_v56  ;;  %v12914_v34 = vsub.f32 %v12718_v54, %v9525_v27  ;;  %v12920_v56 = vld [vmem:[#allocation165_spill] sm:$0xff] }
 0x55a   : > { %v10354_v15 = vmul.f32 1.442695, %v12912_v36  ;;  %v3636_v3 = vmul.f32 1.442695, %v12913_v47  ;;  %v4208_v52 = vadd.f32 %v4207_v12, %v4055_v8  ;;  %v12916_v22 = vsub.f32 %v12915_v6, %v9523_v61  ;;  %v12923_v8 = vld [vmem:[#allocation170_spill] sm:$0xff]  ;;  %v12926_v29 = vld [vmem:[#allocation177_spill] sm:$0xff] }
 0x55b   : > { %v3640_v31 = vmul.f32 1.442695, %v12914_v34  ;;  %5716 = vpow2.f32 %v3632_v9  ;;  %v3644_v25 = vmul.f32 1.442695, %v12917_v60  ;;  %v12919_v57 = vsub.f32 %v12918_v48, %v9523_v61 }
 0x55c   : > { %v10365_v33 = vmul.f32 1.442695, %v12916_v22  ;;  %v12921_v54 = vsub.f32 %v12920_v56, %v9523_v61  ;;  %v12924_v12 = vsub.f32 %v12923_v8, %v9523_v61  ;;  %5718 = vpow2.f32 %v3636_v3  ;;  %v12933_v8 = vld [vmem:[#allocation187_spill] sm:$0xff] }
 0x55d   : > { %v10373_v36 = vmul.f32 1.442695, %v12919_v57  ;;  %v4209_v9 = vadd.f32 %v4208_v52, %v10169_v13  ;;  %v12927_v6 = vsub.f32 %v12926_v29, %v9523_v61  ;;  %5720 = vpow2.f32 %v3642_v44  ;;  %v12930_v57 = vld [vmem:[#allocation183_spill] sm:$0xff]  ;;  %v12936_v13 = vld [vmem:[#allocation193_spill] sm:$0xff] }
 0x55e   : > { %v10378_v47 = vmul.f32 1.442695, %v12921_v54  ;;  %v10383_v34 = vmul.f32 1.442695, %v12924_v12  ;;  %v12929_v60 = vsub.f32 %v12726_v43, %v9525_v27  ;;  %v12931_v56 = vsub.f32 %v12930_v57, %v9523_v61  ;;  %v12939_v43 = vld [vmem:[#allocation198_spill] sm:$0xff] }
 0x55f   : > { %v10389_v22 = vmul.f32 1.442695, %v12927_v6  ;;  %v12934_v3 = vsub.f32 %v12933_v8, %v9523_v61  ;;  %v12937_v52 = vsub.f32 %v12936_v13, %v9523_v61  ;;  %5722 = vpow2.f32 %v3640_v31  ;;  %v10418_v8 = vpop.eup %5708 }
 0x560   : > { %12922 = vst [vmem:[#allocation122_spill] sm:$0xff] %v10378_v47  ;;  %12925 = vst [vmem:[#allocation128_spill] sm:$0xff] %v10383_v34  ;;  %v3648_v48 = vmul.f32 1.442695, %v12929_v60  ;;  %v10397_v54 = vmul.f32 1.442695, %v12931_v56  ;;  %v4210_v44 = vadd.f32 %v4209_v9, %v10175_v50  ;;  %v12940_v6 = vsub.f32 %v12939_v43, %v9523_v61  ;;  %v10436_v43 = vpop.eup %5710 }
 0x561   : > { %12928 = vst [vmem:[#allocation133_spill] sm:$0xff] %v10389_v22  ;;  %v10402_v12 = vmul.f32 1.442695, %v12934_v3  ;;  %v10407_v29 = vmul.f32 1.442695, %v12937_v52  ;;  %5724 = vpow2.f32 %v3644_v25  ;;  %v12942_v57 = vsub.f32 %v12729_v38, %v9525_v27  ;;  %12943 = vst [vmem:[#allocation161_spill] sm:$0xff] %v10418_v8 }
 0x562   : > { %12932 = vst [vmem:[#allocation139_spill] sm:$0xff] %v10397_v54  ;;  %v10413_v60 = vmul.f32 1.442695, %v12940_v6  ;;  %5726 = vpow2.f32 %v3646_v14  ;;  %v12944_v3 = vsub.f32 %v12734_v26, %v9525_v27  ;;  %v12945_v50 = vsub.f32 %v12737_v51, %v9525_v27  ;;  %v12981_v54 = vld [vmem:[#allocation131_spill] sm:$0xff]  ;;  %v13019_v34 = vld [vmem:[#allocation12_spill] sm:$0xff] }
 0x563   : > { %12935 = vst [vmem:[#allocation144_spill] sm:$0xff] %v10402_v12  ;;  %12938 = vst [vmem:[#allocation149_spill] sm:$0xff] %v10407_v29  ;;  %v3652_v56 = vmul.f32 1.442695, %v12942_v57  ;;  %v12946_v61 = vsub.f32 %v12742_v28, %v9525_v27  ;;  %v4211_v25 = vadd.f32 %v4210_v44, %v10183_v2  ;;  %5728 = vpow2.f32 %v3648_v48  ;;  %v12980_v12 = vld [vmem:[#allocation125_spill] sm:$0xff] }
 0x564   : > { %12941 = vst [vmem:[#allocation155_spill] sm:$0xff] %v10413_v60  ;;  %v3656_v13 = vmul.f32 1.442695, %v12944_v3  ;;  %v3660_v31 = vmul.f32 1.442695, %v12945_v50  ;;  %v12947_v38 = vsub.f32 %v12745_v59, %v9525_v27  ;;  %v12948_v14 = vsub.f32 %v12750_v45, %v9525_v27  ;;  %v10454_v45 = vpop.eup %5712 }
 0x565   : > { %v3664_v9 = vmul.f32 1.442695, %v12946_v61  ;;  %5730 = vpow2.f32 %v10239_v35  ;;  %v12949_v51 = vsub.f32 %v12753_v46, %v9525_v27  ;;  %v12950_v2 = vsub.f32 %v12758_v1, %v9525_v27  ;;  %v10467_v3 = vpop.eup %5714 }
 0x566   : > { %v3668_v52 = vmul.f32 1.442695, %v12947_v38  ;;  %v3672_v26 = vmul.f32 1.442695, %v12948_v14  ;;  %v12951_v59 = vsub.f32 %v12761_v40, %v9525_v27  ;;  %v4212_v6 = vadd.f32 %v4211_v25, %v10189_v4  ;;  %v5717_v61 = vpop.eup %5716 }
 0x567   : > { %v10442_v28 = vmul.f32 1.442695, %v12949_v51  ;;  %v10447_v48 = vmul.f32 1.442695, %v12950_v2  ;;  %5732 = vpow2.f32 %v3652_v56  ;;  %v12952_v46 = vsub.f32 %v12766_v20, %v9525_v27 }
 0x568   : > { %v10452_v44 = vmul.f32 1.442695, %v12951_v59  ;;  %v12953_v1 = vsub.f32 %v12769_v41, %v9525_v27  ;;  %5734 = vpow2.f32 %v10244_v24  ;;  %v12954_v40 = vsub.f32 %v12774_v58, %v9525_v27 }
 0x569   : > { %v10460_v35 = vmul.f32 1.442695, %v12952_v46  ;;  %v12955_v4 = vsub.f32 %v12777_v53, %v9525_v27  ;;  %v12956_v56 = vsub.f32 %v12782_v23, %v9525_v27  ;;  %5736 = vpow2.f32 %v3656_v13  ;;  %v5719_v23 = vpop.eup %5718 }
 0x56a   : > { %v10465_v57 = vmul.f32 1.442695, %v12953_v1  ;;  %v10473_v50 = vmul.f32 1.442695, %v12954_v40  ;;  %v12957_v24 = vsub.f32 %v12786_v10, %v9525_v27  ;;  %v12958_v58 = vsub.f32 %v12792_v39, %v9525_v27  ;;  %v10510_v59 = vpop.eup %5720  ;;  %v12963_v1 = vld [vmem:[#allocation47_spill] sm:$0xff]  ;;  %v12967_v40 = vld [vmem:[#allocation157_spill] sm:$0xff] }
 0x56b   : > { %v10478_v20 = vmul.f32 1.442695, %v12955_v4  ;;  %v10483_v41 = vmul.f32 1.442695, %v12956_v56  ;;  %v12959_v53 = vsub.f32 %v12796_v19, %v9525_v27  ;;  %v4213_v51 = vadd.f32 %v4212_v6, %v10195_v18 }
 0x56c   : > { %v10488_v25 = vmul.f32 1.442695, %v12957_v24  ;;  %v10493_v38 = vmul.f32 1.442695, %v12958_v58  ;;  %5738 = vpow2.f32 %v10249_v32  ;;  %v12960_v10 = vsub.f32 %v12800_v30, %v9525_v27  ;;  %v12965_v32 = vld [vmem:[#allocation48_spill] sm:$0xff]  ;;  %v10519_v30 = vpop.eup %5722 }
 0x56d   : > { %v10498_v14 = vmul.f32 1.442695, %v12959_v53  ;;  %v3758_v39 = vsel %vm7863_vm7, %v10436_v43, 0.0  ;;  %5740 = vpow2.f32 %v3660_v31  ;;  %v3759_v46 = vsel %vm7867_vm8, %v5717_v61, 0.0  ;;  %v12969_v31 = vld [vmem:[#allocation163_spill] sm:$0xff]  ;;  %v10537_v60 = vpop.eup %5724 }
 0x56e   : > { %v10505_v13 = vmul.f32 1.442695, %v12960_v10  ;;  %vm12964_vm0 = vnez %v12963_v1  ;;  %vm12966_vm14 = vnez %v12965_v32  ;;  %5742 = vpow2.f32 %v10268_v49  ;;  %v12971_v53 = vld [vmem:[#allocation167_spill] sm:$0xff]  ;;  %v13000_v32 = vld [vmem:[#allocation56_spill] sm:$0xff] }
 0x56f   : > { %v3760_v18 = vsel %vm12964_vm0, %v10454_v45, 0.0  ;;  %v3761_v6 = vsel %vm12966_vm14, %v5719_v23, 0.0  ;;  %v12968_v4 = vsub.f32 %v12967_v40, %v9525_v27  ;;  %v12970_v24 = vsub.f32 %v12969_v31, %v9525_v27 }
 0x570   : > { %v12972_v10 = vsub.f32 %v12971_v53, %v9525_v27  ;;  %5744 = vpow2.f32 %v3664_v9  ;;  %v12974_v49 = vsub.f32 %v12808_v21, %v9525_v27  ;;  %v12976_v40 = vsub.f32 %v12809_v63, %v9525_v27  ;;  %v12978_v53 = vld [vmem:[#allocation19_spill] sm:$0xff]  ;;  %v12982_v63 = vld [vmem:[#allocation20_spill] sm:$0xff] }
 0x571   : > { %v10525_v56 = vmul.f32 1.442695, %v12968_v4  ;;  %v10530_v58 = vmul.f32 1.442695, %v12970_v24  ;;  %v4078_v31 = vadd.f32 %v3760_v18, %v3758_v39  ;;  %v10549_v24 = vpop.eup %5726  ;;  %5746 = vpow2.f32 %v10273_v5  ;;  %v12986_v5 = vld [vmem:[#allocation11_spill] sm:$0xff] }
 0x572   : > { %v10535_v8 = vmul.f32 1.442695, %v12972_v10  ;;  %v10542_v29 = vmul.f32 1.442695, %v12974_v49  ;;  %v10547_v4 = vmul.f32 1.442695, %v12976_v40  ;;  %vm12979_vm9 = vnez %v12978_v53  ;;  %v10557_v49 = vpop.eup %5728 }
 0x573   : > { %v3762_v10 = vsel %vm12979_vm9, %v10467_v3, 0.0  ;;  %v4115_v9 = vadd.f32 %v3761_v6, %v3759_v46  ;;  %v5344_v21 = vpack.c.bf16 %v12981_v54, %v12980_v12  ;;  %v4214_v22 = vadd.f32 %v4213_v51, %v10201_v16  ;;  %v12984_v40 = vld [vmem:[#allocation14_spill] sm:$0xff]  ;;  %v10569_v46 = vpop.eup %5730  ;;  %v12988_v54 = vld [vmem:[#allocation21_spill] sm:$0xff]  ;;  %v13048_v53 = vld [vmem:[#allocation87_spill] sm:$0xff] }
 0x574   : > { %12973 = vst [vmem:[#allocation165_spill] sm:$0xff] %v10535_v8  ;;  %12975 = vst [vmem:[#allocation170_spill] sm:$0xff] %v10542_v29  ;;  %5748 = vpow2.f32 %v3668_v52  ;;  %vm12983_vm4 = vnez %v12982_v63  ;;  %v4079_v18 = vadd.f32 %v4078_v31, %v3762_v10  ;;  %vm12985_vm15 = vcmp.eq.f32.partialorder %v12984_v40, %v12711_v0  ;;  %v10575_v51 = vpop.eup %5732  ;;  %v12990_v6 = vld [vmem:[#allocation185_spill] sm:$0xff]  ;;  %v13021_v8 = vld [vmem:[#allocation18_spill] sm:$0xff] }
 0x575   : > { %12977 = vst [vmem:[#allocation177_spill] sm:$0xff] %v10547_v4  ;;  %v3763_v39 = vsel %vm12983_vm4, %v10519_v30, 0.0  ;;  %vm12987_vm10 = vcmp.eq.f32.partialorder %v12986_v5, %v12711_v0  ;;  %5750 = vpow2.f32 %v10286_v7  ;;  %vm12989_vm2 = vnez %v12988_v54  ;;  %v12993_v4 = vld [vmem:[#allocation50_spill] sm:$0xff] }
 0x576   : > { %vm5345_vm1 = vmpackc.low %vm12987_vm10, %vm12985_vm15  ;;  %v3764_v16 = vsel %vm12989_vm2, %v10510_v59, 0.0  ;;  %v4116_v12 = vadd.f32 %v4115_v9, %v3763_v39  ;;  %v5440_v52 = vpack.c.bf16 %v5719_v23, %v5717_v61  ;;  %5752 = vpow2.f32 %v3672_v26  ;;  %v10589_v9 = vpop.eup %5734  ;;  %v12995_v26 = vld [vmem:[#allocation54_spill] sm:$0xff]  ;;  %v12998_v39 = vld [vmem:[#allocation49_spill] sm:$0xff] }
 0x577   : > { %5346 = vmatprep.subr.msk.bf16.mxu1 %vm5345_vm1, %v5344_v21  ;;  %v12991_v31 = vsub.f32 %v12990_v6, %v9525_v27  ;;  %vm12994_vm10 = vnez %v12993_v4  ;;  %v4080_v7 = vadd.f32 %v4079_v18, %v3764_v16  ;;  %vm5441_vm15 = vmpackc.low %vm12966_vm14, %vm7867_vm8  ;;  %5754 = vpow2.f32 %v10291_v62  ;;  %v12997_v21 = vld [vmem:[#allocation43_spill] sm:$0xff]  ;;  %v12999_v18 = vld [vmem:[#allocation141_spill] sm:$0xff] }
 0x578   : > { %v3765_v29 = vsel %vm12994_vm10, %v10537_v60, 0.0  ;;  %vm12996_vm1 = vnez %v12995_v26  ;;  %5442 = vmatprep.subr.msk.bf16.mxu0 %vm5441_vm15, %v5440_v52  ;;  %v5347_v6 = vpack.c.bf16 %v12998_v39, %v12997_v21  ;;  %v4215_v19 = vadd.f32 %v4214_v22, %v12999_v18  ;;  %v13007_v18 = vld [vmem:[#allocation189_spill] sm:$0xff]  ;;  %v13016_v21 = vld [vmem:[#allocation147_spill] sm:$0xff] }
 0x579   : > { %v10580_v10 = vmul.f32 1.442695, %v12991_v31  ;;  %v3766_v61 = vsel %vm12996_vm1, %v10549_v24, 0.0  ;;  %v4117_v23 = vadd.f32 %v4116_v12, %v3765_v29  ;;  %v10597_v31 = vpop.eup %5736  ;;  %5756 = vpow2.f32 %v10442_v28  ;;  %v13005_v12 = vld [vmem:[#allocation92_spill] sm:$0xff]  ;;  %v13035_v4 = vld [vmem:[#allocation77_spill] sm:$0xff] }
 0x57a   : > { %vm13001_vm8 = vnez %v13000_v32  ;;  %v4081_v62 = vadd.f32 %v4080_v7, %v3766_v61  ;;  %v10610_v29 = vpop.eup %5738  ;;  %5758 = vpow2.f32 %v13005_v12  ;;  %v3768_v28 = vsel %vm8171_vm5, %v10569_v46, 0.0  ;;  %v13070_v32 = vld [vmem:[#allocation72_spill] sm:$0xff]  ;;  %v13085_v22 = vld [vmem:[#allocation109_spill] sm:$0xff] }
 0x57b   : > { %12992 = vst [vmem:[#allocation183_spill] sm:$0xff] %v10580_v10  ;;  %v3767_v16 = vsel %vm13001_vm8, %v10557_v49, 0.0  ;;  %v13002_v10 = vld [vmem:[#allocation13_spill] sm:$0xff]  ;;  %v5443_v7 = vpack.c.bf16 %v10454_v45, %v10436_v43  ;;  %v10618_v61 = vpop.eup %5740  ;;  %5760 = vpow2.f32 %v10447_v48  ;;  %v13008_v12 = vsub.f32 %v13007_v18, %v9525_v27  ;;  %v13014_v48 = vld [vmem:[#allocation136_spill] sm:$0xff] }
 0x57c   : > { %vm13003_vm14 = vcmp.eq.f32.partialorder %v12984_v40, %v13002_v10  ;;  %vm13004_vm15 = vcmp.eq.f32.partialorder %v12986_v5, %v13002_v10  ;;  %v4118_v52 = vadd.f32 %v4117_v23, %v3767_v16  ;;  %v13010_v23 = vld [vmem:[#allocation60_spill] sm:$0xff]  ;;  %v4082_v16 = vadd.f32 %v4081_v62, %v3768_v28  ;;  %v10633_v43 = vpop.eup %5742  ;;  %v13012_v45 = vld [vmem:[#allocation97_spill] sm:$0xff]  ;;  %v13015_v40 = vld [vmem:[#allocation142_spill] sm:$0xff] }
 0x57d   : > { %vm5348_vm13 = vmpackc.low %vm13004_vm15, %vm13003_vm14  ;;  %v10628_v5 = vmul.f32 1.442695, %v13008_v12  ;;  %5762 = vpow2.f32 %v13012_v45  ;;  %v3770_v1 = vsel %vm8248_vm3, %v10589_v9, 0.0  ;;  %v5350_v18 = vpack.c.bf16 %v13015_v40, %v13014_v48  ;;  %v10641_v12 = vpop.eup %5744  ;;  %v13017_v62 = vld [vmem:[#allocation69_spill] sm:$0xff]  ;;  %v13023_v40 = vld [vmem:[#allocation27_spill] sm:$0xff] }
 0x57e   : > { %5349 = vmatpush1.bf16.msk.msra.mxu1 %vm5348_vm13, %v5347_v6  ;;  %vm5444_vm14 = vmpackc.low %vm12964_vm0, %vm7863_vm7  ;;  %vm13011_vm13 = vnez %v13010_v23  ;;  %5764 = vpow2.f32 %v10452_v44  ;;  %vm13018_vm7 = vnez %v13017_v62  ;;  %v4083_v45 = vadd.f32 %v4082_v16, %v3770_v1 }
 0x57f   : > { %13009 = vst [vmem:[#allocation187_spill] sm:$0xff] %v10628_v5  ;;  %v3769_v6 = vsel %vm13011_vm13, %v10575_v51, 0.0  ;;  %5445 = vmatpush1.bf16.msk.msra.mxu0 %vm5444_vm14, %v5443_v7  ;;  %v4216_v5 = vadd.f32 %v4215_v19, %v13016_v21  ;;  %v3771_v28 = vsel %vm13018_vm7, %v10597_v31, 0.0  ;;  %vm13020_vm0 = vcmp.eq.f32.partialorder %v13019_v34, %v12711_v0 }
 0x580   : > { %v4119_v39 = vadd.f32 %v4118_v52, %v3769_v6  ;;  %vm13022_vm15 = vcmp.eq.f32.partialorder %v13021_v8, %v12711_v0  ;;  %v10654_v52 = vpop.eup %5746  ;;  %5766 = vpow2.f32 %v10309_v37  ;;  %vm13024_vm11 = vnez %v13023_v40  ;;  %v13025_v6 = vld [vmem:[#allocation194_spill] sm:$0xff] }
 0x581   : > { %vm5351_vm14 = vmpackc.low %vm13022_vm15, %vm13020_vm0  ;;  %v3772_v44 = vsel %vm13024_vm11, %v10610_v29, 0.0  ;;  %v5446_v19 = vpack.c.bf16 %v10537_v60, %v10519_v30  ;;  %v10662_v7 = vpop.eup %5748  ;;  %5768 = vpow2.f32 %v10460_v35  ;;  %v13026_v16 = vsub.f32 %v13025_v6, %v9525_v27  ;;  %v13028_v37 = vld [vmem:[#allocation30_spill] sm:$0xff]  ;;  %v13030_v35 = vld [vmem:[#allocation75_spill] sm:$0xff] }
 0x582   : > { %v4120_v21 = vadd.f32 %v4119_v39, %v3771_v28  ;;  %5352 = vmatprep.subr.msk.bf16.mxu1 %vm5351_vm14, %v5350_v18  ;;  %vm13029_vm0 = vnez %v13028_v37  ;;  %v4084_v47 = vadd.f32 %v4083_v45, %v3772_v44  ;;  %vm5447_vm15 = vmpackc.low %vm12994_vm10, %vm12983_vm4  ;;  %v10677_v60 = vpop.eup %5750  ;;  %5770 = vpow2.f32 %v10316_v11  ;;  %v13032_v18 = vld [vmem:[#allocation55_spill] sm:$0xff]  ;;  %v13033_v28 = vld [vmem:[#allocation61_spill] sm:$0xff] }
 0x583   : > { %v10668_v1 = vmul.f32 1.442695, %v13026_v16  ;;  %v3773_v48 = vsel %vm13029_vm0, %v10618_v61, 0.0  ;;  %vm13031_vm14 = vnez %v13030_v35  ;;  %5448 = vmatprep.subr.msk.bf16.mxu0 %vm5447_vm15, %v5446_v19  ;;  %v5353_v6 = vpack.c.bf16 %v13033_v28, %v13032_v18  ;;  %v10685_v16 = vpop.eup %5752  ;;  %v13034_v45 = vld [vmem:[#allocation179_spill] sm:$0xff]  ;;  %v13105_v40 = vld [vmem:[#allocation118_spill] sm:$0xff] }
 0x584   : > { %v3774_v30 = vsel %vm13031_vm14, %v10633_v43, 0.0  ;;  %v4121_v39 = vadd.f32 %v4120_v21, %v3773_v48  ;;  %v4217_v63 = vadd.f32 %v4216_v5, %v13034_v45  ;;  %5772 = vpow2.f32 %v10465_v57  ;;  %v10698_v21 = vpop.eup %5754  ;;  %v13039_v19 = vld [vmem:[#allocation107_spill] sm:$0xff]  ;;  %v13041_v45 = vld [vmem:[#allocation200_spill] sm:$0xff]  ;;  %v13127_v5 = vld [vmem:[#allocation129_spill] sm:$0xff] }
 0x585   : > { %13027 = vst [vmem:[#allocation193_spill] sm:$0xff] %v10668_v1  ;;  %vm13036_vm4 = vnez %v13035_v4  ;;  %v4085_v11 = vadd.f32 %v4084_v47, %v3774_v30  ;;  %vm13037_vm10 = vcmp.eq.f32.partialorder %v13019_v34, %v13002_v10  ;;  %vm13038_vm15 = vcmp.eq.f32.partialorder %v13021_v8, %v13002_v10  ;;  %v10706_v30 = vpop.eup %5756  ;;  %v13051_v34 = vld [vmem:[#allocation158_spill] sm:$0xff] }
 0x586   : > { %v3775_v44 = vsel %vm13036_vm4, %v10641_v12, 0.0  ;;  %vm5354_vm14 = vmpackc.low %vm13038_vm15, %vm13037_vm10  ;;  %5774 = vpow2.f32 %v13039_v19  ;;  %v3776_v57 = vsel %vm8385_vm12, %v10654_v52, 0.0  ;;  %v5449_v47 = vpack.c.bf16 %v10510_v59, %v10467_v3  ;;  %v10721_v3 = vpop.eup %5758  ;;  %v13047_v59 = vld [vmem:[#allocation112_spill] sm:$0xff] }
 0x587   : > { %v4122_v48 = vadd.f32 %v4121_v39, %v3775_v44  ;;  %5355 = vmatpush1.bf16.msk.msra.mxu1 %vm5354_vm14, %v5353_v6  ;;  %vm5450_vm10 = vmpackc.low %vm12989_vm2, %vm12979_vm9  ;;  %5776 = vpow2.f32 %v10473_v50  ;;  %v13042_v19 = vsub.f32 %v13041_v45, %v9525_v27  ;;  %v13044_v39 = vld [vmem:[#allocation83_spill] sm:$0xff]  ;;  %v4086_v44 = vadd.f32 %v4085_v11, %v3776_v57  ;;  %13046 = vst [vmem:[#allocation16_spill] sm:$0xff] %v10721_v3  ;;  %v13050_v50 = vld [vmem:[#allocation153_spill] sm:$0xff]  ;;  %v10729_v45 = vpop.eup %5760 }
 0x588   : > { %vm13045_vm14 = vnez %v13044_v39  ;;  %5778 = vpow2.f32 %v13047_v59  ;;  %vm13049_vm15 = vnez %v13048_v53  ;;  %5451 = vmatpush1.bf16.msk.msra.mxu0 %vm5450_vm10, %v5449_v47  ;;  %v5356_v27 = vpack.c.bf16 %v13051_v34, %v13050_v50  ;;  %v13054_v11 = vld [vmem:[#allocation89_spill] sm:$0xff]  ;;  %v10744_v34 = vpop.eup %5762 }
 0x589   : > { %v10716_v8 = vmul.f32 1.442695, %v13042_v19  ;;  %v3777_v6 = vsel %vm13045_vm14, %v10662_v7, 0.0  ;;  %v3778_v54 = vsel %vm13049_vm15, %v10677_v60, 0.0  ;;  %v13052_v19 = vld [vmem:[#allocation202_spill] sm:$0xff]  ;;  %5780 = vpow2.f32 %v10478_v20 }
 0x58a   : > { %v4123_v28 = vadd.f32 %v4122_v48, %v3777_v6  ;;  %v10732_v18 = vadd.f32 %v4217_v63, %v13052_v19  ;;  %vm13055_vm2 = vnez %v13054_v11  ;;  %v4087_v59 = vadd.f32 %v4086_v44, %v3778_v54  ;;  %v13058_v48 = vld [vmem:[#allocation22_spill] sm:$0xff]  ;;  %v13060_v63 = vld [vmem:[#allocation36_spill] sm:$0xff]  ;;  %v10752_v44 = vpop.eup %5764  ;;  %v13062_v54 = vld [vmem:[#allocation37_spill] sm:$0xff] }
 0x58b   : > { %13043 = vst [vmem:[#allocation198_spill] sm:$0xff] %v10716_v8  ;;  %v3779_v57 = vsel %vm13055_vm2, %v10685_v16, 0.0  ;;  %v13056_v8 = vld [vmem:[#allocation24_spill] sm:$0xff]  ;;  %vm13059_vm10 = vcmp.eq.f32.partialorder %v13058_v48, %v12711_v0  ;;  %5782 = vpow2.f32 %v10331_v55  ;;  %vm13061_vm14 = vnez %v13060_v63 }
 0x58c   : > { %13053 = vst [vmem:[#allocation17_spill] sm:$0xff] %v10732_v18  ;;  %vm13057_vm9 = vcmp.eq.f32.partialorder %v13056_v8, %v12711_v0  ;;  %v3780_v20 = vsel %vm13061_vm14, %v10698_v21, 0.0  ;;  %v4124_v47 = vadd.f32 %v4123_v28, %v3779_v57  ;;  %v5452_v6 = vpack.c.bf16 %v10575_v51, %v10557_v49  ;;  %v13064_v19 = vld [vmem:[#allocation96_spill] sm:$0xff]  ;;  %v10765_v28 = vpop.eup %5766  ;;  %v13067_v49 = vld [vmem:[#allocation98_spill] sm:$0xff] }
 0x58d   : > { %vm5357_vm15 = vmpackc.low %vm13059_vm10, %vm13057_vm9  ;;  %5784 = vpow2.f32 %v10483_v41  ;;  %vm13063_vm9 = vnez %v13062_v54  ;;  %vm13065_vm10 = vnez %v13064_v19  ;;  %v4088_v18 = vadd.f32 %v4087_v59, %v3780_v20  ;;  %v13066_v41 = vld [vmem:[#allocation117_spill] sm:$0xff]  ;;  %v13069_v57 = vld [vmem:[#allocation68_spill] sm:$0xff]  ;;  %v10777_v23 = vpop.eup %5768 }
 0x58e   : > { %5358 = vmatprep.subr.msk.bf16.mxu1 %vm5357_vm15, %v5356_v27  ;;  %v3781_v50 = vsel %vm13063_vm9, %v10706_v30, 0.0  ;;  %v3782_v55 = vsel %vm13065_vm10, %v10721_v3, 0.0  ;;  %vm5453_vm15 = vmpackc.low %vm13011_vm13, %vm13001_vm8  ;;  %5786 = vpow2.f32 %v13066_v41  ;;  %vm13068_vm9 = vnez %v13067_v49  ;;  %v13077_v41 = vld [vmem:[#allocation169_spill] sm:$0xff]  ;;  %v13152_v63 = vld [vmem:[#allocation140_spill] sm:$0xff] }
 0x58f   : > { %v3783_v51 = vsel %vm13068_vm9, %v10729_v45, 0.0  ;;  %v4125_v27 = vadd.f32 %v4124_v47, %v3781_v50  ;;  %5454 = vmatprep.subr.msk.bf16.mxu0 %vm5453_vm15, %v5452_v6  ;;  %v5359_v59 = vpack.c.bf16 %v13070_v32, %v13069_v57  ;;  %5788 = vpow2.f32 %v10488_v25  ;;  %v10791_v6 = vpop.eup %5770  ;;  %v13074_v25 = vld [vmem:[#allocation103_spill] sm:$0xff]  ;;  %v13179_v20 = vld [vmem:[#allocation152_spill] sm:$0xff] }
 0x590   : > { %v3784_v1 = vsel %vm8575_vm6, %v10744_v34, 0.0  ;;  %v4089_v3 = vadd.f32 %v4088_v18, %v3782_v55  ;;  %vm13072_vm8 = vcmp.eq.f32.partialorder %v13056_v8, %v13002_v10  ;;  %vm13073_vm13 = vcmp.eq.f32.partialorder %v13058_v48, %v13002_v10  ;;  %v13076_v55 = vld [vmem:[#allocation164_spill] sm:$0xff]  ;;  %v10803_v32 = vpop.eup %5772 }
 0x591   : > { %vm5360_vm2 = vmpackc.low %vm13073_vm13, %vm13072_vm8  ;;  %v5455_v47 = vpack.c.bf16 %v10569_v46, %v10549_v24  ;;  %5790 = vpow2.f32 %v10341_v42  ;;  %vm13075_vm9 = vnez %v13074_v25  ;;  %v4126_v50 = vadd.f32 %v4125_v27, %v3783_v51  ;;  %v13078_v24 = vld [vmem:[#allocation106_spill] sm:$0xff]  ;;  %v13081_v42 = vld [vmem:[#allocation23_spill] sm:$0xff]  ;;  %v10822_v27 = vpop.eup %5774 }
 0x592   : > { %v3785_v18 = vsel %vm13075_vm9, %v10752_v44, 0.0  ;;  %5361 = vmatpush1.bf16.msk.msra.mxu1 %vm5360_vm2, %v5359_v59  ;;  %v5362_v48 = vpack.c.bf16 %v13077_v41, %v13076_v55  ;;  %5792 = vpow2.f32 %v10493_v38  ;;  %vm13079_vm8 = vnez %v13078_v24  ;;  %vm13080_vm13 = vmpackc.low %vm8171_vm5, %vm12996_vm1  ;;  %v13083_v51 = vld [vmem:[#allocation25_spill] sm:$0xff]  ;;  %v10834_v55 = vpop.eup %5776 }
 0x593   : > { %v3786_v46 = vsel %vm13079_vm8, %v10765_v28, 0.0  ;;  %v4090_v8 = vadd.f32 %v4089_v3, %v3784_v1  ;;  %5457 = vmatpush1.bf16.msk.msra.mxu0 %vm13080_vm13, %v5455_v47  ;;  %vm13082_vm2 = vcmp.eq.f32.partialorder %v13081_v42, %v12711_v0  ;;  %vm13084_vm15 = vcmp.eq.f32.partialorder %v13083_v51, %v12711_v0  ;;  %vm5459_vm5 = vmpackc.low %vm13029_vm0, %vm13018_vm7  ;;  %v13087_v3 = vld [vmem:[#allocation42_spill] sm:$0xff]  ;;  %v13088_v59 = vld [vmem:[#allocation45_spill] sm:$0xff]  ;;  %v10848_v37 = vpop.eup %5778 }
 0x594   : > { %vm5363_vm9 = vmpackc.low %vm13084_vm15, %vm13082_vm2  ;;  %v5458_v38 = vpack.c.bf16 %v10618_v61, %v10597_v31  ;;  %5794 = vpow2.f32 %v10346_v17  ;;  %vm13086_vm8 = vnez %v13085_v22  ;;  %v4127_v1 = vadd.f32 %v4126_v50, %v3785_v18  ;;  %v13089_v17 = vld [vmem:[#allocation62_spill] sm:$0xff]  ;;  %v13096_v18 = vld [vmem:[#allocation175_spill] sm:$0xff] }
 0x595   : > { %v3787_v26 = vsel %vm13086_vm8, %v10777_v23, 0.0  ;;  %5364 = vmatprep.subr.msk.bf16.mxu1 %vm5363_vm9, %v5362_v48  ;;  %v5365_v47 = vpack.c.bf16 %v13088_v59, %v13087_v3  ;;  %5796 = vpow2.f32 %v10498_v14  ;;  %vm13090_vm1 = vnez %v13089_v17  ;;  %v13097_v50 = vld [vmem:[#allocation180_spill] sm:$0xff]  ;;  %v13203_v17 = vld [vmem:[#allocation162_spill] sm:$0xff] }
 0x596   : > { %v3788_v31 = vsel %vm13090_vm1, %v10791_v6, 0.0  ;;  %v4091_v61 = vadd.f32 %v4090_v8, %v3786_v46  ;;  %5460 = vmatprep.subr.msk.bf16.mxu0 %vm5459_vm5, %v5458_v38  ;;  %vm13091_vm9 = vcmp.eq.f32.partialorder %v13081_v42, %v13002_v10  ;;  %vm13092_vm15 = vcmp.eq.f32.partialorder %v13083_v51, %v13002_v10  ;;  %v13094_v8 = vld [vmem:[#allocation65_spill] sm:$0xff]  ;;  %v10860_v46 = vpop.eup %5780 }
 0x597   : > { %vm5366_vm7 = vmpackc.low %vm13092_vm15, %vm13091_vm9  ;;  %v5461_v62 = vpack.c.bf16 %v10610_v29, %v10589_v9  ;;  %vm13093_vm0 = vnez %v13030_v35  ;;  %5798 = vpow2.f32 %v10354_v15  ;;  %vm13095_vm2 = vnez %v13094_v8  ;;  %v13098_v9 = vld [vmem:[#allocation116_spill] sm:$0xff]  ;;  %v13101_v15 = vld [vmem:[#allocation26_spill] sm:$0xff] }
 0x598   : > { %v3789_v14 = vsel %vm13095_vm2, %v10803_v32, 0.0  ;;  %v4128_v48 = vadd.f32 %v4127_v1, %v3787_v26  ;;  %5367 = vmatpush1.bf16.msk.msra.mxu1 %vm5366_vm7, %v5365_v47  ;;  %v5368_v41 = vpack.c.bf16 %v13097_v50, %v13096_v18  ;;  %5800 = vpow2.f32 %v10505_v13  ;;  %vm13100_vm9 = vmpackc.low %vm13024_vm11, %vm8248_vm3  ;;  %v13103_v26 = vld [vmem:[#allocation29_spill] sm:$0xff]  ;;  %v10879_v1 = vpop.eup %5782  ;;  %v13117_v50 = vld [vmem:[#allocation186_spill] sm:$0xff] }
 0x599   : > { %vm13099_vm5 = vnez %v13098_v9  ;;  %v4092_v38 = vadd.f32 %v4091_v61, %v3788_v31  ;;  %5463 = vmatpush1.bf16.msk.msra.mxu0 %vm13100_vm9, %v5461_v62  ;;  %vm13102_vm15 = vcmp.eq.f32.partialorder %v13101_v15, %v12711_v0  ;;  %vm13104_vm7 = vcmp.eq.f32.partialorder %v13103_v26, %v12711_v0  ;;  %v13108_v31 = vld [vmem:[#allocation52_spill] sm:$0xff]  ;;  %v13109_v61 = vld [vmem:[#allocation58_spill] sm:$0xff]  ;;  %v10891_v18 = vpop.eup %5784 }
 0x59a   : > { %v3790_v29 = vsel %vm13099_vm5, %v10822_v27, 0.0  ;;  %vm5369_vm13 = vmpackc.low %vm13104_vm7, %vm13102_vm15  ;;  %v5464_v13 = vpack.c.bf16 %v10662_v7, %v10641_v12  ;;  %5802 = vpow2.f32 %v10365_v33  ;;  %vm13106_vm5 = vnez %v13105_v40  ;;  %v13110_v33 = vld [vmem:[#allocation121_spill] sm:$0xff] }
 0x59b   : > { %v3791_v2 = vsel %vm13106_vm5, %v10834_v55, 0.0  ;;  %v4129_v47 = vadd.f32 %v4128_v48, %v3789_v14  ;;  %5370 = vmatprep.subr.msk.bf16.mxu1 %vm5369_vm13, %v5368_v41  ;;  %vm13107_vm3 = vnez %v13044_v39  ;;  %v5371_v62 = vpack.c.bf16 %v13109_v61, %v13108_v31  ;;  %v10905_v39 = vpop.eup %5786  ;;  %v13118_v41 = vld [vmem:[#allocation191_spill] sm:$0xff] }
 0x59c   : > { %vm5465_vm11 = vmpackc.low %vm13107_vm3, %vm13036_vm4  ;;  %5804 = vpow2.f32 %v10525_v56  ;;  %vm13111_vm9 = vnez %v13110_v33  ;;  %v4093_v7 = vadd.f32 %v4092_v38, %v3790_v29  ;;  %vm13112_vm13 = vcmp.eq.f32.partialorder %v13101_v15, %v13002_v10  ;;  %v13115_v56 = vld [vmem:[#allocation123_spill] sm:$0xff]  ;;  %v10917_v38 = vpop.eup %5788 }
 0x59d   : > { %v3792_v12 = vsel %vm13111_vm9, %v10848_v37, 0.0  ;;  %5466 = vmatprep.subr.msk.bf16.mxu0 %vm5465_vm11, %v5464_v13  ;;  %vm13113_vm15 = vcmp.eq.f32.partialorder %v13103_v26, %v13002_v10  ;;  %v5467_v4 = vpack.c.bf16 %v10654_v52, %v10633_v43  ;;  %vm13114_vm7 = vnez %v13048_v53  ;;  %v13119_v43 = vld [vmem:[#allocation127_spill] sm:$0xff] }
 0x59e   : > { %vm5372_vm4 = vmpackc.low %vm13113_vm15, %vm13112_vm13  ;;  %5806 = vpow2.f32 %v10373_v36  ;;  %vm13116_vm11 = vnez %v13115_v56  ;;  %v4130_v48 = vadd.f32 %v4129_v47, %v3791_v2  ;;  %v5374_v29 = vpack.c.bf16 %v13118_v41, %v13117_v50  ;;  %v13122_v36 = vld [vmem:[#allocation32_spill] sm:$0xff]  ;;  %v13124_v2 = vld [vmem:[#allocation34_spill] sm:$0xff]  ;;  %v10936_v47 = vpop.eup %5790 }
 0x59f   : > { %v3793_v14 = vsel %vm13116_vm11, %v10860_v46, 0.0  ;;  %5373 = vmatpush1.bf16.msk.msra.mxu1 %vm5372_vm4, %v5371_v62  ;;  %5808 = vpow2.f32 %v10530_v58  ;;  %vm13120_vm13 = vnez %v13119_v43  ;;  %v4094_v13 = vadd.f32 %v4093_v7, %v3792_v12  ;;  %vm13121_vm15 = vmpackc.low %vm8385_vm12, %vm13093_vm0  ;;  %v13126_v62 = vld [vmem:[#allocation122_spill] sm:$0xff]  ;;  %v13131_v7 = vld [vmem:[#allocation64_spill] sm:$0xff]  ;;  %v10948_v41 = vpop.eup %5792 }
 0x5a0   : > { %v3794_v52 = vsel %vm13120_vm13, %v10879_v1, 0.0  ;;  %5469 = vmatpush1.bf16.msk.msra.mxu0 %vm13121_vm15, %v5467_v4  ;;  %vm13123_vm4 = vcmp.eq.f32.partialorder %v13122_v36, %v12711_v0  ;;  %vm13125_vm3 = vcmp.eq.f32.partialorder %v13124_v2, %v12711_v0  ;;  %v5470_v58 = vpack.c.bf16 %v10706_v30, %v10685_v16  ;;  %v13132_v4 = vld [vmem:[#allocation71_spill] sm:$0xff]  ;;  %v13133_v16 = vld [vmem:[#allocation165_spill] sm:$0xff]  ;;  %v13134_v30 = vld [vmem:[#allocation132_spill] sm:$0xff] }
 0x5a1   : > { %vm5375_vm11 = vmpackc.low %vm13125_vm3, %vm13123_vm4  ;;  %5810 = vpow2.f32 %v13126_v62  ;;  %vm13128_vm13 = vnez %v13127_v5  ;;  %v4131_v12 = vadd.f32 %v4130_v48, %v3793_v14  ;;  %vm13129_vm12 = vnez %v13054_v11  ;;  %v13138_v14 = vld [vmem:[#allocation128_spill] sm:$0xff]  ;;  %v13139_v48 = vld [vmem:[#allocation134_spill] sm:$0xff] }
 0x5a2   : > { %v3795_v35 = vsel %vm13128_vm13, %v10891_v18, 0.0  ;;  %5376 = vmatprep.subr.msk.bf16.mxu1 %vm5375_vm11, %v5374_v29  ;;  %vm13130_vm0 = vnez %v13062_v54  ;;  %v5377_v50 = vpack.c.bf16 %v13132_v4, %v13131_v7  ;;  %5812 = vpow2.f32 %v13133_v16  ;;  %v10962_v54 = vpop.eup %5794  ;;  %v13229_v5 = vld [vmem:[#allocation105_spill] sm:$0xff] }
 0x5a3   : > { %vm5471_vm15 = vmpackc.low %vm13130_vm0, %vm13129_vm12  ;;  %vm13135_vm3 = vnez %v13134_v30  ;;  %v4095_v26 = vadd.f32 %v4094_v13, %v3794_v52  ;;  %vm13136_vm11 = vcmp.eq.f32.partialorder %v13122_v36, %v13002_v10  ;;  %vm13137_vm4 = vcmp.eq.f32.partialorder %v13124_v2, %v13002_v10  ;;  %v13141_v13 = vld [vmem:[#allocation196_spill] sm:$0xff]  ;;  %v10974_v2 = vpop.eup %5796 }
 0x5a4   : > { %v3796_v62 = vsel %vm13135_vm3, %v10905_v39, 0.0  ;;  %5472 = vmatprep.subr.msk.bf16.mxu0 %vm5471_vm15, %v5470_v58  ;;  %vm5378_vm12 = vmpackc.low %vm13137_vm4, %vm13136_vm11  ;;  %v5473_v11 = vpack.c.bf16 %v10698_v21, %v10677_v60  ;;  %5814 = vpow2.f32 %v13138_v14  ;;  %vm13140_vm15 = vnez %v13139_v48  ;;  %v13142_v58 = vld [vmem:[#allocation201_spill] sm:$0xff]  ;;  %v13143_v60 = vld [vmem:[#allocation170_spill] sm:$0xff]  ;;  %v10993_v14 = vpop.eup %5798 }
 0x5a5   : > { %v3797_v29 = vsel %vm13140_vm15, %v10917_v38, 0.0  ;;  %v4132_v52 = vadd.f32 %v4131_v12, %v3795_v35  ;;  %5379 = vmatpush1.bf16.msk.msra.mxu1 %vm5378_vm12, %v5377_v50  ;;  %v5380_v16 = vpack.c.bf16 %v13142_v58, %v13141_v13  ;;  %5816 = vpow2.f32 %v13143_v60  ;;  %v13144_v21 = vld [vmem:[#allocation137_spill] sm:$0xff]  ;;  %vm13146_vm4 = vmpackc.low %vm13061_vm14, %vm13114_vm7  ;;  %v13147_v35 = vld [vmem:[#allocation28_spill] sm:$0xff]  ;;  %v11005_v60 = vpop.eup %5800 }
 0x5a6   : > { %vm13145_vm11 = vnez %v13144_v21  ;;  %v4096_v36 = vadd.f32 %v4095_v26, %v3796_v62  ;;  %5475 = vmatpush1.bf16.msk.msra.mxu0 %vm13146_vm4, %v5473_v11  ;;  %vm13148_vm12 = vcmp.eq.f32.partialorder %v13147_v35, %v12711_v0  ;;  %v13149_v12 = vld [vmem:[#allocation39_spill] sm:$0xff]  ;;  %v5476_v50 = vpack.c.bf16 %v10752_v44, %v10729_v45  ;;  %v13151_v13 = vld [vmem:[#allocation133_spill] sm:$0xff]  ;;  %v13156_v62 = vld [vmem:[#allocation74_spill] sm:$0xff] }
 0x5a7   : > { %v3798_v4 = vsel %vm13145_vm11, %v10936_v47, 0.0  ;;  %vm13150_vm0 = vcmp.eq.f32.partialorder %v13149_v12, %v12711_v0  ;;  %5818 = vpow2.f32 %v13151_v13  ;;  %vm13153_vm11 = vnez %v13152_v63  ;;  %v13157_v11 = vld [vmem:[#allocation79_spill] sm:$0xff]  ;;  %v13158_v45 = vld [vmem:[#allocation177_spill] sm:$0xff] }
 0x5a8   : > { %vm5381_vm3 = vmpackc.low %vm13150_vm0, %vm13148_vm12  ;;  %v3799_v53 = vsel %vm13153_vm11, %v10948_v41, 0.0  ;;  %v4133_v26 = vadd.f32 %v4132_v52, %v3797_v29  ;;  %vm13154_vm14 = vnez %v13067_v49  ;;  %vm13155_vm7 = vnez %v13074_v25  ;;  %v13159_v44 = vld [vmem:[#allocation143_spill] sm:$0xff]  ;;  %v13163_v49 = vld [vmem:[#allocation16_spill] sm:$0xff]  ;;  %v11019_v29 = vpop.eup %5802 }
 0x5a9   : > { %5382 = vmatprep.subr.msk.bf16.mxu1 %vm5381_vm3, %v5380_v16  ;;  %vm5477_vm4 = vmpackc.low %vm13155_vm7, %vm13154_vm14  ;;  %v5383_v58 = vpack.c.bf16 %v13157_v11, %v13156_v62  ;;  %5820 = vpow2.f32 %v13158_v45  ;;  %vm13160_vm0 = vnez %v13159_v44  ;;  %v4097_v7 = vadd.f32 %v4096_v36, %v3798_v4  ;;  %v13165_v52 = vld [vmem:[#allocation139_spill] sm:$0xff]  ;;  %v13166_v36 = vld [vmem:[#allocation146_spill] sm:$0xff]  ;;  %v11031_v11 = vpop.eup %5804 }
 0x5aa   : > { %v3800_v13 = vsel %vm13160_vm0, %v10962_v54, 0.0  ;;  %5478 = vmatprep.subr.msk.bf16.mxu0 %vm5477_vm4, %v5476_v50  ;;  %vm13161_vm3 = vcmp.eq.f32.partialorder %v13147_v35, %v13002_v10  ;;  %vm13162_vm12 = vcmp.eq.f32.partialorder %v13149_v12, %v13002_v10  ;;  %v5479_v25 = vpack.c.bf16 %v10744_v34, %v13163_v49  ;;  %v13168_v50 = vld [vmem:[#allocation40_spill] sm:$0xff]  ;;  %v13169_v45 = vld [vmem:[#allocation15_spill] sm:$0xff]  ;;  %v13171_v49 = vld [vmem:[#allocation150_spill] sm:$0xff] }
 0x5ab   : > { %vm5384_vm14 = vmpackc.low %vm13162_vm12, %vm13161_vm3  ;;  %vm13164_vm7 = vnez %v13078_v24  ;;  %5822 = vpow2.f32 %v13165_v52  ;;  %vm13167_vm4 = vnez %v13166_v36  ;;  %v4134_v16 = vadd.f32 %v4133_v26, %v3799_v53  ;;  %v13170_v34 = vld [vmem:[#allocation183_spill] sm:$0xff]  ;;  %v13174_v53 = vld [vmem:[#allocation46_spill] sm:$0xff]  ;;  %v11050_v52 = vpop.eup %5806 }
 0x5ac   : > { %v3801_v4 = vsel %vm13167_vm4, %v10974_v2, 0.0  ;;  %5385 = vmatpush1.bf16.msk.msra.mxu1 %vm5384_vm14, %v5383_v58  ;;  %v5386_v12 = vpack.c.bf16 %v13169_v45, %v13168_v50  ;;  %5824 = vpow2.f32 %v13170_v34  ;;  %vm13172_vm3 = vnez %v13171_v49  ;;  %vm13173_vm12 = vmpackc.low %vm8575_vm6, %vm13065_vm10  ;;  %v13176_v26 = vld [vmem:[#allocation53_spill] sm:$0xff]  ;;  %v13178_v50 = vld [vmem:[#allocation144_spill] sm:$0xff]  ;;  %v11062_v34 = vpop.eup %5808 }
 0x5ad   : > { %v3802_v35 = vsel %vm13172_vm3, %v10993_v14, 0.0  ;;  %v4098_v62 = vadd.f32 %v4097_v7, %v3800_v13  ;;  %5481 = vmatpush1.bf16.msk.msra.mxu0 %vm13173_vm12, %v5479_v25  ;;  %vm13175_vm14 = vcmp.eq.f32.partialorder %v13174_v53, %v12711_v0  ;;  %vm13177_vm11 = vcmp.eq.f32.partialorder %v13176_v26, %v12711_v0  ;;  %vm5483_vm6 = vmpackc.low %vm13095_vm2, %vm13086_vm8  ;;  %v13181_v13 = vld [vmem:[#allocation85_spill] sm:$0xff]  ;;  %v13182_v25 = vld [vmem:[#allocation91_spill] sm:$0xff]  ;;  %v11076_v8 = vpop.eup %5810 }
 0x5ae   : > { %vm5387_vm0 = vmpackc.low %vm13177_vm11, %vm13175_vm14  ;;  %v5482_v58 = vpack.c.bf16 %v10803_v32, %v10777_v23  ;;  %5826 = vpow2.f32 %v13178_v50  ;;  %vm13180_vm3 = vnez %v13179_v20  ;;  %v4135_v7 = vadd.f32 %v4134_v16, %v3801_v4  ;;  %v13183_v32 = vld [vmem:[#allocation187_spill] sm:$0xff]  ;;  %v13184_v23 = vld [vmem:[#allocation154_spill] sm:$0xff] }
 0x5af   : > { %v3803_v19 = vsel %vm13180_vm3, %v11005_v60, 0.0  ;;  %5388 = vmatprep.subr.msk.bf16.mxu1 %vm5387_vm0, %v5386_v12  ;;  %v5389_v45 = vpack.c.bf16 %v13182_v25, %v13181_v13  ;;  %5828 = vpow2.f32 %v13183_v32  ;;  %vm13185_vm10 = vnez %v13184_v23  ;;  %v13189_v12 = vld [vmem:[#allocation149_spill] sm:$0xff] }
 0x5b0   : > { %v3804_v50 = vsel %vm13185_vm10, %v11019_v29, 0.0  ;;  %v4099_v61 = vadd.f32 %v4098_v62, %v3802_v35  ;;  %5484 = vmatprep.subr.msk.bf16.mxu0 %vm5483_vm6, %v5482_v58  ;;  %vm13186_vm11 = vcmp.eq.f32.partialorder %v13174_v53, %v13002_v10  ;;  %vm13187_vm0 = vcmp.eq.f32.partialorder %v13176_v26, %v13002_v10  ;;  %v13190_v35 = vld [vmem:[#allocation156_spill] sm:$0xff]  ;;  %v13192_v16 = vld [vmem:[#allocation41_spill] sm:$0xff]  ;;  %v11088_v26 = vpop.eup %5812 }
 0x5b1   : > { %vm5390_vm8 = vmpackc.low %vm13187_vm0, %vm13186_vm11  ;;  %v5485_v22 = vpack.c.bf16 %v10791_v6, %v10765_v28  ;;  %vm13188_vm2 = vnez %v13098_v9  ;;  %5830 = vpow2.f32 %v13189_v12  ;;  %vm13191_vm14 = vnez %v13190_v35  ;;  %v13193_v58 = vld [vmem:[#allocation44_spill] sm:$0xff]  ;;  %v13194_v28 = vld [vmem:[#allocation193_spill] sm:$0xff]  ;;  %v11107_v12 = vpop.eup %5814 }
 0x5b2   : > { %v3805_v62 = vsel %vm13191_vm14, %v11031_v11, 0.0  ;;  %v4136_v4 = vadd.f32 %v4135_v7, %v3803_v19  ;;  %5391 = vmatpush1.bf16.msk.msra.mxu1 %vm5390_vm8, %v5389_v45  ;;  %v5392_v32 = vpack.c.bf16 %v13193_v58, %v13192_v16  ;;  %5832 = vpow2.f32 %v13194_v28  ;;  %v13195_v6 = vld [vmem:[#allocation160_spill] sm:$0xff]  ;;  %vm13197_vm11 = vmpackc.low %vm13090_vm1, %vm13164_vm7  ;;  %v13198_v19 = vld [vmem:[#allocation31_spill] sm:$0xff]  ;;  %v11119_v28 = vpop.eup %5816 }
 0x5b3   : > { %vm13196_vm6 = vnez %v13195_v6  ;;  %v4100_v53 = vadd.f32 %v4099_v61, %v3804_v50  ;;  %5487 = vmatpush1.bf16.msk.msra.mxu0 %vm13197_vm11, %v5485_v22  ;;  %vm13199_vm0 = vcmp.eq.f32.partialorder %v13198_v19, %v12711_v0  ;;  %v13200_v7 = vld [vmem:[#allocation66_spill] sm:$0xff]  ;;  %v5488_v45 = vpack.c.bf16 %v10860_v46, %v10834_v55  ;;  %v13207_v22 = vld [vmem:[#allocation100_spill] sm:$0xff]  ;;  %v13208_v55 = vld [vmem:[#allocation155_spill] sm:$0xff] }
 0x5b4   : > { %v3806_v25 = vsel %vm13196_vm6, %v11050_v52, 0.0  ;;  %vm13201_vm8 = vcmp.eq.f32.partialorder %v13200_v7, %v12711_v0  ;;  %v13202_v16 = vld [vmem:[#allocation198_spill] sm:$0xff]  ;;  %vm13204_vm6 = vnez %v13203_v17  ;;  %v4137_v61 = vadd.f32 %v4136_v4, %v3805_v62  ;;  %v13212_v62 = vld [vmem:[#allocation63_spill] sm:$0xff] }
 0x5b5   : > { %vm5393_vm12 = vmpackc.low %vm13201_vm8, %vm13199_vm0  ;;  %5834 = vpow2.f32 %v13202_v16  ;;  %v3807_v24 = vsel %vm13204_vm6, %v11062_v34, 0.0  ;;  %vm13205_vm1 = vnez %v13115_v56  ;;  %v13206_v50 = vld [vmem:[#allocation94_spill] sm:$0xff]  ;;  %v4101_v46 = vadd.f32 %v4100_v53, %v3806_v25  ;;  %v13211_v56 = vld [vmem:[#allocation51_spill] sm:$0xff] }
 0x5b6   : > { %5394 = vmatprep.subr.msk.bf16.mxu1 %vm5393_vm12, %v5392_v32  ;;  %vm5489_vm7 = vmpackc.low %vm13205_vm1, %vm13106_vm5  ;;  %v5395_v58 = vpack.c.bf16 %v13207_v22, %v13206_v50  ;;  %5836 = vpow2.f32 %v13208_v55  ;;  %vm13209_vm11 = vcmp.eq.f32.partialorder %v13198_v19, %v13002_v10  ;;  %vm13210_vm12 = vcmp.eq.f32.partialorder %v13200_v7, %v13002_v10  ;;  %v11132_v32 = vpop.eup %5818  ;;  %v13213_v16 = vld [vmem:[#allocation82_spill] sm:$0xff]  ;;  %v13214_v22 = vld [vmem:[#allocation17_spill] sm:$0xff] }
 0x5b7   : > { %5490 = vmatprep.subr.msk.bf16.mxu0 %vm5489_vm7, %v5488_v45  ;;  %vm5396_vm0 = vmpackc.low %vm13210_vm12, %vm13209_vm11  ;;  %v5491_v40 = vpack.c.bf16 %v10848_v37, %v10822_v27  ;;  %v5398_v4 = vpack.c.bf16 %v13212_v62, %v13211_v56  ;;  %v4219_v55 = vadd.f32 %v13214_v22, %v13213_v16  ;;  %v13215_v53 = vld [vmem:[#allocation166_spill] sm:$0xff]  ;;  %v4138_v45 = vadd.f32 %v4137_v61, %v3807_v24  ;;  %v13217_v19 = vld [vmem:[#allocation80_spill] sm:$0xff]  ;;  %v11147_v37 = vpop.eup %5820 }
 0x5b8   : > { %vm13216_vm5 = vnez %v13215_v53  ;;  %5397 = vmatpush1.bf16.msk.msra.mxu1 %vm5396_vm0, %v5395_v58  ;;  %vm13218_vm8 = vcmp.eq.f32.partialorder %v13217_v19, %v12711_v0  ;;  %v13219_v7 = vld [vmem:[#allocation86_spill] sm:$0xff]  ;;  %v5494_v27 = vpack.c.bf16 %v10917_v38, %v10891_v18  ;;  %v13221_v56 = vld [vmem:[#allocation57_spill] sm:$0xff]  ;;  %v13222_v22 = vld [vmem:[#allocation168_spill] sm:$0xff]  ;;  %v5497_v18 = vpack.c.bf16 %v10905_v39, %v10879_v1  ;;  %v11164_v38 = vpop.eup %5822 }
 0x5b9   : > { %v3808_v25 = vsel %vm13216_vm5, %v11076_v8, 0.0  ;;  %vm13220_vm1 = vcmp.eq.f32.partialorder %v13219_v7, %v12711_v0  ;;  %5838 = vpow2.f32 %v13221_v56  ;;  %vm13223_vm11 = vnez %v13222_v22  ;;  %vm13224_vm12 = vmpackc.low %vm13111_vm9, %vm13188_vm2  ;;  %v13227_v9 = vld [vmem:[#allocation171_spill] sm:$0xff]  ;;  %v11177_v1 = vpop.eup %5824  ;;  %v13231_v39 = vld [vmem:[#allocation173_spill] sm:$0xff] }
 0x5ba   : > { %vm5399_vm7 = vmpackc.low %vm13220_vm1, %vm13218_vm8  ;;  %v3809_v62 = vsel %vm13223_vm11, %v11088_v26, 0.0  ;;  %v4102_v24 = vadd.f32 %v4101_v46, %v3808_v25  ;;  %5493 = vmatpush1.bf16.msk.msra.mxu0 %vm13224_vm12, %v5491_v40  ;;  %vm13225_vm8 = vnez %v13119_v43  ;;  %vm13226_vm1 = vnez %v13134_v30  ;;  %v13230_v58 = vld [vmem:[#allocation111_spill] sm:$0xff]  ;;  %v13235_v16 = vld [vmem:[#allocation73_spill] sm:$0xff] }
 0x5bb   : > { %5400 = vmatprep.subr.msk.bf16.mxu1 %vm5399_vm7, %v5398_v4  ;;  %vm5495_vm0 = vmpackc.low %vm13140_vm15, %vm13128_vm13  ;;  %vm13228_vm9 = vnez %v13227_v9  ;;  %v4139_v61 = vadd.f32 %v4138_v45, %v3809_v62  ;;  %v5401_v48 = vpack.c.bf16 %v13230_v58, %v13229_v5  ;;  %v5500_v46 = vpack.c.bf16 %v10974_v2, %v10948_v41  ;;  %v13236_v25 = vld [vmem:[#allocation84_spill] sm:$0xff]  ;;  %v11192_v41 = vpop.eup %5826  ;;  %v13250_v43 = vld [vmem:[#allocation181_spill] sm:$0xff] }
 0x5bc   : > { %v3810_v33 = vsel %vm13228_vm9, %v11107_v12, 0.0  ;;  %5496 = vmatprep.subr.msk.bf16.mxu0 %vm5495_vm0, %v5494_v27  ;;  %vm13232_vm13 = vnez %v13231_v39  ;;  %vm13233_vm15 = vcmp.eq.f32.partialorder %v13217_v19, %v13002_v10  ;;  %vm13234_vm2 = vcmp.eq.f32.partialorder %v13219_v7, %v13002_v10  ;;  %v13237_v56 = vld [vmem:[#allocation176_spill] sm:$0xff]  ;;  %v13241_v7 = vld [vmem:[#allocation95_spill] sm:$0xff]  ;;  %v13295_v17 = vld [vmem:[#allocation110_spill] sm:$0xff] }
 0x5bd   : > { %v3811_v40 = vsel %vm13232_vm13, %v11119_v28, 0.0  ;;  %v4103_v4 = vadd.f32 %v4102_v24, %v3810_v33  ;;  %vm5402_vm7 = vmpackc.low %vm13234_vm2, %vm13233_vm15  ;;  %v5404_v45 = vpack.c.bf16 %v13236_v25, %v13235_v16  ;;  %v5503_v2 = vpack.c.bf16 %v10962_v54, %v10936_v47  ;;  %v13239_v33 = vld [vmem:[#allocation33_spill] sm:$0xff]  ;;  %v11205_v47 = vpop.eup %5828  ;;  %v13243_v54 = vld [vmem:[#allocation70_spill] sm:$0xff] }
 0x5be   : > { %v4220_v27 = vrot.slane %v4219_v55, 4  ;;  %vm13238_vm12 = vnez %v13237_v56  ;;  %v4140_v24 = vadd.f32 %v4139_v61, %v3811_v40  ;;  %5403 = vmatpush1.bf16.msk.msra.mxu1 %vm5402_vm7, %v5401_v48  ;;  %vm13240_vm0 = vcmp.eq.f32.partialorder %v13239_v33, %v12711_v0  ;;  %v13244_v25 = vld [vmem:[#allocation178_spill] sm:$0xff]  ;;  %vm13246_vm7 = vmpackc.low %vm13226_vm1, %vm13225_vm8  ;;  %v13253_v48 = vld [vmem:[#allocation120_spill] sm:$0xff] }
 0x5bf   : > { %v3812_v62 = vsel %vm13238_vm12, %v11132_v32, 0.0  ;;  %vm13242_vm15 = vcmp.eq.f32.partialorder %v13241_v7, %v12711_v0  ;;  %v5506_v16 = vpack.c.bf16 %v11031_v11, %v11005_v60  ;;  %5840 = vpow2.f32 %v13243_v54  ;;  %5499 = vmatpush1.bf16.msk.msra.mxu0 %vm13246_vm7, %v5497_v18  ;;  %v11222_v60 = vpop.eup %5830  ;;  %v13260_v54 = vld [vmem:[#allocation188_spill] sm:$0xff]  ;;  %v13296_v22 = vld [vmem:[#allocation114_spill] sm:$0xff]  ;;  %v13308_v39 = vld [vmem:[#allocation119_spill] sm:$0xff] }
 0x5c0   : > { %vm5405_vm2 = vmpackc.low %vm13242_vm15, %vm13240_vm0  ;;  %vm13245_vm5 = vnez %v13244_v25  ;;  %v4104_v61 = vadd.f32 %v4103_v4, %v3812_v62  ;;  %vm13247_vm0 = vnez %v13152_v63  ;;  %v5509_v11 = vpack.c.bf16 %v11019_v29, %v10993_v14  ;;  %v13252_v63 = vld [vmem:[#allocation115_spill] sm:$0xff]  ;;  %v11235_v14 = vpop.eup %5832  ;;  %v13254_v29 = vld [vmem:[#allocation184_spill] sm:$0xff] }
 0x5c1   : > { %v3813_v58 = vsel %vm13245_vm5, %v11147_v37, 0.0  ;;  %5406 = vmatprep.subr.msk.bf16.mxu1 %vm5405_vm2, %v5404_v45  ;;  %vm5501_vm15 = vmpackc.low %vm13167_vm4, %vm13247_vm0  ;;  %vm13248_vm12 = vnez %v13144_v21  ;;  %vm13249_vm9 = vnez %v13159_v44  ;;  %vm13251_vm8 = vnez %v13250_v43 }
 0x5c2   : > { %v3814_v30 = vsel %vm13251_vm8, %v11164_v38, 0.0  ;;  %v4141_v18 = vadd.f32 %v4140_v24, %v3813_v58  ;;  %5502 = vmatprep.subr.msk.bf16.mxu0 %vm5501_vm15, %v5500_v46  ;;  %v5407_v36 = vpack.c.bf16 %v13253_v48, %v13252_v63  ;;  %v5512_v40 = vpack.c.bf16 %v11088_v26, %v11062_v34  ;;  %v13258_v58 = vld [vmem:[#allocation90_spill] sm:$0xff]  ;;  %v13259_v46 = vld [vmem:[#allocation93_spill] sm:$0xff]  ;;  %v11250_v34 = vpop.eup %5834  ;;  %v13262_v48 = vld [vmem:[#allocation108_spill] sm:$0xff] }
 0x5c3   : > { %vm13255_vm4 = vnez %v13254_v29  ;;  %v4105_v45 = vadd.f32 %v4104_v61, %v3814_v30  ;;  %vm13256_vm1 = vcmp.eq.f32.partialorder %v13239_v33, %v13002_v10  ;;  %vm13257_vm2 = vcmp.eq.f32.partialorder %v13241_v7, %v13002_v10  ;;  %v13264_v7 = vld [vmem:[#allocation113_spill] sm:$0xff]  ;;  %v13317_v29 = vld [vmem:[#allocation130_spill] sm:$0xff] }
 0x5c4   : > { %v3815_v4 = vsel %vm13255_vm4, %v11177_v1, 0.0  ;;  %vm5408_vm7 = vmpackc.low %vm13257_vm2, %vm13256_vm1  ;;  %v5410_v62 = vpack.c.bf16 %v13259_v46, %v13258_v58  ;;  %v5515_v26 = vpack.c.bf16 %v11076_v8, %v11050_v52  ;;  %v4221_v24 = vadd.f32 %v4220_v27, %v4219_v55  ;;  %v11263_v52 = vpop.eup %5836  ;;  %v13266_v8 = vld [vmem:[#allocation190_spill] sm:$0xff]  ;;  %v13279_v46 = vld [vmem:[#allocation104_spill] sm:$0xff] }
 0x5c5   : > { %vm13261_vm0 = vnez %v13260_v54  ;;  %v4142_v30 = vadd.f32 %v4141_v18, %v3815_v4  ;;  %5409 = vmatpush1.bf16.msk.msra.mxu1 %vm5408_vm7, %v5407_v36  ;;  %vm13263_vm15 = vcmp.eq.f32.partialorder %v13262_v48, %v12711_v0  ;;  %vm13265_vm1 = vcmp.eq.f32.partialorder %v13264_v7, %v12711_v0  ;;  %vm13268_vm7 = vmpackc.low %vm13249_vm9, %vm13248_vm12  ;;  %v13271_v4 = vld [vmem:[#allocation192_spill] sm:$0xff]  ;;  %v11294_v35 = vpop.eup %5838 }
 0x5c6   : > { %v3816_v61 = vsel %vm13261_vm0, %v11192_v41, 0.0  ;;  %vm5411_vm2 = vmpackc.low %vm13265_vm1, %vm13263_vm15  ;;  %v5518_v58 = vpack.c.bf16 %v11147_v37, %v11119_v28  ;;  %vm13267_vm5 = vnez %v13266_v8  ;;  %5505 = vmatpush1.bf16.msk.msra.mxu0 %vm13268_vm7, %v5503_v2  ;;  %v13269_v28 = vld [vmem:[#allocation148_spill] sm:$0xff]  ;;  %v13270_v37 = vld [vmem:[#allocation151_spill] sm:$0xff]  ;;  %v5521_v36 = vpack.c.bf16 %v11132_v32, %v11107_v12 }
 0x5c7   : > { %v3817_v55 = vsel %vm13267_vm5, %v11205_v47, 0.0  ;;  %v4106_v27 = vadd.f32 %v4105_v45, %v3816_v61  ;;  %5412 = vmatprep.subr.msk.bf16.mxu1 %vm5411_vm2, %v5410_v62  ;;  %vm5507_vm15 = vmpackc.low %vm13191_vm14, %vm13180_vm3  ;;  %v5413_v18 = vpack.c.bf16 %v13270_v37, %v13269_v28  ;;  %vm13272_vm1 = vnez %v13271_v4  ;;  %v13275_v12 = vld [vmem:[#allocation195_spill] sm:$0xff] }
 0x5c8   : > { %v3818_v44 = vsel %vm13272_vm1, %v11222_v60, 0.0  ;;  %v4143_v45 = vadd.f32 %v4142_v30, %v3817_v55  ;;  %5508 = vmatprep.subr.msk.bf16.mxu0 %vm5507_vm15, %v5506_v16  ;;  %vm13273_vm9 = vcmp.eq.f32.partialorder %v13262_v48, %v13002_v10  ;;  %vm13274_vm12 = vcmp.eq.f32.partialorder %v13264_v7, %v13002_v10  ;;  %v13278_v16 = vld [vmem:[#allocation99_spill] sm:$0xff]  ;;  %v13286_v55 = vld [vmem:[#allocation78_spill] sm:$0xff] }
 0x5c9   : > { %vm5414_vm2 = vmpackc.low %vm13274_vm12, %vm13273_vm9  ;;  %v5524_v21 = vpack.c.bf16 %v11205_v47, %v11177_v1  ;;  %v5527_v20 = vpack.c.bf16 %v11192_v41, %v11164_v38  ;;  %vm13276_vm3 = vnez %v13275_v12  ;;  %v4107_v2 = vadd.f32 %v4106_v27, %v3818_v44  ;;  %v13280_v38 = vld [vmem:[#allocation197_spill] sm:$0xff]  ;;  %v13282_v30 = vld [vmem:[#allocation35_spill] sm:$0xff] }
 0x5ca   : > { %v3819_v32 = vsel %vm13276_vm3, %v11235_v14, 0.0  ;;  %vm13277_vm14 = vnez %v13171_v49  ;;  %v5416_v62 = vpack.c.bf16 %v13279_v46, %v13278_v16  ;;  %v5530_v1 = vpack.c.bf16 %v11250_v34, %v11235_v14  ;;  %5415 = vmatpush1.bf16.msk.msra.mxu1 %vm5414_vm2, %v5413_v18  ;;  %v13284_v49 = vld [vmem:[#allocation126_spill] sm:$0xff]  ;;  %v13287_v14 = vld [vmem:[#allocation199_spill] sm:$0xff]  ;;  %vm5513_vm2 = vmpackc.low %vm13223_vm11, %vm13204_vm6 }
 0x5cb   : > { %vm5510_vm7 = vmpackc.low %vm13185_vm10, %vm13277_vm14  ;;  %v4222_v47 = vrot.slane %v4221_v24, 2  ;;  %vm13281_vm15 = vnez %v13280_v38  ;;  %v4144_v61 = vadd.f32 %v4143_v45, %v3819_v32  ;;  %vm13283_vm9 = vcmp.eq.f32.partialorder %v13282_v30, %v12711_v0  ;;  %v13289_v45 = vld [vmem:[#allocation172_spill] sm:$0xff]  ;;  %v13299_v16 = vld [vmem:[#allocation145_spill] sm:$0xff] }
 0x5cc   : > { %v3820_v41 = vsel %vm13281_vm15, %v11263_v52, 0.0  ;;  %vm13285_vm12 = vcmp.eq.f32.partialorder %v13284_v49, %v12711_v0  ;;  %v5533_v23 = vpack.c.bf16 %v11263_v52, %v11222_v60  ;;  %5842 = vpow2.f32 %v13286_v55  ;;  %5511 = vmatpush1.bf16.msk.msra.mxu0 %vm5510_vm7, %v5509_v11  ;;  %v13290_v32 = vld [vmem:[#allocation76_spill] sm:$0xff]  ;;  %v13318_v8 = vld [vmem:[#allocation135_spill] sm:$0xff] }
 0x5cd   : > { %vm5417_vm10 = vmpackc.low %vm13285_vm12, %vm13283_vm9  ;;  %vm13288_vm14 = vnez %v13287_v14  ;;  %v11322_v44 = vadd.f32 %v4107_v2, %v3820_v41  ;;  %5514 = vmatprep.subr.msk.bf16.mxu0 %vm5513_vm2, %v5512_v40  ;;  %v5419_v60 = vpack.c.bf16 %v13290_v32, %v13289_v45  ;;  %vm13291_vm9 = vcmp.eq.f32.partialorder %v13282_v30, %v13002_v10  ;;  %v13297_v2 = vld [vmem:[#allocation138_spill] sm:$0xff]  ;;  %v4228_v12 = vld [vmem:[#allocation4] sm:$0xff] }
 0x5ce   : > { %v3821_v27 = vsel %vm13288_vm14, %v11250_v34, 0.0  ;;  %5418 = vmatprep.subr.msk.bf16.mxu1 %vm5417_vm10, %v5416_v62  ;;  %vm13292_vm12 = vcmp.eq.f32.partialorder %v13284_v49, %v13002_v10  ;;  %v11336_v34 = vpop.eup %5840  ;;  %vm13293_vm7 = vnez %v13195_v6  ;;  %vm13294_vm10 = vnez %v13215_v53  ;;  %v13302_v53 = vld [vmem:[#allocation88_spill] sm:$0xff]  ;;  %v4231_v14 = vld [vmem:[#allocation4 + $0x18] sm:$0xff] }
 0x5cf   : > { %v4145_v18 = vadd.f32 %v4144_v61, %v3821_v27  ;;  %vm5420_vm15 = vmpackc.low %vm13292_vm12, %vm13291_vm9  ;;  %v5422_v11 = vpack.c.bf16 %v13296_v22, %v13295_v17  ;;  %v4223_v40 = vadd.f32 %v4222_v47, %v4221_v24  ;;  %vm13298_vm6 = vcmp.eq.f32.partialorder %v13297_v2, %v12711_v0  ;;  %v13303_v24 = vld [vmem:[#allocation102_spill] sm:$0xff]  ;;  %v4234_v17 = vld [vmem:[#allocation5 + $0x10] sm:$0xff] }
 0x5d0   : > { %vm5516_vm1 = vmpackc.low %vm13294_vm10, %vm13293_vm7  ;;  %5421 = vmatpush1.bf16.msk.msra.mxu1 %vm5420_vm15, %v5419_v60  ;;  %vm13300_vm11 = vcmp.eq.f32.partialorder %v13299_v16, %v12711_v0  ;;  %vm13301_vm9 = vnez %v13244_v25  ;;  %v5425_v46 = vpack.c.bf16 %v13303_v24, %v13302_v53  ;;  %vm13304_vm15 = vnez %v13227_v9  ;;  %v13309_v25 = vld [vmem:[#allocation124_spill] sm:$0xff]  ;;  %v13310_v47 = vld [vmem:[#allocation38_spill] sm:$0xff] }
 0x5d1   : > { %v4146_v52 = vrot.slane %v4145_v18, 4  ;;  %vm5423_vm2 = vmpackc.low %vm13300_vm11, %vm13298_vm6  ;;  %5517 = vmatpush1.bf16.msk.msra.mxu0 %vm5516_vm1, %v5515_v26  ;;  %vm13305_vm7 = vnez %v13237_v56  ;;  %vm13306_vm6 = vcmp.eq.f32.partialorder %v13297_v2, %v13002_v10  ;;  %vm13307_vm1 = vcmp.eq.f32.partialorder %v13299_v16, %v13002_v10  ;;  %v13312_v9 = vld [vmem:[#allocation159_spill] sm:$0xff]  ;;  %v13314_v56 = vld [vmem:[#allocation161_spill] sm:$0xff] }
 0x5d2   : > { %5424 = vmatprep.subr.msk.bf16.mxu1 %vm5423_vm2, %v5422_v11  ;;  %vm5519_vm12 = vmpackc.low %vm13301_vm9, %vm13232_vm13  ;;  %v5428_v26 = vpack.c.bf16 %v13309_v25, %v13308_v39  ;;  %v4224_v62 = vrot.slane %v4223_v40, 1  ;;  %vm13311_vm13 = vcmp.eq.f32.partialorder %v13310_v47, %v12711_v0  ;;  %vm13313_vm2 = vcmp.eq.f32.partialorder %v13312_v9, %v12711_v0  ;;  %v13319_v27 = vld [vmem:[#allocation174_spill] sm:$0xff]  ;;  %v4230_v22 = vld [vmem:[#allocation4 + $0x10] sm:$0xff] }
 0x5d3   : > { %v4147_v6 = vadd.f32 %v4146_v52, %v4145_v18  ;;  %5520 = vmatprep.subr.msk.bf16.mxu0 %vm5519_vm12, %v5518_v58  ;;  %vm5522_vm10 = vmpackc.low %vm13305_vm7, %vm13304_vm15  ;;  %v5431_v41 = vpack.c.bf16 %v11294_v35, %v13314_v56  ;;  %vm13315_vm15 = vcmp.eq.f32.partialorder %v13310_v47, %v13002_v10  ;;  %vm13316_vm7 = vcmp.eq.f32.partialorder %v13312_v9, %v13002_v10  ;;  %v13321_v18 = vld [vmem:[#allocation182_spill] sm:$0xff]  ;;  %v13331_v52 = vld [vmem:[#allocation11_spill] sm:$0xff] }
 0x5d4   : > { %vm5426_vm11 = vmpackc.low %vm13307_vm1, %vm13306_vm6  ;;  %v13328_v11 = vld [vmem:[#allocation14_spill] sm:$0xff]  ;;  %v13334_v39 = vld [vmem:[#allocation12_spill] sm:$0xff] }
 0x5d5   : > { %v4148_v58 = vrot.slane %v4147_v6, 2  ;;  %5427 = vmatpush1.bf16.msk.msra.mxu1 %vm5426_vm11, %v5425_v46  ;;  %vm5429_vm9 = vmpackc.low %vm13313_vm2, %vm13311_vm13  ;;  %5523 = vmatpush1.bf16.msk.msra.mxu0 %vm5522_vm10, %v5521_v36  ;;  %v5434_v36 = vpack.c.bf16 %v13318_v8, %v13317_v29  ;;  %vm13324_vm11 = vcmp.eq.f32.partialorder %v13321_v18, %v13002_v10  ;;  %vm13325_vm2 = vnez %v13271_v4  ;;  %v13327_v4 = vld [vmem:[#allocation43_spill] sm:$0xff]  ;;  %v13339_v29 = vld [vmem:[#allocation24_spill] sm:$0xff] }
 0x5d6   : > { %5430 = vmatprep.subr.msk.bf16.mxu1 %vm5429_vm9, %v5428_v26  ;;  %vm5525_vm12 = vmpackc.low %vm13267_vm5, %vm13255_vm4  ;;  %v11386_v55 = vpop.eup %5842  ;;  %vm13320_vm5 = vcmp.eq.f32.partialorder %v13319_v27, %v12711_v0  ;;  %vm13322_vm4 = vcmp.eq.f32.partialorder %v13321_v18, %v12711_v0  ;;  %vm13326_vm9 = vnez %v13280_v38  ;;  %v4232_v0 = vld [vmem:[#allocation5] sm:$0xff] }
 0x5d7   : > { %5526 = vmatprep.subr.msk.bf16.mxu0 %vm5525_vm12, %v5524_v21  ;;  %vm5432_vm6 = vmpackc.low %vm13316_vm7, %vm13315_vm15  ;;  %v4149_v61 = vadd.f32 %v4148_v58, %v4147_v6  ;;  %v4225_v21 = vadd.f32 %v4224_v62, %v4223_v40  ;;  %v5437_v43 = vpack.c.bf16 %v11386_v55, %v11336_v34  ;;  %v13330_v40 = vld [vmem:[#allocation49_spill] sm:$0xff]  ;;  %v13333_v46 = vld [vmem:[#allocation55_spill] sm:$0xff]  ;;  %vm13335_vm15 = vcmp.eq.f32.partialorder %v13334_v39, %v13002_v10 }
 0x5d8   : > { %vm5528_vm10 = vmpackc.low %vm13261_vm0, %vm13251_vm8  ;;  %vm13323_vm0 = vcmp.eq.f32.partialorder %v13319_v27, %v13002_v10  ;;  %v4018_v25 = vsel %vm13335_vm15, %v13333_v46, 0.0  ;;  %v13336_v62 = vld [vmem:[#allocation61_spill] sm:$0xff]  ;;  %v13337_v58 = vld [vmem:[#allocation18_spill] sm:$0xff]  ;;  %vm13372_vm15 = vcmp.eq.f32.partialorder %v13217_v19, %v13002_v10 }
 0x5d9   : > { %5433 = vmatpush1.bf16.msk.msra.mxu1 %vm5432_vm6, %v5431_v41  ;;  %vm5435_vm1 = vmpackc.low %vm13322_vm4, %vm13320_vm5  ;;  %v4150_v60 = vrot.slane %v4149_v61, 1  ;;  %5529 = vmatpush1.bf16.msk.msra.mxu0 %vm5528_vm10, %v5527_v20  ;;  %vm13338_vm7 = vcmp.eq.f32.partialorder %v13337_v58, %v13002_v10  ;;  %vm13340_vm6 = vcmp.eq.f32.partialorder %v13339_v29, %v13002_v10  ;;  %vm13344_vm5 = vcmp.eq.f32.partialorder %v13081_v42, %v13002_v10 }
 0x5da   : > { %5436 = vmatprep.subr.msk.bf16.mxu1 %vm5435_vm1, %v5434_v36  ;;  %vm5531_vm8 = vmpackc.low %vm13288_vm14, %vm13276_vm3  ;;  %vm13329_vm3 = vcmp.eq.f32.partialorder %v13328_v11, %v13002_v10  ;;  %vm13332_vm14 = vcmp.eq.f32.partialorder %v13331_v52, %v13002_v10  ;;  %v4020_v41 = vsel %vm13338_vm7, %v13336_v62, 0.0  ;;  %v4022_v8 = vsel %vm13340_vm6, %v13069_v57, 0.0  ;;  %v13354_v52 = vld [vmem:[#allocation34_spill] sm:$0xff] }
 0x5db   : > { %5532 = vmatprep.subr.msk.bf16.mxu0 %vm5531_vm8, %v5530_v1  ;;  %v4151_v54 = vadd.f32 %v4150_v60, %v4149_v61  ;;  %vm5438_vm13 = vmpackc.low %vm13324_vm11, %vm13323_vm0  ;;  %v4235_v1 = vld [vmem:[#allocation5 + $0x18] sm:$0xff]  ;;  %v4014_v38 = vsel %vm13329_vm3, %v13327_v4, 0.0  ;;  %vm13345_vm4 = vcmp.eq.f32.partialorder %v13083_v51, %v13002_v10  ;;  %vm13346_vm1 = vcmp.eq.f32.partialorder %v13101_v15, %v13002_v10  ;;  %v13348_v4 = vld [vmem:[#allocation29_spill] sm:$0xff] }
 0x5dc   : > { %vm5534_vm12 = vmpackc.low %vm13326_vm9, %vm13325_vm2  ;;  %v13342_v60 = vld [vmem:[#allocation22_spill] sm:$0xff]  ;;  %v4030_v57 = vsel %vm13346_vm1, %v13108_v31, 0.0  ;;  %vm13349_vm8 = vcmp.eq.f32.partialorder %v13348_v4, %v13002_v10  ;;  %vm13355_vm11 = vcmp.eq.f32.partialorder %v13354_v52, %v13002_v10  ;;  %vm13376_vm6 = vcmp.eq.f32.partialorder %v13239_v33, %v13002_v10 }
 0x5dd   : > { %5439 = vmatpush1.bf16.msk.msra.mxu1 %vm5438_vm13, %v5437_v43  ;;  %v11416_v20 = vadd.f32 %v4225_v21, %v4151_v54  ;;  %5535 = vmatpush1.bf16.msk.msra.mxu0 %vm5534_vm12, %v5533_v23  ;;  %v4016_v23 = vsel %vm13332_vm14, %v13330_v40, 0.0  ;;  %v13341_v21 = vld [vmem:[#allocation72_spill] sm:$0xff]  ;;  %vm13343_vm10 = vcmp.eq.f32.partialorder %v13342_v60, %v13002_v10  ;;  %v13356_v31 = vld [vmem:[#allocation74_spill] sm:$0xff]  ;;  %vm13382_vm1 = vcmp.eq.f32.partialorder %v13282_v30, %v13002_v10 }
 0x5de   : > { %v4152_v6 = vadd.f32 %v4016_v23, %v4014_v38  ;;  %v4024_v43 = vsel %vm13343_vm10, %v13341_v21, 0.0  ;;  %v13351_v38 = vld [vmem:[#allocation32_spill] sm:$0xff]  ;;  %v13374_v4 = vld [vmem:[#allocation86_spill] sm:$0xff] }
 0x5df   : > { %vm13352_vm0 = vcmp.eq.f32.partialorder %v13351_v38, %v13002_v10  ;;  %vm13375_vm7 = vcmp.eq.f32.partialorder %v13374_v4, %v13002_v10  ;;  %v13377_v38 = vld [vmem:[#allocation120_spill] sm:$0xff]  ;;  %v13391_v4 = vld [vmem:[#allocation7_spill] sm:$0xff] }
 0x5e0   : > { %4301 = vmatmul.mubr.f32.vlgmr.msra.gmra.mrb[64].mxu1 %v4232_v0  ;;  %4379 = vmatmul.mubr.f32.vlgmr.msra.gmra.mrb[64].mxu0 %v4228_v12  ;;  %v4153_v26 = vadd.f32 %v4152_v6, %v4018_v25  ;;  %v4026_v0 = vsel %vm13344_vm5, %v13087_v3, 0.0  ;;  %v13350_v3 = vld [vmem:[#allocation64_spill] sm:$0xff]  ;;  %v13359_v25 = vld [vmem:[#allocation79_spill] sm:$0xff]  ;;  %vm13380_vm5 = vcmp.eq.f32.partialorder %v13262_v48, %v13002_v10 }
 0x5e1   : > { %4306 = vmatprep.mubr.f32.mxu1 %v4235_v1  ;;  %4384 = vmatprep.mubr.f32.mxu0 %v4231_v14  ;;  %v4028_v1 = vsel %vm13345_vm4, %v13088_v59, 0.0  ;;  %v4034_v40 = vsel %vm13352_vm0, %v13350_v3, 0.0  ;;  %v13353_v59 = vld [vmem:[#allocation71_spill] sm:$0xff]  ;;  %v13357_v6 = vld [vmem:[#allocation28_spill] sm:$0xff]  ;;  %vm13381_vm4 = vcmp.eq.f32.partialorder %v13264_v7, %v13002_v10  ;;  %vm13384_vm0 = vcmp.eq.f32.partialorder %v13297_v2, %v13002_v10 }
 0x5e2   : > { %v4154_v61 = vadd.f32 %v4153_v26, %v4020_v41  ;;  %v4036_v23 = vsel %vm13355_vm11, %v13353_v59, 0.0  ;;  %vm13358_vm13 = vcmp.eq.f32.partialorder %v13357_v6, %v13002_v10  ;;  %v13360_v26 = vld [vmem:[#allocation39_spill] sm:$0xff]  ;;  %v13362_v41 = vld [vmem:[#allocation46_spill] sm:$0xff]  ;;  %v4060_v52 = vsel %vm13381_vm4, %v13270_v37, 0.0 }
 0x5e3   : > { %v4038_v46 = vsel %vm13358_vm13, %v13356_v31, 0.0  ;;  %vm13361_vm2 = vcmp.eq.f32.partialorder %v13360_v26, %v13002_v10  ;;  %vm13363_vm9 = vcmp.eq.f32.partialorder %v13362_v41, %v13002_v10  ;;  %vm13385_vm11 = vcmp.eq.f32.partialorder %v13299_v16, %v13002_v10 }
 0x5e4   : > { %4307 = vmatmul.mubr.f32.gmra.mrb[66].mxu1 %v4234_v17  ;;  %4385 = vmatmul.mubr.f32.gmra.mrb[66].mxu0 %v4230_v22  ;;  %v4155_v36 = vadd.f32 %v4154_v61, %v4022_v8  ;;  %v13347_v22 = vld [vmem:[#allocation58_spill] sm:$0xff]  ;;  %v4040_v62 = vsel %vm13361_vm2, %v13359_v25, 0.0  ;;  %v4042_v61 = vsel %vm13363_vm9, %v13181_v13, 0.0  ;;  %v13364_v8 = vld [vmem:[#allocation91_spill] sm:$0xff]  ;;  %v4050_v13 = vsel %vm13372_vm15, %v13229_v5, 0.0 }
 0x5e5   : > { %v4032_v11 = vsel %vm13349_vm8, %v13347_v22, 0.0  ;;  %v13373_v22 = vld [vmem:[#allocation111_spill] sm:$0xff]  ;;  %v4058_v5 = vsel %vm13380_vm5, %v13269_v28, 0.0  ;;  %vm13383_vm8 = vcmp.eq.f32.partialorder %v13284_v49, %v13002_v10  ;;  %v4066_v28 = vsel %vm13384_vm0, %v13302_v53, 0.0 }
 0x5e6   : > { %v4156_v54 = vadd.f32 %v4155_v36, %v4024_v43  ;;  %v13365_v36 = vld [vmem:[#allocation53_spill] sm:$0xff]  ;;  %v13367_v43 = vld [vmem:[#allocation31_spill] sm:$0xff]  ;;  %v4068_v37 = vsel %vm13385_vm11, %v13303_v24, 0.0  ;;  %vm13386_vm13 = vcmp.eq.f32.partialorder %v13310_v47, %v13002_v10  ;;  %vm13387_vm2 = vcmp.eq.f32.partialorder %v13312_v9, %v13002_v10 }
 0x5e7   : > { %vm13366_vm12 = vcmp.eq.f32.partialorder %v13365_v36, %v13002_v10  ;;  %vm13368_vm3 = vcmp.eq.f32.partialorder %v13367_v43, %v13002_v10  ;;  %vm13388_vm9 = vcmp.eq.f32.partialorder %v13319_v27, %v13002_v10  ;;  %v4109_v31 = vrot.slane %v11322_v44, 4 }
 0x5e8   : > { %v4157_v12 = vadd.f32 %v4156_v54, %v4026_v0  ;;  %v4044_v21 = vsel %vm13366_vm12, %v13364_v8, 0.0  ;;  %v4046_v54 = vsel %vm13368_vm3, %v13206_v50, 0.0  ;;  %v4054_v50 = vsel %vm13376_vm6, %v13252_v63, 0.0 }
 0x5e9   : > { %v4062_v63 = vsel %vm13382_vm1, %v13289_v45, 0.0  ;;  %v4070_v45 = vsel %vm13386_vm13, %v13314_v56, 0.0  ;;  %v4074_v53 = vsel %vm13388_vm9, %v11336_v34, 0.0  ;;  %vm13389_vm12 = vcmp.eq.f32.partialorder %v13321_v18, %v13002_v10 }
 0x5ea   : > { %v4158_v14 = vadd.f32 %v4157_v12, %v4028_v1  ;;  %v13369_v12 = vld [vmem:[#allocation100_spill] sm:$0xff]  ;;  %v13370_v1 = vld [vmem:[#allocation66_spill] sm:$0xff]  ;;  %v4076_v24 = vsel %vm13389_vm12, %v11386_v55, 0.0  ;;  %v4110_v9 = vadd.f32 %v4109_v31, %v11322_v44  ;;  %v4397_v44 = vstv %s4313_s25 }
 0x5eb   : > { %vm13371_vm14 = vcmp.eq.f32.partialorder %v13370_v1, %v13002_v10 }
 0x5ec   : > { %v4159_v17 = vadd.f32 %v4158_v14, %v4030_v57  ;;  %v4048_v14 = vsel %vm13371_vm14, %v13369_v12, 0.0 }
 0x5ee   : > { %v4160_v42 = vadd.f32 %v4159_v17, %v4032_v11  ;;  %v4052_v11 = vsel %vm13375_vm7, %v13373_v22, 0.0 }
 0x5f0   : > { %v4161_v51 = vadd.f32 %v4160_v42, %v4034_v40  ;;  %v13378_v40 = vld [vmem:[#allocation95_spill] sm:$0xff] }
 0x5f1   : > { %vm13379_vm10 = vcmp.eq.f32.partialorder %v13378_v40, %v13002_v10 }
 0x5f2   : > { %v4162_v15 = vadd.f32 %v4161_v51, %v4036_v23  ;;  %v4056_v51 = vsel %vm13379_vm10, %v13377_v38, 0.0  ;;  %v13392_v38 = vld [vmem:[#allocation10_spill] sm:$0xff] }
 0x5f4   : > { %v4163_v39 = vadd.f32 %v4162_v15, %v4038_v46  ;;  %v4064_v15 = vsel %vm13383_vm8, %v13290_v32, 0.0  ;;  %v4072_v32 = vsel %vm13387_vm2, %v11294_v35, 0.0  ;;  %v4111_v46 = vrot.slane %v4110_v9, 2 }
 0x5f6   : > { %v4164_v58 = vadd.f32 %v4163_v39, %v4040_v62  ;;  %v4112_v25 = vadd.f32 %v4111_v46, %v4110_v9 }
 0x5f8   : > { %v4165_v29 = vadd.f32 %v4164_v58, %v4042_v61  ;;  %v4113_v27 = vrot.slane %v4112_v25, 1 }
 0x5fa   : > { %v4166_v60 = vadd.f32 %v4165_v29, %v4044_v21  ;;  %v4114_v62 = vadd.f32 %v4113_v27, %v4112_v25 }
 0x5fc   : > { %v4167_v0 = vadd.f32 %v4166_v60, %v4046_v54 }
 0x5fe   : > { %v4168_v57 = vadd.f32 %v4167_v0, %v4048_v14 }
 0x600   : > { %v4169_v17 = vadd.f32 %v4168_v57, %v4050_v13  ;;  %v13390_v13 = vld [vmem:[#allocation9_spill] sm:$0xff] }
 0x602   : > { %v4170_v42 = vadd.f32 %v4169_v17, %v4052_v11 }
 0x604   : > { %v4171_v3 = vadd.f32 %v4170_v42, %v4054_v50 }
 0x606   : > { %v4172_v19 = vadd.f32 %v4171_v3, %v4056_v51  ;;  %v13393_v51 = vld [vmem:[#allocation8_spill] sm:$0xff] }
 0x608   : > { %v4173_v59 = vadd.f32 %v4172_v19, %v4058_v5 }
 0x60a   : > { %v4174_v33 = vadd.f32 %v4173_v59, %v4060_v52 }
 0x60c   : > { %v4175_v23 = vadd.f32 %v4174_v33, %v4062_v63 }
 0x60e   : > { %v4176_v48 = vadd.f32 %v4175_v23, %v4064_v15 }
 0x610   : > { %v4177_v7 = vadd.f32 %v4176_v48, %v4066_v28 }
 0x612   : > { %v4178_v30 = vadd.f32 %v4177_v7, %v4068_v37 }
 0x614   : > { %v4179_v49 = vadd.f32 %v4178_v30, %v4070_v45 }
 0x616   : > { %v4180_v2 = vadd.f32 %v4179_v49, %v4072_v32 }
 0x618   : > { %v4181_v16 = vadd.f32 %v4180_v2, %v4074_v53 }
 0x61a   : > { %v4182_v47 = vadd.f32 %v4181_v16, %v4076_v24 }
 0x61c   : > { %v4183_v56 = vrot.slane %v4182_v47, 4 }
 0x61e   : > { %v4184_v6 = vadd.f32 %v4183_v56, %v4182_v47 }
 0x620   : > { %v4185_v35 = vrot.slane %v4184_v6, 2 }
 0x622   : > { %v4186_v39 = vadd.f32 %v4185_v35, %v4184_v6 }
 0x624   : > { %v4187_v26 = vrot.slane %v4186_v39, 1 }
 0x626   : > { %v4188_v34 = vadd.f32 %v4187_v26, %v4186_v39 }
 0x628   : > { %v4226_v58 = vadd.f32 %v4188_v34, %v4114_v62 }
 0x62a   : > { %5844 = vrcp.f32 %v4226_v58 }
 0x62b   : > { %5846 = vrcp.f32 %v11416_v20 }
 0x634   : > { %v5845_v29 = vpop.eup %5844 }
 0x635   : > { %v5847_v36 = vpop.eup %5846 }
 0x6b3   : > { %v4302_v10 = vpop.f32.mrb[64].mxu1  ;;  %v4380_v55 = vpop.f32.mrb[64].mxu0 }
 0x6b4   : > { %v4304_v18 = vpop.f32.mrb[65].mxu1  ;;  %v4381_v41 = vadd.f32 %v4380_v55, %v4302_v10  ;;  %v4382_v61 = vpop.f32.mrb[65].mxu0 }
 0x6b5   : > { %v4383_v8 = vadd.f32 %v4382_v61, %v4304_v18 }
 0x6b6   : > { %v4392_v21 = vmul.f32 %v5845_v29, %v4381_v41 }
 0x6b7   : > { %v4308_v60 = vpop.f32.mrb[66].mxu1  ;;  %v4394_v43 = vmul.f32 %v5847_v36, %v4383_v8  ;;  %v4386_v54 = vpop.f32.mrb[66].mxu0 }
 0x6b8   : > { %v4310_v0 = vpop.f32.mrb[67].mxu1  ;;  %v4398_v12 = vmul.f32 %v4397_v44, %v4392_v21  ;;  %v4387_v20 = vadd.f32 %v4386_v54, %v4308_v60  ;;  %v4388_v1 = vpop.f32.mrb[67].mxu0 }
 0x6b9   : > { %v4399_v14 = vmul.f32 %v4397_v44, %v4394_v43  ;;  %v4389_v57 = vadd.f32 %v4388_v1, %v4310_v0 }
 0x6ba   : > { %v4402_v17 = vadd.f32 %v4398_v12, %v13390_v13  ;;  %v4395_v22 = vmul.f32 %v5845_v29, %v4387_v20 }
 0x6bb   : > { %v4403_v11 = vadd.f32 %v4399_v14, %v13391_v4  ;;  %v4396_v42 = vmul.f32 %v5847_v36, %v4389_v57 }
 0x6bc   : > { %4406 = vst [vmem:[%s5958_s17] sm:$0xff] %v4402_v17  ;;  %v4400_v50 = vmul.f32 %v4397_v44, %v4395_v22 }
 0x6bd   : > { %4407 = vst [vmem:[%s5958_s17 + $0x8] sm:$0xff] %v4403_v11  ;;  %v4401_v3 = vmul.f32 %v4397_v44, %v4396_v42 }
 0x6be   : > { %v4404_v40 = vadd.f32 %v4400_v50, %v13392_v38 }
 0x6bf   : > { %v4405_v19 = vadd.f32 %v4401_v3, %v13393_v51 }
 0x6c0   : > { %4408 = vst [vmem:[%s5958_s17 + $0x10] sm:$0xff] %v4404_v40 }
 0x6c1   : > { %4409 = vst [vmem:[%s5958_s17 + $0x18] sm:$0xff] %v4405_v19 }
 0x6c2 PF: > { %s21_s15 = sadd.s32 1, %s5854_s15  }
 0x6c3   : > { %p18_p5 = scmp.ge.s32.totalorder %s21_s15, 4  }
 0x6c5   :  { %20 = sbr.rel (!%p18_p5) target bundleno = 2 (0x2), region = 98 }

</bundles_post_ra>
